<compile_context>
chip_gen: v6e
topology: v6e:2x2x1
jax: 0.10.0
libtpu: 0.0.40
codegen_flags: <defaults>
</compile_context>

<pallas_src>
import jax
import jax.numpy as jnp
from jax.experimental import pallas as pl
from jax.experimental.pallas import tpu as pltpu


def _round_up(x, m):
    return ((x + m - 1) // m) * m


# ---------------------------------------------------------------------------
# Kernel 1: fused conv-as-matmul + 2x2 max-pool + bias + LeakyReLU(0.2)
#   Patches arrive pool-corner major: p_ref[k] holds the im2col rows of all
#   pooled output pixels for pool corner k = di*2+dj, in pooled raster order.
#   Pool  = elementwise max of the 4 corner matmuls (bias/leaky commute).
# ---------------------------------------------------------------------------
def _conv_pool_kernel(p_ref, w_ref, b_ref, o_ref):
    # p_ref: (4, P, K) bf16   w_ref: (K, C) bf16   b_ref: (1, C) f32
    # o_ref: (P, C) bf16  (pooled activation, rows in pooled (i, j) raster)
    w = w_ref[...]
    m = jnp.dot(p_ref[0], w, preferred_element_type=jnp.float32)
    for k in range(1, 4):
        m = jnp.maximum(m, jnp.dot(p_ref[k], w,
                                   preferred_element_type=jnp.float32))
    y = m + b_ref[...]
    o_ref[...] = jnp.where(y >= 0.0, y, 0.2 * y).astype(o_ref.dtype)


def conv_pool_leaky(patches, w, b, *, out_dtype=jnp.bfloat16):
    """patches: (N, 4, P, K) bf16; w: (K, C) bf16; b: (1, C) f32 -> (N, P, C)."""
    N, four, P, K = patches.shape
    assert four == 4
    C = w.shape[1]
    return pl.pallas_call(
        _conv_pool_kernel,
        out_shape=jax.ShapeDtypeStruct((N, P, C), out_dtype),
        grid_spec=pltpu.PrefetchScalarGridSpec(
            num_scalar_prefetch=0,
            grid=(N,),
            in_specs=[
                pl.BlockSpec((None, 4, P, K), lambda n: (n, 0, 0, 0)),
                pl.BlockSpec((K, C), lambda n: (0, 0)),   # weight resident
                pl.BlockSpec((1, C), lambda n: (0, 0)),
            ],
            out_specs=pl.BlockSpec((None, P, C), lambda n: (n, 0, 0)),
        ),
        compiler_params=pltpu.CompilerParams(dimension_semantics=("parallel",)),
    )(patches, w, b)


# ---------------------------------------------------------------------------
# Kernel 2: fused FC head: fc1(3136->1024) + LeakyReLU(0.2) + fc2(1024->1)
#           + Sigmoid.  Grid over 512-wide hidden slices (2 steps); the fc2
#           contribution of each slice is accumulated in a VMEM scratch.
# ---------------------------------------------------------------------------
def _fc_fused_kernel(x_ref, w1_ref, b1_ref, w2_ref, b2_ref, o_ref, acc_ref):
    j = pl.program_id(0)

    @pl.when(j == 0)
    def _():
        acc_ref[...] = jnp.zeros_like(acc_ref)

    h = jnp.dot(x_ref[...], w1_ref[...], preferred_element_type=jnp.float32)
    h = h + b1_ref[...]
    h = jnp.where(h >= 0.0, h, 0.2 * h)                       # LeakyReLU(0.2)
    # fc2 partial contribution of this hidden slice (lane reduce of h * w2row)
    acc_ref[...] += jnp.sum(h * w2_ref[...], axis=1, keepdims=True)

    @pl.when(j == pl.num_programs(0) - 1)
    def _():
        y = acc_ref[...] + b2_ref[...]
        e = jnp.exp(-jnp.abs(y))                              # stable sigmoid
        num = jnp.where(y >= 0.0, 1.0, e)
        o_ref[...] = jnp.clip(num * pl.reciprocal(1.0 + e, approx=True),
                              0.0, 1.0)


def fc_fused(x, w1, b1, w2row, b2, *, tn=512):
    """sigmoid(leaky(x @ w1 + b1) @ w2row.T + b2).
    x: (M, 3136) bf16, w1: (3136, 1024) bf16, b1/w2row: (1, 1024) f32, b2: (1,1)."""
    M, K = x.shape
    K2, H = w1.shape
    assert K == K2 and H % tn == 0
    Mp = _round_up(M, 8)                                      # sublane granularity
    if Mp != M:
        x = jnp.zeros((Mp, K), x.dtype).at[:M].set(x)
    out = pl.pallas_call(
        _fc_fused_kernel,
        out_shape=jax.ShapeDtypeStruct((Mp, 1), jnp.float32),
        grid_spec=pltpu.PrefetchScalarGridSpec(
            num_scalar_prefetch=0,
            grid=(H // tn,),
            in_specs=[
                pl.BlockSpec((Mp, K), lambda j: (0, 0)),      # activation resident
                pl.BlockSpec((K, tn), lambda j: (0, j)),      # fc1 weight slice
                pl.BlockSpec((1, tn), lambda j: (0, j)),
                pl.BlockSpec((1, tn), lambda j: (0, j)),
                pl.BlockSpec((1, 1), lambda j: (0, 0)),
            ],
            out_specs=pl.BlockSpec((Mp, 1), lambda j: (0, 0)),
            scratch_shapes=[pltpu.VMEM((Mp, 1), jnp.float32)],
        ),
        compiler_params=pltpu.CompilerParams(dimension_semantics=("arbitrary",)),
    )(x, w1, b1, w2row, b2)
    return out[:M]


# ---------------------------------------------------------------------------
# XLA glue: im2col for a 3x3/stride-1/pad-1 conv, rearranged pool-corner major
# (di, dj, i, j) so the conv kernel can fuse the 2x2 max-pool.
# ---------------------------------------------------------------------------
def im2col_pool_corners(x):
    """x: (N, H, W, C) NHWC, H and W even.
    Returns (N, 4, (H//2)*(W//2), 9*C) patches; corner = di*2+dj,
    rows in pooled raster (i, j), K ordered (dh, dw, c)."""
    N, H, W, C = x.shape
    xp = jnp.pad(x, ((0, 0), (1, 1), (1, 1), (0, 0)))
    cols = [xp[:, dh:dh + H, dw:dw + W, :] for dh in range(3) for dw in range(3)]
    pat = jnp.concatenate(cols, axis=-1)                      # (N, H, W, 9C)
    Ho, Wo = H // 2, W // 2
    pat = pat.reshape(N, Ho, 2, Wo, 2, 9 * C)
    pat = jnp.transpose(pat, (0, 2, 4, 1, 3, 5))              # (N, 2, 2, Ho, Wo, 9C)
    return pat.reshape(N, 4, Ho * Wo, 9 * C)


def conv_weight_to_mat(w):
    """PyTorch conv weight (O, C, kh, kw) -> im2col matmul weight (kh*kw*C, O)."""
    O, C, KH, KW = w.shape
    return jnp.transpose(w, (2, 3, 1, 0)).reshape(KH * KW * C, O)


def prepare_params(params):
    """One-time weight prep (outside the per-step forward): im2col layouts,
    bf16 casts, (1, N) biases, and fc1 columns permuted from torch's (c, h, w)
    flatten order to our (h, w, c) activation order."""
    wf1 = params["w_fc1"].reshape(1024, 64, 7, 7)             # (out, c, h, w)
    wf1 = jnp.transpose(wf1, (2, 3, 1, 0)).reshape(7 * 7 * 64, 1024)
    return {
        "w_conv1": conv_weight_to_mat(params["w_conv1"]).astype(jnp.bfloat16),
        "b_conv1": params["b_conv1"].astype(jnp.float32).reshape(1, -1),
        "w_conv2": conv_weight_to_mat(params["w_conv2"]).astype(jnp.bfloat16),
        "b_conv2": params["b_conv2"].astype(jnp.float32).reshape(1, -1),
        "w_fc1": wf1.astype(jnp.bfloat16),
        "b_fc1": params["b_fc1"].astype(jnp.float32).reshape(1, -1),
        "w_fc2": params["w_fc2"].astype(jnp.float32).reshape(1, 1024),
        "b_fc2": params["b_fc2"].astype(jnp.float32).reshape(1, 1),
    }


# ---------------------------------------------------------------------------
# Full forward pass (params must come from prepare_params).  3 pallas_calls:
# conv1+pool, conv2+pool, fused fc head.
# ---------------------------------------------------------------------------
def discriminator_forward(x_nchw, p):
    N = x_nchw.shape[0]
    x = jnp.transpose(x_nchw, (0, 2, 3, 1)).astype(jnp.bfloat16)   # NCHW -> NHWC

    # conv1 (1->32) + LeakyReLU + 2x2 max-pool (fused)
    p1 = im2col_pool_corners(x)                                    # (N, 4, 196, 9)
    a1 = conv_pool_leaky(p1, p["w_conv1"], p["b_conv1"])           # (N, 196, 32)

    # conv2 (32->64) + LeakyReLU + 2x2 max-pool (fused)
    p2 = im2col_pool_corners(a1.reshape(N, 14, 14, 32))            # (N, 4, 49, 288)
    a2 = conv_pool_leaky(p2, p["w_conv2"], p["b_conv2"])           # (N, 49, 64)

    # flatten in (h, w, c) order; fc1 columns were pre-permuted to match torch
    flat = a2.reshape(N, 7 * 7 * 64)

    # fused fc1 + LeakyReLU(0.2) + fc2 + Sigmoid
    return fc_fused(flat, p["w_fc1"], p["b_fc1"], p["w_fc2"], p["b_fc2"])


# ---------------------------------------------------------------------------
# Pure-JAX reference (f32) for a correctness sanity check
# ---------------------------------------------------------------------------
def reference_forward(x, params):
    def conv(x, w, b):
        y = jax.lax.conv_general_dilated(
            x, w, (1, 1), ((1, 1), (1, 1)),
            dimension_numbers=("NCHW", "OIHW", "NCHW"))
        return y + b[None, :, None, None]

    def pool(y):
        return jax.lax.reduce_window(y, -jnp.inf, jax.lax.max,
                                     (1, 1, 2, 2), (1, 1, 2, 2), "VALID")

    def leaky(y):
        return jnp.where(y >= 0, y, 0.2 * y)

    y = pool(leaky(conv(x, params["w_conv1"], params["b_conv1"])))
    y = pool(leaky(conv(y, params["w_conv2"], params["b_conv2"])))
    flat = y.reshape(y.shape[0], -1)
    h = leaky(flat @ params["w_fc1"].T + params["b_fc1"])
    return jax.nn.sigmoid(h @ params["w_fc2"].T + params["b_fc2"])


def init_params(key):
    ks = jax.random.split(key, 8)
    s = 0.05
    return {
        "w_conv1": jax.random.normal(ks[0], (32, 1, 3, 3), jnp.float32) * s,
        "b_conv1": jax.random.normal(ks[1], (32,), jnp.float32) * s,
        "w_conv2": jax.random.normal(ks[2], (64, 32, 3, 3), jnp.float32) * s,
        "b_conv2": jax.random.normal(ks[3], (64,), jnp.float32) * s,
        "w_fc1": jax.random.normal(ks[4], (1024, 7 * 7 * 64), jnp.float32) * s,
        "b_fc1": jax.random.normal(ks[5], (1024,), jnp.float32) * s,
        "w_fc2": jax.random.normal(ks[6], (1, 1024), jnp.float32) * s,
        "b_fc2": jax.random.normal(ks[7], (1,), jnp.float32) * s,
    }


if __name__ == "__main__":
    key = jax.random.PRNGKey(0)
    pkey, xkey = jax.random.split(key)
    params = init_params(pkey)
    prepped = prepare_params(params)       # one-time weight prep, outside the step

    # The fc layer (7*7*64) dictates a 28x28 single-channel input.
    x = jax.random.normal(xkey, (2, 1, 28, 28), jnp.float32)   # NCHW like torch

    fwd = jax.jit(discriminator_forward)
    out = jax.block_until_ready(fwd(x, prepped))

    assert out.shape == (2, 1)
    assert bool(jnp.all(jnp.isfinite(out)))
    assert bool(jnp.all((out >= 0.0) & (out <= 1.0)))          # sigmoid range

    ref = reference_forward(x, params)
    assert bool(jnp.all(jnp.abs(out - ref) < 0.05)), (out, ref)  # bf16 tolerance
    print("KERNEL_OK")
</pallas_src>

<mosaic_0001>
module attributes {stable_mosaic.version = 11 : i64} {
  func.func @_conv_pool_kernel(%arg0: i32, %arg1: memref<1x4x196x9xbf16, #tpu.memory_space<vmem>>, %arg2: memref<9x32xbf16, #tpu.memory_space<vmem>>, %arg3: memref<1x32xf32, #tpu.memory_space<vmem>>, %arg4: memref<1x196x32xbf16, #tpu.memory_space<vmem>>) attributes {dimension_semantics = [#tpu.dimension_semantics<parallel>], iteration_bounds = array<i64: 2>, scalar_prefetch = 0 : i64, scratch_operands = 0 : i64, tpu.core_type = #tpu.core_type<tc>, window_params = [{transform_indices = @transform_0, window_bounds = array<i64: 1, 4, 196, 9>}, {pipeline_mode = #tpu.pipeline_mode<synchronous>, transform_indices = @transform_1, window_bounds = array<i64: 9, 32>}, {pipeline_mode = #tpu.pipeline_mode<synchronous>, transform_indices = @transform_2, window_bounds = array<i64: 1, 32>}, {transform_indices = @transform_3, window_bounds = array<i64: 1, 196, 32>}]} {
    %c0 = arith.constant 0 : index
    %c0_0 = arith.constant 0 : index
    %0 = vector.load %arg2[%c0, %c0_0] : memref<9x32xbf16, #tpu.memory_space<vmem>>, vector<9x32xbf16>
    %c0_1 = arith.constant 0 : index
    %c0_2 = arith.constant 0 : index
    %c0_3 = arith.constant 0 : index
    %c0_4 = arith.constant 0 : index
    %1 = vector.load %arg1[%c0_1, %c0_2, %c0_3, %c0_4] : memref<1x4x196x9xbf16, #tpu.memory_space<vmem>>, vector<1x1x196x9xbf16>
    %2 = vector.shape_cast %1 : vector<1x1x196x9xbf16> to vector<196x9xbf16>
    %cst = arith.constant dense<0.000000e+00> : vector<196x32xf32>
    %3 = tpu.matmul %2, %0, %cst {dimension_numbers = #tpu.dot_dimension_numbers<[1], [0], [0], [1], [0, 0, 1, 1], [], []>} : vector<196x9xbf16>, vector<9x32xbf16>, vector<196x32xf32> -> vector<196x32xf32>
    %c0_5 = arith.constant 0 : index
    %c1 = arith.constant 1 : index
    %c0_6 = arith.constant 0 : index
    %c0_7 = arith.constant 0 : index
    %4 = vector.load %arg1[%c0_5, %c1, %c0_6, %c0_7] : memref<1x4x196x9xbf16, #tpu.memory_space<vmem>>, vector<1x1x196x9xbf16>
    %5 = vector.shape_cast %4 : vector<1x1x196x9xbf16> to vector<196x9xbf16>
    %cst_8 = arith.constant dense<0.000000e+00> : vector<196x32xf32>
    %6 = tpu.matmul %5, %0, %cst_8 {dimension_numbers = #tpu.dot_dimension_numbers<[1], [0], [0], [1], [0, 0, 1, 1], [], []>} : vector<196x9xbf16>, vector<9x32xbf16>, vector<196x32xf32> -> vector<196x32xf32>
    %7 = arith.maximumf %3, %6 : vector<196x32xf32>
    %c0_9 = arith.constant 0 : index
    %c2 = arith.constant 2 : index
    %c0_10 = arith.constant 0 : index
    %c0_11 = arith.constant 0 : index
    %8 = vector.load %arg1[%c0_9, %c2, %c0_10, %c0_11] : memref<1x4x196x9xbf16, #tpu.memory_space<vmem>>, vector<1x1x196x9xbf16>
    %9 = vector.shape_cast %8 : vector<1x1x196x9xbf16> to vector<196x9xbf16>
    %cst_12 = arith.constant dense<0.000000e+00> : vector<196x32xf32>
    %10 = tpu.matmul %9, %0, %cst_12 {dimension_numbers = #tpu.dot_dimension_numbers<[1], [0], [0], [1], [0, 0, 1, 1], [], []>} : vector<196x9xbf16>, vector<9x32xbf16>, vector<196x32xf32> -> vector<196x32xf32>
    %11 = arith.maximumf %7, %10 : vector<196x32xf32>
    %c0_13 = arith.constant 0 : index
    %c3 = arith.constant 3 : index
    %c0_14 = arith.constant 0 : index
    %c0_15 = arith.constant 0 : index
    %12 = vector.load %arg1[%c0_13, %c3, %c0_14, %c0_15] : memref<1x4x196x9xbf16, #tpu.memory_space<vmem>>, vector<1x1x196x9xbf16>
    %13 = vector.shape_cast %12 : vector<1x1x196x9xbf16> to vector<196x9xbf16>
    %cst_16 = arith.constant dense<0.000000e+00> : vector<196x32xf32>
    %14 = tpu.matmul %13, %0, %cst_16 {dimension_numbers = #tpu.dot_dimension_numbers<[1], [0], [0], [1], [0, 0, 1, 1], [], []>} : vector<196x9xbf16>, vector<9x32xbf16>, vector<196x32xf32> -> vector<196x32xf32>
    %15 = arith.maximumf %11, %14 : vector<196x32xf32>
    %c0_17 = arith.constant 0 : index
    %c0_18 = arith.constant 0 : index
    %16 = vector.load %arg3[%c0_17, %c0_18] : memref<1x32xf32, #tpu.memory_space<vmem>>, vector<1x32xf32>
    %17 = vector.broadcast %16 : vector<1x32xf32> to vector<196x32xf32>
    %18 = arith.addf %15, %17 : vector<196x32xf32>
    %cst_19 = arith.constant 0.000000e+00 : f32
    %19 = vector.broadcast %cst_19 : f32 to vector<196x32xf32>
    %20 = arith.cmpf oge, %18, %19 : vector<196x32xf32>
    %cst_20 = arith.constant 2.000000e-01 : f32
    %21 = vector.broadcast %cst_20 : f32 to vector<196x32xf32>
    %22 = arith.mulf %21, %18 : vector<196x32xf32>
    %23 = arith.select %20, %18, %22 : vector<196x32xi1>, vector<196x32xf32>
    %24 = arith.truncf %23 : vector<196x32xf32> to vector<196x32xbf16>
    %c0_21 = arith.constant 0 : index
    %c0_22 = arith.constant 0 : index
    %c0_23 = arith.constant 0 : index
    %25 = vector.load %arg4[%c0_21, %c0_22, %c0_23] : memref<1x196x32xbf16, #tpu.memory_space<vmem>>, vector<1x196x32xbf16>
    %26 = vector.shape_cast %25 : vector<1x196x32xbf16> to vector<196x32xbf16>
    %27 = vector.shape_cast %24 : vector<196x32xbf16> to vector<1x196x32xbf16>
    tpu.vector_store %arg4[%c0_21, %c0_22, %c0_23], %27 {strides = array<i32>} : memref<1x196x32xbf16, #tpu.memory_space<vmem>>, vector<1x196x32xbf16>,
    return
  }
  func.func @transform_0(%arg0: i32) -> (i32, i32, i32, i32) {
    %c0_i32 = arith.constant 0 : i32
    %c0_i32_0 = arith.constant 0 : i32
    %c0_i32_1 = arith.constant 0 : i32
    %c0_i32_2 = arith.constant 0 : i32
    return %arg0, %c0_i32, %c0_i32_0, %c0_i32_1 : i32, i32, i32, i32
  }
  func.func @transform_1(%arg0: i32) -> (i32, i32) {
    %c0_i32 = arith.constant 0 : i32
    %c0_i32_0 = arith.constant 0 : i32
    %c0_i32_1 = arith.constant 0 : i32
    return %c0_i32, %c0_i32_0 : i32, i32
  }
  func.func @transform_2(%arg0: i32) -> (i32, i32) {
    %c0_i32 = arith.constant 0 : i32
    %c0_i32_0 = arith.constant 0 : i32
    %c0_i32_1 = arith.constant 0 : i32
    return %c0_i32, %c0_i32_0 : i32, i32
  }
  func.func @transform_3(%arg0: i32) -> (i32, i32, i32) {
    %c0_i32 = arith.constant 0 : i32
    %c0_i32_0 = arith.constant 0 : i32
    %c0_i32_1 = arith.constant 0 : i32
    return %arg0, %c0_i32, %c0_i32_0 : i32, i32, i32
  }
}

module attributes {stable_mosaic.version = 11 : i64} {
  func.func @_conv_pool_kernel(%arg0: i32, %arg1: memref<1x4x49x288xbf16, #tpu.memory_space<vmem>>, %arg2: memref<288x64xbf16, #tpu.memory_space<vmem>>, %arg3: memref<1x64xf32, #tpu.memory_space<vmem>>, %arg4: memref<1x49x64xbf16, #tpu.memory_space<vmem>>) attributes {dimension_semantics = [#tpu.dimension_semantics<parallel>], iteration_bounds = array<i64: 2>, scalar_prefetch = 0 : i64, scratch_operands = 0 : i64, tpu.core_type = #tpu.core_type<tc>, window_params = [{transform_indices = @transform_0, window_bounds = array<i64: 1, 4, 49, 288>}, {pipeline_mode = #tpu.pipeline_mode<synchronous>, transform_indices = @transform_1, window_bounds = array<i64: 288, 64>}, {pipeline_mode = #tpu.pipeline_mode<synchronous>, transform_indices = @transform_2, window_bounds = array<i64: 1, 64>}, {transform_indices = @transform_3, window_bounds = array<i64: 1, 49, 64>}]} {
    %c0 = arith.constant 0 : index
    %c0_0 = arith.constant 0 : index
    %0 = vector.load %arg2[%c0, %c0_0] : memref<288x64xbf16, #tpu.memory_space<vmem>>, vector<288x64xbf16>
    %c0_1 = arith.constant 0 : index
    %c0_2 = arith.constant 0 : index
    %c0_3 = arith.constant 0 : index
    %c0_4 = arith.constant 0 : index
    %1 = vector.load %arg1[%c0_1, %c0_2, %c0_3, %c0_4] : memref<1x4x49x288xbf16, #tpu.memory_space<vmem>>, vector<1x1x49x288xbf16>
    %2 = vector.shape_cast %1 : vector<1x1x49x288xbf16> to vector<49x288xbf16>
    %cst = arith.constant dense<0.000000e+00> : vector<49x64xf32>
    %3 = tpu.matmul %2, %0, %cst {dimension_numbers = #tpu.dot_dimension_numbers<[1], [0], [0], [1], [0, 0, 1, 1], [], []>} : vector<49x288xbf16>, vector<288x64xbf16>, vector<49x64xf32> -> vector<49x64xf32>
    %c0_5 = arith.constant 0 : index
    %c1 = arith.constant 1 : index
    %c0_6 = arith.constant 0 : index
    %c0_7 = arith.constant 0 : index
    %4 = vector.load %arg1[%c0_5, %c1, %c0_6, %c0_7] : memref<1x4x49x288xbf16, #tpu.memory_space<vmem>>, vector<1x1x49x288xbf16>
    %5 = vector.shape_cast %4 : vector<1x1x49x288xbf16> to vector<49x288xbf16>
    %cst_8 = arith.constant dense<0.000000e+00> : vector<49x64xf32>
    %6 = tpu.matmul %5, %0, %cst_8 {dimension_numbers = #tpu.dot_dimension_numbers<[1], [0], [0], [1], [0, 0, 1, 1], [], []>} : vector<49x288xbf16>, vector<288x64xbf16>, vector<49x64xf32> -> vector<49x64xf32>
    %7 = arith.maximumf %3, %6 : vector<49x64xf32>
    %c0_9 = arith.constant 0 : index
    %c2 = arith.constant 2 : index
    %c0_10 = arith.constant 0 : index
    %c0_11 = arith.constant 0 : index
    %8 = vector.load %arg1[%c0_9, %c2, %c0_10, %c0_11] : memref<1x4x49x288xbf16, #tpu.memory_space<vmem>>, vector<1x1x49x288xbf16>
    %9 = vector.shape_cast %8 : vector<1x1x49x288xbf16> to vector<49x288xbf16>
    %cst_12 = arith.constant dense<0.000000e+00> : vector<49x64xf32>
    %10 = tpu.matmul %9, %0, %cst_12 {dimension_numbers = #tpu.dot_dimension_numbers<[1], [0], [0], [1], [0, 0, 1, 1], [], []>} : vector<49x288xbf16>, vector<288x64xbf16>, vector<49x64xf32> -> vector<49x64xf32>
    %11 = arith.maximumf %7, %10 : vector<49x64xf32>
    %c0_13 = arith.constant 0 : index
    %c3 = arith.constant 3 : index
    %c0_14 = arith.constant 0 : index
    %c0_15 = arith.constant 0 : index
    %12 = vector.load %arg1[%c0_13, %c3, %c0_14, %c0_15] : memref<1x4x49x288xbf16, #tpu.memory_space<vmem>>, vector<1x1x49x288xbf16>
    %13 = vector.shape_cast %12 : vector<1x1x49x288xbf16> to vector<49x288xbf16>
    %cst_16 = arith.constant dense<0.000000e+00> : vector<49x64xf32>
    %14 = tpu.matmul %13, %0, %cst_16 {dimension_numbers = #tpu.dot_dimension_numbers<[1], [0], [0], [1], [0, 0, 1, 1], [], []>} : vector<49x288xbf16>, vector<288x64xbf16>, vector<49x64xf32> -> vector<49x64xf32>
    %15 = arith.maximumf %11, %14 : vector<49x64xf32>
    %c0_17 = arith.constant 0 : index
    %c0_18 = arith.constant 0 : index
    %16 = vector.load %arg3[%c0_17, %c0_18] : memref<1x64xf32, #tpu.memory_space<vmem>>, vector<1x64xf32>
    %17 = vector.broadcast %16 : vector<1x64xf32> to vector<49x64xf32>
    %18 = arith.addf %15, %17 : vector<49x64xf32>
    %cst_19 = arith.constant 0.000000e+00 : f32
    %19 = vector.broadcast %cst_19 : f32 to vector<49x64xf32>
    %20 = arith.cmpf oge, %18, %19 : vector<49x64xf32>
    %cst_20 = arith.constant 2.000000e-01 : f32
    %21 = vector.broadcast %cst_20 : f32 to vector<49x64xf32>
    %22 = arith.mulf %21, %18 : vector<49x64xf32>
    %23 = arith.select %20, %18, %22 : vector<49x64xi1>, vector<49x64xf32>
    %24 = arith.truncf %23 : vector<49x64xf32> to vector<49x64xbf16>
    %c0_21 = arith.constant 0 : index
    %c0_22 = arith.constant 0 : index
    %c0_23 = arith.constant 0 : index
    %25 = vector.load %arg4[%c0_21, %c0_22, %c0_23] : memref<1x49x64xbf16, #tpu.memory_space<vmem>>, vector<1x49x64xbf16>
    %26 = vector.shape_cast %25 : vector<1x49x64xbf16> to vector<49x64xbf16>
    %27 = vector.shape_cast %24 : vector<49x64xbf16> to vector<1x49x64xbf16>
    tpu.vector_store %arg4[%c0_21, %c0_22, %c0_23], %27 {strides = array<i32>} : memref<1x49x64xbf16, #tpu.memory_space<vmem>>, vector<1x49x64xbf16>,
    return
  }
  func.func @transform_0(%arg0: i32) -> (i32, i32, i32, i32) {
    %c0_i32 = arith.constant 0 : i32
    %c0_i32_0 = arith.constant 0 : i32
    %c0_i32_1 = arith.constant 0 : i32
    %c0_i32_2 = arith.constant 0 : i32
    return %arg0, %c0_i32, %c0_i32_0, %c0_i32_1 : i32, i32, i32, i32
  }
  func.func @transform_1(%arg0: i32) -> (i32, i32) {
    %c0_i32 = arith.constant 0 : i32
    %c0_i32_0 = arith.constant 0 : i32
    %c0_i32_1 = arith.constant 0 : i32
    return %c0_i32, %c0_i32_0 : i32, i32
  }
  func.func @transform_2(%arg0: i32) -> (i32, i32) {
    %c0_i32 = arith.constant 0 : i32
    %c0_i32_0 = arith.constant 0 : i32
    %c0_i32_1 = arith.constant 0 : i32
    return %c0_i32, %c0_i32_0 : i32, i32
  }
  func.func @transform_3(%arg0: i32) -> (i32, i32, i32) {
    %c0_i32 = arith.constant 0 : i32
    %c0_i32_0 = arith.constant 0 : i32
    %c0_i32_1 = arith.constant 0 : i32
    return %arg0, %c0_i32, %c0_i32_0 : i32, i32, i32
  }
}

module attributes {stable_mosaic.version = 11 : i64} {
  func.func @_fc_fused_kernel(%arg0: i32, %arg1: memref<8x3136xbf16, #tpu.memory_space<vmem>>, %arg2: memref<3136x512xbf16, #tpu.memory_space<vmem>>, %arg3: memref<1x512xf32, #tpu.memory_space<vmem>>, %arg4: memref<1x512xf32, #tpu.memory_space<vmem>>, %arg5: memref<1x1xf32, #tpu.memory_space<vmem>>, %arg6: memref<8x1xf32, #tpu.memory_space<vmem>>, %arg7: memref<8x1xf32, #tpu.memory_space<vmem>>) attributes {dimension_semantics = [#tpu.dimension_semantics<arbitrary>], iteration_bounds = array<i64: 2>, scalar_prefetch = 0 : i64, scratch_operands = 1 : i64, tpu.core_type = #tpu.core_type<tc>, window_params = [{pipeline_mode = #tpu.pipeline_mode<synchronous>, transform_indices = @transform_0, window_bounds = array<i64: 8, 3136>}, {transform_indices = @transform_1, window_bounds = array<i64: 3136, 512>}, {transform_indices = @transform_2, window_bounds = array<i64: 1, 512>}, {transform_indices = @transform_3, window_bounds = array<i64: 1, 512>}, {pipeline_mode = #tpu.pipeline_mode<synchronous>, transform_indices = @transform_4, window_bounds = array<i64: 1, 1>}, {pipeline_mode = #tpu.pipeline_mode<synchronous>, transform_indices = @transform_5, window_bounds = array<i64: 8, 1>}]} {
    %c0_i32 = arith.constant 0 : i32
    %0 = arith.cmpi eq, %arg0, %c0_i32 : i32
    %1 = arith.extui %0 : i1 to i32
    %c0_i32_0 = arith.constant 0 : i32
    %2 = arith.cmpi ne, %1, %c0_i32_0 : i32
    scf.if %2 {
      %cst_16 = arith.constant 0.000000e+00 : f32
      %25 = vector.broadcast %cst_16 : f32 to vector<8x1xf32>
      %c0_17 = arith.constant 0 : index
      %c0_18 = arith.constant 0 : index
      %26 = vector.load %arg7[%c0_17, %c0_18] : memref<8x1xf32, #tpu.memory_space<vmem>>, vector<8x1xf32>
      tpu.vector_store %arg7[%c0_17, %c0_18], %25 {strides = array<i32>} : memref<8x1xf32, #tpu.memory_space<vmem>>, vector<8x1xf32>,
    } else {
    }
    %c0 = arith.constant 0 : index
    %c0_1 = arith.constant 0 : index
    %3 = vector.load %arg1[%c0, %c0_1] : memref<8x3136xbf16, #tpu.memory_space<vmem>>, vector<8x3136xbf16>
    %c0_2 = arith.constant 0 : index
    %c0_3 = arith.constant 0 : index
    %4 = vector.load %arg2[%c0_2, %c0_3] : memref<3136x512xbf16, #tpu.memory_space<vmem>>, vector<3136x512xbf16>
    %cst = arith.constant dense<0.000000e+00> : vector<8x512xf32>
    %5 = tpu.matmul %3, %4, %cst {dimension_numbers = #tpu.dot_dimension_numbers<[1], [0], [0], [1], [0, 0, 1, 1], [], []>} : vector<8x3136xbf16>, vector<3136x512xbf16>, vector<8x512xf32> -> vector<8x512xf32>
    %c0_4 = arith.constant 0 : index
    %c0_5 = arith.constant 0 : index
    %6 = vector.load %arg3[%c0_4, %c0_5] : memref<1x512xf32, #tpu.memory_space<vmem>>, vector<1x512xf32>
    %7 = vector.broadcast %6 : vector<1x512xf32> to vector<8x512xf32>
    %8 = arith.addf %5, %7 : vector<8x512xf32>
    %cst_6 = arith.constant 0.000000e+00 : f32
    %9 = vector.broadcast %cst_6 : f32 to vector<8x512xf32>
    %10 = arith.cmpf oge, %8, %9 : vector<8x512xf32>
    %cst_7 = arith.constant 2.000000e-01 : f32
    %11 = vector.broadcast %cst_7 : f32 to vector<8x512xf32>
    %12 = arith.mulf %11, %8 : vector<8x512xf32>
    %13 = arith.select %10, %8, %12 : vector<8x512xi1>, vector<8x512xf32>
    %c0_8 = arith.constant 0 : index
    %c0_9 = arith.constant 0 : index
    %14 = vector.load %arg7[%c0_8, %c0_9] : memref<8x1xf32, #tpu.memory_space<vmem>>, vector<8x1xf32>
    %c0_10 = arith.constant 0 : index
    %c0_11 = arith.constant 0 : index
    %15 = vector.load %arg4[%c0_10, %c0_11] : memref<1x512xf32, #tpu.memory_space<vmem>>, vector<1x512xf32>
    %16 = vector.broadcast %15 : vector<1x512xf32> to vector<8x512xf32>
    %17 = arith.mulf %13, %16 : vector<8x512xf32>
    %cst_12 = arith.constant dense<0.000000e+00> : vector<8xf32>
    %18 = vector.multi_reduction <add>, %17, %cst_12 [1] : vector<8x512xf32> to vector<8xf32>
    %19 = vector.shape_cast %18 : vector<8xf32> to vector<8x1xf32>
    %20 = arith.addf %14, %19 : vector<8x1xf32>
    %c0_13 = arith.constant 0 : index
    %c0_14 = arith.constant 0 : index
    %21 = vector.load %arg7[%c0_13, %c0_14] : memref<8x1xf32, #tpu.memory_space<vmem>>, vector<8x1xf32>
    tpu.vector_store %arg7[%c0_13, %c0_14], %20 {strides = array<i32>} : memref<8x1xf32, #tpu.memory_space<vmem>>, vector<8x1xf32>,
    %c1_i32 = arith.constant 1 : i32
    %22 = arith.cmpi eq, %arg0, %c1_i32 : i32
    %23 = arith.extui %22 : i1 to i32
    %c0_i32_15 = arith.constant 0 : i32
    %24 = arith.cmpi ne, %23, %c0_i32_15 : i32
    scf.if %24 {
      %c0_16 = arith.constant 0 : index
      %c0_17 = arith.constant 0 : index
      %25 = vector.load %arg7[%c0_16, %c0_17] : memref<8x1xf32, #tpu.memory_space<vmem>>, vector<8x1xf32>
      %c0_18 = arith.constant 0 : index
      %c0_19 = arith.constant 0 : index
      %26 = vector.load %arg5[%c0_18, %c0_19] : memref<1x1xf32, #tpu.memory_space<vmem>>, vector<1x1xf32>
      %27 = vector.broadcast %26 : vector<1x1xf32> to vector<8x1xf32>
      %28 = arith.addf %25, %27 : vector<8x1xf32>
      %29 = math.absf %28 : vector<8x1xf32>
      %cst_20 = arith.constant 0.000000e+00 : f32
      %30 = vector.broadcast %cst_20 : f32 to vector<8x1xf32>
      %31 = arith.subf %30, %29 : vector<8x1xf32>
      %32 = math.exp %31 : vector<8x1xf32>
      %cst_21 = arith.constant 0.000000e+00 : f32
      %33 = vector.broadcast %cst_21 : f32 to vector<8x1xf32>
      %34 = arith.cmpf oge, %28, %33 : vector<8x1xf32>
      %cst_22 = arith.constant 1.000000e+00 : f32
      %35 = vector.broadcast %cst_22 : f32 to vector<8x1xf32>
      %36 = arith.select %34, %35, %32 : vector<8x1xi1>, vector<8x1xf32>
      %cst_23 = arith.constant 1.000000e+00 : f32
      %37 = vector.broadcast %cst_23 : f32 to vector<8x1xf32>
      %38 = arith.addf %37, %32 : vector<8x1xf32>
      %39 = tpu.reciprocal %38 {approx = true} : vector<8x1xf32> -> vector<8x1xf32>
      %40 = arith.mulf %36, %39 : vector<8x1xf32>
      %cst_24 = arith.constant 0.000000e+00 : f32
      %cst_25 = arith.constant 1.000000e+00 : f32
      %41 = vector.broadcast %cst_24 : f32 to vector<8x1xf32>
      %42 = arith.maximumf %41, %40 : vector<8x1xf32>
      %43 = vector.broadcast %cst_25 : f32 to vector<8x1xf32>
      %44 = arith.minimumf %43, %42 : vector<8x1xf32>
      %c0_26 = arith.constant 0 : index
      %c0_27 = arith.constant 0 : index
      %45 = vector.load %arg6[%c0_26, %c0_27] : memref<8x1xf32, #tpu.memory_space<vmem>>, vector<8x1xf32>
      tpu.vector_store %arg6[%c0_26, %c0_27], %44 {strides = array<i32>} : memref<8x1xf32, #tpu.memory_space<vmem>>, vector<8x1xf32>,
    } else {
    }
    return
  }
  func.func @transform_0(%arg0: i32) -> (i32, i32) {
    %c0_i32 = arith.constant 0 : i32
    %c0_i32_0 = arith.constant 0 : i32
    %c0_i32_1 = arith.constant 0 : i32
    return %c0_i32, %c0_i32_0 : i32, i32
  }
  func.func @transform_1(%arg0: i32) -> (i32, i32) {
    %c0_i32 = arith.constant 0 : i32
    %c0_i32_0 = arith.constant 0 : i32
    return %c0_i32, %arg0 : i32, i32
  }
  func.func @transform_2(%arg0: i32) -> (i32, i32) {
    %c0_i32 = arith.constant 0 : i32
    %c0_i32_0 = arith.constant 0 : i32
    return %c0_i32, %arg0 : i32, i32
  }
  func.func @transform_3(%arg0: i32) -> (i32, i32) {
    %c0_i32 = arith.constant 0 : i32
    %c0_i32_0 = arith.constant 0 : i32
    return %c0_i32, %arg0 : i32, i32
  }
  func.func @transform_4(%arg0: i32) -> (i32, i32) {
    %c0_i32 = arith.constant 0 : i32
    %c0_i32_0 = arith.constant 0 : i32
    %c0_i32_1 = arith.constant 0 : i32
    return %c0_i32, %c0_i32_0 : i32, i32
  }
  func.func @transform_5(%arg0: i32) -> (i32, i32) {
    %c0_i32 = arith.constant 0 : i32
    %c0_i32_0 = arith.constant 0 : i32
    %c0_i32_1 = arith.constant 0 : i32
    return %c0_i32, %c0_i32_0 : i32, i32
  }
}

</mosaic_0001>

<bundles_post_ra>
// kernel: discriminator_forward.3
= control target key start
LH: loop header
LB: loop body
LE: loop exit
PB: predicated region body
PF: predicated region fallthrough
CT: control target
= control target key end

     0   :  { %s2216_s12 = smov 0   ;;  %s2760_s0 = inlined_call_operand.vmem [shape: bf16[2,4,196,9], index: 0, kind: input, shape index: {}]   ;;  %s2761_s1 = inlined_call_operand.vmem [shape: bf16[9,32], index: 1, kind: input, shape index: {}]   ;;  %s2762_s2 = inlined_call_operand.vmem [shape: f32[1,32], index: 2, kind: input, shape index: {}]   ;;  %s2763_s3 = inlined_call_operand.vmem [shape: bf16[2,196,32], index: 3, kind: output, shape index: {}]  }
   0x1 LB: > { %s1607_s13 = sadd.s32 4294967295, %s2191_s12   ;;  %p1611_p0 = scmp.ge.s32.totalorder %s2191_s12, 1  ;;  %s2191_s12 = sphi %s2216_s12, %s13_s12  }
   0x2   : > { %p137_p1 = scmp.lt.s32.totalorder %s2191_s12, 3 }
   0x4   : > { %p138_p2 = pnand %p1611_p0, %p137_p1 }
   0x5   : > { %p161_p3 = scmp.lt.s32.totalorder (!%p138_p2), %s1607_s13, 1 }
   0x6   : > { %141 = sbr.rel (%p138_p2) target bundleno = 424 (0x1a8), region = 32 }
   0xb   : > { %vm307_vm0 = vcmask 1043456   ;;  %v2193_v0 = vmov 0.0   ;;  %v2132_v1 = vld [vmem:[%s2761_s1] sm:$0x1f]   ;;  %vm308_vm1 = vcmask 1044480   ;;  %v2194_v2 = vmov 65535  }
   0xc   : > { %1903 = vmatprep.subr.bf16.mxu0 %v2193_v0  ;;  %1957 = vmatprep.subr.bf16.mxu1 %v2193_v0  ;;  %v309_v3 = vsel %vm307_vm0, 4294967295, %v2194_v2  ;;  %vm2195_vm2 = vmmov 0   ;;  %s2789_s13 = smov (!%p161_p3, %s1607_s13), 1  ;;  %vm267_vm3 = vcmask 72704   ;;  %vm1525_vm5 = vcmask 257024  }
   0xd   : > { %1905 = vmatprep.mubr.msk.bf16.mxu0 %vm2195_vm2, %v2193_v0  ;;  %1959 = vmatprep.mubr.msk.bf16.mxu1 %vm2195_vm2, %v2193_v0  ;;  %v310_v4 = vsel %vm308_vm1, %v309_v3, 0  ;;  %s2119_s16 = smul.u32 400, %s2789_s13 }
   0xe   : > { %v312_v5 = vand.u32 %v2132_v1, %v310_v4  ;;  %s2120_s22 = smul.u32 100, %s2789_s13 }
   0xf   : > { %s2240_s19 = scalar_lea.vmem %s2760_s0, %s2119_s16 }
  0x10   : > { %1904 = vmatpush3.bf16.msra.mxu0 %v312_v5  ;;  %1958 = vmatpush3.bf16.msra.mxu1 %v312_v5  ;;  %v2133_v6 = vld [vmem:[%s2240_s19] sm:$0xff]   ;;  %v2135_v8 = vld [vmem:[%s2240_s19 + $0x8] sm:$0xff]   ;;  %v2137_v10 = vld [vmem:[%s2240_s19 + $0x10] sm:$0xff]   ;;  %s2613_s25 = scalar_lea.vmem %s2763_s3, %s2120_s22 }
  0x11   : > { %2011 = vmatprep.subr.bf16.mxu0 %v2193_v0  ;;  %2065 = vmatprep.subr.bf16.mxu1 %v2193_v0  ;;  %v2134_v7 = vld [vmem:[%s2240_s19 + $0x64] sm:$0xff]   ;;  %v2136_v9 = vld [vmem:[%s2240_s19 + $0x6c] sm:$0xff]   ;;  %v2138_v11 = vld [vmem:[%s2240_s19 + $0x74] sm:$0xff]  }
  0x12   : > { %v2139_v12 = vld [vmem:[%s2240_s19 + $0x18] sm:$0xff]   ;;  %v2141_v14 = vld [vmem:[%s2240_s19 + $0x20] sm:$0xff]   ;;  %v2143_v16 = vld [vmem:[%s2240_s19 + $0x28] sm:$0xff]  }
  0x13   : > { %1906 = vmatmul.mubr.msk.bf16.vlgmr.msra.gmra.mxu0 %vm267_vm3, %v2133_v6  ;;  %1960 = vmatmul.mubr.msk.bf16.vlgmr.msra.gmra.mxu1 %vm267_vm3, %v2134_v7  ;;  %v2140_v13 = vld [vmem:[%s2240_s19 + $0x7c] sm:$0xff]   ;;  %v2142_v15 = vld [vmem:[%s2240_s19 + $0x84] sm:$0xff]   ;;  %v2144_v17 = vld [vmem:[%s2240_s19 + $0x8c] sm:$0xff]  }
  0x14   : > { %2012 = vmatpush3.bf16.msra.mxu0 %v312_v5  ;;  %2066 = vmatpush3.bf16.msra.mxu1 %v312_v5  ;;  %v2145_v18 = vld [vmem:[%s2240_s19 + $0x30] sm:$0xff]   ;;  %v2147_v20 = vld [vmem:[%s2240_s19 + $0x38] sm:$0xff]   ;;  %v2149_v22 = vld [vmem:[%s2240_s19 + $0x40] sm:$0xff]  }
  0x15   : > { %1909 = vmatprep.mubr.msk.bf16.mxu0 %vm2195_vm2, %v2193_v0  ;;  %1963 = vmatprep.mubr.msk.bf16.mxu1 %vm2195_vm2, %v2193_v0  ;;  %v2146_v19 = vld [vmem:[%s2240_s19 + $0x94] sm:$0xff]   ;;  %v2148_v21 = vld [vmem:[%s2240_s19 + $0x9c] sm:$0xff]   ;;  %v2150_v23 = vld [vmem:[%s2240_s19 + $0xa4] sm:$0xff]  }
  0x16   : > { %v2151_v24 = vld [vmem:[%s2240_s19 + $0x48] sm:$0xff]   ;;  %v2153_v26 = vld [vmem:[%s2240_s19 + $0x50] sm:$0xff]   ;;  %v2155_v28 = vld [vmem:[%s2240_s19 + $0x58] sm:$0xff]  }
  0x17   : > { %v2152_v25 = vld [vmem:[%s2240_s19 + $0xac] sm:$0xff]   ;;  %v2154_v27 = vld [vmem:[%s2240_s19 + $0xb4] sm:$0xff]   ;;  %v2156_v29 = vld [vmem:[%s2240_s19 + $0xbc] sm:$0xff]  }
  0x18   : > { %v2157_v30 = vld [vmem:[%s2240_s19 + $0x60] ss:$0 sps:$4 sm:$0x33]   ;;  %v2158_v31 = vld [vmem:[%s2240_s19 + $0xc4] ss:$0 sps:$4 sm:$0x33]  }
  0x19   : > { %v2159_v32 = vld [vmem:[%s2240_s19 + $0xc8] sm:$0xff]   ;;  %v2161_v34 = vld [vmem:[%s2240_s19 + $0xd0] sm:$0xff]   ;;  %v2163_v36 = vld [vmem:[%s2240_s19 + $0xd8] sm:$0xff]  }
  0x1a   : > { %v2160_v33 = vld [vmem:[%s2240_s19 + $0x12c] sm:$0xff]   ;;  %v2162_v35 = vld [vmem:[%s2240_s19 + $0x134] sm:$0xff]   ;;  %v2164_v37 = vld [vmem:[%s2240_s19 + $0x13c] sm:$0xff]  }
  0x1b   : > { %1910 = vmatmul.mubr.msk.bf16.gmra.mxu0 %vm267_vm3, %v2135_v8  ;;  %1964 = vmatmul.mubr.msk.bf16.gmra.mxu1 %vm267_vm3, %v2136_v9  ;;  %v2165_v38 = vld [vmem:[%s2240_s19 + $0xe0] sm:$0xff]   ;;  %v2167_v40 = vld [vmem:[%s2240_s19 + $0xe8] sm:$0xff]   ;;  %v2169_v42 = vld [vmem:[%s2240_s19 + $0xf0] sm:$0xff]  }
  0x1c   : > { %1913 = vmatprep.mubr.msk.bf16.mxu0 %vm2195_vm2, %v2193_v0  ;;  %1967 = vmatprep.mubr.msk.bf16.mxu1 %vm2195_vm2, %v2193_v0  ;;  %v2166_v39 = vld [vmem:[%s2240_s19 + $0x144] sm:$0xff]   ;;  %v2168_v41 = vld [vmem:[%s2240_s19 + $0x14c] sm:$0xff]   ;;  %v2170_v43 = vld [vmem:[%s2240_s19 + $0x154] sm:$0xff]  }
  0x1d   : > { %v2171_v44 = vld [vmem:[%s2240_s19 + $0xf8] sm:$0xff]   ;;  %v2173_v46 = vld [vmem:[%s2240_s19 + $0x100] sm:$0xff]   ;;  %v2175_v48 = vld [vmem:[%s2240_s19 + $0x108] sm:$0xff]  }
  0x1e   : > { %v2172_v45 = vld [vmem:[%s2240_s19 + $0x15c] sm:$0xff]   ;;  %v2174_v47 = vld [vmem:[%s2240_s19 + $0x164] sm:$0xff]   ;;  %v2176_v49 = vld [vmem:[%s2240_s19 + $0x16c] sm:$0xff]  }
  0x1f   : > { %v2177_v50 = vld [vmem:[%s2240_s19 + $0x110] sm:$0xff]   ;;  %v2179_v52 = vld [vmem:[%s2240_s19 + $0x118] sm:$0xff]   ;;  %v2181_v54 = vld [vmem:[%s2240_s19 + $0x120] sm:$0xff]  }
  0x20   : > { %v2178_v51 = vld [vmem:[%s2240_s19 + $0x174] sm:$0xff]   ;;  %v2180_v53 = vld [vmem:[%s2240_s19 + $0x17c] sm:$0xff]   ;;  %v2182_v55 = vld [vmem:[%s2240_s19 + $0x184] sm:$0xff]  }
  0x21   : > { %v2183_v62 = vld [vmem:[%s2240_s19 + $0x128] ss:$0 sps:$4 sm:$0x33]   ;;  %v2184_v1 = vld [vmem:[%s2240_s19 + $0x18c] ss:$0 sps:$4 sm:$0x33]  }
  0x23   : > { %1914 = vmatmul.mubr.msk.bf16.gmra.mxu0 %vm267_vm3, %v2137_v10  ;;  %1968 = vmatmul.mubr.msk.bf16.gmra.mxu1 %vm267_vm3, %v2138_v11 }
  0x24   : > { %1917 = vmatprep.mubr.msk.bf16.mxu0 %vm2195_vm2, %v2193_v0  ;;  %1971 = vmatprep.mubr.msk.bf16.mxu1 %vm2195_vm2, %v2193_v0 }
  0x2b   : > { %1918 = vmatmul.mubr.msk.bf16.gmra.mxu0 %vm267_vm3, %v2139_v12  ;;  %1972 = vmatmul.mubr.msk.bf16.gmra.mxu1 %vm267_vm3, %v2140_v13 }
  0x2c   : > { %1921 = vmatprep.mubr.msk.bf16.mxu0 %vm2195_vm2, %v2193_v0  ;;  %1975 = vmatprep.mubr.msk.bf16.mxu1 %vm2195_vm2, %v2193_v0 }
  0x33   : > { %1922 = vmatmul.mubr.msk.bf16.gmra.mxu0 %vm267_vm3, %v2141_v14  ;;  %1976 = vmatmul.mubr.msk.bf16.gmra.mxu1 %vm267_vm3, %v2142_v15 }
  0x34   : > { %1925 = vmatprep.mubr.msk.bf16.mxu0 %vm2195_vm2, %v2193_v0  ;;  %1979 = vmatprep.mubr.msk.bf16.mxu1 %vm2195_vm2, %v2193_v0 }
  0x3b   : > { %1926 = vmatmul.mubr.msk.bf16.gmra.mxu0 %vm267_vm3, %v2143_v16  ;;  %1980 = vmatmul.mubr.msk.bf16.gmra.mxu1 %vm267_vm3, %v2144_v17 }
  0x3c   : > { %1929 = vmatprep.mubr.msk.bf16.mxu0 %vm2195_vm2, %v2193_v0  ;;  %1983 = vmatprep.mubr.msk.bf16.mxu1 %vm2195_vm2, %v2193_v0 }
  0x43   : > { %1930 = vmatmul.mubr.msk.bf16.gmra.mxu0 %vm267_vm3, %v2145_v18  ;;  %1984 = vmatmul.mubr.msk.bf16.gmra.mxu1 %vm267_vm3, %v2146_v19 }
  0x44   : > { %1933 = vmatprep.mubr.msk.bf16.mxu0 %vm2195_vm2, %v2193_v0  ;;  %1987 = vmatprep.mubr.msk.bf16.mxu1 %vm2195_vm2, %v2193_v0 }
  0x4b   : > { %1934 = vmatmul.mubr.msk.bf16.gmra.mxu0 %vm267_vm3, %v2147_v20  ;;  %1988 = vmatmul.mubr.msk.bf16.gmra.mxu1 %vm267_vm3, %v2148_v21 }
  0x4c   : > { %1937 = vmatprep.mubr.msk.bf16.mxu0 %vm2195_vm2, %v2193_v0  ;;  %1991 = vmatprep.mubr.msk.bf16.mxu1 %vm2195_vm2, %v2193_v0 }
  0x53   : > { %1938 = vmatmul.mubr.msk.bf16.gmra.mxu0 %vm267_vm3, %v2149_v22  ;;  %1992 = vmatmul.mubr.msk.bf16.gmra.mxu1 %vm267_vm3, %v2150_v23 }
  0x54   : > { %1941 = vmatprep.mubr.msk.bf16.mxu0 %vm2195_vm2, %v2193_v0  ;;  %1995 = vmatprep.mubr.msk.bf16.mxu1 %vm2195_vm2, %v2193_v0 }
  0x5b   : > { %1942 = vmatmul.mubr.msk.bf16.gmra.mxu0 %vm267_vm3, %v2151_v24  ;;  %1996 = vmatmul.mubr.msk.bf16.gmra.mxu1 %vm267_vm3, %v2152_v25 }
  0x5c   : > { %1945 = vmatprep.mubr.msk.bf16.mxu0 %vm2195_vm2, %v2193_v0  ;;  %1999 = vmatprep.mubr.msk.bf16.mxu1 %vm2195_vm2, %v2193_v0 }
  0x63   : > { %1946 = vmatmul.mubr.msk.bf16.gmra.mxu0 %vm267_vm3, %v2153_v26  ;;  %2000 = vmatmul.mubr.msk.bf16.gmra.mxu1 %vm267_vm3, %v2154_v27 }
  0x64   : > { %1949 = vmatprep.mubr.msk.bf16.mxu0 %vm2195_vm2, %v2193_v0  ;;  %2003 = vmatprep.mubr.msk.bf16.mxu1 %vm2195_vm2, %v2193_v0 }
  0x6b   : > { %1950 = vmatmul.mubr.msk.bf16.gmra.mxu0 %vm267_vm3, %v2155_v28  ;;  %2004 = vmatmul.mubr.msk.bf16.gmra.mxu1 %vm267_vm3, %v2156_v29 }
  0x6c   : > { %1953 = vmatprep.mubr.msk.bf16.mxu0 %vm2195_vm2, %v2193_v0  ;;  %2007 = vmatprep.mubr.msk.bf16.mxu1 %vm2195_vm2, %v2193_v0 }
  0x73   : > { %1954 = vmatmul.mubr.msk.bf16.gmra.mxu0 %vm267_vm3, %v2157_v30  ;;  %2008 = vmatmul.mubr.msk.bf16.gmra.mxu1 %vm267_vm3, %v2158_v31 }
  0x74   : > { %2013 = vmatprep.mubr.msk.bf16.mxu0 %vm2195_vm2, %v2193_v0  ;;  %2067 = vmatprep.mubr.msk.bf16.mxu1 %vm2195_vm2, %v2193_v0 }
  0x7b   : > { %2014 = vmatmul.mubr.msk.bf16.vlgmr.msra.gmra.mxu0 %vm267_vm3, %v2159_v32  ;;  %2068 = vmatmul.mubr.msk.bf16.vlgmr.msra.gmra.mxu1 %vm267_vm3, %v2160_v33 }
  0x7c   : > { %2017 = vmatprep.mubr.msk.bf16.mxu0 %vm2195_vm2, %v2193_v0  ;;  %2071 = vmatprep.mubr.msk.bf16.mxu1 %vm2195_vm2, %v2193_v0 }
  0x83   : > { %2018 = vmatmul.mubr.msk.bf16.gmra.mxu0 %vm267_vm3, %v2161_v34  ;;  %2072 = vmatmul.mubr.msk.bf16.gmra.mxu1 %vm267_vm3, %v2162_v35 }
  0x84   : > { %2021 = vmatprep.mubr.msk.bf16.mxu0 %vm2195_vm2, %v2193_v0  ;;  %2075 = vmatprep.mubr.msk.bf16.mxu1 %vm2195_vm2, %v2193_v0 }
  0x8b   : > { %2022 = vmatmul.mubr.msk.bf16.gmra.mxu0 %vm267_vm3, %v2163_v36  ;;  %2076 = vmatmul.mubr.msk.bf16.gmra.mxu1 %vm267_vm3, %v2164_v37 }
  0x8c   : > { %2025 = vmatprep.mubr.msk.bf16.mxu0 %vm2195_vm2, %v2193_v0  ;;  %2079 = vmatprep.mubr.msk.bf16.mxu1 %vm2195_vm2, %v2193_v0 }
  0x93   : > { %2026 = vmatmul.mubr.msk.bf16.gmra.mxu0 %vm267_vm3, %v2165_v38  ;;  %2080 = vmatmul.mubr.msk.bf16.gmra.mxu1 %vm267_vm3, %v2166_v39 }
  0x94   : > { %2029 = vmatprep.mubr.msk.bf16.mxu0 %vm2195_vm2, %v2193_v0  ;;  %2083 = vmatprep.mubr.msk.bf16.mxu1 %vm2195_vm2, %v2193_v0 }
  0x9b   : > { %2030 = vmatmul.mubr.msk.bf16.gmra.mxu0 %vm267_vm3, %v2167_v40  ;;  %2084 = vmatmul.mubr.msk.bf16.gmra.mxu1 %vm267_vm3, %v2168_v41  ;;  %v2603_v41 = vld [vmem:[%s2762_s2] ss:$0 sm:$0xff] }
  0x9c   : > { %2033 = vmatprep.mubr.msk.bf16.mxu0 %vm2195_vm2, %v2193_v0  ;;  %2087 = vmatprep.mubr.msk.bf16.mxu1 %vm2195_vm2, %v2193_v0 }
  0xa3   : > { %2034 = vmatmul.mubr.msk.bf16.gmra.mxu0 %vm267_vm3, %v2169_v42  ;;  %2088 = vmatmul.mubr.msk.bf16.gmra.mxu1 %vm267_vm3, %v2170_v43 }
  0xa4   : > { %2037 = vmatprep.mubr.msk.bf16.mxu0 %vm2195_vm2, %v2193_v0  ;;  %2091 = vmatprep.mubr.msk.bf16.mxu1 %vm2195_vm2, %v2193_v0 }
  0xab   : > { %2038 = vmatmul.mubr.msk.bf16.gmra.mxu0 %vm267_vm3, %v2171_v44  ;;  %2092 = vmatmul.mubr.msk.bf16.gmra.mxu1 %vm267_vm3, %v2172_v45 }
  0xac   : > { %2041 = vmatprep.mubr.msk.bf16.mxu0 %vm2195_vm2, %v2193_v0  ;;  %2095 = vmatprep.mubr.msk.bf16.mxu1 %vm2195_vm2, %v2193_v0 }
  0xb3   : > { %2042 = vmatmul.mubr.msk.bf16.gmra.mxu0 %vm267_vm3, %v2173_v46  ;;  %2096 = vmatmul.mubr.msk.bf16.gmra.mxu1 %vm267_vm3, %v2174_v47 }
  0xb4   : > { %2045 = vmatprep.mubr.msk.bf16.mxu0 %vm2195_vm2, %v2193_v0  ;;  %2099 = vmatprep.mubr.msk.bf16.mxu1 %vm2195_vm2, %v2193_v0 }
  0xbb   : > { %2046 = vmatmul.mubr.msk.bf16.gmra.mxu0 %vm267_vm3, %v2175_v48  ;;  %2100 = vmatmul.mubr.msk.bf16.gmra.mxu1 %vm267_vm3, %v2176_v49 }
  0xbc   : > { %2049 = vmatprep.mubr.msk.bf16.mxu0 %vm2195_vm2, %v2193_v0  ;;  %2103 = vmatprep.mubr.msk.bf16.mxu1 %vm2195_vm2, %v2193_v0 }
  0xc3   : > { %2050 = vmatmul.mubr.msk.bf16.gmra.mxu0 %vm267_vm3, %v2177_v50  ;;  %2104 = vmatmul.mubr.msk.bf16.gmra.mxu1 %vm267_vm3, %v2178_v51 }
  0xc4   : > { %2053 = vmatprep.mubr.msk.bf16.mxu0 %vm2195_vm2, %v2193_v0  ;;  %2107 = vmatprep.mubr.msk.bf16.mxu1 %vm2195_vm2, %v2193_v0 }
  0xcb   : > { %2054 = vmatmul.mubr.msk.bf16.gmra.mxu0 %vm267_vm3, %v2179_v52  ;;  %2108 = vmatmul.mubr.msk.bf16.gmra.mxu1 %vm267_vm3, %v2180_v53 }
  0xcc   : > { %2057 = vmatprep.mubr.msk.bf16.mxu0 %vm2195_vm2, %v2193_v0  ;;  %2111 = vmatprep.mubr.msk.bf16.mxu1 %vm2195_vm2, %v2193_v0 }
  0xd3   : > { %v2437_v56 = vpop.f32.mrf.mxu0  ;;  %2058 = vmatmul.mubr.msk.bf16.gmra.mxu0 %vm267_vm3, %v2181_v54  ;;  %v2440_v57 = vpop.f32.mrf.mxu1  ;;  %2112 = vmatmul.mubr.msk.bf16.gmra.mxu1 %vm267_vm3, %v2182_v55 }
  0xd4   : > { %2061 = vmatprep.mubr.msk.bf16.mxu0 %vm2195_vm2, %v2193_v0  ;;  %v714_v58 = vmax.f32 %v2437_v56, %v2440_v57  ;;  %2115 = vmatprep.mubr.msk.bf16.mxu1 %vm2195_vm2, %v2193_v0 }
  0xd5   : > { %v1907_v59 = vpop.f32.mrf.mxu0  ;;  %v1961_v60 = vpop.f32.mrf.mxu1 }
  0xd7   : > { %v2449_v61 = vpop.f32.mrf.mxu0  ;;  %v2452_v63 = vpop.f32.mrf.mxu1 }
  0xd9   : > { %v1908_v3 = vpop.f32.mrf.mxu0  ;;  %v1962_v4 = vpop.f32.mrf.mxu1 }
  0xdb   : > { %v2457_v5 = vpop.f32.mrf.mxu0  ;;  %2062 = vmatmul.mubr.msk.bf16.gmra.mxu0 %vm267_vm3, %v2183_v62  ;;  %v2460_v6 = vpop.f32.mrf.mxu1  ;;  %2116 = vmatmul.mubr.msk.bf16.gmra.mxu1 %vm267_vm3, %v2184_v1 }
  0xdd   : > { %v1911_v7 = vpop.f32.mrf.mxu0  ;;  %v1965_v8 = vpop.f32.mrf.mxu1 }
  0xdf   : > { %v2465_v9 = vpop.f32.mrf.mxu0  ;;  %v2467_v10 = vpop.f32.mrf.mxu1 }
  0xe1   : > { %v1912_v12 = vpop.f32.mrf.mxu0  ;;  %v1966_v13 = vpop.f32.mrf.mxu1 }
  0xe3   : > { %v2471_v14 = vpop.f32.mrf.mxu0  ;;  %v2473_v15 = vpop.f32.mrf.mxu1 }
  0xe5   : > { %v1915_v17 = vpop.f32.mrf.mxu0  ;;  %v1969_v18 = vpop.f32.mrf.mxu1 }
  0xe7   : > { %v2477_v19 = vpop.f32.mrf.mxu0  ;;  %v2479_v20 = vpop.f32.mrf.mxu1 }
  0xe9   : > { %v1916_v22 = vpop.f32.mrf.mxu0  ;;  %v1970_v23 = vpop.f32.mrf.mxu1 }
  0xeb   : > { %v2483_v24 = vpop.f32.mrf.mxu0  ;;  %v2485_v25 = vpop.f32.mrf.mxu1 }
  0xed   : > { %v1919_v27 = vpop.f32.mrf.mxu0  ;;  %v1973_v28 = vpop.f32.mrf.mxu1 }
  0xef   : > { %v2489_v29 = vpop.f32.mrf.mxu0  ;;  %v2491_v30 = vpop.f32.mrf.mxu1 }
  0xf1   : > { %v1920_v32 = vpop.f32.mrf.mxu0  ;;  %v1974_v33 = vpop.f32.mrf.mxu1 }
  0xf3   : > { %v2495_v34 = vpop.f32.mrf.mxu0  ;;  %v2497_v35 = vpop.f32.mrf.mxu1 }
  0xf5   : > { %v1923_v37 = vpop.f32.mrf.mxu0  ;;  %v1977_v38 = vpop.f32.mrf.mxu1 }
  0xf7   : > { %v2501_v39 = vpop.f32.mrf.mxu0  ;;  %v2503_v40 = vpop.f32.mrf.mxu1 }
  0xf9   : > { %v1924_v42 = vpop.f32.mrf.mxu0  ;;  %v1978_v43 = vpop.f32.mrf.mxu1 }
  0xfb   : > { %v2507_v44 = vpop.f32.mrf.mxu0  ;;  %v2509_v45 = vpop.f32.mrf.mxu1 }
  0xfd   : > { %v1927_v47 = vpop.f32.mrf.mxu0  ;;  %v1981_v48 = vpop.f32.mrf.mxu1 }
  0xff   : > { %v2513_v49 = vpop.f32.mrf.mxu0  ;;  %v2515_v50 = vpop.f32.mrf.mxu1 }
 0x101   : > { %v1928_v52 = vpop.f32.mrf.mxu0  ;;  %v1982_v53 = vpop.f32.mrf.mxu1 }
 0x103   : > { %v2519_v54 = vpop.f32.mrf.mxu0  ;;  %v2521_v55 = vpop.f32.mrf.mxu1 }
 0x105   : > { %v1931_v60 = vpop.f32.mrf.mxu0  ;;  %v1985_v62 = vpop.f32.mrf.mxu1 }
 0x107   : > { %v2525_v1 = vpop.f32.mrf.mxu0  ;;  %v2527_v3 = vpop.f32.mrf.mxu1 }
 0x109   : > { %v1932_v7 = vpop.f32.mrf.mxu0  ;;  %v1986_v8 = vpop.f32.mrf.mxu1 }
 0x10b   : > { %v2531_v12 = vpop.f32.mrf.mxu0  ;;  %v2533_v13 = vpop.f32.mrf.mxu1 }
 0x10d   : > { %v1935_v18 = vpop.f32.mrf.mxu0  ;;  %v1989_v22 = vpop.f32.mrf.mxu1 }
 0x10f   : > { %v2537_v23 = vpop.f32.mrf.mxu0  ;;  %v2539_v27 = vpop.f32.mrf.mxu1 }
 0x111   : > { %v1936_v32 = vpop.f32.mrf.mxu0  ;;  %v1990_v33 = vpop.f32.mrf.mxu1 }
 0x113   : > { %v2543_v37 = vpop.f32.mrf.mxu0  ;;  %v2545_v38 = vpop.f32.mrf.mxu1 }
 0x115   : > { %v1939_v43 = vpop.f32.mrf.mxu0  ;;  %v1993_v47 = vpop.f32.mrf.mxu1 }
 0x117   : > { %v2549_v48 = vpop.f32.mrf.mxu0  ;;  %v2551_v52 = vpop.f32.mrf.mxu1 }
 0x119   : > { %v1940_v60 = vpop.f32.mrf.mxu0  ;;  %v1994_v62 = vpop.f32.mrf.mxu1 }
 0x11b   : > { %v2555_v7 = vpop.f32.mrf.mxu0  ;;  %v2557_v8 = vpop.f32.mrf.mxu1 }
 0x11d   : > { %v1943_v22 = vpop.f32.mrf.mxu0  ;;  %v1997_v32 = vpop.f32.mrf.mxu1 }
 0x11f   : > { %v2561_v33 = vpop.f32.mrf.mxu0  ;;  %v2563_v43 = vpop.f32.mrf.mxu1 }
 0x121   : > { %v1944_v42 = vpop.f32.mrf.mxu0  ;;  %v1998_v53 = vpop.f32.mrf.mxu1 }
 0x123   : > { %v2567_v60 = vpop.f32.mrf.mxu0  ;;  %v2569_v62 = vpop.f32.mrf.mxu1 }
 0x125   : > { %v1947_v17 = vpop.f32.mrf.mxu0  ;;  %v2001_v18 = vpop.f32.mrf.mxu1 }
 0x127   : > { %v2573_v22 = vpop.f32.mrf.mxu0  ;;  %v2575_v32 = vpop.f32.mrf.mxu1 }
 0x129   : > { %v1948_v59 = vpop.f32.mrf.mxu0  ;;  %v2002_v47 = vpop.f32.mrf.mxu1 }
 0x12b   : > { %v2579_v42 = vpop.f32.mrf.mxu0  ;;  %v2581_v53 = vpop.f32.mrf.mxu1 }
 0x12d   : > { %v1951_v46 = vpop.f32.mrf.mxu0  ;;  %v2005_v28 = vpop.f32.mrf.mxu1 }
 0x12f   : > { %v2585_v17 = vpop.f32.mrf.mxu0  ;;  %v2587_v18 = vpop.f32.mrf.mxu1 }
 0x131   : > { %v1952_v36 = vpop.f32.mrf.mxu0  ;;  %v2006_v4 = vpop.f32.mrf.mxu1 }
 0x133   : > { %v2591_v59 = vpop.f32.mrf.mxu0  ;;  %v2593_v47 = vpop.f32.mrf.mxu1 }
 0x135   : > { %v1955_v51 = vpop.f32.mrf.mxu0  ;;  %v2009_v46 = vpop.f32.mrf.mxu1 }
 0x137   : > { %v447_v28 = vpop.f32.mrf.mxu0  ;;  %v711_v26 = vpop.f32.mrf.mxu1 }
 0x139   : > { %v1956_v21 = vpop.f32.mrf.mxu0  ;;  %v2010_v16 = vpop.f32.mrf.mxu1 }
 0x13a   : > { %v2764_v16 = vmax.f32 %v2449_v61, %v2452_v63  ;;  %v2765_v61 = vmax.f32 %v2457_v5, %v2460_v6 }
 0x13b   : > { %v901_v11 = vpop.f32.mrf.mxu0  ;;  %v1190_v4 = vpop.f32.mrf.mxu1 }
 0x13c   : > { %v1003_v36 = vmax.f32 %v714_v58, %v901_v11 }
 0x13d   : > { %v2015_v0 = vpop.f32.mrf.mxu0  ;;  %v2069_v31 = vpop.f32.mrf.mxu1 }
 0x13e   : > { %v1292_v2 = vmax.f32 %v1003_v36, %v1190_v4 }
 0x13f   : > { %v904_v51 = vpop.f32.mrf.mxu0  ;;  %v1193_v46 = vpop.f32.mrf.mxu1 }
 0x140   : > { %v1324_v26 = vadd.f32 %v2603_v41, %v1292_v2  ;;  %v1004_v21 = vmax.f32 %v2764_v16, %v904_v51 }
 0x141   : > { %v2016_v56 = vpop.f32.mrf.mxu0  ;;  %v2070_v11 = vpop.f32.mrf.mxu1 }
 0x142   : > { %vm1349_vm4 = vcmp.ge.f32.partialorder %v1324_v26, 0.0  ;;  %v1374_v57 = vmul.f32 0.2, %v1324_v26  ;;  %v1293_v58 = vmax.f32 %v1004_v21, %v1193_v46 }
 0x143   : > { %v909_v28 = vpop.f32.mrf.mxu0  ;;  %v1198_v31 = vpop.f32.mrf.mxu1 }
 0x144   : > { %v1399_v0 = vsel %vm1349_vm4, %v1324_v26, %v1374_v57  ;;  %v1325_v2 = vadd.f32 %v2603_v41, %v1293_v58  ;;  %v1005_v63 = vmax.f32 %v2765_v61, %v909_v28  ;;  %v2766_v57 = vmax.f32 %v2465_v9, %v2467_v10 }
 0x145   : > { %v1822_v36 = vpack.c.bf16 %v1399_v0, %v1399_v0  ;;  %v2019_v4 = vpop.f32.mrf.mxu0  ;;  %v2073_v21 = vpop.f32.mrf.mxu1 }
 0x146   : > { %vm1350_vm6 = vcmp.ge.f32.partialorder %v1325_v2, 0.0  ;;  %v1375_v51 = vmul.f32 0.2, %v1325_v2  ;;  %v1294_v16 = vmax.f32 %v1005_v63, %v1198_v31 }
 0x147   : > { %1526 = vst.msk [vmem:[%s2613_s25] sm:$0xf] %vm1525_vm5, %v1822_v36  ;;  %v912_v46 = vpop.f32.mrf.mxu0  ;;  %v1201_v5 = vpop.f32.mrf.mxu1  ;;  %v2767_v36 = vmax.f32 %v2471_v14, %v2473_v15 }
 0x148   : > { %v1400_v56 = vsel %vm1350_vm6, %v1325_v2, %v1375_v51  ;;  %v1326_v26 = vadd.f32 %v2603_v41, %v1294_v16  ;;  %v1006_v58 = vmax.f32 %v2766_v57, %v912_v46 }
 0x149   : > { %v1823_v6 = vpack.c.bf16 %v1400_v56, %v1400_v56  ;;  %v2020_v11 = vpop.f32.mrf.mxu0  ;;  %v2074_v61 = vpop.f32.mrf.mxu1 }
 0x14a   : > { %vm1351_vm7 = vcmp.ge.f32.partialorder %v1326_v26, 0.0  ;;  %v1376_v28 = vmul.f32 0.2, %v1326_v26  ;;  %v1295_v0 = vmax.f32 %v1006_v58, %v1201_v5  ;;  %v2768_v58 = vmax.f32 %v2477_v19, %v2479_v20 }
 0x14b   : > { %1527 = vst.msk [vmem:[%s2613_s25 + $0x4] sm:$0xf] %vm1525_vm5, %v1823_v6  ;;  %v917_v63 = vpop.f32.mrf.mxu0  ;;  %v1206_v9 = vpop.f32.mrf.mxu1 }
 0x14c   : > { %v1401_v31 = vsel %vm1351_vm7, %v1326_v26, %v1376_v28  ;;  %v1327_v2 = vadd.f32 %v2603_v41, %v1295_v0  ;;  %v1007_v4 = vmax.f32 %v2767_v36, %v917_v63 }
 0x14d   : > { %v1824_v10 = vpack.c.bf16 %v1401_v31, %v1401_v31  ;;  %v2023_v51 = vpop.f32.mrf.mxu0  ;;  %v2077_v46 = vpop.f32.mrf.mxu1 }
 0x14e   : > { %vm1352_vm8 = vcmp.ge.f32.partialorder %v1327_v2, 0.0  ;;  %v1377_v16 = vmul.f32 0.2, %v1327_v2  ;;  %v1296_v21 = vmax.f32 %v1007_v4, %v1206_v9 }
 0x14f   : > { %1528 = vst.msk [vmem:[%s2613_s25 + $0x8] sm:$0xf] %vm1525_vm5, %v1824_v10  ;;  %v920_v56 = vpop.f32.mrf.mxu0  ;;  %v1209_v14 = vpop.f32.mrf.mxu1 }
 0x150   : > { %v1402_v57 = vsel %vm1352_vm8, %v1327_v2, %v1377_v16  ;;  %v1328_v26 = vadd.f32 %v2603_v41, %v1296_v21  ;;  %v1008_v5 = vmax.f32 %v2768_v58, %v920_v56  ;;  %v2769_v2 = vmax.f32 %v2483_v24, %v2485_v25 }
 0x151   : > { %v1825_v15 = vpack.c.bf16 %v1402_v57, %v1402_v57  ;;  %v2024_v6 = vpop.f32.mrf.mxu0  ;;  %v2078_v0 = vpop.f32.mrf.mxu1  ;;  %v2770_v56 = vmax.f32 %v2489_v29, %v2491_v30 }
 0x152   : > { %vm1353_vm9 = vcmp.ge.f32.partialorder %v1328_v26, 0.0  ;;  %v1378_v11 = vmul.f32 0.2, %v1328_v26  ;;  %v1297_v28 = vmax.f32 %v1008_v5, %v1209_v14 }
 0x153   : > { %1529 = vst.msk [vmem:[%s2613_s25 + $0xc] sm:$0xf] %vm1525_vm5, %v1825_v15  ;;  %v925_v61 = vpop.f32.mrf.mxu0  ;;  %v1214_v19 = vpop.f32.mrf.mxu1 }
 0x154   : > { %v1403_v63 = vsel %vm1353_vm9, %v1328_v26, %v1378_v11  ;;  %v1329_v31 = vadd.f32 %v2603_v41, %v1297_v28  ;;  %v1009_v36 = vmax.f32 %v2769_v2, %v925_v61  ;;  %v2771_v28 = vmax.f32 %v2495_v34, %v2497_v35 }
 0x155   : > { %v1826_v20 = vpack.c.bf16 %v1403_v63, %v1403_v63  ;;  %v2027_v4 = vpop.f32.mrf.mxu0  ;;  %v2081_v51 = vpop.f32.mrf.mxu1 }
 0x156   : > { %vm1354_vm10 = vcmp.ge.f32.partialorder %v1329_v31, 0.0  ;;  %v1379_v9 = vmul.f32 0.2, %v1329_v31  ;;  %v1298_v10 = vmax.f32 %v1009_v36, %v1214_v19  ;;  %v2772_v4 = vmax.f32 %v2501_v39, %v2503_v40 }
 0x157   : > { %1530 = vst.msk [vmem:[%s2613_s25 + $0x10] sm:$0xf] %vm1525_vm5, %v1826_v20  ;;  %v928_v16 = vpop.f32.mrf.mxu0  ;;  %v1217_v24 = vpop.f32.mrf.mxu1 }
 0x158   : > { %v1404_v21 = vsel %vm1354_vm10, %v1329_v31, %v1379_v9  ;;  %v1330_v46 = vadd.f32 %v2603_v41, %v1298_v10  ;;  %v1010_v57 = vmax.f32 %v2770_v56, %v928_v16 }
 0x159   : > { %v1827_v25 = vpack.c.bf16 %v1404_v21, %v1404_v21  ;;  %v2028_v26 = vpop.f32.mrf.mxu0  ;;  %v2082_v14 = vpop.f32.mrf.mxu1 }
 0x15a   : > { %vm1355_vm11 = vcmp.ge.f32.partialorder %v1330_v46, 0.0  ;;  %v1380_v58 = vmul.f32 0.2, %v1330_v46  ;;  %v1299_v5 = vmax.f32 %v1010_v57, %v1217_v24  ;;  %v2773_v24 = vmax.f32 %v2507_v44, %v2509_v45 }
 0x15b   : > { %1531 = vst.msk [vmem:[%s2613_s25 + $0x14] sm:$0xf] %vm1525_vm5, %v1827_v25  ;;  %v933_v15 = vpop.f32.mrf.mxu0  ;;  %v1222_v29 = vpop.f32.mrf.mxu1 }
 0x15c   : > { %v1405_v6 = vsel %vm1355_vm11, %v1330_v46, %v1380_v58  ;;  %v1331_v11 = vadd.f32 %v2603_v41, %v1299_v5  ;;  %v1011_v0 = vmax.f32 %v2771_v28, %v933_v15  ;;  %v2774_v28 = vmax.f32 %v2513_v49, %v2515_v50 }
 0x15d   : > { %v1828_v30 = vpack.c.bf16 %v1405_v6, %v1405_v6  ;;  %v2031_v61 = vpop.f32.mrf.mxu0  ;;  %v2085_v2 = vpop.f32.mrf.mxu1 }
 0x15e   : > { %vm1356_vm12 = vcmp.ge.f32.partialorder %v1331_v11, 0.0  ;;  %v1381_v63 = vmul.f32 0.2, %v1331_v11  ;;  %v1300_v31 = vmax.f32 %v1011_v0, %v1222_v29 }
 0x15f   : > { %1532 = vst.msk [vmem:[%s2613_s25 + $0x18] sm:$0xf] %vm1525_vm5, %v1828_v30  ;;  %v936_v36 = vpop.f32.mrf.mxu0  ;;  %v1225_v34 = vpop.f32.mrf.mxu1 }
 0x160   : > { %v1406_v19 = vsel %vm1356_vm12, %v1331_v11, %v1381_v63  ;;  %v1332_v20 = vadd.f32 %v2603_v41, %v1300_v31  ;;  %v1012_v9 = vmax.f32 %v2772_v4, %v936_v36 }
 0x161   : > { %v1829_v35 = vpack.c.bf16 %v1406_v19, %v1406_v19  ;;  %v2032_v10 = vpop.f32.mrf.mxu0  ;;  %v2086_v21 = vpop.f32.mrf.mxu1  ;;  %v2775_v19 = vmax.f32 %v2519_v54, %v2521_v55 }
 0x162   : > { %vm1357_vm13 = vcmp.ge.f32.partialorder %v1332_v20, 0.0  ;;  %v1382_v51 = vmul.f32 0.2, %v1332_v20  ;;  %v1301_v16 = vmax.f32 %v1012_v9, %v1225_v34  ;;  %v2776_v21 = vmax.f32 %v2525_v1, %v2527_v3 }
 0x163   : > { %1533 = vst.msk [vmem:[%s2613_s25 + $0x1c] sm:$0xf] %vm1525_vm5, %v1829_v35  ;;  %v941_v46 = vpop.f32.mrf.mxu0  ;;  %v1230_v39 = vpop.f32.mrf.mxu1 }
 0x164   : > { %v1407_v56 = vsel %vm1357_vm13, %v1332_v20, %v1382_v51  ;;  %v1333_v57 = vadd.f32 %v2603_v41, %v1301_v16  ;;  %v1013_v25 = vmax.f32 %v2773_v24, %v941_v46 }
 0x165   : > { %v1830_v40 = vpack.c.bf16 %v1407_v56, %v1407_v56  ;;  %v2035_v26 = vpop.f32.mrf.mxu0  ;;  %v2089_v14 = vpop.f32.mrf.mxu1 }
 0x166   : > { %vm1358_vm14 = vcmp.ge.f32.partialorder %v1333_v57, 0.0  ;;  %v1383_v58 = vmul.f32 0.2, %v1333_v57  ;;  %v1302_v5 = vmax.f32 %v1013_v25, %v1230_v39 }
 0x167   : > { %1534 = vst.msk [vmem:[%s2613_s25 + $0x20] sm:$0xf] %vm1525_vm5, %v1830_v40  ;;  %v944_v15 = vpop.f32.mrf.mxu0  ;;  %v1233_v44 = vpop.f32.mrf.mxu1 }
 0x168   : > { %v1408_v6 = vsel %vm1358_vm14, %v1333_v57, %v1383_v58  ;;  %v1334_v11 = vadd.f32 %v2603_v41, %v1302_v5  ;;  %v1014_v0 = vmax.f32 %v2774_v28, %v944_v15  ;;  %v2777_v58 = vmax.f32 %v2531_v12, %v2533_v13 }
 0x169   : > { %v1831_v45 = vpack.c.bf16 %v1408_v6, %v1408_v6  ;;  %v2036_v29 = vpop.f32.mrf.mxu0  ;;  %v2090_v63 = vpop.f32.mrf.mxu1 }
 0x16a   : > { %vm1359_vm15 = vcmp.ge.f32.partialorder %v1334_v11, 0.0  ;;  %v1384_v30 = vmul.f32 0.2, %v1334_v11  ;;  %v1303_v61 = vmax.f32 %v1014_v0, %v1233_v44 }
 0x16b   : > { %1535 = vst.msk [vmem:[%s2613_s25 + $0x24] sm:$0xf] %vm1525_vm5, %v1831_v45  ;;  %v949_v31 = vpop.f32.mrf.mxu0  ;;  %v1238_v49 = vpop.f32.mrf.mxu1  ;;  %v2778_v45 = vmax.f32 %v2537_v23, %v2539_v27 }
 0x16c   : > { %v1409_v2 = vsel %vm1359_vm15, %v1334_v11, %v1384_v30  ;;  %v1335_v36 = vadd.f32 %v2603_v41, %v1303_v61  ;;  %v1015_v20 = vmax.f32 %v2775_v19, %v949_v31  ;;  %vm1550_vm15 = vcmask 254976  }
 0x16d   : > { %v1832_v50 = vpack.c.bf16 %v1409_v2, %v1409_v2  ;;  %v2039_v4 = vpop.f32.mrf.mxu0  ;;  %v2093_v35 = vpop.f32.mrf.mxu1 }
 0x16e   : > { %vm1360_vm0 = vcmp.ge.f32.partialorder %v1335_v36, 0.0  ;;  %v1385_v9 = vmul.f32 0.2, %v1335_v36  ;;  %v1304_v34 = vmax.f32 %v1015_v20, %v1238_v49  ;;  %v2779_v20 = vmax.f32 %v2543_v37, %v2545_v38 }
 0x16f   : > { %1536 = vst.msk [vmem:[%s2613_s25 + $0x28] sm:$0xf] %vm1525_vm5, %v1832_v50  ;;  %v952_v10 = vpop.f32.mrf.mxu0  ;;  %v1241_v54 = vpop.f32.mrf.mxu1 }
 0x170   : > { %v1410_v51 = vsel %vm1360_vm0, %v1335_v36, %v1385_v9  ;;  %v1336_v16 = vadd.f32 %v2603_v41, %v1304_v34  ;;  %v1016_v46 = vmax.f32 %v2776_v21, %v952_v10 }
 0x171   : > { %v1833_v55 = vpack.c.bf16 %v1410_v51, %v1410_v51  ;;  %v2040_v56 = vpop.f32.mrf.mxu0  ;;  %v2094_v25 = vpop.f32.mrf.mxu1 }
 0x172   : > { %vm1361_vm1 = vcmp.ge.f32.partialorder %v1336_v16, 0.0  ;;  %v1386_v57 = vmul.f32 0.2, %v1336_v16  ;;  %v1305_v24 = vmax.f32 %v1016_v46, %v1241_v54 }
 0x173   : > { %1537 = vst.msk [vmem:[%s2613_s25 + $0x2c] sm:$0xf] %vm1525_vm5, %v1833_v55  ;;  %v957_v39 = vpop.f32.mrf.mxu0  ;;  %v1246_v1 = vpop.f32.mrf.mxu1 }
 0x174   : > { %v1411_v40 = vsel %vm1361_vm1, %v1336_v16, %v1386_v57  ;;  %v1337_v26 = vadd.f32 %v2603_v41, %v1305_v24  ;;  %v1017_v5 = vmax.f32 %v2777_v58, %v957_v39  ;;  %v2780_v16 = vmax.f32 %v2549_v48, %v2551_v52 }
 0x175   : > { %v1834_v3 = vpack.c.bf16 %v1411_v40, %v1411_v40  ;;  %v2043_v14 = vpop.f32.mrf.mxu0  ;;  %v2097_v11 = vpop.f32.mrf.mxu1  ;;  %v2781_v39 = vmax.f32 %v2555_v7, %v2557_v8 }
 0x176   : > { %vm1362_vm2 = vcmp.ge.f32.partialorder %v1337_v26, 0.0  ;;  %v1387_v15 = vmul.f32 0.2, %v1337_v26  ;;  %v1306_v6 = vmax.f32 %v1017_v5, %v1246_v1 }
 0x177   : > { %1538 = vst.msk [vmem:[%s2613_s25 + $0x30] sm:$0xf] %vm1525_vm5, %v1834_v3  ;;  %v960_v28 = vpop.f32.mrf.mxu0  ;;  %v1249_v12 = vpop.f32.mrf.mxu1 }
 0x178   : > { %v1412_v0 = vsel %vm1362_vm2, %v1337_v26, %v1387_v15  ;;  %v1338_v44 = vadd.f32 %v2603_v41, %v1306_v6  ;;  %v1018_v29 = vmax.f32 %v2778_v45, %v960_v28  ;;  %v2782_v6 = vmax.f32 %v2561_v33, %v2563_v43 }
 0x179   : > { %v1835_v13 = vpack.c.bf16 %v1412_v0, %v1412_v0  ;;  %v2044_v30 = vpop.f32.mrf.mxu0  ;;  %v2098_v31 = vpop.f32.mrf.mxu1 }
 0x17a   : > { %vm1363_vm3 = vcmp.ge.f32.partialorder %v1338_v44, 0.0  ;;  %v1388_v61 = vmul.f32 0.2, %v1338_v44  ;;  %v1307_v63 = vmax.f32 %v1018_v29, %v1249_v12  ;;  %v2783_v30 = vmax.f32 %v2567_v60, %v2569_v62 }
 0x17b   : > { %1539 = vst.msk [vmem:[%s2613_s25 + $0x34] sm:$0xf] %vm1525_vm5, %v1835_v13  ;;  %v965_v2 = vpop.f32.mrf.mxu0  ;;  %v1254_v23 = vpop.f32.mrf.mxu1 }
 0x17c   : > { %v1413_v36 = vsel %vm1363_vm3, %v1338_v44, %v1388_v61  ;;  %v1339_v19 = vadd.f32 %v2603_v41, %v1307_v63  ;;  %v1019_v49 = vmax.f32 %v2779_v20, %v965_v2 }
 0x17d   : > { %v1836_v27 = vpack.c.bf16 %v1413_v36, %v1413_v36  ;;  %v2047_v50 = vpop.f32.mrf.mxu0  ;;  %v2101_v34 = vpop.f32.mrf.mxu1 }
 0x17e   : > { %vm1364_vm4 = vcmp.ge.f32.partialorder %v1339_v19, 0.0  ;;  %v1389_v4 = vmul.f32 0.2, %v1339_v19  ;;  %v1308_v9 = vmax.f32 %v1019_v49, %v1254_v23  ;;  %v2784_v23 = vmax.f32 %v2573_v22, %v2575_v32 }
 0x17f   : > { %1540 = vst.msk [vmem:[%s2613_s25 + $0x38] sm:$0xf] %vm1525_vm5, %v1836_v27  ;;  %v968_v35 = vpop.f32.mrf.mxu0  ;;  %v1257_v37 = vpop.f32.mrf.mxu1 }
 0x180   : > { %v1414_v10 = vsel %vm1364_vm4, %v1339_v19, %v1389_v4  ;;  %v1340_v51 = vadd.f32 %v2603_v41, %v1308_v9  ;;  %v1020_v21 = vmax.f32 %v2780_v16, %v968_v35  ;;  %v2785_v16 = vmax.f32 %v2579_v42, %v2581_v53 }
 0x181   : > { %v1837_v38 = vpack.c.bf16 %v1414_v10, %v1414_v10  ;;  %v2048_v46 = vpop.f32.mrf.mxu0  ;;  %v2102_v56 = vpop.f32.mrf.mxu1 }
 0x182   : > { %vm1365_vm6 = vcmp.ge.f32.partialorder %v1340_v51, 0.0  ;;  %v1390_v54 = vmul.f32 0.2, %v1340_v51  ;;  %v1309_v55 = vmax.f32 %v1020_v21, %v1257_v37 }
 0x183   : > { %1541 = vst.msk [vmem:[%s2613_s25 + $0x3c] sm:$0xf] %vm1525_vm5, %v1837_v38  ;;  %v973_v57 = vpop.f32.mrf.mxu0  ;;  %v1262_v48 = vpop.f32.mrf.mxu1 }
 0x184   : > { %v1415_v24 = vsel %vm1365_vm6, %v1340_v51, %v1390_v54  ;;  %v1341_v25 = vadd.f32 %v2603_v41, %v1309_v55  ;;  %v1021_v40 = vmax.f32 %v2781_v39, %v973_v57 }
 0x185   : > { %v1838_v52 = vpack.c.bf16 %v1415_v24, %v1415_v24  ;;  %v2051_v26 = vpop.f32.mrf.mxu0  ;;  %v2105_v1 = vpop.f32.mrf.mxu1  ;;  %v2786_v24 = vmax.f32 %v2585_v17, %v2587_v18 }
 0x186   : > { %vm1366_vm7 = vcmp.ge.f32.partialorder %v1341_v25, 0.0  ;;  %v1391_v58 = vmul.f32 0.2, %v1341_v25  ;;  %v1310_v5 = vmax.f32 %v1021_v40, %v1262_v48  ;;  %v2787_v1 = vmax.f32 %v2591_v59, %v2593_v47 }
 0x187   : > { %1542 = vst.msk [vmem:[%s2613_s25 + $0x40] sm:$0xf] %vm1525_vm5, %v1838_v52  ;;  %v976_v3 = vpop.f32.mrf.mxu0  ;;  %v1265_v7 = vpop.f32.mrf.mxu1 }
 0x188   : > { %v1416_v14 = vsel %vm1366_vm7, %v1341_v25, %v1391_v58  ;;  %v1342_v15 = vadd.f32 %v2603_v41, %v1310_v5  ;;  %v1022_v11 = vmax.f32 %v2782_v6, %v976_v3 }
 0x189   : > { %v1839_v8 = vpack.c.bf16 %v1416_v14, %v1416_v14  ;;  %v2052_v28 = vpop.f32.mrf.mxu0  ;;  %v2106_v45 = vpop.f32.mrf.mxu1 }
 0x18a   : > { %vm1367_vm8 = vcmp.ge.f32.partialorder %v1342_v15, 0.0  ;;  %v1392_v0 = vmul.f32 0.2, %v1342_v15  ;;  %v1311_v44 = vmax.f32 %v1022_v11, %v1265_v7 }
 0x18b   : > { %1543 = vst.msk [vmem:[%s2613_s25 + $0x44] sm:$0xf] %vm1525_vm5, %v1839_v8  ;;  %v981_v29 = vpop.f32.mrf.mxu0  ;;  %v1270_v33 = vpop.f32.mrf.mxu1 }
 0x18c   : > { %v1417_v12 = vsel %vm1367_vm8, %v1342_v15, %v1392_v0  ;;  %v1343_v13 = vadd.f32 %v2603_v41, %v1311_v44  ;;  %v1023_v61 = vmax.f32 %v2783_v30, %v981_v29 }
 0x18d   : > { %v1840_v43 = vpack.c.bf16 %v1417_v12, %v1417_v12  ;;  %v2055_v63 = vpop.f32.mrf.mxu0  ;;  %v2109_v36 = vpop.f32.mrf.mxu1 }
 0x18e   : > { %vm1368_vm9 = vcmp.ge.f32.partialorder %v1343_v13, 0.0  ;;  %v1393_v31 = vmul.f32 0.2, %v1343_v13  ;;  %v1312_v2 = vmax.f32 %v1023_v61, %v1270_v33 }
 0x18f   : > { %1544 = vst.msk [vmem:[%s2613_s25 + $0x48] sm:$0xf] %vm1525_vm5, %v1840_v43  ;;  %v984_v19 = vpop.f32.mrf.mxu0  ;;  %v1273_v60 = vpop.f32.mrf.mxu1 }
 0x190   : > { %v1418_v20 = vsel %vm1368_vm9, %v1343_v13, %v1393_v31  ;;  %v1344_v49 = vadd.f32 %v2603_v41, %v1312_v2  ;;  %v1024_v27 = vmax.f32 %v2784_v23, %v984_v19 }
 0x191   : > { %v1841_v62 = vpack.c.bf16 %v1418_v20, %v1418_v20  ;;  %v2056_v50 = vpop.f32.mrf.mxu0  ;;  %v2110_v34 = vpop.f32.mrf.mxu1 }
 0x192   : > { %vm1369_vm10 = vcmp.ge.f32.partialorder %v1344_v49, 0.0  ;;  %v1394_v4 = vmul.f32 0.2, %v1344_v49  ;;  %v1313_v9 = vmax.f32 %v1024_v27, %v1273_v60 }
 0x193   : > { %1545 = vst.msk [vmem:[%s2613_s25 + $0x4c] sm:$0xf] %vm1525_vm5, %v1841_v62  ;;  %v989_v35 = vpop.f32.mrf.mxu0  ;;  %v1278_v22 = vpop.f32.mrf.mxu1 }
 0x194   : > { %v1419_v10 = vsel %vm1369_vm10, %v1344_v49, %v1394_v4  ;;  %v1345_v51 = vadd.f32 %v2603_v41, %v1313_v9  ;;  %v1025_v21 = vmax.f32 %v2785_v16, %v989_v35 }
 0x195   : > { %v1842_v32 = vpack.c.bf16 %v1419_v10, %v1419_v10  ;;  %v2059_v37 = vpop.f32.mrf.mxu0  ;;  %v2113_v54 = vpop.f32.mrf.mxu1 }
 0x196   : > { %vm1370_vm11 = vcmp.ge.f32.partialorder %v1345_v51, 0.0  ;;  %v1395_v38 = vmul.f32 0.2, %v1345_v51  ;;  %v1314_v46 = vmax.f32 %v1025_v21, %v1278_v22 }
 0x197   : > { %1546 = vst.msk [vmem:[%s2613_s25 + $0x50] sm:$0xf] %vm1525_vm5, %v1842_v32  ;;  %v992_v55 = vpop.f32.mrf.mxu0  ;;  %v1281_v42 = vpop.f32.mrf.mxu1 }
 0x198   : > { %v1420_v56 = vsel %vm1370_vm11, %v1345_v51, %v1395_v38  ;;  %v1346_v57 = vadd.f32 %v2603_v41, %v1314_v46  ;;  %v1026_v25 = vmax.f32 %v2786_v24, %v992_v55 }
 0x199   : > { %v1843_v53 = vpack.c.bf16 %v1420_v56, %v1420_v56  ;;  %v2060_v39 = vpop.f32.mrf.mxu0  ;;  %v2114_v52 = vpop.f32.mrf.mxu1 }
 0x19a   : > { %vm1371_vm12 = vcmp.ge.f32.partialorder %v1346_v57, 0.0  ;;  %v1396_v40 = vmul.f32 0.2, %v1346_v57  ;;  %v1315_v48 = vmax.f32 %v1026_v25, %v1281_v42 }
 0x19b   : > { %1547 = vst.msk [vmem:[%s2613_s25 + $0x54] sm:$0xf] %vm1525_vm5, %v1843_v53  ;;  %v997_v26 = vpop.f32.mrf.mxu0  ;;  %v1286_v17 = vpop.f32.mrf.mxu1 }
 0x19c   : > { %v1421_v58 = vsel %vm1371_vm12, %v1346_v57, %v1396_v40  ;;  %v1347_v5 = vadd.f32 %v2603_v41, %v1315_v48  ;;  %v1027_v3 = vmax.f32 %v2787_v1, %v997_v26 }
 0x19d   : > { %v1844_v18 = vpack.c.bf16 %v1421_v58, %v1421_v58  ;;  %v2063_v14 = vpop.f32.mrf.mxu0  ;;  %v2117_v11 = vpop.f32.mrf.mxu1 }
 0x19e   : > { %vm1372_vm13 = vcmp.ge.f32.partialorder %v1347_v5, 0.0  ;;  %v1397_v15 = vmul.f32 0.2, %v1347_v5  ;;  %v1316_v6 = vmax.f32 %v1027_v3, %v1286_v17 }
 0x19f   : > { %1548 = vst.msk [vmem:[%s2613_s25 + $0x58] sm:$0xf] %vm1525_vm5, %v1844_v18  ;;  %v1000_v7 = vpop.f32.mrf.mxu0  ;;  %v1289_v0 = vpop.f32.mrf.mxu1 }
 0x1a0   : > { %v1422_v8 = vsel %vm1372_vm13, %v1347_v5, %v1397_v15  ;;  %v1348_v28 = vadd.f32 %v2603_v41, %v1316_v6 }
 0x1a1   : > { %v1845_v44 = vpack.c.bf16 %v1422_v8, %v1422_v8  ;;  %v2064_v45 = vpop.f32.mrf.mxu0  ;;  %v2118_v47 = vpop.f32.mrf.mxu1 }
 0x1a2   : > { %vm1373_vm14 = vcmp.ge.f32.partialorder %v1348_v28, 0.0  ;;  %v1398_v59 = vmul.f32 0.2, %v1348_v28 }
 0x1a3   : > { %1549 = vst.msk [vmem:[%s2613_s25 + $0x5c] sm:$0xf] %vm1525_vm5, %v1845_v44 }
 0x1a4   : > { %v1423_v29 = vsel %vm1373_vm14, %v1348_v28, %v1398_v59 }
 0x1a5   : > { %v1846_v12 = vpack.c.bf16 %v1423_v29, %v1423_v29 }
 0x1a7   : > { %1551 = vst.msk [vmem:[%s2613_s25 + $0x60] sm:$0x3] %vm1550_vm15, %v1846_v12 }
 0x1a8 PF: > { %s13_s12 = sadd.s32 1, %s2191_s12  }
 0x1a9   : > { %p10_p4 = scmp.ge.s32.totalorder %s13_s12, 4  }
 0x1ab   :  { %12 = sbr.rel (!%p10_p4) target bundleno = 1 (0x1), region = 65 }

// kernel: discriminator_forward.4
= control target key start
LH: loop header
LB: loop body
LE: loop exit
PB: predicated region body
PF: predicated region fallthrough
CT: control target
= control target key end

     0   :  { %s1805_s12 = smov 0   ;;  %s2173_s0 = inlined_call_operand.vmem [shape: bf16[2,4,49,288], index: 0, kind: input, shape index: {}]   ;;  %s2174_s1 = inlined_call_operand.vmem [shape: bf16[288,64], index: 1, kind: input, shape index: {}]   ;;  %s2175_s2 = inlined_call_operand.vmem [shape: f32[1,64], index: 2, kind: input, shape index: {}]   ;;  %s2176_s3 = inlined_call_operand.vmem [shape: bf16[2,49,64], index: 3, kind: output, shape index: {}]  }
   0x1 LB: > { %s1309_s13 = sadd.s32 4294967295, %s1783_s12   ;;  %p1313_p0 = scmp.ge.s32.totalorder %s1783_s12, 1  ;;  %s1783_s12 = sphi %s1805_s12, %s13_s12  }
   0x2   : > { %p137_p1 = scmp.lt.s32.totalorder %s1783_s12, 3 }
   0x4   : > { %p138_p2 = pnand %p1313_p0, %p137_p1 }
   0x5   : > { %p161_p3 = scmp.lt.s32.totalorder (!%p138_p2), %s1309_s13, 1 }
   0x6   : > { %141 = sbr.rel (%p138_p2) target bundleno = 343 (0x157), region = 32 }
   0xb   : > { %v1816_v0 = vld [vmem:[%s2174_s1 + $0x78] sm:$0xff]   ;;  %v1828_v2 = vld [vmem:[%s2174_s1 + $0x70] sm:$0xff]   ;;  %v1842_v4 = vld [vmem:[%s2174_s1 + $0x68] sm:$0xff]   ;;  %s2178_s13 = smov (!%p161_p3, %s1309_s13), 1  ;;  %vm385_vm0 = vcmask 261120   ;;  %vm1241_vm1 = vcmask 519168  }
   0xc   : > { %v1821_v1 = vld [vmem:[%s2174_s1 + $0x38] sm:$0xff]   ;;  %1457 = vmatprep.subr.bf16.mxu0 %v1816_v0  ;;  %1503 = vmatprep.subr.bf16.mxu1 %v1816_v0  ;;  %v1835_v3 = vld [vmem:[%s2174_s1 + $0x30] sm:$0xff]   ;;  %v1851_v5 = vld [vmem:[%s2174_s1 + $0x28] sm:$0xff]   ;;  %s1689_s28 = smul.u32 336, %s2178_s13  ;;  %vm1248_vm6 = vcmask 516096  }
   0xd   : > { %1458 = vmatpush3.bf16.msra.mxu0 %v1821_v1  ;;  %1504 = vmatpush3.bf16.msra.mxu1 %v1821_v1  ;;  %v1858_v6 = vld [vmem:[%s2174_s1 + $0x60] sm:$0xff]   ;;  %v1873_v8 = vld [vmem:[%s2174_s1 + $0x58] sm:$0xff]   ;;  %v1892_v10 = vld [vmem:[%s2174_s1 + $0x50] sm:$0xff]   ;;  %s1690_s4 = smul.u32 28, %s2178_s13  ;;  %vm1249_vm7 = vsmask.f32 256 }
   0xe   : > { %1459 = vmatprep.subr.bf16.mxu0 %v1828_v2  ;;  %1505 = vmatprep.subr.bf16.mxu1 %v1828_v2  ;;  %v1866_v7 = vld [vmem:[%s2174_s1 + $0x20] sm:$0xff]   ;;  %s1878_s8 = scalar_lea.vmem %s2173_s0, %s1689_s28  ;;  %v1885_v9 = vld [vmem:[%s2174_s1 + $0x18] sm:$0xff]   ;;  %v1901_v13 = vld [vmem:[%s2174_s1 + $0x10] sm:$0xff]  }
   0xf   : > { %v1717_v11 = vld [vmem:[%s1878_s8 + $0x4] ss:$12 sps:$4 sm:$0xff]   ;;  %v1908_v14 = vld [vmem:[%s2174_s1 + $0x48] sm:$0xff]   ;;  %v1718_v20 = vld [vmem:[%s1878_s8 + $0x54] ss:$12 sps:$4 sm:$0xff]   ;;  %s2143_s6 = scalar_lea.vmem %s2176_s3, %s1690_s4 }
  0x10   : > { %v1720_v12 = vld [vmem:[%s1878_s8 + $0x58] ss:$12 sps:$4 sm:$0xff]   ;;  %430 = vmatprep.mubr.bf16.mxu0 %v1717_v11  ;;  %v1915_v15 = vld [vmem:[%s2174_s1 + $0x8] sm:$0xff]   ;;  %v1724_v22 = vld [vmem:[%s1878_s8 + $0x70] ss:$12 sps:$4 sm:$0xff]  }
  0x11   : > { %1460 = vmatpush3.bf16.msra.mxu0 %v1835_v3  ;;  %1506 = vmatpush3.bf16.msra.mxu1 %v1835_v3  ;;  %v1922_v16 = vld [vmem:[%s2174_s1 + $0x40] sm:$0xff]   ;;  %v1936_v18 = vld [vmem:[%s2174_s1 + $0x88] sm:$0xff]   ;;  %v1732_v30 = vld [vmem:[%s1878_s8 + $0x30] ss:$12 sps:$4 sm:$0xff]  }
  0x12   : > { %1461 = vmatprep.subr.bf16.mxu0 %v1842_v4  ;;  %1507 = vmatprep.subr.bf16.mxu1 %v1842_v4  ;;  %v1929_v17 = vld [vmem:[%s2174_s1] sm:$0xff]   ;;  %v1722_v21 = vld [vmem:[%s1878_s8 + $0x1c] ss:$12 sps:$4 sm:$0xff]   ;;  %v1727_v25 = vld [vmem:[%s1878_s8 + $0x6c] ss:$12 sps:$4 sm:$0xff]  }
  0x13   : > { %640 = vmatprep.mubr.bf16.mxu1 %v1720_v12  ;;  %v1715_v19 = vld [vmem:[%s1878_s8] ss:$12 sps:$4 sm:$0xff]   ;;  %v1726_v24 = vld [vmem:[%s1878_s8 + $0x18] ss:$12 sps:$4 sm:$0xff]   ;;  %v1730_v27 = vld [vmem:[%s1878_s8 + $0x88] ss:$12 sps:$4 sm:$0xff]  }
  0x14   : > { %v1949_v23 = vld [vmem:[%s2174_s1 + $0x80] sm:$0xff]   ;;  %v220_v28 = vld [vmem:[%s1878_s8 + $0x48] sm:$0x11]  ;;  %v1747_v42 = vld [vmem:[%s1878_s8 + $0x50] ss:$0 sps:$4 sm:$0x11]  }
  0x15   : > { %1462 = vmatpush3.bf16.msra.mxu0 %v1851_v5  ;;  %1508 = vmatpush3.bf16.msra.mxu1 %v1851_v5  ;;  %v1728_v26 = vld [vmem:[%s1878_s8 + $0x34] ss:$12 sps:$4 sm:$0xff]   ;;  %v1734_v31 = vld [vmem:[%s1878_s8 + $0x84] ss:$12 sps:$4 sm:$0xff]   ;;  %v1326_v32 = vcombine.high %v220_v28, %v220_v28  ;;  %v1325_v34 = vcombine.low %v220_v28, %v220_v28  ;;  %v1742_v37 = vld [vmem:[%s1878_s8 + $0xac] ss:$12 sps:$4 sm:$0xff]  }
  0x16   : > { %1463 = vmatprep.subr.bf16.mxu0 %v1858_v6  ;;  %1509 = vmatprep.subr.bf16.mxu1 %v1858_v6  ;;  %v1362_v29 = vld [vmem:[%s1878_s8 + $0x9c] sm:$0x11]  ;;  %v1739_v36 = vld [vmem:[%s1878_s8 + $0x8] ss:$12 sps:$4 sm:$0xff]   ;;  %v1744_v40 = vld [vmem:[%s1878_s8 + $0x38] ss:$12 sps:$4 sm:$0xff]  }
  0x17   : > { %v1374_v33 = vcombine.high %v1362_v29, %v1362_v29  ;;  %v1373_v35 = vcombine.low %v1362_v29, %v1362_v29  ;;  %v1740_v38 = vld [vmem:[%s1878_s8 + $0xa8] ss:$12 sps:$4 sm:$0xff]   ;;  %v1743_v39 = vld [vmem:[%s1878_s8 + $0x20] ss:$12 sps:$4 sm:$0xff]   ;;  %v1745_v41 = vld [vmem:[%s1878_s8 + $0xc4] ss:$12 sps:$4 sm:$0xff]  }
  0x18   : > { %v1748_v43 = vld [vmem:[%s1878_s8 + $0xc0] ss:$12 sps:$4 sm:$0xff]   ;;  %v1749_v44 = vld [vmem:[%s1878_s8 + $0x5c] ss:$12 sps:$4 sm:$0xff]   ;;  %v1753_v47 = vld [vmem:[%s1878_s8 + $0xd8] ss:$12 sps:$4 sm:$0xff]  }
  0x19   : > { %1464 = vmatpush3.bf16.msra.mxu0 %v1866_v7  ;;  %1510 = vmatpush3.bf16.msra.mxu1 %v1866_v7  ;;  %v1750_v45 = vld [vmem:[%s1878_s8 + $0xdc] ss:$12 sps:$4 sm:$0xff]   ;;  %v1752_v46 = vld [vmem:[%s1878_s8 + $0x74] ss:$12 sps:$4 sm:$0xff]   ;;  %v1754_v49 = vld [vmem:[%s1878_s8 + $0x8c] ss:$12 sps:$4 sm:$0xff]  }
  0x1a   : > { %1465 = vmatprep.subr.bf16.mxu0 %v1873_v8  ;;  %1511 = vmatprep.subr.bf16.mxu1 %v1873_v8  ;;  %v1392_v48 = vld [vmem:[%s1878_s8 + $0xf0] sm:$0x11]  ;;  %v1756_v51 = vld [vmem:[%s1878_s8 + $0xa4] ss:$0 sps:$4 sm:$0x11]   ;;  %vm1250_vm10 = vmand %vm1248_vm6, %vm1249_vm7 }
  0x1b   : > { %v1404_v50 = vcombine.high %v1392_v48, %v1392_v48  ;;  %v1403_v52 = vcombine.low %v1392_v48, %v1392_v48  ;;  %v1758_v53 = vld [vmem:[%s1878_s8 + $0xb0] ss:$12 sps:$4 sm:$0xff]   ;;  %v1761_v54 = vld [vmem:[%s1878_s8 + $0x100] ss:$12 sps:$4 sm:$0xff]   ;;  %v1762_v56 = vld [vmem:[%s1878_s8 + $0xc8] ss:$12 sps:$4 sm:$0xff]  }
  0x1c   : > { %v1759_v55 = vld [vmem:[%s1878_s8 + $0xfc] ss:$12 sps:$4 sm:$0xff]   ;;  %v1763_v57 = vld [vmem:[%s1878_s8 + $0xe0] ss:$12 sps:$4 sm:$0xff]   ;;  %v1764_v58 = vld [vmem:[%s1878_s8 + $0x118] ss:$12 sps:$4 sm:$0xff]  }
  0x1d   : > { %1466 = vmatpush3.bf16.msra.mxu0 %v1885_v9  ;;  %1512 = vmatpush3.bf16.msra.mxu1 %v1885_v9  ;;  %v1766_v59 = vld [vmem:[%s1878_s8 + $0xf8] ss:$0 sps:$4 sm:$0x11]   ;;  %v1767_v60 = vld [vmem:[%s1878_s8 + $0x114] ss:$12 sps:$4 sm:$0xff]  }
  0x1e   : > { %1467 = vmatprep.subr.bf16.mxu0 %v1892_v10  ;;  %1513 = vmatprep.subr.bf16.mxu1 %v1892_v10  ;;  %v1768_v61 = vld [vmem:[%s1878_s8 + $0x130] ss:$12 sps:$4 sm:$0xff]   ;;  %v1422_v63 = vld [vmem:[%s1878_s8 + $0x144] sm:$0x11] }
  0x1f   : > { %v1770_v62 = vld [vmem:[%s1878_s8 + $0x104] ss:$12 sps:$4 sm:$0xff]  }
  0x21   : > { %1468 = vmatpush3.bf16.msra.mxu0 %v1901_v13  ;;  %1514 = vmatpush3.bf16.msra.mxu1 %v1901_v13 }
  0x22   : > { %1469 = vmatprep.subr.bf16.mxu0 %v1908_v14  ;;  %1515 = vmatprep.subr.bf16.mxu1 %v1908_v14 }
  0x25   : > { %1470 = vmatpush3.bf16.msra.mxu0 %v1915_v15  ;;  %1516 = vmatpush3.bf16.msra.mxu1 %v1915_v15 }
  0x26   : > { %1471 = vmatprep.subr.bf16.mxu0 %v1922_v16  ;;  %1517 = vmatprep.subr.bf16.mxu1 %v1922_v16 }
  0x29   : > { %1472 = vmatpush3.bf16.msra.mxu0 %v1929_v17  ;;  %1518 = vmatpush3.bf16.msra.mxu1 %v1929_v17 }
  0x2a   : > { %1641 = vmatprep.subr.bf16.mxu0 %v1936_v18  ;;  %1549 = vmatprep.subr.bf16.mxu1 %v1816_v0 }
  0x2c   : > { %431 = vmatmul.mubr.bf16.vlgmr.msra.gmra.mxu0 %v1715_v19  ;;  %641 = vmatmul.mubr.bf16.vlgmr.msra.gmra.mxu1 %v1718_v20 }
  0x2d   : > { %1642 = vmatpush3.bf16.msra.mxu0 %v1936_v18  ;;  %1550 = vmatpush3.bf16.msra.mxu1 %v1821_v1 }
  0x2e   : > { %1551 = vmatprep.subr.bf16.mxu1 %v1828_v2  ;;  %438 = vmatprep.mubr.bf16.mxu0 %v1722_v21 }
  0x2f   : > { %648 = vmatprep.mubr.bf16.mxu1 %v1724_v22  ;;  %1643 = vmatprep.subr.bf16.mxu0 %v1949_v23 }
  0x31   : > { %1552 = vmatpush3.bf16.msra.mxu1 %v1835_v3  ;;  %1644 = vmatpush3.bf16.msra.mxu0 %v1949_v23 }
  0x32   : > { %1553 = vmatprep.subr.bf16.mxu1 %v1842_v4  ;;  %1653 = vmatprep.subr.bf16.mxu0 %v1936_v18 }
  0x34   : > { %439 = vmatmul.mubr.bf16.gmra.mxu0 %v1726_v24  ;;  %649 = vmatmul.mubr.bf16.gmra.mxu1 %v1727_v25 }
  0x35   : > { %1554 = vmatpush3.bf16.msra.mxu1 %v1851_v5  ;;  %446 = vmatprep.mubr.bf16.mxu0 %v1728_v26 }
  0x36   : > { %1555 = vmatprep.subr.bf16.mxu1 %v1858_v6  ;;  %656 = vmatprep.mubr.bf16.mxu1 %v1730_v27 }
  0x39   : > { %1556 = vmatpush3.bf16.msra.mxu1 %v1866_v7 }
  0x3a   : > { %1557 = vmatprep.subr.bf16.mxu1 %v1873_v8 }
  0x3c   : > { %447 = vmatmul.mubr.bf16.gmra.mxu0 %v1732_v30  ;;  %657 = vmatmul.mubr.bf16.gmra.mxu1 %v1734_v31 }
  0x3d   : > { %1558 = vmatpush3.bf16.msra.mxu1 %v1885_v9  ;;  %454 = vmatprep.mubr.bf16.mxu0 %v1326_v32 }
  0x3e   : > { %1559 = vmatprep.subr.bf16.mxu1 %v1892_v10  ;;  %664 = vmatprep.mubr.bf16.mxu1 %v1374_v33 }
  0x41   : > { %1560 = vmatpush3.bf16.msra.mxu1 %v1901_v13 }
  0x42   : > { %1561 = vmatprep.subr.bf16.mxu1 %v1908_v14 }
  0x44   : > { %455 = vmatmul.mubr.bf16.gmra.mxu0 %v1325_v34  ;;  %665 = vmatmul.mubr.bf16.gmra.mxu1 %v1373_v35 }
  0x45   : > { %1562 = vmatpush3.bf16.msra.mxu1 %v1915_v15  ;;  %1645 = vmatprep.mubr.msk.bf16.mxu0 %vm385_vm0, %v1739_v36 }
  0x46   : > { %1563 = vmatprep.subr.bf16.mxu1 %v1922_v16  ;;  %857 = vmatprep.mubr.bf16.mxu1 %v1742_v37 }
  0x49   : > { %1564 = vmatpush3.bf16.msra.mxu1 %v1929_v17 }
  0x4a   : > { %1595 = vmatprep.subr.bf16.mxu1 %v1816_v0  ;;  %v1771_v0 = vld [vmem:[%s1878_s8 + $0x12c] ss:$12 sps:$4 sm:$0xff]  }
  0x4c   : > { %1646 = vmatmul.mubr.msk.bf16.vlgmr.msra.gmra.mxu0 %vm385_vm0, %v1743_v39  ;;  %858 = vmatmul.mubr.bf16.vlgmr.msra.gmra.mxu1 %v1740_v38 }
  0x4d   : > { %1654 = vmatpush3.bf16.msra.mxu0 %v1936_v18  ;;  %1596 = vmatpush3.bf16.msra.mxu1 %v1821_v1  ;;  %v1772_v1 = vld [vmem:[%s1878_s8 + $0x11c] ss:$12 sps:$4 sm:$0xff]  }
  0x4e   : > { %1597 = vmatprep.subr.bf16.mxu1 %v1828_v2  ;;  %1649 = vmatprep.mubr.msk.bf16.mxu0 %vm385_vm0, %v1744_v40  ;;  %v1434_v2 = vcombine.high %v1422_v63, %v1422_v63 }
  0x4f   : > { %865 = vmatprep.mubr.bf16.mxu1 %v1745_v41  ;;  %1655 = vmatprep.subr.bf16.mxu0 %v1949_v23 }
  0x51   : > { %1598 = vmatpush3.bf16.msra.mxu1 %v1835_v3  ;;  %1656 = vmatpush3.bf16.msra.mxu0 %v1949_v23  ;;  %v1774_v3 = vld [vmem:[%s1878_s8 + $0x134] ss:$12 sps:$4 sm:$0xff]  }
  0x52   : > { %1599 = vmatprep.subr.bf16.mxu1 %v1842_v4  ;;  %1665 = vmatprep.subr.bf16.mxu0 %v1936_v18  ;;  %v1433_v4 = vcombine.low %v1422_v63, %v1422_v63 }
  0x54   : > { %1650 = vmatmul.mubr.msk.bf16.gmra.mxu0 %vm385_vm0, %v1747_v42  ;;  %866 = vmatmul.mubr.bf16.gmra.mxu1 %v1748_v43 }
  0x55   : > { %1600 = vmatpush3.bf16.msra.mxu1 %v1851_v5  ;;  %1657 = vmatprep.mubr.msk.bf16.mxu0 %vm385_vm0, %v1749_v44  ;;  %v1776_v5 = vld [vmem:[%s1878_s8 + $0x14c] ss:$0 sps:$4 sm:$0x11]  }
  0x56   : > { %1601 = vmatprep.subr.bf16.mxu1 %v1858_v6  ;;  %873 = vmatprep.mubr.bf16.mxu1 %v1750_v45 }
  0x59   : > { %1602 = vmatpush3.bf16.msra.mxu1 %v1866_v7 }
  0x5a   : > { %1603 = vmatprep.subr.bf16.mxu1 %v1873_v8 }
  0x5c   : > { %1658 = vmatmul.mubr.msk.bf16.vlgmr.msra.gmra.mxu0 %vm385_vm0, %v1752_v46  ;;  %874 = vmatmul.mubr.bf16.gmra.mxu1 %v1753_v47 }
  0x5d   : > { %1666 = vmatpush3.bf16.msra.mxu0 %v1936_v18  ;;  %1604 = vmatpush3.bf16.msra.mxu1 %v1885_v9 }
  0x5e   : > { %1605 = vmatprep.subr.bf16.mxu1 %v1892_v10  ;;  %1661 = vmatprep.mubr.msk.bf16.mxu0 %vm385_vm0, %v1754_v49 }
  0x5f   : > { %881 = vmatprep.mubr.bf16.mxu1 %v1404_v50  ;;  %1667 = vmatprep.subr.bf16.mxu0 %v1949_v23 }
  0x61   : > { %1606 = vmatpush3.bf16.msra.mxu1 %v1901_v13  ;;  %1668 = vmatpush3.bf16.msra.mxu0 %v1949_v23 }
  0x62   : > { %1607 = vmatprep.subr.bf16.mxu1 %v1908_v14  ;;  %1677 = vmatprep.subr.bf16.mxu0 %v1936_v18 }
  0x64   : > { %1662 = vmatmul.mubr.msk.bf16.gmra.mxu0 %vm385_vm0, %v1756_v51  ;;  %882 = vmatmul.mubr.bf16.gmra.mxu1 %v1403_v52 }
  0x65   : > { %1608 = vmatpush3.bf16.msra.mxu1 %v1915_v15  ;;  %1669 = vmatprep.mubr.msk.bf16.mxu0 %vm385_vm0, %v1758_v53 }
  0x66   : > { %1609 = vmatprep.subr.bf16.mxu1 %v1922_v16  ;;  %1074 = vmatprep.mubr.bf16.mxu1 %v1761_v54 }
  0x69   : > { %1610 = vmatpush3.bf16.msra.mxu1 %v1929_v17 }
  0x6c   : > { %1670 = vmatmul.mubr.msk.bf16.vlgmr.msra.gmra.mxu0 %vm385_vm0, %v1762_v56  ;;  %1075 = vmatmul.mubr.bf16.vlgmr.msra.gmra.mxu1 %v1759_v55 }
  0x6d   : > { %1678 = vmatpush3.bf16.msra.mxu0 %v1936_v18  ;;  %1673 = vmatprep.mubr.msk.bf16.mxu0 %vm385_vm0, %v1763_v57 }
  0x6e   : > { %1082 = vmatprep.mubr.bf16.mxu1 %v1764_v58  ;;  %1679 = vmatprep.subr.bf16.mxu0 %v1949_v23 }
  0x71   : > { %1680 = vmatpush3.bf16.msra.mxu0 %v1949_v23 }
  0x74   : > { %1674 = vmatmul.mubr.msk.bf16.gmra.mxu0 %vm385_vm0, %v1766_v59  ;;  %1083 = vmatmul.mubr.bf16.gmra.mxu1 %v1767_v60 }
  0x75   : > { %1090 = vmatprep.mubr.bf16.mxu1 %v1768_v61  ;;  %1681 = vmatprep.mubr.msk.bf16.mxu0 %vm385_vm0, %v1770_v62 }
  0x7c   : > { %1091 = vmatmul.mubr.bf16.gmra.mxu1 %v1771_v0  ;;  %1682 = vmatmul.mubr.msk.bf16.vlgmr.msra.gmra.mxu0 %vm385_vm0, %v1772_v1 }
  0x7d   : > { %1098 = vmatprep.mubr.bf16.mxu1 %v1434_v2  ;;  %1685 = vmatprep.mubr.msk.bf16.mxu0 %vm385_vm0, %v1774_v3 }
  0x84   : > { %1099 = vmatmul.mubr.bf16.gmra.mxu1 %v1433_v4  ;;  %1686 = vmatmul.mubr.msk.bf16.gmra.mxu0 %vm385_vm0, %v1776_v5 }
  0xec   : > { %v1473_v6 = vpop.f32.mrf.mxu0  ;;  %v1519_v7 = vpop.f32.mrf.mxu1 }
  0xee   : > { %v1474_v8 = vpop.f32.mrf.mxu0  ;;  %v1520_v9 = vpop.f32.mrf.mxu1 }
  0xef   : > { %v1475_v10 = vadd.f32 %v1474_v8, %v1473_v6  ;;  %v2051_v11 = vadd.f32 %v1520_v9, %v1519_v7 }
  0xf0   : > { %v1476_v12 = vpop.f32.mrf.mxu0  ;;  %v1522_v13 = vpop.f32.mrf.mxu1 }
  0xf2   : > { %v1477_v14 = vpop.f32.mrf.mxu0  ;;  %v1523_v15 = vpop.f32.mrf.mxu1 }
  0xf3   : > { %v2053_v16 = vadd.f32 %v1477_v14, %v1476_v12  ;;  %v2055_v17 = vadd.f32 %v1523_v15, %v1522_v13 }
  0xf4   : > { %v1479_v18 = vpop.f32.mrf.mxu0  ;;  %v1525_v19 = vpop.f32.mrf.mxu1 }
  0xf6   : > { %v1480_v20 = vpop.f32.mrf.mxu0  ;;  %v1526_v21 = vpop.f32.mrf.mxu1 }
  0xf7   : > { %v1481_v22 = vadd.f32 %v1480_v20, %v1479_v18  ;;  %v1527_v23 = vadd.f32 %v1526_v21, %v1525_v19 }
  0xf8   : > { %v1482_v24 = vpop.f32.mrf.mxu0  ;;  %v1528_v25 = vpop.f32.mrf.mxu1 }
  0xfa   : > { %v1483_v26 = vpop.f32.mrf.mxu0  ;;  %v1529_v27 = vpop.f32.mrf.mxu1 }
  0xfb   : > { %v1484_v28 = vadd.f32 %v1483_v26, %v1482_v24  ;;  %v1530_v29 = vadd.f32 %v1529_v27, %v1528_v25 }
  0xfc   : > { %v1485_v30 = vpop.f32.mrf.mxu0  ;;  %v1531_v31 = vpop.f32.mrf.mxu1 }
  0xfe   : > { %v1486_v32 = vpop.f32.mrf.mxu0  ;;  %v1532_v33 = vpop.f32.mrf.mxu1 }
  0xff   : > { %v1487_v34 = vadd.f32 %v1486_v32, %v1485_v30  ;;  %v1533_v35 = vadd.f32 %v1532_v33, %v1531_v31 }
 0x100   : > { %v1488_v36 = vpop.f32.mrf.mxu0  ;;  %v1534_v37 = vpop.f32.mrf.mxu1 }
 0x102   : > { %v1489_v38 = vpop.f32.mrf.mxu0  ;;  %v1535_v39 = vpop.f32.mrf.mxu1 }
 0x103   : > { %v1490_v40 = vadd.f32 %v1489_v38, %v1488_v36  ;;  %v1536_v41 = vadd.f32 %v1535_v39, %v1534_v37 }
 0x104   : > { %v2057_v42 = vpop.f32.mrf.mxu0  ;;  %v2059_v43 = vpop.f32.mrf.mxu1 }
 0x106   : > { %v2061_v44 = vpop.f32.mrf.mxu0  ;;  %v2063_v45 = vpop.f32.mrf.mxu1 }
 0x108   : > { %v1494_v46 = vpop.f32.mrf.mxu0  ;;  %v1540_v47 = vpop.f32.mrf.mxu1 }
 0x10a   : > { %v1495_v48 = vpop.f32.mrf.mxu0  ;;  %v1541_v49 = vpop.f32.mrf.mxu1 }
 0x10c   : > { %v1647_v50 = vpop.f32.mrf.mxu0  ;;  %v2065_v51 = vpop.f32.mrf.mxu1 }
 0x10d   : > { %v505_v4 = vadd.f32 %v1647_v50, %v1481_v22 }
 0x10e   : > { %v496_v52 = vpop.f32.mrf.mxu0  ;;  %v1566_v53 = vpop.f32.mrf.mxu1 }
 0x10f   : > { %v2077_v8 = vadd.f32 %v1475_v10, %v496_v52 }
 0x110   : > { %v1648_v54 = vpop.f32.mrf.mxu0  ;;  %v2067_v55 = vpop.f32.mrf.mxu1 }
 0x111   : > { %v2082_v15 = vadd.f32 %v1648_v54, %v1484_v28 }
 0x112   : > { %v499_v56 = vpop.f32.mrf.mxu0  ;;  %v2069_v57 = vpop.f32.mrf.mxu1 }
 0x113   : > { %v2090_v22 = vadd.f32 %v2053_v16, %v499_v56 }
 0x114   : > { %v2071_v58 = vpop.f32.mrf.mxu0  ;;  %v1571_v59 = vpop.f32.mrf.mxu1 }
 0x116   : > { %v512_v60 = vpop.f32.mrf.mxu0  ;;  %v1572_v61 = vpop.f32.mrf.mxu1 }
 0x117   : > { %v2103_v28 = vadd.f32 %v1487_v34, %v512_v60  ;;  %v1573_v60 = vadd.f32 %v1572_v61, %v1571_v59  ;;  %v1493_v59 = vadd.f32 %v2061_v44, %v2057_v42  ;;  %v2125_v61 = vld [vmem:[%s2175_s2] ss:$0 sm:$0xff] }
 0x118   : > { %v1652_v62 = vpop.f32.mrf.mxu0  ;;  %v1574_v63 = vpop.f32.mrf.mxu1 }
 0x11a   : > { %v515_v0 = vpop.f32.mrf.mxu0  ;;  %v1575_v1 = vpop.f32.mrf.mxu1 }
 0x11b   : > { %v2109_v33 = vadd.f32 %v1490_v40, %v515_v0 }
 0x11c   : > { %v1659_v2 = vpop.f32.mrf.mxu0  ;;  %v2073_v3 = vpop.f32.mrf.mxu1 }
 0x11d   : > { %v715_v5 = vadd.f32 %v1659_v2, %v1527_v23 }
 0x11e   : > { %v706_v6 = vpop.f32.mrf.mxu0  ;;  %v2075_v7 = vpop.f32.mrf.mxu1 }
 0x11f   : > { %v738_v9 = vmax.f32 %v505_v4, %v715_v5  ;;  %v707_v12 = vadd.f32 %v2051_v11, %v706_v6  ;;  %v1576_v5 = vadd.f32 %v1575_v1, %v1574_v63  ;;  %v1579_v42 = vadd.f32 %v2075_v7, %v2073_v3 }
 0x120   : > { %v1660_v13 = vpop.f32.mrf.mxu0  ;;  %v2080_v14 = vpop.f32.mrf.mxu1 }
 0x121   : > { %v736_v18 = vmax.f32 %v2077_v8, %v707_v12  ;;  %v2085_v19 = vadd.f32 %v1660_v13, %v1530_v29  ;;  %v1539_v12 = vadd.f32 %v2063_v45, %v2059_v43 }
 0x122   : > { %v709_v20 = vpop.f32.mrf.mxu0  ;;  %v2087_v21 = vpop.f32.mrf.mxu1 }
 0x123   : > { %v739_v10 = vmax.f32 %v2082_v15, %v2085_v19  ;;  %v2095_v11 = vadd.f32 %v2055_v17, %v709_v20 }
 0x124   : > { %v1663_v23 = vpop.f32.mrf.mxu0  ;;  %v2097_v24 = vpop.f32.mrf.mxu1 }
 0x125   : > { %v737_v25 = vmax.f32 %v2090_v22, %v2095_v11 }
 0x126   : > { %v722_v26 = vpop.f32.mrf.mxu0  ;;  %v2101_v27 = vpop.f32.mrf.mxu1 }
 0x127   : > { %v2105_v29 = vadd.f32 %v1533_v35, %v722_v26 }
 0x128   : > { %v1664_v16 = vpop.f32.mrf.mxu0  ;;  %v1586_v30 = vpop.f32.mrf.mxu1 }
 0x129   : > { %v740_v31 = vmax.f32 %v2103_v28, %v2105_v29 }
 0x12a   : > { %v725_v17 = vpop.f32.mrf.mxu0  ;;  %v1587_v32 = vpop.f32.mrf.mxu1 }
 0x12b   : > { %v2111_v36 = vadd.f32 %v1536_v41, %v725_v17  ;;  %v1567_v41 = vadd.f32 %v1566_v53, %v2065_v51  ;;  %v1570_v51 = vadd.f32 %v2069_v57, %v2067_v55  ;;  %v731_v53 = vadd.f32 %v1663_v23, %v1539_v12 }
 0x12c   : > { %v1671_v37 = vpop.f32.mrf.mxu0  ;;  %v1611_v38 = vpop.f32.mrf.mxu1  ;;  %v521_v17 = vadd.f32 %v2071_v58, %v1493_v59  ;;  %v1585_v58 = vadd.f32 %v2101_v27, %v2097_v24 }
 0x12d   : > { %v741_v39 = vmax.f32 %v2109_v33, %v2111_v36  ;;  %v932_v0 = vadd.f32 %v1671_v37, %v1573_v60 }
 0x12e   : > { %v923_v34 = vpop.f32.mrf.mxu0  ;;  %v1612_v46 = vpop.f32.mrf.mxu1 }
 0x12f   : > { %v924_v6 = vadd.f32 %v1567_v41, %v923_v34  ;;  %v955_v19 = vmax.f32 %v738_v9, %v932_v0  ;;  %v1613_v20 = vadd.f32 %v1612_v46, %v1611_v38  ;;  %v742_v34 = vmax.f32 %v521_v17, %v731_v53 }
 0x130   : > { %v1672_v35 = vpop.f32.mrf.mxu0  ;;  %v1614_v47 = vpop.f32.mrf.mxu1 }
 0x131   : > { %v935_v26 = vadd.f32 %v1672_v35, %v1576_v5  ;;  %v953_v63 = vmax.f32 %v736_v18, %v924_v6  ;;  %v1582_v18 = vadd.f32 %v2087_v21, %v2080_v14 }
 0x132   : > { %v926_v48 = vpop.f32.mrf.mxu0  ;;  %v1615_v49 = vpop.f32.mrf.mxu1 }
 0x133   : > { %v927_v44 = vadd.f32 %v1570_v51, %v926_v48  ;;  %v956_v23 = vmax.f32 %v739_v10, %v935_v26  ;;  %v1616_v46 = vadd.f32 %v1615_v49, %v1614_v47 }
 0x134   : > { %v1675_v50 = vpop.f32.mrf.mxu0  ;;  %v1617_v52 = vpop.f32.mrf.mxu1 }
 0x136   : > { %v939_v54 = vpop.f32.mrf.mxu0  ;;  %v1618_v56 = vpop.f32.mrf.mxu1 }
 0x137   : > { %v1619_v8 = vadd.f32 %v1618_v56, %v1617_v52  ;;  %v954_v52 = vmax.f32 %v737_v25, %v927_v44  ;;  %v948_v56 = vadd.f32 %v1675_v50, %v1585_v58  ;;  %v940_v60 = vadd.f32 %v1579_v42, %v939_v54  ;;  %v1251_v42 = vld [vmem:[%s2143_s6 + $0x18] sm:$0x1] }
 0x138   : > { %v1676_v40 = vpop.f32.mrf.mxu0  ;;  %v1620_v62 = vpop.f32.mrf.mxu1 }
 0x13a   : > { %v942_v2 = vpop.f32.mrf.mxu0  ;;  %v1621_v4 = vpop.f32.mrf.mxu1 }
 0x13b   : > { %v1622_v1 = vadd.f32 %v1621_v4, %v1620_v62  ;;  %v943_v49 = vadd.f32 %v1582_v18, %v942_v2  ;;  %v957_v4 = vmax.f32 %v740_v31, %v940_v60 }
 0x13c   : > { %v1623_v13 = vpop.f32.mrf.mxu1  ;;  %v1683_v15 = vpop.f32.mrf.mxu0 }
 0x13d   : > { %v1149_v16 = vadd.f32 %v1683_v15, %v1619_v8  ;;  %v958_v59 = vmax.f32 %v741_v39, %v943_v49 }
 0x13e   : > { %v1624_v43 = vpop.f32.mrf.mxu1  ;;  %v1140_v45 = vpop.f32.mrf.mxu0 }
 0x13f   : > { %v1172_v9 = vmax.f32 %v955_v19, %v1149_v16  ;;  %v1141_v30 = vadd.f32 %v1613_v20, %v1140_v45  ;;  %v1625_v22 = vadd.f32 %v1624_v43, %v1623_v13  ;;  %v959_v13 = vmax.f32 %v742_v34, %v948_v56 }
 0x140   : > { %v1626_v55 = vpop.f32.mrf.mxu1  ;;  %v1684_v57 = vpop.f32.mrf.mxu0 }
 0x141   : > { %v1186_v32 = vadd.f32 %v2125_v61, %v1172_v9  ;;  %v1170_v37 = vmax.f32 %v953_v63, %v1141_v30  ;;  %v1152_v38 = vadd.f32 %v1684_v57, %v1622_v1 }
 0x142   : > { %v1627_v35 = vpop.f32.mrf.mxu1  ;;  %v1143_v3 = vpop.f32.mrf.mxu0 }
 0x143   : > { %vm1193_vm2 = vcmp.ge.f32.partialorder %v1186_v32, 0.0  ;;  %v1200_v7 = vmul.f32 0.2, %v1186_v32  ;;  %v1184_v48 = vadd.f32 %v2125_v61, %v1170_v37  ;;  %v1173_v10 = vmax.f32 %v956_v23, %v1152_v38 }
 0x144   : > { %v1144_v40 = vadd.f32 %v1616_v46, %v1143_v3  ;;  %v1629_v14 = vpop.f32.mrf.mxu1  ;;  %v1687_v21 = vpop.f32.mrf.mxu0  ;;  %v1628_v19 = vadd.f32 %v1627_v35, %v1626_v55 }
 0x145   : > { %v1207_v24 = vsel %vm1193_vm2, %v1186_v32, %v1200_v7  ;;  %vm1191_vm3 = vcmp.ge.f32.partialorder %v1184_v48, 0.0  ;;  %v1198_v27 = vmul.f32 0.2, %v1184_v48  ;;  %v1187_v47 = vadd.f32 %v2125_v61, %v1173_v10 }
 0x146   : > { %v1452_v62 = vpack.c.bf16 %v1207_v24, %v1207_v24  ;;  %v1171_v11 = vmax.f32 %v954_v52, %v1144_v40  ;;  %v1630_v25 = vpop.f32.mrf.mxu1  ;;  %v1156_v50 = vpop.f32.mrf.mxu0 }
 0x147   : > { %v1205_v54 = vsel %vm1191_vm3, %v1184_v48, %v1198_v27  ;;  %vm1194_vm4 = vcmp.ge.f32.partialorder %v1187_v47, 0.0  ;;  %v1201_v41 = vmul.f32 0.2, %v1187_v47  ;;  %v1631_v0 = vadd.f32 %v1630_v25, %v1629_v14 }
 0x148   : > { %1244 = vst.msk [vmem:[%s2143_s6 + $0x8] sm:$0xf] %vm1241_vm1, %v1452_v62  ;;  %v1450_v5 = vpack.c.bf16 %v1205_v54, %v1205_v54  ;;  %v1185_v6 = vadd.f32 %v2125_v61, %v1171_v11  ;;  %v1157_v2 = vadd.f32 %v1625_v22, %v1156_v50  ;;  %v1632_v8 = vpop.f32.mrf.mxu1  ;;  %v1688_v12 = vpop.f32.mrf.mxu0 }
 0x149   : > { %v1208_v15 = vsel %vm1194_vm4, %v1187_v47, %v1201_v41  ;;  %v1165_v20 = vadd.f32 %v1687_v21, %v1631_v0 }
 0x14a   : > { %1242 = vst.msk [vmem:[%s2143_s6] sm:$0xf] %vm1241_vm1, %v1450_v5  ;;  %v1453_v26 = vpack.c.bf16 %v1208_v15, %v1208_v15  ;;  %vm1192_vm5 = vcmp.ge.f32.partialorder %v1185_v6, 0.0  ;;  %v1199_v16 = vmul.f32 0.2, %v1185_v6  ;;  %v1174_v28 = vmax.f32 %v957_v4, %v1157_v2  ;;  %v1633_v29 = vpop.f32.mrf.mxu1  ;;  %v1159_v31 = vpop.f32.mrf.mxu0 }
 0x14b   : > { %v1176_v51 = vmax.f32 %v959_v13, %v1165_v20  ;;  %v1160_v53 = vadd.f32 %v1628_v19, %v1159_v31 }
 0x14c   : > { %1245 = vst.msk [vmem:[%s2143_s6 + $0xc] sm:$0xf] %vm1241_vm1, %v1453_v26  ;;  %v1206_v43 = vsel %vm1192_vm5, %v1185_v6, %v1199_v16  ;;  %v1188_v45 = vadd.f32 %v2125_v61, %v1174_v28 }
 0x14d   : > { %v1451_v63 = vpack.c.bf16 %v1206_v43, %v1206_v43  ;;  %v1190_v1 = vadd.f32 %v2125_v61, %v1176_v51  ;;  %v1175_v9 = vmax.f32 %v958_v59, %v1160_v53 }
 0x14e   : > { %vm1195_vm8 = vcmp.ge.f32.partialorder %v1188_v45, 0.0  ;;  %v1202_v30 = vmul.f32 0.2, %v1188_v45 }
 0x14f   : > { %1243 = vst.msk [vmem:[%s2143_s6 + $0x4] sm:$0xf] %vm1241_vm1, %v1451_v63  ;;  %vm1197_vm9 = vcmp.ge.f32.partialorder %v1190_v1, 0.0  ;;  %v1204_v33 = vmul.f32 0.2, %v1190_v1  ;;  %v1189_v36 = vadd.f32 %v2125_v61, %v1175_v9 }
 0x150   : > { %v1209_v39 = vsel %vm1195_vm8, %v1188_v45, %v1202_v30 }
 0x151   : > { %v1211_v17 = vsel %vm1197_vm9, %v1190_v1, %v1204_v33  ;;  %v1454_v44 = vpack.c.bf16 %v1209_v39, %v1209_v39  ;;  %vm1196_vm11 = vcmp.ge.f32.partialorder %v1189_v36, 0.0  ;;  %v1203_v55 = vmul.f32 0.2, %v1189_v36 }
 0x152   : > { %v1456_v57 = vpack.c.bf16 %v1211_v17, %v1211_v17 }
 0x153   : > { %1246 = vst.msk [vmem:[%s2143_s6 + $0x10] sm:$0xf] %vm1241_vm1, %v1454_v44  ;;  %v1210_v23 = vsel %vm1196_vm11, %v1189_v36, %v1203_v55 }
 0x154   : > { %v1252_v32 = vsel %vm1250_vm10, %v1456_v57, %v1251_v42  ;;  %v1455_v37 = vpack.c.bf16 %v1210_v23, %v1210_v23 }
 0x155   : > { %1253 = vst [vmem:[%s2143_s6 + $0x18] sm:$0x1] %v1252_v32 }
 0x156   : > { %1247 = vst.msk [vmem:[%s2143_s6 + $0x14] sm:$0xf] %vm1241_vm1, %v1455_v37 }
 0x157 PF: > { %s13_s12 = sadd.s32 1, %s1783_s12  }
 0x158   : > { %p10_p4 = scmp.ge.s32.totalorder %s13_s12, 4  }
 0x15a   :  { %12 = sbr.rel (!%p10_p4) target bundleno = 1 (0x1), region = 65 }

// kernel: discriminator_forward.5
= control target key start
LH: loop header
LB: loop body
LE: loop exit
PB: predicated region body
PF: predicated region fallthrough
CT: control target
= control target key end

     0   :  { %s12692_s0 = inlined_call_operand.vmem [shape: bf16[8,3136], index: 0, kind: input, shape index: {}]   ;;  %s12693_s1 = inlined_call_operand.vmem [shape: bf16[3136,1024], index: 1, kind: input, shape index: {}]   ;;  %s12694_s2 = inlined_call_operand.vmem [shape: f32[1,1024], index: 2, kind: input, shape index: {}]   ;;  %s12695_s3 = inlined_call_operand.vmem [shape: f32[1,1024], index: 3, kind: input, shape index: {}]   ;;  %s12696_s4 = inlined_call_operand.<no memory space> [shape: f32[1,1], index: 4, kind: input, shape index: {}]   ;;  %s12697_s5 = inlined_call_operand.vmem [shape: f32[8,1], index: 5, kind: output, shape index: {}]  }
   0x1   :  { %v10_v0 = vstv %s12696_s4 }
   0x2   :  { %11 = vst [vmem:[#allocation3] sm:$0x1] %v10_v0 }
   0x3   :  { %s9983_s20 = smov 0   ;;  %s9985_s21 = smov 0  }
   0x4   :  { %s9987_s22 = smov 0  }
   0x5 LB: > { %s9999_s4 = sadd.s32 4294967295, %s9946_s22   ;;  %s10002_s23 = sadd.s32 1, %s9946_s22   ;;  %s9946_s22 = sphi %s9987_s22, %s12700_s22   ;;  %s9942_s21 = sphi %s9985_s21, %s12699_s21   ;;  %s9938_s20 = sphi %s9983_s20, %s12698_s20  }
   0x6   : > { %s42_s24 = ssub.s32 %s9946_s22, %s10002_s23  ;;  %s45_s25 = sadd.s32 1, %s9942_s21 }
   0x7   : > { %p43_p0 = scmp.eq.s32.totalorder %s42_s24, 0  ;;  %p52_p1 = scmp.ne.s32.totalorder %s9942_s21, %s9938_s20 }
   0x8   : > { %p53_p2 = scmp.eq.s32.totalorder %s9946_s22, 0  ;;  %p7866_p4 = scmp.ge.s32.totalorder %s9946_s22, 2 }
   0x9   : > { %s10011_s26 = scalar_select %p43_p0, %s9942_s21, %s45_s25  }
   0xa   : > { %p54_p3 = por %p53_p2, %p52_p1  ;;  %178 = sbr.rel (%p7866_p4) target bundleno = 411 (0x19b), region = 24 }
   0xf   : > { %181 = sbr.rel (!%p54_p3) target bundleno = 411 (0x19b), region = 28  ;;  %s183_s27 = sand.u32 (%p54_p3), 1, %s9942_s21  }
  0x10   : > { %s8688_s28 = sshll.u32 (%p54_p3), %s9946_s22, 4  ;;  %s8689_s29 = smul.u32 (%p54_p3), 6272, %s183_s27 }
  0x11   : > { %s10019_s7 = scalar_lea.vmem (%p54_p3), %s12693_s1, %s8688_s28 }
  0x12   : > { %v201_v1 = vld [vmem:[%s10019_s7] sm:$0xff] (%p54_p3)  ;;  %v203_v2 = vld [vmem:[%s10019_s7 + $0x8] sm:$0xff] (%p54_p3)  ;;  %s10027_s8 = scalar_lea.vmem (%p54_p3), [#allocation4], %s8689_s29 }
  0x13   : > { %v205_v3 = vld [vmem:[%s10019_s7 + $0x20] sm:$0xff] (%p54_p3)  ;;  %v207_v4 = vld [vmem:[%s10019_s7 + $0x28] sm:$0xff] (%p54_p3)  ;;  %202 = vst [vmem:[%s10027_s8] sm:$0xff] (%p54_p3), %v201_v1  ;;  %204 = vst [vmem:[%s10027_s8 + $0x8] sm:$0xff] (%p54_p3), %v203_v2 }
  0x14   : > { %v209_v5 = vld [vmem:[%s10019_s7 + $0x40] sm:$0xff]  ;;  %v211_v6 = vld [vmem:[%s10019_s7 + $0x48] sm:$0xff]  ;;  %206 = vst [vmem:[%s10027_s8 + $0x10] sm:$0xff] %v205_v3  ;;  %208 = vst [vmem:[%s10027_s8 + $0x18] sm:$0xff] %v207_v4 }
  0x15   : > { %210 = vst [vmem:[%s10027_s8 + $0x20] sm:$0xff] %v209_v5  ;;  %212 = vst [vmem:[%s10027_s8 + $0x28] sm:$0xff] %v211_v6  ;;  %v213_v7 = vld [vmem:[%s10019_s7 + $0x60] sm:$0xff]  ;;  %v215_v8 = vld [vmem:[%s10019_s7 + $0x68] sm:$0xff] }
  0x16   : > { %v217_v9 = vld [vmem:[%s10019_s7 + $0x80] sm:$0xff]  ;;  %214 = vst [vmem:[%s10027_s8 + $0x30] sm:$0xff] %v213_v7  ;;  %216 = vst [vmem:[%s10027_s8 + $0x38] sm:$0xff] %v215_v8  ;;  %v219_v10 = vld [vmem:[%s10019_s7 + $0x88] sm:$0xff] }
  0x17   : > { %218 = vst [vmem:[%s10027_s8 + $0x40] sm:$0xff] %v217_v9  ;;  %v221_v11 = vld [vmem:[%s10019_s7 + $0xa0] sm:$0xff]  ;;  %v223_v12 = vld [vmem:[%s10019_s7 + $0xa8] sm:$0xff]  ;;  %220 = vst [vmem:[%s10027_s8 + $0x48] sm:$0xff] %v219_v10 }
  0x18   : > { %222 = vst [vmem:[%s10027_s8 + $0x50] sm:$0xff] %v221_v11  ;;  %224 = vst [vmem:[%s10027_s8 + $0x58] sm:$0xff] %v223_v12  ;;  %v225_v13 = vld [vmem:[%s10019_s7 + $0xc0] sm:$0xff]  ;;  %v227_v14 = vld [vmem:[%s10019_s7 + $0xc8] sm:$0xff] }
  0x19   : > { %v229_v15 = vld [vmem:[%s10019_s7 + $0xe0] sm:$0xff]  ;;  %226 = vst [vmem:[%s10027_s8 + $0x60] sm:$0xff] %v225_v13  ;;  %228 = vst [vmem:[%s10027_s8 + $0x68] sm:$0xff] %v227_v14  ;;  %v231_v16 = vld [vmem:[%s10019_s7 + $0xe8] sm:$0xff] }
  0x1a   : > { %230 = vst [vmem:[%s10027_s8 + $0x70] sm:$0xff] %v229_v15  ;;  %v233_v17 = vld [vmem:[%s10019_s7 + $0x100] sm:$0xff]  ;;  %v235_v18 = vld [vmem:[%s10019_s7 + $0x108] sm:$0xff]  ;;  %232 = vst [vmem:[%s10027_s8 + $0x78] sm:$0xff] %v231_v16 }
  0x1b   : > { %234 = vst [vmem:[%s10027_s8 + $0x80] sm:$0xff] %v233_v17  ;;  %236 = vst [vmem:[%s10027_s8 + $0x88] sm:$0xff] %v235_v18  ;;  %v237_v19 = vld [vmem:[%s10019_s7 + $0x120] sm:$0xff]  ;;  %v239_v20 = vld [vmem:[%s10019_s7 + $0x128] sm:$0xff] }
  0x1c   : > { %v241_v21 = vld [vmem:[%s10019_s7 + $0x140] sm:$0xff]  ;;  %238 = vst [vmem:[%s10027_s8 + $0x90] sm:$0xff] %v237_v19  ;;  %240 = vst [vmem:[%s10027_s8 + $0x98] sm:$0xff] %v239_v20  ;;  %v243_v22 = vld [vmem:[%s10019_s7 + $0x148] sm:$0xff] }
  0x1d   : > { %242 = vst [vmem:[%s10027_s8 + $0xa0] sm:$0xff] %v241_v21  ;;  %v245_v23 = vld [vmem:[%s10019_s7 + $0x160] sm:$0xff]  ;;  %v247_v24 = vld [vmem:[%s10019_s7 + $0x168] sm:$0xff]  ;;  %244 = vst [vmem:[%s10027_s8 + $0xa8] sm:$0xff] %v243_v22 }
  0x1e   : > { %246 = vst [vmem:[%s10027_s8 + $0xb0] sm:$0xff] %v245_v23  ;;  %248 = vst [vmem:[%s10027_s8 + $0xb8] sm:$0xff] %v247_v24  ;;  %v249_v25 = vld [vmem:[%s10019_s7 + $0x180] sm:$0xff]  ;;  %v251_v26 = vld [vmem:[%s10019_s7 + $0x188] sm:$0xff] }
  0x1f   : > { %v253_v27 = vld [vmem:[%s10019_s7 + $0x1a0] sm:$0xff]  ;;  %250 = vst [vmem:[%s10027_s8 + $0xc0] sm:$0xff] %v249_v25  ;;  %252 = vst [vmem:[%s10027_s8 + $0xc8] sm:$0xff] %v251_v26  ;;  %v255_v28 = vld [vmem:[%s10019_s7 + $0x1a8] sm:$0xff] }
  0x20   : > { %254 = vst [vmem:[%s10027_s8 + $0xd0] sm:$0xff] %v253_v27  ;;  %v257_v29 = vld [vmem:[%s10019_s7 + $0x1c0] sm:$0xff]  ;;  %v259_v30 = vld [vmem:[%s10019_s7 + $0x1c8] sm:$0xff]  ;;  %256 = vst [vmem:[%s10027_s8 + $0xd8] sm:$0xff] %v255_v28 }
  0x21   : > { %258 = vst [vmem:[%s10027_s8 + $0xe0] sm:$0xff] %v257_v29  ;;  %260 = vst [vmem:[%s10027_s8 + $0xe8] sm:$0xff] %v259_v30  ;;  %v261_v31 = vld [vmem:[%s10019_s7 + $0x1e0] sm:$0xff]  ;;  %v263_v32 = vld [vmem:[%s10019_s7 + $0x1e8] sm:$0xff] }
  0x22   : > { %v265_v33 = vld [vmem:[%s10019_s7 + $0x200] sm:$0xff]  ;;  %262 = vst [vmem:[%s10027_s8 + $0xf0] sm:$0xff] %v261_v31  ;;  %264 = vst [vmem:[%s10027_s8 + $0xf8] sm:$0xff] %v263_v32  ;;  %v267_v34 = vld [vmem:[%s10019_s7 + $0x208] sm:$0xff] }
  0x23   : > { %266 = vst [vmem:[%s10027_s8 + $0x100] sm:$0xff] %v265_v33  ;;  %v269_v35 = vld [vmem:[%s10019_s7 + $0x220] sm:$0xff]  ;;  %v271_v36 = vld [vmem:[%s10019_s7 + $0x228] sm:$0xff]  ;;  %268 = vst [vmem:[%s10027_s8 + $0x108] sm:$0xff] %v267_v34 }
  0x24   : > { %270 = vst [vmem:[%s10027_s8 + $0x110] sm:$0xff] %v269_v35  ;;  %272 = vst [vmem:[%s10027_s8 + $0x118] sm:$0xff] %v271_v36  ;;  %v273_v37 = vld [vmem:[%s10019_s7 + $0x240] sm:$0xff]  ;;  %v275_v38 = vld [vmem:[%s10019_s7 + $0x248] sm:$0xff] }
  0x25   : > { %v277_v39 = vld [vmem:[%s10019_s7 + $0x260] sm:$0xff]  ;;  %274 = vst [vmem:[%s10027_s8 + $0x120] sm:$0xff] %v273_v37  ;;  %276 = vst [vmem:[%s10027_s8 + $0x128] sm:$0xff] %v275_v38  ;;  %v279_v40 = vld [vmem:[%s10019_s7 + $0x268] sm:$0xff] }
  0x26   : > { %278 = vst [vmem:[%s10027_s8 + $0x130] sm:$0xff] %v277_v39  ;;  %v281_v41 = vld [vmem:[%s10019_s7 + $0x280] sm:$0xff]  ;;  %v283_v42 = vld [vmem:[%s10019_s7 + $0x288] sm:$0xff]  ;;  %280 = vst [vmem:[%s10027_s8 + $0x138] sm:$0xff] %v279_v40 }
  0x27   : > { %282 = vst [vmem:[%s10027_s8 + $0x140] sm:$0xff] %v281_v41  ;;  %284 = vst [vmem:[%s10027_s8 + $0x148] sm:$0xff] %v283_v42  ;;  %v285_v43 = vld [vmem:[%s10019_s7 + $0x2a0] sm:$0xff]  ;;  %v287_v44 = vld [vmem:[%s10019_s7 + $0x2a8] sm:$0xff] }
  0x28   : > { %v289_v45 = vld [vmem:[%s10019_s7 + $0x2c0] sm:$0xff]  ;;  %286 = vst [vmem:[%s10027_s8 + $0x150] sm:$0xff] %v285_v43  ;;  %288 = vst [vmem:[%s10027_s8 + $0x158] sm:$0xff] %v287_v44  ;;  %v291_v46 = vld [vmem:[%s10019_s7 + $0x2c8] sm:$0xff] }
  0x29   : > { %290 = vst [vmem:[%s10027_s8 + $0x160] sm:$0xff] %v289_v45  ;;  %v293_v47 = vld [vmem:[%s10019_s7 + $0x2e0] sm:$0xff]  ;;  %v295_v48 = vld [vmem:[%s10019_s7 + $0x2e8] sm:$0xff]  ;;  %292 = vst [vmem:[%s10027_s8 + $0x168] sm:$0xff] %v291_v46 }
  0x2a   : > { %294 = vst [vmem:[%s10027_s8 + $0x170] sm:$0xff] %v293_v47  ;;  %296 = vst [vmem:[%s10027_s8 + $0x178] sm:$0xff] %v295_v48  ;;  %v297_v49 = vld [vmem:[%s10019_s7 + $0x300] sm:$0xff]  ;;  %v299_v50 = vld [vmem:[%s10019_s7 + $0x308] sm:$0xff] }
  0x2b   : > { %v301_v51 = vld [vmem:[%s10019_s7 + $0x320] sm:$0xff]  ;;  %298 = vst [vmem:[%s10027_s8 + $0x180] sm:$0xff] %v297_v49  ;;  %300 = vst [vmem:[%s10027_s8 + $0x188] sm:$0xff] %v299_v50  ;;  %v303_v52 = vld [vmem:[%s10019_s7 + $0x328] sm:$0xff] }
  0x2c   : > { %302 = vst [vmem:[%s10027_s8 + $0x190] sm:$0xff] %v301_v51  ;;  %v305_v53 = vld [vmem:[%s10019_s7 + $0x340] sm:$0xff]  ;;  %v307_v54 = vld [vmem:[%s10019_s7 + $0x348] sm:$0xff]  ;;  %304 = vst [vmem:[%s10027_s8 + $0x198] sm:$0xff] %v303_v52 }
  0x2d   : > { %306 = vst [vmem:[%s10027_s8 + $0x1a0] sm:$0xff] %v305_v53  ;;  %308 = vst [vmem:[%s10027_s8 + $0x1a8] sm:$0xff] %v307_v54  ;;  %v309_v55 = vld [vmem:[%s10019_s7 + $0x360] sm:$0xff]  ;;  %v311_v56 = vld [vmem:[%s10019_s7 + $0x368] sm:$0xff] }
  0x2e   : > { %v313_v57 = vld [vmem:[%s10019_s7 + $0x380] sm:$0xff]  ;;  %310 = vst [vmem:[%s10027_s8 + $0x1b0] sm:$0xff] %v309_v55  ;;  %312 = vst [vmem:[%s10027_s8 + $0x1b8] sm:$0xff] %v311_v56  ;;  %v315_v58 = vld [vmem:[%s10019_s7 + $0x388] sm:$0xff] }
  0x2f   : > { %314 = vst [vmem:[%s10027_s8 + $0x1c0] sm:$0xff] %v313_v57  ;;  %v317_v59 = vld [vmem:[%s10019_s7 + $0x3a0] sm:$0xff]  ;;  %v319_v60 = vld [vmem:[%s10019_s7 + $0x3a8] sm:$0xff]  ;;  %316 = vst [vmem:[%s10027_s8 + $0x1c8] sm:$0xff] %v315_v58 }
  0x30   : > { %318 = vst [vmem:[%s10027_s8 + $0x1d0] sm:$0xff] %v317_v59  ;;  %320 = vst [vmem:[%s10027_s8 + $0x1d8] sm:$0xff] %v319_v60  ;;  %v321_v61 = vld [vmem:[%s10019_s7 + $0x3c0] sm:$0xff]  ;;  %v323_v62 = vld [vmem:[%s10019_s7 + $0x3c8] sm:$0xff] }
  0x31   : > { %v325_v63 = vld [vmem:[%s10019_s7 + $0x3e0] sm:$0xff]  ;;  %322 = vst [vmem:[%s10027_s8 + $0x1e0] sm:$0xff] %v321_v61  ;;  %324 = vst [vmem:[%s10027_s8 + $0x1e8] sm:$0xff] %v323_v62  ;;  %v327_v0 = vld [vmem:[%s10019_s7 + $0x3e8] sm:$0xff] }
  0x32   : > { %326 = vst [vmem:[%s10027_s8 + $0x1f0] sm:$0xff] %v325_v63  ;;  %v329_v1 = vld [vmem:[%s10019_s7 + $0x400] sm:$0xff]  ;;  %v331_v2 = vld [vmem:[%s10019_s7 + $0x408] sm:$0xff]  ;;  %328 = vst [vmem:[%s10027_s8 + $0x1f8] sm:$0xff] %v327_v0 }
  0x33   : > { %330 = vst [vmem:[%s10027_s8 + $0x200] sm:$0xff] %v329_v1  ;;  %332 = vst [vmem:[%s10027_s8 + $0x208] sm:$0xff] %v331_v2  ;;  %v333_v3 = vld [vmem:[%s10019_s7 + $0x420] sm:$0xff]  ;;  %v335_v4 = vld [vmem:[%s10019_s7 + $0x428] sm:$0xff] }
  0x34   : > { %v337_v5 = vld [vmem:[%s10019_s7 + $0x440] sm:$0xff]  ;;  %334 = vst [vmem:[%s10027_s8 + $0x210] sm:$0xff] %v333_v3  ;;  %336 = vst [vmem:[%s10027_s8 + $0x218] sm:$0xff] %v335_v4  ;;  %v339_v6 = vld [vmem:[%s10019_s7 + $0x448] sm:$0xff] }
  0x35   : > { %338 = vst [vmem:[%s10027_s8 + $0x220] sm:$0xff] %v337_v5  ;;  %v341_v7 = vld [vmem:[%s10019_s7 + $0x460] sm:$0xff]  ;;  %v343_v8 = vld [vmem:[%s10019_s7 + $0x468] sm:$0xff]  ;;  %340 = vst [vmem:[%s10027_s8 + $0x228] sm:$0xff] %v339_v6 }
  0x36   : > { %342 = vst [vmem:[%s10027_s8 + $0x230] sm:$0xff] %v341_v7  ;;  %344 = vst [vmem:[%s10027_s8 + $0x238] sm:$0xff] %v343_v8  ;;  %v345_v9 = vld [vmem:[%s10019_s7 + $0x480] sm:$0xff]  ;;  %v347_v10 = vld [vmem:[%s10019_s7 + $0x488] sm:$0xff] }
  0x37   : > { %v349_v11 = vld [vmem:[%s10019_s7 + $0x4a0] sm:$0xff]  ;;  %346 = vst [vmem:[%s10027_s8 + $0x240] sm:$0xff] %v345_v9  ;;  %348 = vst [vmem:[%s10027_s8 + $0x248] sm:$0xff] %v347_v10  ;;  %v351_v12 = vld [vmem:[%s10019_s7 + $0x4a8] sm:$0xff] }
  0x38   : > { %350 = vst [vmem:[%s10027_s8 + $0x250] sm:$0xff] %v349_v11  ;;  %v353_v13 = vld [vmem:[%s10019_s7 + $0x4c0] sm:$0xff]  ;;  %v355_v14 = vld [vmem:[%s10019_s7 + $0x4c8] sm:$0xff]  ;;  %352 = vst [vmem:[%s10027_s8 + $0x258] sm:$0xff] %v351_v12 }
  0x39   : > { %354 = vst [vmem:[%s10027_s8 + $0x260] sm:$0xff] %v353_v13  ;;  %356 = vst [vmem:[%s10027_s8 + $0x268] sm:$0xff] %v355_v14  ;;  %v357_v15 = vld [vmem:[%s10019_s7 + $0x4e0] sm:$0xff]  ;;  %v359_v16 = vld [vmem:[%s10019_s7 + $0x4e8] sm:$0xff] }
  0x3a   : > { %v361_v17 = vld [vmem:[%s10019_s7 + $0x500] sm:$0xff]  ;;  %358 = vst [vmem:[%s10027_s8 + $0x270] sm:$0xff] %v357_v15  ;;  %360 = vst [vmem:[%s10027_s8 + $0x278] sm:$0xff] %v359_v16  ;;  %v363_v18 = vld [vmem:[%s10019_s7 + $0x508] sm:$0xff] }
  0x3b   : > { %362 = vst [vmem:[%s10027_s8 + $0x280] sm:$0xff] %v361_v17  ;;  %v365_v19 = vld [vmem:[%s10019_s7 + $0x520] sm:$0xff]  ;;  %v367_v20 = vld [vmem:[%s10019_s7 + $0x528] sm:$0xff]  ;;  %364 = vst [vmem:[%s10027_s8 + $0x288] sm:$0xff] %v363_v18 }
  0x3c   : > { %366 = vst [vmem:[%s10027_s8 + $0x290] sm:$0xff] %v365_v19  ;;  %368 = vst [vmem:[%s10027_s8 + $0x298] sm:$0xff] %v367_v20  ;;  %v369_v21 = vld [vmem:[%s10019_s7 + $0x540] sm:$0xff]  ;;  %v371_v22 = vld [vmem:[%s10019_s7 + $0x548] sm:$0xff] }
  0x3d   : > { %v373_v23 = vld [vmem:[%s10019_s7 + $0x560] sm:$0xff]  ;;  %370 = vst [vmem:[%s10027_s8 + $0x2a0] sm:$0xff] %v369_v21  ;;  %372 = vst [vmem:[%s10027_s8 + $0x2a8] sm:$0xff] %v371_v22  ;;  %v375_v24 = vld [vmem:[%s10019_s7 + $0x568] sm:$0xff] }
  0x3e   : > { %374 = vst [vmem:[%s10027_s8 + $0x2b0] sm:$0xff] %v373_v23  ;;  %v377_v25 = vld [vmem:[%s10019_s7 + $0x580] sm:$0xff]  ;;  %v379_v26 = vld [vmem:[%s10019_s7 + $0x588] sm:$0xff]  ;;  %376 = vst [vmem:[%s10027_s8 + $0x2b8] sm:$0xff] %v375_v24 }
  0x3f   : > { %378 = vst [vmem:[%s10027_s8 + $0x2c0] sm:$0xff] %v377_v25  ;;  %380 = vst [vmem:[%s10027_s8 + $0x2c8] sm:$0xff] %v379_v26  ;;  %v381_v27 = vld [vmem:[%s10019_s7 + $0x5a0] sm:$0xff]  ;;  %v383_v28 = vld [vmem:[%s10019_s7 + $0x5a8] sm:$0xff] }
  0x40   : > { %v385_v29 = vld [vmem:[%s10019_s7 + $0x5c0] sm:$0xff]  ;;  %382 = vst [vmem:[%s10027_s8 + $0x2d0] sm:$0xff] %v381_v27  ;;  %384 = vst [vmem:[%s10027_s8 + $0x2d8] sm:$0xff] %v383_v28  ;;  %v387_v30 = vld [vmem:[%s10019_s7 + $0x5c8] sm:$0xff] }
  0x41   : > { %386 = vst [vmem:[%s10027_s8 + $0x2e0] sm:$0xff] %v385_v29  ;;  %v389_v31 = vld [vmem:[%s10019_s7 + $0x5e0] sm:$0xff]  ;;  %v391_v32 = vld [vmem:[%s10019_s7 + $0x5e8] sm:$0xff]  ;;  %388 = vst [vmem:[%s10027_s8 + $0x2e8] sm:$0xff] %v387_v30 }
  0x42   : > { %390 = vst [vmem:[%s10027_s8 + $0x2f0] sm:$0xff] %v389_v31  ;;  %392 = vst [vmem:[%s10027_s8 + $0x2f8] sm:$0xff] %v391_v32  ;;  %v393_v33 = vld [vmem:[%s10019_s7 + $0x600] sm:$0xff]  ;;  %v395_v34 = vld [vmem:[%s10019_s7 + $0x608] sm:$0xff] }
  0x43   : > { %v397_v35 = vld [vmem:[%s10019_s7 + $0x620] sm:$0xff]  ;;  %394 = vst [vmem:[%s10027_s8 + $0x300] sm:$0xff] %v393_v33  ;;  %396 = vst [vmem:[%s10027_s8 + $0x308] sm:$0xff] %v395_v34  ;;  %v399_v36 = vld [vmem:[%s10019_s7 + $0x628] sm:$0xff] }
  0x44   : > { %398 = vst [vmem:[%s10027_s8 + $0x310] sm:$0xff] %v397_v35  ;;  %v401_v37 = vld [vmem:[%s10019_s7 + $0x640] sm:$0xff]  ;;  %v403_v38 = vld [vmem:[%s10019_s7 + $0x648] sm:$0xff]  ;;  %400 = vst [vmem:[%s10027_s8 + $0x318] sm:$0xff] %v399_v36 }
  0x45   : > { %402 = vst [vmem:[%s10027_s8 + $0x320] sm:$0xff] %v401_v37  ;;  %404 = vst [vmem:[%s10027_s8 + $0x328] sm:$0xff] %v403_v38  ;;  %v405_v39 = vld [vmem:[%s10019_s7 + $0x660] sm:$0xff]  ;;  %v407_v40 = vld [vmem:[%s10019_s7 + $0x668] sm:$0xff] }
  0x46   : > { %v409_v41 = vld [vmem:[%s10019_s7 + $0x680] sm:$0xff]  ;;  %406 = vst [vmem:[%s10027_s8 + $0x330] sm:$0xff] %v405_v39  ;;  %408 = vst [vmem:[%s10027_s8 + $0x338] sm:$0xff] %v407_v40  ;;  %v411_v42 = vld [vmem:[%s10019_s7 + $0x688] sm:$0xff] }
  0x47   : > { %410 = vst [vmem:[%s10027_s8 + $0x340] sm:$0xff] %v409_v41  ;;  %v413_v43 = vld [vmem:[%s10019_s7 + $0x6a0] sm:$0xff]  ;;  %v415_v44 = vld [vmem:[%s10019_s7 + $0x6a8] sm:$0xff]  ;;  %412 = vst [vmem:[%s10027_s8 + $0x348] sm:$0xff] %v411_v42 }
  0x48   : > { %414 = vst [vmem:[%s10027_s8 + $0x350] sm:$0xff] %v413_v43  ;;  %416 = vst [vmem:[%s10027_s8 + $0x358] sm:$0xff] %v415_v44  ;;  %v417_v45 = vld [vmem:[%s10019_s7 + $0x6c0] sm:$0xff]  ;;  %v419_v46 = vld [vmem:[%s10019_s7 + $0x6c8] sm:$0xff] }
  0x49   : > { %v421_v47 = vld [vmem:[%s10019_s7 + $0x6e0] sm:$0xff]  ;;  %418 = vst [vmem:[%s10027_s8 + $0x360] sm:$0xff] %v417_v45  ;;  %420 = vst [vmem:[%s10027_s8 + $0x368] sm:$0xff] %v419_v46  ;;  %v423_v48 = vld [vmem:[%s10019_s7 + $0x6e8] sm:$0xff] }
  0x4a   : > { %422 = vst [vmem:[%s10027_s8 + $0x370] sm:$0xff] %v421_v47  ;;  %v425_v49 = vld [vmem:[%s10019_s7 + $0x700] sm:$0xff]  ;;  %v427_v50 = vld [vmem:[%s10019_s7 + $0x708] sm:$0xff]  ;;  %424 = vst [vmem:[%s10027_s8 + $0x378] sm:$0xff] %v423_v48 }
  0x4b   : > { %426 = vst [vmem:[%s10027_s8 + $0x380] sm:$0xff] %v425_v49  ;;  %428 = vst [vmem:[%s10027_s8 + $0x388] sm:$0xff] %v427_v50  ;;  %v429_v51 = vld [vmem:[%s10019_s7 + $0x720] sm:$0xff]  ;;  %v431_v52 = vld [vmem:[%s10019_s7 + $0x728] sm:$0xff] }
  0x4c   : > { %v433_v53 = vld [vmem:[%s10019_s7 + $0x740] sm:$0xff]  ;;  %430 = vst [vmem:[%s10027_s8 + $0x390] sm:$0xff] %v429_v51  ;;  %432 = vst [vmem:[%s10027_s8 + $0x398] sm:$0xff] %v431_v52  ;;  %v435_v54 = vld [vmem:[%s10019_s7 + $0x748] sm:$0xff] }
  0x4d   : > { %434 = vst [vmem:[%s10027_s8 + $0x3a0] sm:$0xff] %v433_v53  ;;  %v437_v55 = vld [vmem:[%s10019_s7 + $0x760] sm:$0xff]  ;;  %v439_v56 = vld [vmem:[%s10019_s7 + $0x768] sm:$0xff]  ;;  %436 = vst [vmem:[%s10027_s8 + $0x3a8] sm:$0xff] %v435_v54 }
  0x4e   : > { %438 = vst [vmem:[%s10027_s8 + $0x3b0] sm:$0xff] %v437_v55  ;;  %440 = vst [vmem:[%s10027_s8 + $0x3b8] sm:$0xff] %v439_v56  ;;  %v441_v57 = vld [vmem:[%s10019_s7 + $0x780] sm:$0xff]  ;;  %v443_v58 = vld [vmem:[%s10019_s7 + $0x788] sm:$0xff] }
  0x4f   : > { %v445_v59 = vld [vmem:[%s10019_s7 + $0x7a0] sm:$0xff]  ;;  %442 = vst [vmem:[%s10027_s8 + $0x3c0] sm:$0xff] %v441_v57  ;;  %444 = vst [vmem:[%s10027_s8 + $0x3c8] sm:$0xff] %v443_v58  ;;  %v447_v60 = vld [vmem:[%s10019_s7 + $0x7a8] sm:$0xff] }
  0x50   : > { %446 = vst [vmem:[%s10027_s8 + $0x3d0] sm:$0xff] %v445_v59  ;;  %v449_v61 = vld [vmem:[%s10019_s7 + $0x7c0] sm:$0xff]  ;;  %v451_v62 = vld [vmem:[%s10019_s7 + $0x7c8] sm:$0xff]  ;;  %448 = vst [vmem:[%s10027_s8 + $0x3d8] sm:$0xff] %v447_v60 }
  0x51   : > { %450 = vst [vmem:[%s10027_s8 + $0x3e0] sm:$0xff] %v449_v61  ;;  %452 = vst [vmem:[%s10027_s8 + $0x3e8] sm:$0xff] %v451_v62  ;;  %v453_v63 = vld [vmem:[%s10019_s7 + $0x7e0] sm:$0xff]  ;;  %v455_v0 = vld [vmem:[%s10019_s7 + $0x7e8] sm:$0xff] }
  0x52   : > { %v457_v1 = vld [vmem:[%s10019_s7 + $0x800] sm:$0xff]  ;;  %454 = vst [vmem:[%s10027_s8 + $0x3f0] sm:$0xff] %v453_v63  ;;  %456 = vst [vmem:[%s10027_s8 + $0x3f8] sm:$0xff] %v455_v0  ;;  %v459_v2 = vld [vmem:[%s10019_s7 + $0x808] sm:$0xff] }
  0x53   : > { %458 = vst [vmem:[%s10027_s8 + $0x400] sm:$0xff] %v457_v1  ;;  %v461_v3 = vld [vmem:[%s10019_s7 + $0x820] sm:$0xff]  ;;  %v463_v4 = vld [vmem:[%s10019_s7 + $0x828] sm:$0xff]  ;;  %460 = vst [vmem:[%s10027_s8 + $0x408] sm:$0xff] %v459_v2 }
  0x54   : > { %462 = vst [vmem:[%s10027_s8 + $0x410] sm:$0xff] %v461_v3  ;;  %464 = vst [vmem:[%s10027_s8 + $0x418] sm:$0xff] %v463_v4  ;;  %v465_v5 = vld [vmem:[%s10019_s7 + $0x840] sm:$0xff]  ;;  %v467_v6 = vld [vmem:[%s10019_s7 + $0x848] sm:$0xff] }
  0x55   : > { %v469_v7 = vld [vmem:[%s10019_s7 + $0x860] sm:$0xff]  ;;  %466 = vst [vmem:[%s10027_s8 + $0x420] sm:$0xff] %v465_v5  ;;  %468 = vst [vmem:[%s10027_s8 + $0x428] sm:$0xff] %v467_v6  ;;  %v471_v8 = vld [vmem:[%s10019_s7 + $0x868] sm:$0xff] }
  0x56   : > { %470 = vst [vmem:[%s10027_s8 + $0x430] sm:$0xff] %v469_v7  ;;  %v473_v9 = vld [vmem:[%s10019_s7 + $0x880] sm:$0xff]  ;;  %v475_v10 = vld [vmem:[%s10019_s7 + $0x888] sm:$0xff]  ;;  %472 = vst [vmem:[%s10027_s8 + $0x438] sm:$0xff] %v471_v8 }
  0x57   : > { %474 = vst [vmem:[%s10027_s8 + $0x440] sm:$0xff] %v473_v9  ;;  %476 = vst [vmem:[%s10027_s8 + $0x448] sm:$0xff] %v475_v10  ;;  %v477_v11 = vld [vmem:[%s10019_s7 + $0x8a0] sm:$0xff]  ;;  %v479_v12 = vld [vmem:[%s10019_s7 + $0x8a8] sm:$0xff] }
  0x58   : > { %v481_v13 = vld [vmem:[%s10019_s7 + $0x8c0] sm:$0xff]  ;;  %478 = vst [vmem:[%s10027_s8 + $0x450] sm:$0xff] %v477_v11  ;;  %480 = vst [vmem:[%s10027_s8 + $0x458] sm:$0xff] %v479_v12  ;;  %v483_v14 = vld [vmem:[%s10019_s7 + $0x8c8] sm:$0xff] }
  0x59   : > { %482 = vst [vmem:[%s10027_s8 + $0x460] sm:$0xff] %v481_v13  ;;  %v485_v15 = vld [vmem:[%s10019_s7 + $0x8e0] sm:$0xff]  ;;  %v487_v16 = vld [vmem:[%s10019_s7 + $0x8e8] sm:$0xff]  ;;  %484 = vst [vmem:[%s10027_s8 + $0x468] sm:$0xff] %v483_v14 }
  0x5a   : > { %486 = vst [vmem:[%s10027_s8 + $0x470] sm:$0xff] %v485_v15  ;;  %488 = vst [vmem:[%s10027_s8 + $0x478] sm:$0xff] %v487_v16  ;;  %v489_v17 = vld [vmem:[%s10019_s7 + $0x900] sm:$0xff]  ;;  %v491_v18 = vld [vmem:[%s10019_s7 + $0x908] sm:$0xff] }
  0x5b   : > { %v493_v19 = vld [vmem:[%s10019_s7 + $0x920] sm:$0xff]  ;;  %490 = vst [vmem:[%s10027_s8 + $0x480] sm:$0xff] %v489_v17  ;;  %492 = vst [vmem:[%s10027_s8 + $0x488] sm:$0xff] %v491_v18  ;;  %v495_v20 = vld [vmem:[%s10019_s7 + $0x928] sm:$0xff] }
  0x5c   : > { %494 = vst [vmem:[%s10027_s8 + $0x490] sm:$0xff] %v493_v19  ;;  %v497_v21 = vld [vmem:[%s10019_s7 + $0x940] sm:$0xff]  ;;  %v499_v22 = vld [vmem:[%s10019_s7 + $0x948] sm:$0xff]  ;;  %496 = vst [vmem:[%s10027_s8 + $0x498] sm:$0xff] %v495_v20 }
  0x5d   : > { %498 = vst [vmem:[%s10027_s8 + $0x4a0] sm:$0xff] %v497_v21  ;;  %500 = vst [vmem:[%s10027_s8 + $0x4a8] sm:$0xff] %v499_v22  ;;  %v501_v23 = vld [vmem:[%s10019_s7 + $0x960] sm:$0xff]  ;;  %v503_v24 = vld [vmem:[%s10019_s7 + $0x968] sm:$0xff] }
  0x5e   : > { %v505_v25 = vld [vmem:[%s10019_s7 + $0x980] sm:$0xff]  ;;  %502 = vst [vmem:[%s10027_s8 + $0x4b0] sm:$0xff] %v501_v23  ;;  %504 = vst [vmem:[%s10027_s8 + $0x4b8] sm:$0xff] %v503_v24  ;;  %v507_v26 = vld [vmem:[%s10019_s7 + $0x988] sm:$0xff] }
  0x5f   : > { %506 = vst [vmem:[%s10027_s8 + $0x4c0] sm:$0xff] %v505_v25  ;;  %v509_v27 = vld [vmem:[%s10019_s7 + $0x9a0] sm:$0xff]  ;;  %v511_v28 = vld [vmem:[%s10019_s7 + $0x9a8] sm:$0xff]  ;;  %508 = vst [vmem:[%s10027_s8 + $0x4c8] sm:$0xff] %v507_v26 }
  0x60   : > { %510 = vst [vmem:[%s10027_s8 + $0x4d0] sm:$0xff] %v509_v27  ;;  %512 = vst [vmem:[%s10027_s8 + $0x4d8] sm:$0xff] %v511_v28  ;;  %v513_v29 = vld [vmem:[%s10019_s7 + $0x9c0] sm:$0xff]  ;;  %v515_v30 = vld [vmem:[%s10019_s7 + $0x9c8] sm:$0xff] }
  0x61   : > { %v517_v31 = vld [vmem:[%s10019_s7 + $0x9e0] sm:$0xff]  ;;  %514 = vst [vmem:[%s10027_s8 + $0x4e0] sm:$0xff] %v513_v29  ;;  %516 = vst [vmem:[%s10027_s8 + $0x4e8] sm:$0xff] %v515_v30  ;;  %v519_v32 = vld [vmem:[%s10019_s7 + $0x9e8] sm:$0xff] }
  0x62   : > { %518 = vst [vmem:[%s10027_s8 + $0x4f0] sm:$0xff] %v517_v31  ;;  %v521_v33 = vld [vmem:[%s10019_s7 + $0xa00] sm:$0xff]  ;;  %v523_v34 = vld [vmem:[%s10019_s7 + $0xa08] sm:$0xff]  ;;  %520 = vst [vmem:[%s10027_s8 + $0x4f8] sm:$0xff] %v519_v32 }
  0x63   : > { %522 = vst [vmem:[%s10027_s8 + $0x500] sm:$0xff] %v521_v33  ;;  %524 = vst [vmem:[%s10027_s8 + $0x508] sm:$0xff] %v523_v34  ;;  %v525_v35 = vld [vmem:[%s10019_s7 + $0xa20] sm:$0xff]  ;;  %v527_v36 = vld [vmem:[%s10019_s7 + $0xa28] sm:$0xff] }
  0x64   : > { %v529_v37 = vld [vmem:[%s10019_s7 + $0xa40] sm:$0xff]  ;;  %526 = vst [vmem:[%s10027_s8 + $0x510] sm:$0xff] %v525_v35  ;;  %528 = vst [vmem:[%s10027_s8 + $0x518] sm:$0xff] %v527_v36  ;;  %v531_v38 = vld [vmem:[%s10019_s7 + $0xa48] sm:$0xff] }
  0x65   : > { %530 = vst [vmem:[%s10027_s8 + $0x520] sm:$0xff] %v529_v37  ;;  %v533_v39 = vld [vmem:[%s10019_s7 + $0xa60] sm:$0xff]  ;;  %v535_v40 = vld [vmem:[%s10019_s7 + $0xa68] sm:$0xff]  ;;  %532 = vst [vmem:[%s10027_s8 + $0x528] sm:$0xff] %v531_v38 }
  0x66   : > { %534 = vst [vmem:[%s10027_s8 + $0x530] sm:$0xff] %v533_v39  ;;  %536 = vst [vmem:[%s10027_s8 + $0x538] sm:$0xff] %v535_v40  ;;  %v537_v41 = vld [vmem:[%s10019_s7 + $0xa80] sm:$0xff]  ;;  %v539_v42 = vld [vmem:[%s10019_s7 + $0xa88] sm:$0xff] }
  0x67   : > { %v541_v43 = vld [vmem:[%s10019_s7 + $0xaa0] sm:$0xff]  ;;  %538 = vst [vmem:[%s10027_s8 + $0x540] sm:$0xff] %v537_v41  ;;  %540 = vst [vmem:[%s10027_s8 + $0x548] sm:$0xff] %v539_v42  ;;  %v543_v44 = vld [vmem:[%s10019_s7 + $0xaa8] sm:$0xff] }
  0x68   : > { %542 = vst [vmem:[%s10027_s8 + $0x550] sm:$0xff] %v541_v43  ;;  %v545_v45 = vld [vmem:[%s10019_s7 + $0xac0] sm:$0xff]  ;;  %v547_v46 = vld [vmem:[%s10019_s7 + $0xac8] sm:$0xff]  ;;  %544 = vst [vmem:[%s10027_s8 + $0x558] sm:$0xff] %v543_v44 }
  0x69   : > { %546 = vst [vmem:[%s10027_s8 + $0x560] sm:$0xff] %v545_v45  ;;  %548 = vst [vmem:[%s10027_s8 + $0x568] sm:$0xff] %v547_v46  ;;  %v549_v47 = vld [vmem:[%s10019_s7 + $0xae0] sm:$0xff]  ;;  %v551_v48 = vld [vmem:[%s10019_s7 + $0xae8] sm:$0xff] }
  0x6a   : > { %v553_v49 = vld [vmem:[%s10019_s7 + $0xb00] sm:$0xff]  ;;  %550 = vst [vmem:[%s10027_s8 + $0x570] sm:$0xff] %v549_v47  ;;  %552 = vst [vmem:[%s10027_s8 + $0x578] sm:$0xff] %v551_v48  ;;  %v555_v50 = vld [vmem:[%s10019_s7 + $0xb08] sm:$0xff] }
  0x6b   : > { %554 = vst [vmem:[%s10027_s8 + $0x580] sm:$0xff] %v553_v49  ;;  %v557_v51 = vld [vmem:[%s10019_s7 + $0xb20] sm:$0xff]  ;;  %v559_v52 = vld [vmem:[%s10019_s7 + $0xb28] sm:$0xff]  ;;  %556 = vst [vmem:[%s10027_s8 + $0x588] sm:$0xff] %v555_v50 }
  0x6c   : > { %558 = vst [vmem:[%s10027_s8 + $0x590] sm:$0xff] %v557_v51  ;;  %560 = vst [vmem:[%s10027_s8 + $0x598] sm:$0xff] %v559_v52  ;;  %v561_v53 = vld [vmem:[%s10019_s7 + $0xb40] sm:$0xff]  ;;  %v563_v54 = vld [vmem:[%s10019_s7 + $0xb48] sm:$0xff] }
  0x6d   : > { %v565_v55 = vld [vmem:[%s10019_s7 + $0xb60] sm:$0xff]  ;;  %562 = vst [vmem:[%s10027_s8 + $0x5a0] sm:$0xff] %v561_v53  ;;  %564 = vst [vmem:[%s10027_s8 + $0x5a8] sm:$0xff] %v563_v54  ;;  %v567_v56 = vld [vmem:[%s10019_s7 + $0xb68] sm:$0xff] }
  0x6e   : > { %566 = vst [vmem:[%s10027_s8 + $0x5b0] sm:$0xff] %v565_v55  ;;  %v569_v57 = vld [vmem:[%s10019_s7 + $0xb80] sm:$0xff]  ;;  %v571_v58 = vld [vmem:[%s10019_s7 + $0xb88] sm:$0xff]  ;;  %568 = vst [vmem:[%s10027_s8 + $0x5b8] sm:$0xff] %v567_v56 }
  0x6f   : > { %570 = vst [vmem:[%s10027_s8 + $0x5c0] sm:$0xff] %v569_v57  ;;  %572 = vst [vmem:[%s10027_s8 + $0x5c8] sm:$0xff] %v571_v58  ;;  %v573_v59 = vld [vmem:[%s10019_s7 + $0xba0] sm:$0xff]  ;;  %v575_v60 = vld [vmem:[%s10019_s7 + $0xba8] sm:$0xff] }
  0x70   : > { %v577_v61 = vld [vmem:[%s10019_s7 + $0xbc0] sm:$0xff]  ;;  %574 = vst [vmem:[%s10027_s8 + $0x5d0] sm:$0xff] %v573_v59  ;;  %576 = vst [vmem:[%s10027_s8 + $0x5d8] sm:$0xff] %v575_v60  ;;  %v579_v62 = vld [vmem:[%s10019_s7 + $0xbc8] sm:$0xff] }
  0x71   : > { %578 = vst [vmem:[%s10027_s8 + $0x5e0] sm:$0xff] %v577_v61  ;;  %v581_v63 = vld [vmem:[%s10019_s7 + $0xbe0] sm:$0xff]  ;;  %v583_v0 = vld [vmem:[%s10019_s7 + $0xbe8] sm:$0xff]  ;;  %580 = vst [vmem:[%s10027_s8 + $0x5e8] sm:$0xff] %v579_v62 }
  0x72   : > { %582 = vst [vmem:[%s10027_s8 + $0x5f0] sm:$0xff] %v581_v63  ;;  %584 = vst [vmem:[%s10027_s8 + $0x5f8] sm:$0xff] %v583_v0  ;;  %v585_v1 = vld [vmem:[%s10019_s7 + $0xc00] sm:$0xff]  ;;  %v587_v2 = vld [vmem:[%s10019_s7 + $0xc08] sm:$0xff] }
  0x73   : > { %v589_v3 = vld [vmem:[%s10019_s7 + $0xc20] sm:$0xff]  ;;  %586 = vst [vmem:[%s10027_s8 + $0x600] sm:$0xff] %v585_v1  ;;  %588 = vst [vmem:[%s10027_s8 + $0x608] sm:$0xff] %v587_v2  ;;  %v591_v4 = vld [vmem:[%s10019_s7 + $0xc28] sm:$0xff] }
  0x74   : > { %590 = vst [vmem:[%s10027_s8 + $0x610] sm:$0xff] %v589_v3  ;;  %v593_v5 = vld [vmem:[%s10019_s7 + $0xc40] sm:$0xff]  ;;  %v595_v6 = vld [vmem:[%s10019_s7 + $0xc48] sm:$0xff]  ;;  %592 = vst [vmem:[%s10027_s8 + $0x618] sm:$0xff] %v591_v4 }
  0x75   : > { %594 = vst [vmem:[%s10027_s8 + $0x620] sm:$0xff] %v593_v5  ;;  %596 = vst [vmem:[%s10027_s8 + $0x628] sm:$0xff] %v595_v6  ;;  %v597_v7 = vld [vmem:[%s10019_s7 + $0xc60] sm:$0xff]  ;;  %v599_v8 = vld [vmem:[%s10019_s7 + $0xc68] sm:$0xff] }
  0x76   : > { %v601_v9 = vld [vmem:[%s10019_s7 + $0xc80] sm:$0xff]  ;;  %598 = vst [vmem:[%s10027_s8 + $0x630] sm:$0xff] %v597_v7  ;;  %600 = vst [vmem:[%s10027_s8 + $0x638] sm:$0xff] %v599_v8  ;;  %v603_v10 = vld [vmem:[%s10019_s7 + $0xc88] sm:$0xff] }
  0x77   : > { %602 = vst [vmem:[%s10027_s8 + $0x640] sm:$0xff] %v601_v9  ;;  %v605_v11 = vld [vmem:[%s10019_s7 + $0xca0] sm:$0xff]  ;;  %v607_v12 = vld [vmem:[%s10019_s7 + $0xca8] sm:$0xff]  ;;  %604 = vst [vmem:[%s10027_s8 + $0x648] sm:$0xff] %v603_v10 }
  0x78   : > { %606 = vst [vmem:[%s10027_s8 + $0x650] sm:$0xff] %v605_v11  ;;  %608 = vst [vmem:[%s10027_s8 + $0x658] sm:$0xff] %v607_v12  ;;  %v609_v13 = vld [vmem:[%s10019_s7 + $0xcc0] sm:$0xff]  ;;  %v611_v14 = vld [vmem:[%s10019_s7 + $0xcc8] sm:$0xff] }
  0x79   : > { %v613_v15 = vld [vmem:[%s10019_s7 + $0xce0] sm:$0xff]  ;;  %610 = vst [vmem:[%s10027_s8 + $0x660] sm:$0xff] %v609_v13  ;;  %612 = vst [vmem:[%s10027_s8 + $0x668] sm:$0xff] %v611_v14  ;;  %v615_v16 = vld [vmem:[%s10019_s7 + $0xce8] sm:$0xff] }
  0x7a   : > { %614 = vst [vmem:[%s10027_s8 + $0x670] sm:$0xff] %v613_v15  ;;  %v617_v17 = vld [vmem:[%s10019_s7 + $0xd00] sm:$0xff]  ;;  %v619_v18 = vld [vmem:[%s10019_s7 + $0xd08] sm:$0xff]  ;;  %616 = vst [vmem:[%s10027_s8 + $0x678] sm:$0xff] %v615_v16 }
  0x7b   : > { %618 = vst [vmem:[%s10027_s8 + $0x680] sm:$0xff] %v617_v17  ;;  %620 = vst [vmem:[%s10027_s8 + $0x688] sm:$0xff] %v619_v18  ;;  %v621_v19 = vld [vmem:[%s10019_s7 + $0xd20] sm:$0xff]  ;;  %v623_v20 = vld [vmem:[%s10019_s7 + $0xd28] sm:$0xff] }
  0x7c   : > { %v625_v21 = vld [vmem:[%s10019_s7 + $0xd40] sm:$0xff]  ;;  %622 = vst [vmem:[%s10027_s8 + $0x690] sm:$0xff] %v621_v19  ;;  %624 = vst [vmem:[%s10027_s8 + $0x698] sm:$0xff] %v623_v20  ;;  %v627_v22 = vld [vmem:[%s10019_s7 + $0xd48] sm:$0xff] }
  0x7d   : > { %626 = vst [vmem:[%s10027_s8 + $0x6a0] sm:$0xff] %v625_v21  ;;  %v629_v23 = vld [vmem:[%s10019_s7 + $0xd60] sm:$0xff]  ;;  %v631_v24 = vld [vmem:[%s10019_s7 + $0xd68] sm:$0xff]  ;;  %628 = vst [vmem:[%s10027_s8 + $0x6a8] sm:$0xff] %v627_v22 }
  0x7e   : > { %630 = vst [vmem:[%s10027_s8 + $0x6b0] sm:$0xff] %v629_v23  ;;  %632 = vst [vmem:[%s10027_s8 + $0x6b8] sm:$0xff] %v631_v24  ;;  %v633_v25 = vld [vmem:[%s10019_s7 + $0xd80] sm:$0xff]  ;;  %v635_v26 = vld [vmem:[%s10019_s7 + $0xd88] sm:$0xff] }
  0x7f   : > { %v637_v27 = vld [vmem:[%s10019_s7 + $0xda0] sm:$0xff]  ;;  %634 = vst [vmem:[%s10027_s8 + $0x6c0] sm:$0xff] %v633_v25  ;;  %636 = vst [vmem:[%s10027_s8 + $0x6c8] sm:$0xff] %v635_v26  ;;  %v639_v28 = vld [vmem:[%s10019_s7 + $0xda8] sm:$0xff] }
  0x80   : > { %638 = vst [vmem:[%s10027_s8 + $0x6d0] sm:$0xff] %v637_v27  ;;  %v641_v29 = vld [vmem:[%s10019_s7 + $0xdc0] sm:$0xff]  ;;  %v643_v30 = vld [vmem:[%s10019_s7 + $0xdc8] sm:$0xff]  ;;  %640 = vst [vmem:[%s10027_s8 + $0x6d8] sm:$0xff] %v639_v28 }
  0x81   : > { %642 = vst [vmem:[%s10027_s8 + $0x6e0] sm:$0xff] %v641_v29  ;;  %644 = vst [vmem:[%s10027_s8 + $0x6e8] sm:$0xff] %v643_v30  ;;  %v645_v31 = vld [vmem:[%s10019_s7 + $0xde0] sm:$0xff]  ;;  %v647_v32 = vld [vmem:[%s10019_s7 + $0xde8] sm:$0xff] }
  0x82   : > { %v649_v33 = vld [vmem:[%s10019_s7 + $0xe00] sm:$0xff]  ;;  %646 = vst [vmem:[%s10027_s8 + $0x6f0] sm:$0xff] %v645_v31  ;;  %648 = vst [vmem:[%s10027_s8 + $0x6f8] sm:$0xff] %v647_v32  ;;  %v651_v34 = vld [vmem:[%s10019_s7 + $0xe08] sm:$0xff] }
  0x83   : > { %650 = vst [vmem:[%s10027_s8 + $0x700] sm:$0xff] %v649_v33  ;;  %v653_v35 = vld [vmem:[%s10019_s7 + $0xe20] sm:$0xff]  ;;  %v655_v36 = vld [vmem:[%s10019_s7 + $0xe28] sm:$0xff]  ;;  %652 = vst [vmem:[%s10027_s8 + $0x708] sm:$0xff] %v651_v34 }
  0x84   : > { %654 = vst [vmem:[%s10027_s8 + $0x710] sm:$0xff] %v653_v35  ;;  %656 = vst [vmem:[%s10027_s8 + $0x718] sm:$0xff] %v655_v36  ;;  %v657_v37 = vld [vmem:[%s10019_s7 + $0xe40] sm:$0xff]  ;;  %v659_v38 = vld [vmem:[%s10019_s7 + $0xe48] sm:$0xff] }
  0x85   : > { %v661_v39 = vld [vmem:[%s10019_s7 + $0xe60] sm:$0xff]  ;;  %658 = vst [vmem:[%s10027_s8 + $0x720] sm:$0xff] %v657_v37  ;;  %660 = vst [vmem:[%s10027_s8 + $0x728] sm:$0xff] %v659_v38  ;;  %v663_v40 = vld [vmem:[%s10019_s7 + $0xe68] sm:$0xff] }
  0x86   : > { %662 = vst [vmem:[%s10027_s8 + $0x730] sm:$0xff] %v661_v39  ;;  %v665_v41 = vld [vmem:[%s10019_s7 + $0xe80] sm:$0xff]  ;;  %v667_v42 = vld [vmem:[%s10019_s7 + $0xe88] sm:$0xff]  ;;  %664 = vst [vmem:[%s10027_s8 + $0x738] sm:$0xff] %v663_v40 }
  0x87   : > { %666 = vst [vmem:[%s10027_s8 + $0x740] sm:$0xff] %v665_v41  ;;  %668 = vst [vmem:[%s10027_s8 + $0x748] sm:$0xff] %v667_v42  ;;  %v669_v43 = vld [vmem:[%s10019_s7 + $0xea0] sm:$0xff]  ;;  %v671_v44 = vld [vmem:[%s10019_s7 + $0xea8] sm:$0xff] }
  0x88   : > { %v673_v45 = vld [vmem:[%s10019_s7 + $0xec0] sm:$0xff]  ;;  %670 = vst [vmem:[%s10027_s8 + $0x750] sm:$0xff] %v669_v43  ;;  %672 = vst [vmem:[%s10027_s8 + $0x758] sm:$0xff] %v671_v44  ;;  %v675_v46 = vld [vmem:[%s10019_s7 + $0xec8] sm:$0xff] }
  0x89   : > { %674 = vst [vmem:[%s10027_s8 + $0x760] sm:$0xff] %v673_v45  ;;  %v677_v47 = vld [vmem:[%s10019_s7 + $0xee0] sm:$0xff]  ;;  %v679_v48 = vld [vmem:[%s10019_s7 + $0xee8] sm:$0xff]  ;;  %676 = vst [vmem:[%s10027_s8 + $0x768] sm:$0xff] %v675_v46 }
  0x8a   : > { %678 = vst [vmem:[%s10027_s8 + $0x770] sm:$0xff] %v677_v47  ;;  %680 = vst [vmem:[%s10027_s8 + $0x778] sm:$0xff] %v679_v48  ;;  %v681_v49 = vld [vmem:[%s10019_s7 + $0xf00] sm:$0xff]  ;;  %v683_v50 = vld [vmem:[%s10019_s7 + $0xf08] sm:$0xff] }
  0x8b   : > { %v685_v51 = vld [vmem:[%s10019_s7 + $0xf20] sm:$0xff]  ;;  %682 = vst [vmem:[%s10027_s8 + $0x780] sm:$0xff] %v681_v49  ;;  %684 = vst [vmem:[%s10027_s8 + $0x788] sm:$0xff] %v683_v50  ;;  %v687_v52 = vld [vmem:[%s10019_s7 + $0xf28] sm:$0xff] }
  0x8c   : > { %686 = vst [vmem:[%s10027_s8 + $0x790] sm:$0xff] %v685_v51  ;;  %v689_v53 = vld [vmem:[%s10019_s7 + $0xf40] sm:$0xff]  ;;  %v691_v54 = vld [vmem:[%s10019_s7 + $0xf48] sm:$0xff]  ;;  %688 = vst [vmem:[%s10027_s8 + $0x798] sm:$0xff] %v687_v52 }
  0x8d   : > { %690 = vst [vmem:[%s10027_s8 + $0x7a0] sm:$0xff] %v689_v53  ;;  %692 = vst [vmem:[%s10027_s8 + $0x7a8] sm:$0xff] %v691_v54  ;;  %v693_v55 = vld [vmem:[%s10019_s7 + $0xf60] sm:$0xff]  ;;  %v695_v56 = vld [vmem:[%s10019_s7 + $0xf68] sm:$0xff] }
  0x8e   : > { %v697_v57 = vld [vmem:[%s10019_s7 + $0xf80] sm:$0xff]  ;;  %694 = vst [vmem:[%s10027_s8 + $0x7b0] sm:$0xff] %v693_v55  ;;  %696 = vst [vmem:[%s10027_s8 + $0x7b8] sm:$0xff] %v695_v56  ;;  %v699_v58 = vld [vmem:[%s10019_s7 + $0xf88] sm:$0xff] }
  0x8f   : > { %698 = vst [vmem:[%s10027_s8 + $0x7c0] sm:$0xff] %v697_v57  ;;  %v701_v59 = vld [vmem:[%s10019_s7 + $0xfa0] sm:$0xff]  ;;  %v703_v60 = vld [vmem:[%s10019_s7 + $0xfa8] sm:$0xff]  ;;  %700 = vst [vmem:[%s10027_s8 + $0x7c8] sm:$0xff] %v699_v58 }
  0x90   : > { %702 = vst [vmem:[%s10027_s8 + $0x7d0] sm:$0xff] %v701_v59  ;;  %704 = vst [vmem:[%s10027_s8 + $0x7d8] sm:$0xff] %v703_v60  ;;  %v705_v61 = vld [vmem:[%s10019_s7 + $0xfc0] sm:$0xff]  ;;  %v707_v62 = vld [vmem:[%s10019_s7 + $0xfc8] sm:$0xff] }
  0x91   : > { %v709_v63 = vld [vmem:[%s10019_s7 + $0xfe0] sm:$0xff]  ;;  %706 = vst [vmem:[%s10027_s8 + $0x7e0] sm:$0xff] %v705_v61  ;;  %708 = vst [vmem:[%s10027_s8 + $0x7e8] sm:$0xff] %v707_v62  ;;  %v711_v0 = vld [vmem:[%s10019_s7 + $0xfe8] sm:$0xff] }
  0x92   : > { %710 = vst [vmem:[%s10027_s8 + $0x7f0] sm:$0xff] %v709_v63  ;;  %v713_v1 = vld [vmem:[%s10019_s7 + $0x1000] sm:$0xff]  ;;  %v715_v2 = vld [vmem:[%s10019_s7 + $0x1008] sm:$0xff]  ;;  %712 = vst [vmem:[%s10027_s8 + $0x7f8] sm:$0xff] %v711_v0 }
  0x93   : > { %714 = vst [vmem:[%s10027_s8 + $0x800] sm:$0xff] %v713_v1  ;;  %716 = vst [vmem:[%s10027_s8 + $0x808] sm:$0xff] %v715_v2  ;;  %v717_v3 = vld [vmem:[%s10019_s7 + $0x1020] sm:$0xff]  ;;  %v719_v4 = vld [vmem:[%s10019_s7 + $0x1028] sm:$0xff] }
  0x94   : > { %v721_v5 = vld [vmem:[%s10019_s7 + $0x1040] sm:$0xff]  ;;  %718 = vst [vmem:[%s10027_s8 + $0x810] sm:$0xff] %v717_v3  ;;  %720 = vst [vmem:[%s10027_s8 + $0x818] sm:$0xff] %v719_v4  ;;  %v723_v6 = vld [vmem:[%s10019_s7 + $0x1048] sm:$0xff] }
  0x95   : > { %722 = vst [vmem:[%s10027_s8 + $0x820] sm:$0xff] %v721_v5  ;;  %v725_v7 = vld [vmem:[%s10019_s7 + $0x1060] sm:$0xff]  ;;  %v727_v8 = vld [vmem:[%s10019_s7 + $0x1068] sm:$0xff]  ;;  %724 = vst [vmem:[%s10027_s8 + $0x828] sm:$0xff] %v723_v6 }
  0x96   : > { %726 = vst [vmem:[%s10027_s8 + $0x830] sm:$0xff] %v725_v7  ;;  %728 = vst [vmem:[%s10027_s8 + $0x838] sm:$0xff] %v727_v8  ;;  %v729_v9 = vld [vmem:[%s10019_s7 + $0x1080] sm:$0xff]  ;;  %v731_v10 = vld [vmem:[%s10019_s7 + $0x1088] sm:$0xff] }
  0x97   : > { %v733_v11 = vld [vmem:[%s10019_s7 + $0x10a0] sm:$0xff]  ;;  %730 = vst [vmem:[%s10027_s8 + $0x840] sm:$0xff] %v729_v9  ;;  %732 = vst [vmem:[%s10027_s8 + $0x848] sm:$0xff] %v731_v10  ;;  %v735_v12 = vld [vmem:[%s10019_s7 + $0x10a8] sm:$0xff] }
  0x98   : > { %734 = vst [vmem:[%s10027_s8 + $0x850] sm:$0xff] %v733_v11  ;;  %v737_v13 = vld [vmem:[%s10019_s7 + $0x10c0] sm:$0xff]  ;;  %v739_v14 = vld [vmem:[%s10019_s7 + $0x10c8] sm:$0xff]  ;;  %736 = vst [vmem:[%s10027_s8 + $0x858] sm:$0xff] %v735_v12 }
  0x99   : > { %738 = vst [vmem:[%s10027_s8 + $0x860] sm:$0xff] %v737_v13  ;;  %740 = vst [vmem:[%s10027_s8 + $0x868] sm:$0xff] %v739_v14  ;;  %v741_v15 = vld [vmem:[%s10019_s7 + $0x10e0] sm:$0xff]  ;;  %v743_v16 = vld [vmem:[%s10019_s7 + $0x10e8] sm:$0xff] }
  0x9a   : > { %v745_v17 = vld [vmem:[%s10019_s7 + $0x1100] sm:$0xff]  ;;  %742 = vst [vmem:[%s10027_s8 + $0x870] sm:$0xff] %v741_v15  ;;  %744 = vst [vmem:[%s10027_s8 + $0x878] sm:$0xff] %v743_v16  ;;  %v747_v18 = vld [vmem:[%s10019_s7 + $0x1108] sm:$0xff] }
  0x9b   : > { %746 = vst [vmem:[%s10027_s8 + $0x880] sm:$0xff] %v745_v17  ;;  %v749_v19 = vld [vmem:[%s10019_s7 + $0x1120] sm:$0xff]  ;;  %v751_v20 = vld [vmem:[%s10019_s7 + $0x1128] sm:$0xff]  ;;  %748 = vst [vmem:[%s10027_s8 + $0x888] sm:$0xff] %v747_v18 }
  0x9c   : > { %750 = vst [vmem:[%s10027_s8 + $0x890] sm:$0xff] %v749_v19  ;;  %752 = vst [vmem:[%s10027_s8 + $0x898] sm:$0xff] %v751_v20  ;;  %v753_v21 = vld [vmem:[%s10019_s7 + $0x1140] sm:$0xff]  ;;  %v755_v22 = vld [vmem:[%s10019_s7 + $0x1148] sm:$0xff] }
  0x9d   : > { %v757_v23 = vld [vmem:[%s10019_s7 + $0x1160] sm:$0xff]  ;;  %754 = vst [vmem:[%s10027_s8 + $0x8a0] sm:$0xff] %v753_v21  ;;  %756 = vst [vmem:[%s10027_s8 + $0x8a8] sm:$0xff] %v755_v22  ;;  %v759_v24 = vld [vmem:[%s10019_s7 + $0x1168] sm:$0xff] }
  0x9e   : > { %758 = vst [vmem:[%s10027_s8 + $0x8b0] sm:$0xff] %v757_v23  ;;  %v761_v25 = vld [vmem:[%s10019_s7 + $0x1180] sm:$0xff]  ;;  %v763_v26 = vld [vmem:[%s10019_s7 + $0x1188] sm:$0xff]  ;;  %760 = vst [vmem:[%s10027_s8 + $0x8b8] sm:$0xff] %v759_v24 }
  0x9f   : > { %762 = vst [vmem:[%s10027_s8 + $0x8c0] sm:$0xff] %v761_v25  ;;  %764 = vst [vmem:[%s10027_s8 + $0x8c8] sm:$0xff] %v763_v26  ;;  %v765_v27 = vld [vmem:[%s10019_s7 + $0x11a0] sm:$0xff]  ;;  %v767_v28 = vld [vmem:[%s10019_s7 + $0x11a8] sm:$0xff] }
  0xa0   : > { %v769_v29 = vld [vmem:[%s10019_s7 + $0x11c0] sm:$0xff]  ;;  %766 = vst [vmem:[%s10027_s8 + $0x8d0] sm:$0xff] %v765_v27  ;;  %768 = vst [vmem:[%s10027_s8 + $0x8d8] sm:$0xff] %v767_v28  ;;  %v771_v30 = vld [vmem:[%s10019_s7 + $0x11c8] sm:$0xff] }
  0xa1   : > { %770 = vst [vmem:[%s10027_s8 + $0x8e0] sm:$0xff] %v769_v29  ;;  %v773_v31 = vld [vmem:[%s10019_s7 + $0x11e0] sm:$0xff]  ;;  %v775_v32 = vld [vmem:[%s10019_s7 + $0x11e8] sm:$0xff]  ;;  %772 = vst [vmem:[%s10027_s8 + $0x8e8] sm:$0xff] %v771_v30 }
  0xa2   : > { %774 = vst [vmem:[%s10027_s8 + $0x8f0] sm:$0xff] %v773_v31  ;;  %776 = vst [vmem:[%s10027_s8 + $0x8f8] sm:$0xff] %v775_v32  ;;  %v777_v33 = vld [vmem:[%s10019_s7 + $0x1200] sm:$0xff]  ;;  %v779_v34 = vld [vmem:[%s10019_s7 + $0x1208] sm:$0xff] }
  0xa3   : > { %v781_v35 = vld [vmem:[%s10019_s7 + $0x1220] sm:$0xff]  ;;  %778 = vst [vmem:[%s10027_s8 + $0x900] sm:$0xff] %v777_v33  ;;  %780 = vst [vmem:[%s10027_s8 + $0x908] sm:$0xff] %v779_v34  ;;  %v783_v36 = vld [vmem:[%s10019_s7 + $0x1228] sm:$0xff] }
  0xa4   : > { %782 = vst [vmem:[%s10027_s8 + $0x910] sm:$0xff] %v781_v35  ;;  %v785_v37 = vld [vmem:[%s10019_s7 + $0x1240] sm:$0xff]  ;;  %v787_v38 = vld [vmem:[%s10019_s7 + $0x1248] sm:$0xff]  ;;  %784 = vst [vmem:[%s10027_s8 + $0x918] sm:$0xff] %v783_v36 }
  0xa5   : > { %786 = vst [vmem:[%s10027_s8 + $0x920] sm:$0xff] %v785_v37  ;;  %788 = vst [vmem:[%s10027_s8 + $0x928] sm:$0xff] %v787_v38  ;;  %v789_v39 = vld [vmem:[%s10019_s7 + $0x1260] sm:$0xff]  ;;  %v791_v40 = vld [vmem:[%s10019_s7 + $0x1268] sm:$0xff] }
  0xa6   : > { %v793_v41 = vld [vmem:[%s10019_s7 + $0x1280] sm:$0xff]  ;;  %790 = vst [vmem:[%s10027_s8 + $0x930] sm:$0xff] %v789_v39  ;;  %792 = vst [vmem:[%s10027_s8 + $0x938] sm:$0xff] %v791_v40  ;;  %v795_v42 = vld [vmem:[%s10019_s7 + $0x1288] sm:$0xff] }
  0xa7   : > { %794 = vst [vmem:[%s10027_s8 + $0x940] sm:$0xff] %v793_v41  ;;  %v797_v43 = vld [vmem:[%s10019_s7 + $0x12a0] sm:$0xff]  ;;  %v799_v44 = vld [vmem:[%s10019_s7 + $0x12a8] sm:$0xff]  ;;  %796 = vst [vmem:[%s10027_s8 + $0x948] sm:$0xff] %v795_v42 }
  0xa8   : > { %798 = vst [vmem:[%s10027_s8 + $0x950] sm:$0xff] %v797_v43  ;;  %800 = vst [vmem:[%s10027_s8 + $0x958] sm:$0xff] %v799_v44  ;;  %v801_v45 = vld [vmem:[%s10019_s7 + $0x12c0] sm:$0xff]  ;;  %v803_v46 = vld [vmem:[%s10019_s7 + $0x12c8] sm:$0xff] }
  0xa9   : > { %v805_v47 = vld [vmem:[%s10019_s7 + $0x12e0] sm:$0xff]  ;;  %802 = vst [vmem:[%s10027_s8 + $0x960] sm:$0xff] %v801_v45  ;;  %804 = vst [vmem:[%s10027_s8 + $0x968] sm:$0xff] %v803_v46  ;;  %v807_v48 = vld [vmem:[%s10019_s7 + $0x12e8] sm:$0xff] }
  0xaa   : > { %806 = vst [vmem:[%s10027_s8 + $0x970] sm:$0xff] %v805_v47  ;;  %v809_v49 = vld [vmem:[%s10019_s7 + $0x1300] sm:$0xff]  ;;  %v811_v50 = vld [vmem:[%s10019_s7 + $0x1308] sm:$0xff]  ;;  %808 = vst [vmem:[%s10027_s8 + $0x978] sm:$0xff] %v807_v48 }
  0xab   : > { %810 = vst [vmem:[%s10027_s8 + $0x980] sm:$0xff] %v809_v49  ;;  %812 = vst [vmem:[%s10027_s8 + $0x988] sm:$0xff] %v811_v50  ;;  %v813_v51 = vld [vmem:[%s10019_s7 + $0x1320] sm:$0xff]  ;;  %v815_v52 = vld [vmem:[%s10019_s7 + $0x1328] sm:$0xff] }
  0xac   : > { %v817_v53 = vld [vmem:[%s10019_s7 + $0x1340] sm:$0xff]  ;;  %814 = vst [vmem:[%s10027_s8 + $0x990] sm:$0xff] %v813_v51  ;;  %816 = vst [vmem:[%s10027_s8 + $0x998] sm:$0xff] %v815_v52  ;;  %v819_v54 = vld [vmem:[%s10019_s7 + $0x1348] sm:$0xff] }
  0xad   : > { %818 = vst [vmem:[%s10027_s8 + $0x9a0] sm:$0xff] %v817_v53  ;;  %v821_v55 = vld [vmem:[%s10019_s7 + $0x1360] sm:$0xff]  ;;  %v823_v56 = vld [vmem:[%s10019_s7 + $0x1368] sm:$0xff]  ;;  %820 = vst [vmem:[%s10027_s8 + $0x9a8] sm:$0xff] %v819_v54 }
  0xae   : > { %822 = vst [vmem:[%s10027_s8 + $0x9b0] sm:$0xff] %v821_v55  ;;  %824 = vst [vmem:[%s10027_s8 + $0x9b8] sm:$0xff] %v823_v56  ;;  %v825_v57 = vld [vmem:[%s10019_s7 + $0x1380] sm:$0xff]  ;;  %v827_v58 = vld [vmem:[%s10019_s7 + $0x1388] sm:$0xff] }
  0xaf   : > { %v829_v59 = vld [vmem:[%s10019_s7 + $0x13a0] sm:$0xff]  ;;  %826 = vst [vmem:[%s10027_s8 + $0x9c0] sm:$0xff] %v825_v57  ;;  %828 = vst [vmem:[%s10027_s8 + $0x9c8] sm:$0xff] %v827_v58  ;;  %v831_v60 = vld [vmem:[%s10019_s7 + $0x13a8] sm:$0xff] }
  0xb0   : > { %830 = vst [vmem:[%s10027_s8 + $0x9d0] sm:$0xff] %v829_v59  ;;  %v833_v61 = vld [vmem:[%s10019_s7 + $0x13c0] sm:$0xff]  ;;  %v835_v62 = vld [vmem:[%s10019_s7 + $0x13c8] sm:$0xff]  ;;  %832 = vst [vmem:[%s10027_s8 + $0x9d8] sm:$0xff] %v831_v60 }
  0xb1   : > { %834 = vst [vmem:[%s10027_s8 + $0x9e0] sm:$0xff] %v833_v61  ;;  %836 = vst [vmem:[%s10027_s8 + $0x9e8] sm:$0xff] %v835_v62  ;;  %v837_v63 = vld [vmem:[%s10019_s7 + $0x13e0] sm:$0xff]  ;;  %v839_v0 = vld [vmem:[%s10019_s7 + $0x13e8] sm:$0xff] }
  0xb2   : > { %v841_v1 = vld [vmem:[%s10019_s7 + $0x1400] sm:$0xff]  ;;  %838 = vst [vmem:[%s10027_s8 + $0x9f0] sm:$0xff] %v837_v63  ;;  %840 = vst [vmem:[%s10027_s8 + $0x9f8] sm:$0xff] %v839_v0  ;;  %v843_v2 = vld [vmem:[%s10019_s7 + $0x1408] sm:$0xff] }
  0xb3   : > { %842 = vst [vmem:[%s10027_s8 + $0xa00] sm:$0xff] %v841_v1  ;;  %v845_v3 = vld [vmem:[%s10019_s7 + $0x1420] sm:$0xff]  ;;  %v847_v4 = vld [vmem:[%s10019_s7 + $0x1428] sm:$0xff]  ;;  %844 = vst [vmem:[%s10027_s8 + $0xa08] sm:$0xff] %v843_v2 }
  0xb4   : > { %846 = vst [vmem:[%s10027_s8 + $0xa10] sm:$0xff] %v845_v3  ;;  %848 = vst [vmem:[%s10027_s8 + $0xa18] sm:$0xff] %v847_v4  ;;  %v849_v5 = vld [vmem:[%s10019_s7 + $0x1440] sm:$0xff]  ;;  %v851_v6 = vld [vmem:[%s10019_s7 + $0x1448] sm:$0xff] }
  0xb5   : > { %v853_v7 = vld [vmem:[%s10019_s7 + $0x1460] sm:$0xff]  ;;  %850 = vst [vmem:[%s10027_s8 + $0xa20] sm:$0xff] %v849_v5  ;;  %852 = vst [vmem:[%s10027_s8 + $0xa28] sm:$0xff] %v851_v6  ;;  %v855_v8 = vld [vmem:[%s10019_s7 + $0x1468] sm:$0xff] }
  0xb6   : > { %854 = vst [vmem:[%s10027_s8 + $0xa30] sm:$0xff] %v853_v7  ;;  %v857_v9 = vld [vmem:[%s10019_s7 + $0x1480] sm:$0xff]  ;;  %v859_v10 = vld [vmem:[%s10019_s7 + $0x1488] sm:$0xff]  ;;  %856 = vst [vmem:[%s10027_s8 + $0xa38] sm:$0xff] %v855_v8 }
  0xb7   : > { %858 = vst [vmem:[%s10027_s8 + $0xa40] sm:$0xff] %v857_v9  ;;  %860 = vst [vmem:[%s10027_s8 + $0xa48] sm:$0xff] %v859_v10  ;;  %v861_v11 = vld [vmem:[%s10019_s7 + $0x14a0] sm:$0xff]  ;;  %v863_v12 = vld [vmem:[%s10019_s7 + $0x14a8] sm:$0xff] }
  0xb8   : > { %v865_v13 = vld [vmem:[%s10019_s7 + $0x14c0] sm:$0xff]  ;;  %862 = vst [vmem:[%s10027_s8 + $0xa50] sm:$0xff] %v861_v11  ;;  %864 = vst [vmem:[%s10027_s8 + $0xa58] sm:$0xff] %v863_v12  ;;  %v867_v14 = vld [vmem:[%s10019_s7 + $0x14c8] sm:$0xff] }
  0xb9   : > { %866 = vst [vmem:[%s10027_s8 + $0xa60] sm:$0xff] %v865_v13  ;;  %v869_v15 = vld [vmem:[%s10019_s7 + $0x14e0] sm:$0xff]  ;;  %v871_v16 = vld [vmem:[%s10019_s7 + $0x14e8] sm:$0xff]  ;;  %868 = vst [vmem:[%s10027_s8 + $0xa68] sm:$0xff] %v867_v14 }
  0xba   : > { %870 = vst [vmem:[%s10027_s8 + $0xa70] sm:$0xff] %v869_v15  ;;  %872 = vst [vmem:[%s10027_s8 + $0xa78] sm:$0xff] %v871_v16  ;;  %v873_v17 = vld [vmem:[%s10019_s7 + $0x1500] sm:$0xff]  ;;  %v875_v18 = vld [vmem:[%s10019_s7 + $0x1508] sm:$0xff] }
  0xbb   : > { %v877_v19 = vld [vmem:[%s10019_s7 + $0x1520] sm:$0xff]  ;;  %874 = vst [vmem:[%s10027_s8 + $0xa80] sm:$0xff] %v873_v17  ;;  %876 = vst [vmem:[%s10027_s8 + $0xa88] sm:$0xff] %v875_v18  ;;  %v879_v20 = vld [vmem:[%s10019_s7 + $0x1528] sm:$0xff] }
  0xbc   : > { %878 = vst [vmem:[%s10027_s8 + $0xa90] sm:$0xff] %v877_v19  ;;  %v881_v21 = vld [vmem:[%s10019_s7 + $0x1540] sm:$0xff]  ;;  %v883_v22 = vld [vmem:[%s10019_s7 + $0x1548] sm:$0xff]  ;;  %880 = vst [vmem:[%s10027_s8 + $0xa98] sm:$0xff] %v879_v20 }
  0xbd   : > { %882 = vst [vmem:[%s10027_s8 + $0xaa0] sm:$0xff] %v881_v21  ;;  %884 = vst [vmem:[%s10027_s8 + $0xaa8] sm:$0xff] %v883_v22  ;;  %v885_v23 = vld [vmem:[%s10019_s7 + $0x1560] sm:$0xff]  ;;  %v887_v24 = vld [vmem:[%s10019_s7 + $0x1568] sm:$0xff] }
  0xbe   : > { %v889_v25 = vld [vmem:[%s10019_s7 + $0x1580] sm:$0xff]  ;;  %886 = vst [vmem:[%s10027_s8 + $0xab0] sm:$0xff] %v885_v23  ;;  %888 = vst [vmem:[%s10027_s8 + $0xab8] sm:$0xff] %v887_v24  ;;  %v891_v26 = vld [vmem:[%s10019_s7 + $0x1588] sm:$0xff] }
  0xbf   : > { %890 = vst [vmem:[%s10027_s8 + $0xac0] sm:$0xff] %v889_v25  ;;  %v893_v27 = vld [vmem:[%s10019_s7 + $0x15a0] sm:$0xff]  ;;  %v895_v28 = vld [vmem:[%s10019_s7 + $0x15a8] sm:$0xff]  ;;  %892 = vst [vmem:[%s10027_s8 + $0xac8] sm:$0xff] %v891_v26 }
  0xc0   : > { %894 = vst [vmem:[%s10027_s8 + $0xad0] sm:$0xff] %v893_v27  ;;  %896 = vst [vmem:[%s10027_s8 + $0xad8] sm:$0xff] %v895_v28  ;;  %v897_v29 = vld [vmem:[%s10019_s7 + $0x15c0] sm:$0xff]  ;;  %v899_v30 = vld [vmem:[%s10019_s7 + $0x15c8] sm:$0xff] }
  0xc1   : > { %v901_v31 = vld [vmem:[%s10019_s7 + $0x15e0] sm:$0xff]  ;;  %898 = vst [vmem:[%s10027_s8 + $0xae0] sm:$0xff] %v897_v29  ;;  %900 = vst [vmem:[%s10027_s8 + $0xae8] sm:$0xff] %v899_v30  ;;  %v903_v32 = vld [vmem:[%s10019_s7 + $0x15e8] sm:$0xff] }
  0xc2   : > { %902 = vst [vmem:[%s10027_s8 + $0xaf0] sm:$0xff] %v901_v31  ;;  %v905_v33 = vld [vmem:[%s10019_s7 + $0x1600] sm:$0xff]  ;;  %v907_v34 = vld [vmem:[%s10019_s7 + $0x1608] sm:$0xff]  ;;  %904 = vst [vmem:[%s10027_s8 + $0xaf8] sm:$0xff] %v903_v32 }
  0xc3   : > { %906 = vst [vmem:[%s10027_s8 + $0xb00] sm:$0xff] %v905_v33  ;;  %908 = vst [vmem:[%s10027_s8 + $0xb08] sm:$0xff] %v907_v34  ;;  %v909_v35 = vld [vmem:[%s10019_s7 + $0x1620] sm:$0xff]  ;;  %v911_v36 = vld [vmem:[%s10019_s7 + $0x1628] sm:$0xff] }
  0xc4   : > { %v913_v37 = vld [vmem:[%s10019_s7 + $0x1640] sm:$0xff]  ;;  %910 = vst [vmem:[%s10027_s8 + $0xb10] sm:$0xff] %v909_v35  ;;  %912 = vst [vmem:[%s10027_s8 + $0xb18] sm:$0xff] %v911_v36  ;;  %v915_v38 = vld [vmem:[%s10019_s7 + $0x1648] sm:$0xff] }
  0xc5   : > { %914 = vst [vmem:[%s10027_s8 + $0xb20] sm:$0xff] %v913_v37  ;;  %v917_v39 = vld [vmem:[%s10019_s7 + $0x1660] sm:$0xff]  ;;  %v919_v40 = vld [vmem:[%s10019_s7 + $0x1668] sm:$0xff]  ;;  %916 = vst [vmem:[%s10027_s8 + $0xb28] sm:$0xff] %v915_v38 }
  0xc6   : > { %918 = vst [vmem:[%s10027_s8 + $0xb30] sm:$0xff] %v917_v39  ;;  %920 = vst [vmem:[%s10027_s8 + $0xb38] sm:$0xff] %v919_v40  ;;  %v921_v41 = vld [vmem:[%s10019_s7 + $0x1680] sm:$0xff]  ;;  %v923_v42 = vld [vmem:[%s10019_s7 + $0x1688] sm:$0xff] }
  0xc7   : > { %v925_v43 = vld [vmem:[%s10019_s7 + $0x16a0] sm:$0xff]  ;;  %922 = vst [vmem:[%s10027_s8 + $0xb40] sm:$0xff] %v921_v41  ;;  %924 = vst [vmem:[%s10027_s8 + $0xb48] sm:$0xff] %v923_v42  ;;  %v927_v44 = vld [vmem:[%s10019_s7 + $0x16a8] sm:$0xff] }
  0xc8   : > { %926 = vst [vmem:[%s10027_s8 + $0xb50] sm:$0xff] %v925_v43  ;;  %v929_v45 = vld [vmem:[%s10019_s7 + $0x16c0] sm:$0xff]  ;;  %v931_v46 = vld [vmem:[%s10019_s7 + $0x16c8] sm:$0xff]  ;;  %928 = vst [vmem:[%s10027_s8 + $0xb58] sm:$0xff] %v927_v44 }
  0xc9   : > { %930 = vst [vmem:[%s10027_s8 + $0xb60] sm:$0xff] %v929_v45  ;;  %932 = vst [vmem:[%s10027_s8 + $0xb68] sm:$0xff] %v931_v46  ;;  %v933_v47 = vld [vmem:[%s10019_s7 + $0x16e0] sm:$0xff]  ;;  %v935_v48 = vld [vmem:[%s10019_s7 + $0x16e8] sm:$0xff] }
  0xca   : > { %v937_v49 = vld [vmem:[%s10019_s7 + $0x1700] sm:$0xff]  ;;  %934 = vst [vmem:[%s10027_s8 + $0xb70] sm:$0xff] %v933_v47  ;;  %936 = vst [vmem:[%s10027_s8 + $0xb78] sm:$0xff] %v935_v48  ;;  %v939_v50 = vld [vmem:[%s10019_s7 + $0x1708] sm:$0xff] }
  0xcb   : > { %938 = vst [vmem:[%s10027_s8 + $0xb80] sm:$0xff] %v937_v49  ;;  %v941_v51 = vld [vmem:[%s10019_s7 + $0x1720] sm:$0xff]  ;;  %v943_v52 = vld [vmem:[%s10019_s7 + $0x1728] sm:$0xff]  ;;  %940 = vst [vmem:[%s10027_s8 + $0xb88] sm:$0xff] %v939_v50 }
  0xcc   : > { %942 = vst [vmem:[%s10027_s8 + $0xb90] sm:$0xff] %v941_v51  ;;  %944 = vst [vmem:[%s10027_s8 + $0xb98] sm:$0xff] %v943_v52  ;;  %v945_v53 = vld [vmem:[%s10019_s7 + $0x1740] sm:$0xff]  ;;  %v947_v54 = vld [vmem:[%s10019_s7 + $0x1748] sm:$0xff] }
  0xcd   : > { %v949_v55 = vld [vmem:[%s10019_s7 + $0x1760] sm:$0xff]  ;;  %946 = vst [vmem:[%s10027_s8 + $0xba0] sm:$0xff] %v945_v53  ;;  %948 = vst [vmem:[%s10027_s8 + $0xba8] sm:$0xff] %v947_v54  ;;  %v951_v56 = vld [vmem:[%s10019_s7 + $0x1768] sm:$0xff] }
  0xce   : > { %950 = vst [vmem:[%s10027_s8 + $0xbb0] sm:$0xff] %v949_v55  ;;  %v953_v57 = vld [vmem:[%s10019_s7 + $0x1780] sm:$0xff]  ;;  %v955_v58 = vld [vmem:[%s10019_s7 + $0x1788] sm:$0xff]  ;;  %952 = vst [vmem:[%s10027_s8 + $0xbb8] sm:$0xff] %v951_v56 }
  0xcf   : > { %954 = vst [vmem:[%s10027_s8 + $0xbc0] sm:$0xff] %v953_v57  ;;  %956 = vst [vmem:[%s10027_s8 + $0xbc8] sm:$0xff] %v955_v58  ;;  %v957_v59 = vld [vmem:[%s10019_s7 + $0x17a0] sm:$0xff]  ;;  %v959_v60 = vld [vmem:[%s10019_s7 + $0x17a8] sm:$0xff] }
  0xd0   : > { %v961_v61 = vld [vmem:[%s10019_s7 + $0x17c0] sm:$0xff]  ;;  %958 = vst [vmem:[%s10027_s8 + $0xbd0] sm:$0xff] %v957_v59  ;;  %960 = vst [vmem:[%s10027_s8 + $0xbd8] sm:$0xff] %v959_v60  ;;  %v963_v62 = vld [vmem:[%s10019_s7 + $0x17c8] sm:$0xff] }
  0xd1   : > { %962 = vst [vmem:[%s10027_s8 + $0xbe0] sm:$0xff] %v961_v61  ;;  %v965_v63 = vld [vmem:[%s10019_s7 + $0x17e0] sm:$0xff]  ;;  %v967_v0 = vld [vmem:[%s10019_s7 + $0x17e8] sm:$0xff]  ;;  %964 = vst [vmem:[%s10027_s8 + $0xbe8] sm:$0xff] %v963_v62 }
  0xd2   : > { %966 = vst [vmem:[%s10027_s8 + $0xbf0] sm:$0xff] %v965_v63  ;;  %968 = vst [vmem:[%s10027_s8 + $0xbf8] sm:$0xff] %v967_v0  ;;  %v969_v1 = vld [vmem:[%s10019_s7 + $0x1800] sm:$0xff]  ;;  %v971_v2 = vld [vmem:[%s10019_s7 + $0x1808] sm:$0xff] }
  0xd3   : > { %v973_v3 = vld [vmem:[%s10019_s7 + $0x1820] sm:$0xff]  ;;  %970 = vst [vmem:[%s10027_s8 + $0xc00] sm:$0xff] %v969_v1  ;;  %972 = vst [vmem:[%s10027_s8 + $0xc08] sm:$0xff] %v971_v2  ;;  %v975_v4 = vld [vmem:[%s10019_s7 + $0x1828] sm:$0xff] }
  0xd4   : > { %974 = vst [vmem:[%s10027_s8 + $0xc10] sm:$0xff] %v973_v3  ;;  %v977_v5 = vld [vmem:[%s10019_s7 + $0x1840] sm:$0xff]  ;;  %v979_v6 = vld [vmem:[%s10019_s7 + $0x1848] sm:$0xff]  ;;  %976 = vst [vmem:[%s10027_s8 + $0xc18] sm:$0xff] %v975_v4 }
  0xd5   : > { %978 = vst [vmem:[%s10027_s8 + $0xc20] sm:$0xff] %v977_v5  ;;  %980 = vst [vmem:[%s10027_s8 + $0xc28] sm:$0xff] %v979_v6  ;;  %v981_v7 = vld [vmem:[%s10019_s7 + $0x1860] sm:$0xff]  ;;  %v983_v8 = vld [vmem:[%s10019_s7 + $0x1868] sm:$0xff] }
  0xd6   : > { %v985_v9 = vld [vmem:[%s10019_s7 + $0x1880] sm:$0xff]  ;;  %982 = vst [vmem:[%s10027_s8 + $0xc30] sm:$0xff] %v981_v7  ;;  %984 = vst [vmem:[%s10027_s8 + $0xc38] sm:$0xff] %v983_v8  ;;  %v987_v10 = vld [vmem:[%s10019_s7 + $0x1888] sm:$0xff] }
  0xd7   : > { %986 = vst [vmem:[%s10027_s8 + $0xc40] sm:$0xff] %v985_v9  ;;  %v989_v11 = vld [vmem:[%s10019_s7 + $0x18a0] sm:$0xff]  ;;  %v991_v12 = vld [vmem:[%s10019_s7 + $0x18a8] sm:$0xff]  ;;  %988 = vst [vmem:[%s10027_s8 + $0xc48] sm:$0xff] %v987_v10 }
  0xd8   : > { %990 = vst [vmem:[%s10027_s8 + $0xc50] sm:$0xff] %v989_v11  ;;  %992 = vst [vmem:[%s10027_s8 + $0xc58] sm:$0xff] %v991_v12  ;;  %v993_v13 = vld [vmem:[%s10019_s7 + $0x18c0] sm:$0xff]  ;;  %v995_v14 = vld [vmem:[%s10019_s7 + $0x18c8] sm:$0xff] }
  0xd9   : > { %v997_v15 = vld [vmem:[%s10019_s7 + $0x18e0] sm:$0xff]  ;;  %994 = vst [vmem:[%s10027_s8 + $0xc60] sm:$0xff] %v993_v13  ;;  %996 = vst [vmem:[%s10027_s8 + $0xc68] sm:$0xff] %v995_v14  ;;  %v999_v16 = vld [vmem:[%s10019_s7 + $0x18e8] sm:$0xff] }
  0xda   : > { %998 = vst [vmem:[%s10027_s8 + $0xc70] sm:$0xff] %v997_v15  ;;  %v1001_v17 = vld [vmem:[%s10019_s7 + $0x1900] sm:$0xff]  ;;  %v1003_v18 = vld [vmem:[%s10019_s7 + $0x1908] sm:$0xff]  ;;  %1000 = vst [vmem:[%s10027_s8 + $0xc78] sm:$0xff] %v999_v16 }
  0xdb   : > { %1002 = vst [vmem:[%s10027_s8 + $0xc80] sm:$0xff] %v1001_v17  ;;  %1004 = vst [vmem:[%s10027_s8 + $0xc88] sm:$0xff] %v1003_v18  ;;  %v1005_v19 = vld [vmem:[%s10019_s7 + $0x1920] sm:$0xff]  ;;  %v1007_v20 = vld [vmem:[%s10019_s7 + $0x1928] sm:$0xff] }
  0xdc   : > { %v1009_v21 = vld [vmem:[%s10019_s7 + $0x1940] sm:$0xff]  ;;  %1006 = vst [vmem:[%s10027_s8 + $0xc90] sm:$0xff] %v1005_v19  ;;  %1008 = vst [vmem:[%s10027_s8 + $0xc98] sm:$0xff] %v1007_v20  ;;  %v1011_v22 = vld [vmem:[%s10019_s7 + $0x1948] sm:$0xff] }
  0xdd   : > { %1010 = vst [vmem:[%s10027_s8 + $0xca0] sm:$0xff] %v1009_v21  ;;  %v1013_v23 = vld [vmem:[%s10019_s7 + $0x1960] sm:$0xff]  ;;  %v1015_v24 = vld [vmem:[%s10019_s7 + $0x1968] sm:$0xff]  ;;  %1012 = vst [vmem:[%s10027_s8 + $0xca8] sm:$0xff] %v1011_v22 }
  0xde   : > { %1014 = vst [vmem:[%s10027_s8 + $0xcb0] sm:$0xff] %v1013_v23  ;;  %1016 = vst [vmem:[%s10027_s8 + $0xcb8] sm:$0xff] %v1015_v24  ;;  %v1017_v25 = vld [vmem:[%s10019_s7 + $0x1980] sm:$0xff]  ;;  %v1019_v26 = vld [vmem:[%s10019_s7 + $0x1988] sm:$0xff] }
  0xdf   : > { %v1021_v27 = vld [vmem:[%s10019_s7 + $0x19a0] sm:$0xff]  ;;  %1018 = vst [vmem:[%s10027_s8 + $0xcc0] sm:$0xff] %v1017_v25  ;;  %1020 = vst [vmem:[%s10027_s8 + $0xcc8] sm:$0xff] %v1019_v26  ;;  %v1023_v28 = vld [vmem:[%s10019_s7 + $0x19a8] sm:$0xff] }
  0xe0   : > { %1022 = vst [vmem:[%s10027_s8 + $0xcd0] sm:$0xff] %v1021_v27  ;;  %v1025_v29 = vld [vmem:[%s10019_s7 + $0x19c0] sm:$0xff]  ;;  %v1027_v30 = vld [vmem:[%s10019_s7 + $0x19c8] sm:$0xff]  ;;  %1024 = vst [vmem:[%s10027_s8 + $0xcd8] sm:$0xff] %v1023_v28 }
  0xe1   : > { %1026 = vst [vmem:[%s10027_s8 + $0xce0] sm:$0xff] %v1025_v29  ;;  %1028 = vst [vmem:[%s10027_s8 + $0xce8] sm:$0xff] %v1027_v30  ;;  %v1029_v31 = vld [vmem:[%s10019_s7 + $0x19e0] sm:$0xff]  ;;  %v1031_v32 = vld [vmem:[%s10019_s7 + $0x19e8] sm:$0xff] }
  0xe2   : > { %v1033_v33 = vld [vmem:[%s10019_s7 + $0x1a00] sm:$0xff]  ;;  %1030 = vst [vmem:[%s10027_s8 + $0xcf0] sm:$0xff] %v1029_v31  ;;  %1032 = vst [vmem:[%s10027_s8 + $0xcf8] sm:$0xff] %v1031_v32  ;;  %v1035_v34 = vld [vmem:[%s10019_s7 + $0x1a08] sm:$0xff] }
  0xe3   : > { %1034 = vst [vmem:[%s10027_s8 + $0xd00] sm:$0xff] %v1033_v33  ;;  %v1037_v35 = vld [vmem:[%s10019_s7 + $0x1a20] sm:$0xff]  ;;  %v1039_v36 = vld [vmem:[%s10019_s7 + $0x1a28] sm:$0xff]  ;;  %1036 = vst [vmem:[%s10027_s8 + $0xd08] sm:$0xff] %v1035_v34 }
  0xe4   : > { %1038 = vst [vmem:[%s10027_s8 + $0xd10] sm:$0xff] %v1037_v35  ;;  %1040 = vst [vmem:[%s10027_s8 + $0xd18] sm:$0xff] %v1039_v36  ;;  %v1041_v37 = vld [vmem:[%s10019_s7 + $0x1a40] sm:$0xff]  ;;  %v1043_v38 = vld [vmem:[%s10019_s7 + $0x1a48] sm:$0xff] }
  0xe5   : > { %v1045_v39 = vld [vmem:[%s10019_s7 + $0x1a60] sm:$0xff]  ;;  %1042 = vst [vmem:[%s10027_s8 + $0xd20] sm:$0xff] %v1041_v37  ;;  %1044 = vst [vmem:[%s10027_s8 + $0xd28] sm:$0xff] %v1043_v38  ;;  %v1047_v40 = vld [vmem:[%s10019_s7 + $0x1a68] sm:$0xff] }
  0xe6   : > { %1046 = vst [vmem:[%s10027_s8 + $0xd30] sm:$0xff] %v1045_v39  ;;  %v1049_v41 = vld [vmem:[%s10019_s7 + $0x1a80] sm:$0xff]  ;;  %v1051_v42 = vld [vmem:[%s10019_s7 + $0x1a88] sm:$0xff]  ;;  %1048 = vst [vmem:[%s10027_s8 + $0xd38] sm:$0xff] %v1047_v40 }
  0xe7   : > { %1050 = vst [vmem:[%s10027_s8 + $0xd40] sm:$0xff] %v1049_v41  ;;  %1052 = vst [vmem:[%s10027_s8 + $0xd48] sm:$0xff] %v1051_v42  ;;  %v1053_v43 = vld [vmem:[%s10019_s7 + $0x1aa0] sm:$0xff]  ;;  %v1055_v44 = vld [vmem:[%s10019_s7 + $0x1aa8] sm:$0xff] }
  0xe8   : > { %v1057_v45 = vld [vmem:[%s10019_s7 + $0x1ac0] sm:$0xff]  ;;  %1054 = vst [vmem:[%s10027_s8 + $0xd50] sm:$0xff] %v1053_v43  ;;  %1056 = vst [vmem:[%s10027_s8 + $0xd58] sm:$0xff] %v1055_v44  ;;  %v1059_v46 = vld [vmem:[%s10019_s7 + $0x1ac8] sm:$0xff] }
  0xe9   : > { %1058 = vst [vmem:[%s10027_s8 + $0xd60] sm:$0xff] %v1057_v45  ;;  %v1061_v47 = vld [vmem:[%s10019_s7 + $0x1ae0] sm:$0xff]  ;;  %v1063_v48 = vld [vmem:[%s10019_s7 + $0x1ae8] sm:$0xff]  ;;  %1060 = vst [vmem:[%s10027_s8 + $0xd68] sm:$0xff] %v1059_v46 }
  0xea   : > { %1062 = vst [vmem:[%s10027_s8 + $0xd70] sm:$0xff] %v1061_v47  ;;  %1064 = vst [vmem:[%s10027_s8 + $0xd78] sm:$0xff] %v1063_v48  ;;  %v1065_v49 = vld [vmem:[%s10019_s7 + $0x1b00] sm:$0xff]  ;;  %v1067_v50 = vld [vmem:[%s10019_s7 + $0x1b08] sm:$0xff] }
  0xeb   : > { %v1069_v51 = vld [vmem:[%s10019_s7 + $0x1b20] sm:$0xff]  ;;  %1066 = vst [vmem:[%s10027_s8 + $0xd80] sm:$0xff] %v1065_v49  ;;  %1068 = vst [vmem:[%s10027_s8 + $0xd88] sm:$0xff] %v1067_v50  ;;  %v1071_v52 = vld [vmem:[%s10019_s7 + $0x1b28] sm:$0xff] }
  0xec   : > { %1070 = vst [vmem:[%s10027_s8 + $0xd90] sm:$0xff] %v1069_v51  ;;  %v1073_v53 = vld [vmem:[%s10019_s7 + $0x1b40] sm:$0xff]  ;;  %v1075_v54 = vld [vmem:[%s10019_s7 + $0x1b48] sm:$0xff]  ;;  %1072 = vst [vmem:[%s10027_s8 + $0xd98] sm:$0xff] %v1071_v52 }
  0xed   : > { %1074 = vst [vmem:[%s10027_s8 + $0xda0] sm:$0xff] %v1073_v53  ;;  %1076 = vst [vmem:[%s10027_s8 + $0xda8] sm:$0xff] %v1075_v54  ;;  %v1077_v55 = vld [vmem:[%s10019_s7 + $0x1b60] sm:$0xff]  ;;  %v1079_v56 = vld [vmem:[%s10019_s7 + $0x1b68] sm:$0xff] }
  0xee   : > { %v1081_v57 = vld [vmem:[%s10019_s7 + $0x1b80] sm:$0xff]  ;;  %1078 = vst [vmem:[%s10027_s8 + $0xdb0] sm:$0xff] %v1077_v55  ;;  %1080 = vst [vmem:[%s10027_s8 + $0xdb8] sm:$0xff] %v1079_v56  ;;  %v1083_v58 = vld [vmem:[%s10019_s7 + $0x1b88] sm:$0xff] }
  0xef   : > { %1082 = vst [vmem:[%s10027_s8 + $0xdc0] sm:$0xff] %v1081_v57  ;;  %v1085_v59 = vld [vmem:[%s10019_s7 + $0x1ba0] sm:$0xff]  ;;  %v1087_v60 = vld [vmem:[%s10019_s7 + $0x1ba8] sm:$0xff]  ;;  %1084 = vst [vmem:[%s10027_s8 + $0xdc8] sm:$0xff] %v1083_v58 }
  0xf0   : > { %1086 = vst [vmem:[%s10027_s8 + $0xdd0] sm:$0xff] %v1085_v59  ;;  %1088 = vst [vmem:[%s10027_s8 + $0xdd8] sm:$0xff] %v1087_v60  ;;  %v1089_v61 = vld [vmem:[%s10019_s7 + $0x1bc0] sm:$0xff]  ;;  %v1091_v62 = vld [vmem:[%s10019_s7 + $0x1bc8] sm:$0xff] }
  0xf1   : > { %v1093_v63 = vld [vmem:[%s10019_s7 + $0x1be0] sm:$0xff]  ;;  %1090 = vst [vmem:[%s10027_s8 + $0xde0] sm:$0xff] %v1089_v61  ;;  %1092 = vst [vmem:[%s10027_s8 + $0xde8] sm:$0xff] %v1091_v62  ;;  %v1095_v0 = vld [vmem:[%s10019_s7 + $0x1be8] sm:$0xff] }
  0xf2   : > { %1094 = vst [vmem:[%s10027_s8 + $0xdf0] sm:$0xff] %v1093_v63  ;;  %v1097_v1 = vld [vmem:[%s10019_s7 + $0x1c00] sm:$0xff]  ;;  %v1099_v2 = vld [vmem:[%s10019_s7 + $0x1c08] sm:$0xff]  ;;  %1096 = vst [vmem:[%s10027_s8 + $0xdf8] sm:$0xff] %v1095_v0 }
  0xf3   : > { %1098 = vst [vmem:[%s10027_s8 + $0xe00] sm:$0xff] %v1097_v1  ;;  %1100 = vst [vmem:[%s10027_s8 + $0xe08] sm:$0xff] %v1099_v2  ;;  %v1101_v3 = vld [vmem:[%s10019_s7 + $0x1c20] sm:$0xff]  ;;  %v1103_v4 = vld [vmem:[%s10019_s7 + $0x1c28] sm:$0xff] }
  0xf4   : > { %v1105_v5 = vld [vmem:[%s10019_s7 + $0x1c40] sm:$0xff]  ;;  %1102 = vst [vmem:[%s10027_s8 + $0xe10] sm:$0xff] %v1101_v3  ;;  %1104 = vst [vmem:[%s10027_s8 + $0xe18] sm:$0xff] %v1103_v4  ;;  %v1107_v6 = vld [vmem:[%s10019_s7 + $0x1c48] sm:$0xff] }
  0xf5   : > { %1106 = vst [vmem:[%s10027_s8 + $0xe20] sm:$0xff] %v1105_v5  ;;  %v1109_v7 = vld [vmem:[%s10019_s7 + $0x1c60] sm:$0xff]  ;;  %v1111_v8 = vld [vmem:[%s10019_s7 + $0x1c68] sm:$0xff]  ;;  %1108 = vst [vmem:[%s10027_s8 + $0xe28] sm:$0xff] %v1107_v6 }
  0xf6   : > { %1110 = vst [vmem:[%s10027_s8 + $0xe30] sm:$0xff] %v1109_v7  ;;  %1112 = vst [vmem:[%s10027_s8 + $0xe38] sm:$0xff] %v1111_v8  ;;  %v1113_v9 = vld [vmem:[%s10019_s7 + $0x1c80] sm:$0xff]  ;;  %v1115_v10 = vld [vmem:[%s10019_s7 + $0x1c88] sm:$0xff] }
  0xf7   : > { %v1117_v11 = vld [vmem:[%s10019_s7 + $0x1ca0] sm:$0xff]  ;;  %1114 = vst [vmem:[%s10027_s8 + $0xe40] sm:$0xff] %v1113_v9  ;;  %1116 = vst [vmem:[%s10027_s8 + $0xe48] sm:$0xff] %v1115_v10  ;;  %v1119_v12 = vld [vmem:[%s10019_s7 + $0x1ca8] sm:$0xff] }
  0xf8   : > { %1118 = vst [vmem:[%s10027_s8 + $0xe50] sm:$0xff] %v1117_v11  ;;  %v1121_v13 = vld [vmem:[%s10019_s7 + $0x1cc0] sm:$0xff]  ;;  %v1123_v14 = vld [vmem:[%s10019_s7 + $0x1cc8] sm:$0xff]  ;;  %1120 = vst [vmem:[%s10027_s8 + $0xe58] sm:$0xff] %v1119_v12 }
  0xf9   : > { %1122 = vst [vmem:[%s10027_s8 + $0xe60] sm:$0xff] %v1121_v13  ;;  %1124 = vst [vmem:[%s10027_s8 + $0xe68] sm:$0xff] %v1123_v14  ;;  %v1125_v15 = vld [vmem:[%s10019_s7 + $0x1ce0] sm:$0xff]  ;;  %v1127_v16 = vld [vmem:[%s10019_s7 + $0x1ce8] sm:$0xff] }
  0xfa   : > { %v1129_v17 = vld [vmem:[%s10019_s7 + $0x1d00] sm:$0xff]  ;;  %1126 = vst [vmem:[%s10027_s8 + $0xe70] sm:$0xff] %v1125_v15  ;;  %1128 = vst [vmem:[%s10027_s8 + $0xe78] sm:$0xff] %v1127_v16  ;;  %v1131_v18 = vld [vmem:[%s10019_s7 + $0x1d08] sm:$0xff] }
  0xfb   : > { %1130 = vst [vmem:[%s10027_s8 + $0xe80] sm:$0xff] %v1129_v17  ;;  %v1133_v19 = vld [vmem:[%s10019_s7 + $0x1d20] sm:$0xff]  ;;  %v1135_v20 = vld [vmem:[%s10019_s7 + $0x1d28] sm:$0xff]  ;;  %1132 = vst [vmem:[%s10027_s8 + $0xe88] sm:$0xff] %v1131_v18 }
  0xfc   : > { %1134 = vst [vmem:[%s10027_s8 + $0xe90] sm:$0xff] %v1133_v19  ;;  %1136 = vst [vmem:[%s10027_s8 + $0xe98] sm:$0xff] %v1135_v20  ;;  %v1137_v21 = vld [vmem:[%s10019_s7 + $0x1d40] sm:$0xff]  ;;  %v1139_v22 = vld [vmem:[%s10019_s7 + $0x1d48] sm:$0xff] }
  0xfd   : > { %v1141_v23 = vld [vmem:[%s10019_s7 + $0x1d60] sm:$0xff]  ;;  %1138 = vst [vmem:[%s10027_s8 + $0xea0] sm:$0xff] %v1137_v21  ;;  %1140 = vst [vmem:[%s10027_s8 + $0xea8] sm:$0xff] %v1139_v22  ;;  %v1143_v24 = vld [vmem:[%s10019_s7 + $0x1d68] sm:$0xff] }
  0xfe   : > { %1142 = vst [vmem:[%s10027_s8 + $0xeb0] sm:$0xff] %v1141_v23  ;;  %v1145_v25 = vld [vmem:[%s10019_s7 + $0x1d80] sm:$0xff]  ;;  %v1147_v26 = vld [vmem:[%s10019_s7 + $0x1d88] sm:$0xff]  ;;  %1144 = vst [vmem:[%s10027_s8 + $0xeb8] sm:$0xff] %v1143_v24 }
  0xff   : > { %1146 = vst [vmem:[%s10027_s8 + $0xec0] sm:$0xff] %v1145_v25  ;;  %1148 = vst [vmem:[%s10027_s8 + $0xec8] sm:$0xff] %v1147_v26  ;;  %v1149_v27 = vld [vmem:[%s10019_s7 + $0x1da0] sm:$0xff]  ;;  %v1151_v28 = vld [vmem:[%s10019_s7 + $0x1da8] sm:$0xff] }
 0x100   : > { %v1153_v29 = vld [vmem:[%s10019_s7 + $0x1dc0] sm:$0xff]  ;;  %1150 = vst [vmem:[%s10027_s8 + $0xed0] sm:$0xff] %v1149_v27  ;;  %1152 = vst [vmem:[%s10027_s8 + $0xed8] sm:$0xff] %v1151_v28  ;;  %v1155_v30 = vld [vmem:[%s10019_s7 + $0x1dc8] sm:$0xff] }
 0x101   : > { %1154 = vst [vmem:[%s10027_s8 + $0xee0] sm:$0xff] %v1153_v29  ;;  %v1157_v31 = vld [vmem:[%s10019_s7 + $0x1de0] sm:$0xff]  ;;  %v1159_v32 = vld [vmem:[%s10019_s7 + $0x1de8] sm:$0xff]  ;;  %1156 = vst [vmem:[%s10027_s8 + $0xee8] sm:$0xff] %v1155_v30 }
 0x102   : > { %1158 = vst [vmem:[%s10027_s8 + $0xef0] sm:$0xff] %v1157_v31  ;;  %1160 = vst [vmem:[%s10027_s8 + $0xef8] sm:$0xff] %v1159_v32  ;;  %v1161_v33 = vld [vmem:[%s10019_s7 + $0x1e00] sm:$0xff]  ;;  %v1163_v34 = vld [vmem:[%s10019_s7 + $0x1e08] sm:$0xff] }
 0x103   : > { %v1165_v35 = vld [vmem:[%s10019_s7 + $0x1e20] sm:$0xff]  ;;  %1162 = vst [vmem:[%s10027_s8 + $0xf00] sm:$0xff] %v1161_v33  ;;  %1164 = vst [vmem:[%s10027_s8 + $0xf08] sm:$0xff] %v1163_v34  ;;  %v1167_v36 = vld [vmem:[%s10019_s7 + $0x1e28] sm:$0xff] }
 0x104   : > { %1166 = vst [vmem:[%s10027_s8 + $0xf10] sm:$0xff] %v1165_v35  ;;  %v1169_v37 = vld [vmem:[%s10019_s7 + $0x1e40] sm:$0xff]  ;;  %v1171_v38 = vld [vmem:[%s10019_s7 + $0x1e48] sm:$0xff]  ;;  %1168 = vst [vmem:[%s10027_s8 + $0xf18] sm:$0xff] %v1167_v36 }
 0x105   : > { %1170 = vst [vmem:[%s10027_s8 + $0xf20] sm:$0xff] %v1169_v37  ;;  %1172 = vst [vmem:[%s10027_s8 + $0xf28] sm:$0xff] %v1171_v38  ;;  %v1173_v39 = vld [vmem:[%s10019_s7 + $0x1e60] sm:$0xff]  ;;  %v1175_v40 = vld [vmem:[%s10019_s7 + $0x1e68] sm:$0xff] }
 0x106   : > { %v1177_v41 = vld [vmem:[%s10019_s7 + $0x1e80] sm:$0xff]  ;;  %1174 = vst [vmem:[%s10027_s8 + $0xf30] sm:$0xff] %v1173_v39  ;;  %1176 = vst [vmem:[%s10027_s8 + $0xf38] sm:$0xff] %v1175_v40  ;;  %v1179_v42 = vld [vmem:[%s10019_s7 + $0x1e88] sm:$0xff] }
 0x107   : > { %1178 = vst [vmem:[%s10027_s8 + $0xf40] sm:$0xff] %v1177_v41  ;;  %v1181_v43 = vld [vmem:[%s10019_s7 + $0x1ea0] sm:$0xff]  ;;  %v1183_v44 = vld [vmem:[%s10019_s7 + $0x1ea8] sm:$0xff]  ;;  %1180 = vst [vmem:[%s10027_s8 + $0xf48] sm:$0xff] %v1179_v42 }
 0x108   : > { %1182 = vst [vmem:[%s10027_s8 + $0xf50] sm:$0xff] %v1181_v43  ;;  %1184 = vst [vmem:[%s10027_s8 + $0xf58] sm:$0xff] %v1183_v44  ;;  %v1185_v45 = vld [vmem:[%s10019_s7 + $0x1ec0] sm:$0xff]  ;;  %v1187_v46 = vld [vmem:[%s10019_s7 + $0x1ec8] sm:$0xff] }
 0x109   : > { %v1189_v47 = vld [vmem:[%s10019_s7 + $0x1ee0] sm:$0xff]  ;;  %1186 = vst [vmem:[%s10027_s8 + $0xf60] sm:$0xff] %v1185_v45  ;;  %1188 = vst [vmem:[%s10027_s8 + $0xf68] sm:$0xff] %v1187_v46  ;;  %v1191_v48 = vld [vmem:[%s10019_s7 + $0x1ee8] sm:$0xff] }
 0x10a   : > { %1190 = vst [vmem:[%s10027_s8 + $0xf70] sm:$0xff] %v1189_v47  ;;  %v1193_v49 = vld [vmem:[%s10019_s7 + $0x1f00] sm:$0xff]  ;;  %v1195_v50 = vld [vmem:[%s10019_s7 + $0x1f08] sm:$0xff]  ;;  %1192 = vst [vmem:[%s10027_s8 + $0xf78] sm:$0xff] %v1191_v48 }
 0x10b   : > { %1194 = vst [vmem:[%s10027_s8 + $0xf80] sm:$0xff] %v1193_v49  ;;  %1196 = vst [vmem:[%s10027_s8 + $0xf88] sm:$0xff] %v1195_v50  ;;  %v1197_v51 = vld [vmem:[%s10019_s7 + $0x1f20] sm:$0xff]  ;;  %v1199_v52 = vld [vmem:[%s10019_s7 + $0x1f28] sm:$0xff] }
 0x10c   : > { %v1201_v53 = vld [vmem:[%s10019_s7 + $0x1f40] sm:$0xff]  ;;  %1198 = vst [vmem:[%s10027_s8 + $0xf90] sm:$0xff] %v1197_v51  ;;  %1200 = vst [vmem:[%s10027_s8 + $0xf98] sm:$0xff] %v1199_v52  ;;  %v1203_v54 = vld [vmem:[%s10019_s7 + $0x1f48] sm:$0xff] }
 0x10d   : > { %1202 = vst [vmem:[%s10027_s8 + $0xfa0] sm:$0xff] %v1201_v53  ;;  %v1205_v55 = vld [vmem:[%s10019_s7 + $0x1f60] sm:$0xff]  ;;  %v1207_v56 = vld [vmem:[%s10019_s7 + $0x1f68] sm:$0xff]  ;;  %1204 = vst [vmem:[%s10027_s8 + $0xfa8] sm:$0xff] %v1203_v54 }
 0x10e   : > { %1206 = vst [vmem:[%s10027_s8 + $0xfb0] sm:$0xff] %v1205_v55  ;;  %1208 = vst [vmem:[%s10027_s8 + $0xfb8] sm:$0xff] %v1207_v56  ;;  %v1209_v57 = vld [vmem:[%s10019_s7 + $0x1f80] sm:$0xff]  ;;  %v1211_v58 = vld [vmem:[%s10019_s7 + $0x1f88] sm:$0xff] }
 0x10f   : > { %v1213_v59 = vld [vmem:[%s10019_s7 + $0x1fa0] sm:$0xff]  ;;  %1210 = vst [vmem:[%s10027_s8 + $0xfc0] sm:$0xff] %v1209_v57  ;;  %1212 = vst [vmem:[%s10027_s8 + $0xfc8] sm:$0xff] %v1211_v58  ;;  %v1215_v60 = vld [vmem:[%s10019_s7 + $0x1fa8] sm:$0xff] }
 0x110   : > { %1214 = vst [vmem:[%s10027_s8 + $0xfd0] sm:$0xff] %v1213_v59  ;;  %v1217_v61 = vld [vmem:[%s10019_s7 + $0x1fc0] sm:$0xff]  ;;  %v1219_v62 = vld [vmem:[%s10019_s7 + $0x1fc8] sm:$0xff]  ;;  %1216 = vst [vmem:[%s10027_s8 + $0xfd8] sm:$0xff] %v1215_v60 }
 0x111   : > { %1218 = vst [vmem:[%s10027_s8 + $0xfe0] sm:$0xff] %v1217_v61  ;;  %1220 = vst [vmem:[%s10027_s8 + $0xfe8] sm:$0xff] %v1219_v62  ;;  %v1221_v63 = vld [vmem:[%s10019_s7 + $0x1fe0] sm:$0xff]  ;;  %v1223_v0 = vld [vmem:[%s10019_s7 + $0x1fe8] sm:$0xff] }
 0x112   : > { %v1225_v1 = vld [vmem:[%s10019_s7 + $0x2000] sm:$0xff]  ;;  %1222 = vst [vmem:[%s10027_s8 + $0xff0] sm:$0xff] %v1221_v63  ;;  %1224 = vst [vmem:[%s10027_s8 + $0xff8] sm:$0xff] %v1223_v0  ;;  %v1227_v2 = vld [vmem:[%s10019_s7 + $0x2008] sm:$0xff] }
 0x113   : > { %1226 = vst [vmem:[%s10027_s8 + $0x1000] sm:$0xff] %v1225_v1  ;;  %v1229_v3 = vld [vmem:[%s10019_s7 + $0x2020] sm:$0xff]  ;;  %v1231_v4 = vld [vmem:[%s10019_s7 + $0x2028] sm:$0xff]  ;;  %1228 = vst [vmem:[%s10027_s8 + $0x1008] sm:$0xff] %v1227_v2 }
 0x114   : > { %1230 = vst [vmem:[%s10027_s8 + $0x1010] sm:$0xff] %v1229_v3  ;;  %1232 = vst [vmem:[%s10027_s8 + $0x1018] sm:$0xff] %v1231_v4  ;;  %v1233_v5 = vld [vmem:[%s10019_s7 + $0x2040] sm:$0xff]  ;;  %v1235_v6 = vld [vmem:[%s10019_s7 + $0x2048] sm:$0xff] }
 0x115   : > { %v1237_v7 = vld [vmem:[%s10019_s7 + $0x2060] sm:$0xff]  ;;  %1234 = vst [vmem:[%s10027_s8 + $0x1020] sm:$0xff] %v1233_v5  ;;  %1236 = vst [vmem:[%s10027_s8 + $0x1028] sm:$0xff] %v1235_v6  ;;  %v1239_v8 = vld [vmem:[%s10019_s7 + $0x2068] sm:$0xff] }
 0x116   : > { %1238 = vst [vmem:[%s10027_s8 + $0x1030] sm:$0xff] %v1237_v7  ;;  %v1241_v9 = vld [vmem:[%s10019_s7 + $0x2080] sm:$0xff]  ;;  %v1243_v10 = vld [vmem:[%s10019_s7 + $0x2088] sm:$0xff]  ;;  %1240 = vst [vmem:[%s10027_s8 + $0x1038] sm:$0xff] %v1239_v8 }
 0x117   : > { %1242 = vst [vmem:[%s10027_s8 + $0x1040] sm:$0xff] %v1241_v9  ;;  %1244 = vst [vmem:[%s10027_s8 + $0x1048] sm:$0xff] %v1243_v10  ;;  %v1245_v11 = vld [vmem:[%s10019_s7 + $0x20a0] sm:$0xff]  ;;  %v1247_v12 = vld [vmem:[%s10019_s7 + $0x20a8] sm:$0xff] }
 0x118   : > { %v1249_v13 = vld [vmem:[%s10019_s7 + $0x20c0] sm:$0xff]  ;;  %1246 = vst [vmem:[%s10027_s8 + $0x1050] sm:$0xff] %v1245_v11  ;;  %1248 = vst [vmem:[%s10027_s8 + $0x1058] sm:$0xff] %v1247_v12  ;;  %v1251_v14 = vld [vmem:[%s10019_s7 + $0x20c8] sm:$0xff] }
 0x119   : > { %1250 = vst [vmem:[%s10027_s8 + $0x1060] sm:$0xff] %v1249_v13  ;;  %v1253_v15 = vld [vmem:[%s10019_s7 + $0x20e0] sm:$0xff]  ;;  %v1255_v16 = vld [vmem:[%s10019_s7 + $0x20e8] sm:$0xff]  ;;  %1252 = vst [vmem:[%s10027_s8 + $0x1068] sm:$0xff] %v1251_v14 }
 0x11a   : > { %1254 = vst [vmem:[%s10027_s8 + $0x1070] sm:$0xff] %v1253_v15  ;;  %1256 = vst [vmem:[%s10027_s8 + $0x1078] sm:$0xff] %v1255_v16  ;;  %v1257_v17 = vld [vmem:[%s10019_s7 + $0x2100] sm:$0xff]  ;;  %v1259_v18 = vld [vmem:[%s10019_s7 + $0x2108] sm:$0xff] }
 0x11b   : > { %v1261_v19 = vld [vmem:[%s10019_s7 + $0x2120] sm:$0xff]  ;;  %1258 = vst [vmem:[%s10027_s8 + $0x1080] sm:$0xff] %v1257_v17  ;;  %1260 = vst [vmem:[%s10027_s8 + $0x1088] sm:$0xff] %v1259_v18  ;;  %v1263_v20 = vld [vmem:[%s10019_s7 + $0x2128] sm:$0xff] }
 0x11c   : > { %1262 = vst [vmem:[%s10027_s8 + $0x1090] sm:$0xff] %v1261_v19  ;;  %v1265_v21 = vld [vmem:[%s10019_s7 + $0x2140] sm:$0xff]  ;;  %v1267_v22 = vld [vmem:[%s10019_s7 + $0x2148] sm:$0xff]  ;;  %1264 = vst [vmem:[%s10027_s8 + $0x1098] sm:$0xff] %v1263_v20 }
 0x11d   : > { %1266 = vst [vmem:[%s10027_s8 + $0x10a0] sm:$0xff] %v1265_v21  ;;  %1268 = vst [vmem:[%s10027_s8 + $0x10a8] sm:$0xff] %v1267_v22  ;;  %v1269_v23 = vld [vmem:[%s10019_s7 + $0x2160] sm:$0xff]  ;;  %v1271_v24 = vld [vmem:[%s10019_s7 + $0x2168] sm:$0xff] }
 0x11e   : > { %v1273_v25 = vld [vmem:[%s10019_s7 + $0x2180] sm:$0xff]  ;;  %1270 = vst [vmem:[%s10027_s8 + $0x10b0] sm:$0xff] %v1269_v23  ;;  %1272 = vst [vmem:[%s10027_s8 + $0x10b8] sm:$0xff] %v1271_v24  ;;  %v1275_v26 = vld [vmem:[%s10019_s7 + $0x2188] sm:$0xff] }
 0x11f   : > { %1274 = vst [vmem:[%s10027_s8 + $0x10c0] sm:$0xff] %v1273_v25  ;;  %v1277_v27 = vld [vmem:[%s10019_s7 + $0x21a0] sm:$0xff]  ;;  %v1279_v28 = vld [vmem:[%s10019_s7 + $0x21a8] sm:$0xff]  ;;  %1276 = vst [vmem:[%s10027_s8 + $0x10c8] sm:$0xff] %v1275_v26 }
 0x120   : > { %1278 = vst [vmem:[%s10027_s8 + $0x10d0] sm:$0xff] %v1277_v27  ;;  %1280 = vst [vmem:[%s10027_s8 + $0x10d8] sm:$0xff] %v1279_v28  ;;  %v1281_v29 = vld [vmem:[%s10019_s7 + $0x21c0] sm:$0xff]  ;;  %v1283_v30 = vld [vmem:[%s10019_s7 + $0x21c8] sm:$0xff] }
 0x121   : > { %v1285_v31 = vld [vmem:[%s10019_s7 + $0x21e0] sm:$0xff]  ;;  %1282 = vst [vmem:[%s10027_s8 + $0x10e0] sm:$0xff] %v1281_v29  ;;  %1284 = vst [vmem:[%s10027_s8 + $0x10e8] sm:$0xff] %v1283_v30  ;;  %v1287_v32 = vld [vmem:[%s10019_s7 + $0x21e8] sm:$0xff] }
 0x122   : > { %1286 = vst [vmem:[%s10027_s8 + $0x10f0] sm:$0xff] %v1285_v31  ;;  %v1289_v33 = vld [vmem:[%s10019_s7 + $0x2200] sm:$0xff]  ;;  %v1291_v34 = vld [vmem:[%s10019_s7 + $0x2208] sm:$0xff]  ;;  %1288 = vst [vmem:[%s10027_s8 + $0x10f8] sm:$0xff] %v1287_v32 }
 0x123   : > { %1290 = vst [vmem:[%s10027_s8 + $0x1100] sm:$0xff] %v1289_v33  ;;  %1292 = vst [vmem:[%s10027_s8 + $0x1108] sm:$0xff] %v1291_v34  ;;  %v1293_v35 = vld [vmem:[%s10019_s7 + $0x2220] sm:$0xff]  ;;  %v1295_v36 = vld [vmem:[%s10019_s7 + $0x2228] sm:$0xff] }
 0x124   : > { %v1297_v37 = vld [vmem:[%s10019_s7 + $0x2240] sm:$0xff]  ;;  %1294 = vst [vmem:[%s10027_s8 + $0x1110] sm:$0xff] %v1293_v35  ;;  %1296 = vst [vmem:[%s10027_s8 + $0x1118] sm:$0xff] %v1295_v36  ;;  %v1299_v38 = vld [vmem:[%s10019_s7 + $0x2248] sm:$0xff] }
 0x125   : > { %1298 = vst [vmem:[%s10027_s8 + $0x1120] sm:$0xff] %v1297_v37  ;;  %v1301_v39 = vld [vmem:[%s10019_s7 + $0x2260] sm:$0xff]  ;;  %v1303_v40 = vld [vmem:[%s10019_s7 + $0x2268] sm:$0xff]  ;;  %1300 = vst [vmem:[%s10027_s8 + $0x1128] sm:$0xff] %v1299_v38 }
 0x126   : > { %1302 = vst [vmem:[%s10027_s8 + $0x1130] sm:$0xff] %v1301_v39  ;;  %1304 = vst [vmem:[%s10027_s8 + $0x1138] sm:$0xff] %v1303_v40  ;;  %v1305_v41 = vld [vmem:[%s10019_s7 + $0x2280] sm:$0xff]  ;;  %v1307_v42 = vld [vmem:[%s10019_s7 + $0x2288] sm:$0xff] }
 0x127   : > { %v1309_v43 = vld [vmem:[%s10019_s7 + $0x22a0] sm:$0xff]  ;;  %1306 = vst [vmem:[%s10027_s8 + $0x1140] sm:$0xff] %v1305_v41  ;;  %1308 = vst [vmem:[%s10027_s8 + $0x1148] sm:$0xff] %v1307_v42  ;;  %v1311_v44 = vld [vmem:[%s10019_s7 + $0x22a8] sm:$0xff] }
 0x128   : > { %1310 = vst [vmem:[%s10027_s8 + $0x1150] sm:$0xff] %v1309_v43  ;;  %v1313_v45 = vld [vmem:[%s10019_s7 + $0x22c0] sm:$0xff]  ;;  %v1315_v46 = vld [vmem:[%s10019_s7 + $0x22c8] sm:$0xff]  ;;  %1312 = vst [vmem:[%s10027_s8 + $0x1158] sm:$0xff] %v1311_v44 }
 0x129   : > { %1314 = vst [vmem:[%s10027_s8 + $0x1160] sm:$0xff] %v1313_v45  ;;  %1316 = vst [vmem:[%s10027_s8 + $0x1168] sm:$0xff] %v1315_v46  ;;  %v1317_v47 = vld [vmem:[%s10019_s7 + $0x22e0] sm:$0xff]  ;;  %v1319_v48 = vld [vmem:[%s10019_s7 + $0x22e8] sm:$0xff] }
 0x12a   : > { %v1321_v49 = vld [vmem:[%s10019_s7 + $0x2300] sm:$0xff]  ;;  %1318 = vst [vmem:[%s10027_s8 + $0x1170] sm:$0xff] %v1317_v47  ;;  %1320 = vst [vmem:[%s10027_s8 + $0x1178] sm:$0xff] %v1319_v48  ;;  %v1323_v50 = vld [vmem:[%s10019_s7 + $0x2308] sm:$0xff] }
 0x12b   : > { %1322 = vst [vmem:[%s10027_s8 + $0x1180] sm:$0xff] %v1321_v49  ;;  %v1325_v51 = vld [vmem:[%s10019_s7 + $0x2320] sm:$0xff]  ;;  %v1327_v52 = vld [vmem:[%s10019_s7 + $0x2328] sm:$0xff]  ;;  %1324 = vst [vmem:[%s10027_s8 + $0x1188] sm:$0xff] %v1323_v50 }
 0x12c   : > { %1326 = vst [vmem:[%s10027_s8 + $0x1190] sm:$0xff] %v1325_v51  ;;  %1328 = vst [vmem:[%s10027_s8 + $0x1198] sm:$0xff] %v1327_v52  ;;  %v1329_v53 = vld [vmem:[%s10019_s7 + $0x2340] sm:$0xff]  ;;  %v1331_v54 = vld [vmem:[%s10019_s7 + $0x2348] sm:$0xff] }
 0x12d   : > { %v1333_v55 = vld [vmem:[%s10019_s7 + $0x2360] sm:$0xff]  ;;  %1330 = vst [vmem:[%s10027_s8 + $0x11a0] sm:$0xff] %v1329_v53  ;;  %1332 = vst [vmem:[%s10027_s8 + $0x11a8] sm:$0xff] %v1331_v54  ;;  %v1335_v56 = vld [vmem:[%s10019_s7 + $0x2368] sm:$0xff] }
 0x12e   : > { %1334 = vst [vmem:[%s10027_s8 + $0x11b0] sm:$0xff] %v1333_v55  ;;  %v1337_v57 = vld [vmem:[%s10019_s7 + $0x2380] sm:$0xff]  ;;  %v1339_v58 = vld [vmem:[%s10019_s7 + $0x2388] sm:$0xff]  ;;  %1336 = vst [vmem:[%s10027_s8 + $0x11b8] sm:$0xff] %v1335_v56 }
 0x12f   : > { %1338 = vst [vmem:[%s10027_s8 + $0x11c0] sm:$0xff] %v1337_v57  ;;  %1340 = vst [vmem:[%s10027_s8 + $0x11c8] sm:$0xff] %v1339_v58  ;;  %v1341_v59 = vld [vmem:[%s10019_s7 + $0x23a0] sm:$0xff]  ;;  %v1343_v60 = vld [vmem:[%s10019_s7 + $0x23a8] sm:$0xff] }
 0x130   : > { %v1345_v61 = vld [vmem:[%s10019_s7 + $0x23c0] sm:$0xff]  ;;  %1342 = vst [vmem:[%s10027_s8 + $0x11d0] sm:$0xff] %v1341_v59  ;;  %1344 = vst [vmem:[%s10027_s8 + $0x11d8] sm:$0xff] %v1343_v60  ;;  %v1347_v62 = vld [vmem:[%s10019_s7 + $0x23c8] sm:$0xff] }
 0x131   : > { %1346 = vst [vmem:[%s10027_s8 + $0x11e0] sm:$0xff] %v1345_v61  ;;  %v1349_v63 = vld [vmem:[%s10019_s7 + $0x23e0] sm:$0xff]  ;;  %v1351_v0 = vld [vmem:[%s10019_s7 + $0x23e8] sm:$0xff]  ;;  %1348 = vst [vmem:[%s10027_s8 + $0x11e8] sm:$0xff] %v1347_v62 }
 0x132   : > { %1350 = vst [vmem:[%s10027_s8 + $0x11f0] sm:$0xff] %v1349_v63  ;;  %1352 = vst [vmem:[%s10027_s8 + $0x11f8] sm:$0xff] %v1351_v0  ;;  %v1353_v1 = vld [vmem:[%s10019_s7 + $0x2400] sm:$0xff]  ;;  %v1355_v2 = vld [vmem:[%s10019_s7 + $0x2408] sm:$0xff] }
 0x133   : > { %v1357_v3 = vld [vmem:[%s10019_s7 + $0x2420] sm:$0xff]  ;;  %1354 = vst [vmem:[%s10027_s8 + $0x1200] sm:$0xff] %v1353_v1  ;;  %1356 = vst [vmem:[%s10027_s8 + $0x1208] sm:$0xff] %v1355_v2  ;;  %v1359_v4 = vld [vmem:[%s10019_s7 + $0x2428] sm:$0xff] }
 0x134   : > { %1358 = vst [vmem:[%s10027_s8 + $0x1210] sm:$0xff] %v1357_v3  ;;  %v1361_v5 = vld [vmem:[%s10019_s7 + $0x2440] sm:$0xff]  ;;  %v1363_v6 = vld [vmem:[%s10019_s7 + $0x2448] sm:$0xff]  ;;  %1360 = vst [vmem:[%s10027_s8 + $0x1218] sm:$0xff] %v1359_v4 }
 0x135   : > { %1362 = vst [vmem:[%s10027_s8 + $0x1220] sm:$0xff] %v1361_v5  ;;  %1364 = vst [vmem:[%s10027_s8 + $0x1228] sm:$0xff] %v1363_v6  ;;  %v1365_v7 = vld [vmem:[%s10019_s7 + $0x2460] sm:$0xff]  ;;  %v1367_v8 = vld [vmem:[%s10019_s7 + $0x2468] sm:$0xff] }
 0x136   : > { %v1369_v9 = vld [vmem:[%s10019_s7 + $0x2480] sm:$0xff]  ;;  %1366 = vst [vmem:[%s10027_s8 + $0x1230] sm:$0xff] %v1365_v7  ;;  %1368 = vst [vmem:[%s10027_s8 + $0x1238] sm:$0xff] %v1367_v8  ;;  %v1371_v10 = vld [vmem:[%s10019_s7 + $0x2488] sm:$0xff] }
 0x137   : > { %1370 = vst [vmem:[%s10027_s8 + $0x1240] sm:$0xff] %v1369_v9  ;;  %v1373_v11 = vld [vmem:[%s10019_s7 + $0x24a0] sm:$0xff]  ;;  %v1375_v12 = vld [vmem:[%s10019_s7 + $0x24a8] sm:$0xff]  ;;  %1372 = vst [vmem:[%s10027_s8 + $0x1248] sm:$0xff] %v1371_v10 }
 0x138   : > { %1374 = vst [vmem:[%s10027_s8 + $0x1250] sm:$0xff] %v1373_v11  ;;  %1376 = vst [vmem:[%s10027_s8 + $0x1258] sm:$0xff] %v1375_v12  ;;  %v1377_v13 = vld [vmem:[%s10019_s7 + $0x24c0] sm:$0xff]  ;;  %v1379_v14 = vld [vmem:[%s10019_s7 + $0x24c8] sm:$0xff] }
 0x139   : > { %v1381_v15 = vld [vmem:[%s10019_s7 + $0x24e0] sm:$0xff]  ;;  %1378 = vst [vmem:[%s10027_s8 + $0x1260] sm:$0xff] %v1377_v13  ;;  %1380 = vst [vmem:[%s10027_s8 + $0x1268] sm:$0xff] %v1379_v14  ;;  %v1383_v16 = vld [vmem:[%s10019_s7 + $0x24e8] sm:$0xff] }
 0x13a   : > { %1382 = vst [vmem:[%s10027_s8 + $0x1270] sm:$0xff] %v1381_v15  ;;  %v1385_v17 = vld [vmem:[%s10019_s7 + $0x2500] sm:$0xff]  ;;  %v1387_v18 = vld [vmem:[%s10019_s7 + $0x2508] sm:$0xff]  ;;  %1384 = vst [vmem:[%s10027_s8 + $0x1278] sm:$0xff] %v1383_v16 }
 0x13b   : > { %1386 = vst [vmem:[%s10027_s8 + $0x1280] sm:$0xff] %v1385_v17  ;;  %1388 = vst [vmem:[%s10027_s8 + $0x1288] sm:$0xff] %v1387_v18  ;;  %v1389_v19 = vld [vmem:[%s10019_s7 + $0x2520] sm:$0xff]  ;;  %v1391_v20 = vld [vmem:[%s10019_s7 + $0x2528] sm:$0xff] }
 0x13c   : > { %v1393_v21 = vld [vmem:[%s10019_s7 + $0x2540] sm:$0xff]  ;;  %1390 = vst [vmem:[%s10027_s8 + $0x1290] sm:$0xff] %v1389_v19  ;;  %1392 = vst [vmem:[%s10027_s8 + $0x1298] sm:$0xff] %v1391_v20  ;;  %v1395_v22 = vld [vmem:[%s10019_s7 + $0x2548] sm:$0xff] }
 0x13d   : > { %1394 = vst [vmem:[%s10027_s8 + $0x12a0] sm:$0xff] %v1393_v21  ;;  %v1397_v23 = vld [vmem:[%s10019_s7 + $0x2560] sm:$0xff]  ;;  %v1399_v24 = vld [vmem:[%s10019_s7 + $0x2568] sm:$0xff]  ;;  %1396 = vst [vmem:[%s10027_s8 + $0x12a8] sm:$0xff] %v1395_v22 }
 0x13e   : > { %1398 = vst [vmem:[%s10027_s8 + $0x12b0] sm:$0xff] %v1397_v23  ;;  %1400 = vst [vmem:[%s10027_s8 + $0x12b8] sm:$0xff] %v1399_v24  ;;  %v1401_v25 = vld [vmem:[%s10019_s7 + $0x2580] sm:$0xff]  ;;  %v1403_v26 = vld [vmem:[%s10019_s7 + $0x2588] sm:$0xff] }
 0x13f   : > { %v1405_v27 = vld [vmem:[%s10019_s7 + $0x25a0] sm:$0xff]  ;;  %1402 = vst [vmem:[%s10027_s8 + $0x12c0] sm:$0xff] %v1401_v25  ;;  %1404 = vst [vmem:[%s10027_s8 + $0x12c8] sm:$0xff] %v1403_v26  ;;  %v1407_v28 = vld [vmem:[%s10019_s7 + $0x25a8] sm:$0xff] }
 0x140   : > { %1406 = vst [vmem:[%s10027_s8 + $0x12d0] sm:$0xff] %v1405_v27  ;;  %v1409_v29 = vld [vmem:[%s10019_s7 + $0x25c0] sm:$0xff]  ;;  %v1411_v30 = vld [vmem:[%s10019_s7 + $0x25c8] sm:$0xff]  ;;  %1408 = vst [vmem:[%s10027_s8 + $0x12d8] sm:$0xff] %v1407_v28 }
 0x141   : > { %1410 = vst [vmem:[%s10027_s8 + $0x12e0] sm:$0xff] %v1409_v29  ;;  %1412 = vst [vmem:[%s10027_s8 + $0x12e8] sm:$0xff] %v1411_v30  ;;  %v1413_v31 = vld [vmem:[%s10019_s7 + $0x25e0] sm:$0xff]  ;;  %v1415_v32 = vld [vmem:[%s10019_s7 + $0x25e8] sm:$0xff] }
 0x142   : > { %v1417_v33 = vld [vmem:[%s10019_s7 + $0x2600] sm:$0xff]  ;;  %1414 = vst [vmem:[%s10027_s8 + $0x12f0] sm:$0xff] %v1413_v31  ;;  %1416 = vst [vmem:[%s10027_s8 + $0x12f8] sm:$0xff] %v1415_v32  ;;  %v1419_v34 = vld [vmem:[%s10019_s7 + $0x2608] sm:$0xff] }
 0x143   : > { %1418 = vst [vmem:[%s10027_s8 + $0x1300] sm:$0xff] %v1417_v33  ;;  %v1421_v35 = vld [vmem:[%s10019_s7 + $0x2620] sm:$0xff]  ;;  %v1423_v36 = vld [vmem:[%s10019_s7 + $0x2628] sm:$0xff]  ;;  %1420 = vst [vmem:[%s10027_s8 + $0x1308] sm:$0xff] %v1419_v34 }
 0x144   : > { %1422 = vst [vmem:[%s10027_s8 + $0x1310] sm:$0xff] %v1421_v35  ;;  %1424 = vst [vmem:[%s10027_s8 + $0x1318] sm:$0xff] %v1423_v36  ;;  %v1425_v37 = vld [vmem:[%s10019_s7 + $0x2640] sm:$0xff]  ;;  %v1427_v38 = vld [vmem:[%s10019_s7 + $0x2648] sm:$0xff] }
 0x145   : > { %v1429_v39 = vld [vmem:[%s10019_s7 + $0x2660] sm:$0xff]  ;;  %1426 = vst [vmem:[%s10027_s8 + $0x1320] sm:$0xff] %v1425_v37  ;;  %1428 = vst [vmem:[%s10027_s8 + $0x1328] sm:$0xff] %v1427_v38  ;;  %v1431_v40 = vld [vmem:[%s10019_s7 + $0x2668] sm:$0xff] }
 0x146   : > { %1430 = vst [vmem:[%s10027_s8 + $0x1330] sm:$0xff] %v1429_v39  ;;  %v1433_v41 = vld [vmem:[%s10019_s7 + $0x2680] sm:$0xff]  ;;  %v1435_v42 = vld [vmem:[%s10019_s7 + $0x2688] sm:$0xff]  ;;  %1432 = vst [vmem:[%s10027_s8 + $0x1338] sm:$0xff] %v1431_v40 }
 0x147   : > { %1434 = vst [vmem:[%s10027_s8 + $0x1340] sm:$0xff] %v1433_v41  ;;  %1436 = vst [vmem:[%s10027_s8 + $0x1348] sm:$0xff] %v1435_v42  ;;  %v1437_v43 = vld [vmem:[%s10019_s7 + $0x26a0] sm:$0xff]  ;;  %v1439_v44 = vld [vmem:[%s10019_s7 + $0x26a8] sm:$0xff] }
 0x148   : > { %v1441_v45 = vld [vmem:[%s10019_s7 + $0x26c0] sm:$0xff]  ;;  %1438 = vst [vmem:[%s10027_s8 + $0x1350] sm:$0xff] %v1437_v43  ;;  %1440 = vst [vmem:[%s10027_s8 + $0x1358] sm:$0xff] %v1439_v44  ;;  %v1443_v46 = vld [vmem:[%s10019_s7 + $0x26c8] sm:$0xff] }
 0x149   : > { %1442 = vst [vmem:[%s10027_s8 + $0x1360] sm:$0xff] %v1441_v45  ;;  %v1445_v47 = vld [vmem:[%s10019_s7 + $0x26e0] sm:$0xff]  ;;  %v1447_v48 = vld [vmem:[%s10019_s7 + $0x26e8] sm:$0xff]  ;;  %1444 = vst [vmem:[%s10027_s8 + $0x1368] sm:$0xff] %v1443_v46 }
 0x14a   : > { %1446 = vst [vmem:[%s10027_s8 + $0x1370] sm:$0xff] %v1445_v47  ;;  %1448 = vst [vmem:[%s10027_s8 + $0x1378] sm:$0xff] %v1447_v48  ;;  %v1449_v49 = vld [vmem:[%s10019_s7 + $0x2700] sm:$0xff]  ;;  %v1451_v50 = vld [vmem:[%s10019_s7 + $0x2708] sm:$0xff] }
 0x14b   : > { %v1453_v51 = vld [vmem:[%s10019_s7 + $0x2720] sm:$0xff]  ;;  %1450 = vst [vmem:[%s10027_s8 + $0x1380] sm:$0xff] %v1449_v49  ;;  %1452 = vst [vmem:[%s10027_s8 + $0x1388] sm:$0xff] %v1451_v50  ;;  %v1455_v52 = vld [vmem:[%s10019_s7 + $0x2728] sm:$0xff] }
 0x14c   : > { %1454 = vst [vmem:[%s10027_s8 + $0x1390] sm:$0xff] %v1453_v51  ;;  %v1457_v53 = vld [vmem:[%s10019_s7 + $0x2740] sm:$0xff]  ;;  %v1459_v54 = vld [vmem:[%s10019_s7 + $0x2748] sm:$0xff]  ;;  %1456 = vst [vmem:[%s10027_s8 + $0x1398] sm:$0xff] %v1455_v52 }
 0x14d   : > { %1458 = vst [vmem:[%s10027_s8 + $0x13a0] sm:$0xff] %v1457_v53  ;;  %1460 = vst [vmem:[%s10027_s8 + $0x13a8] sm:$0xff] %v1459_v54  ;;  %v1461_v55 = vld [vmem:[%s10019_s7 + $0x2760] sm:$0xff]  ;;  %v1463_v56 = vld [vmem:[%s10019_s7 + $0x2768] sm:$0xff] }
 0x14e   : > { %v1465_v57 = vld [vmem:[%s10019_s7 + $0x2780] sm:$0xff]  ;;  %1462 = vst [vmem:[%s10027_s8 + $0x13b0] sm:$0xff] %v1461_v55  ;;  %1464 = vst [vmem:[%s10027_s8 + $0x13b8] sm:$0xff] %v1463_v56  ;;  %v1467_v58 = vld [vmem:[%s10019_s7 + $0x2788] sm:$0xff] }
 0x14f   : > { %1466 = vst [vmem:[%s10027_s8 + $0x13c0] sm:$0xff] %v1465_v57  ;;  %v1469_v59 = vld [vmem:[%s10019_s7 + $0x27a0] sm:$0xff]  ;;  %v1471_v60 = vld [vmem:[%s10019_s7 + $0x27a8] sm:$0xff]  ;;  %1468 = vst [vmem:[%s10027_s8 + $0x13c8] sm:$0xff] %v1467_v58 }
 0x150   : > { %1470 = vst [vmem:[%s10027_s8 + $0x13d0] sm:$0xff] %v1469_v59  ;;  %1472 = vst [vmem:[%s10027_s8 + $0x13d8] sm:$0xff] %v1471_v60  ;;  %v1473_v61 = vld [vmem:[%s10019_s7 + $0x27c0] sm:$0xff]  ;;  %v1475_v62 = vld [vmem:[%s10019_s7 + $0x27c8] sm:$0xff] }
 0x151   : > { %v1477_v63 = vld [vmem:[%s10019_s7 + $0x27e0] sm:$0xff]  ;;  %1474 = vst [vmem:[%s10027_s8 + $0x13e0] sm:$0xff] %v1473_v61  ;;  %1476 = vst [vmem:[%s10027_s8 + $0x13e8] sm:$0xff] %v1475_v62  ;;  %v1479_v0 = vld [vmem:[%s10019_s7 + $0x27e8] sm:$0xff] }
 0x152   : > { %1478 = vst [vmem:[%s10027_s8 + $0x13f0] sm:$0xff] %v1477_v63  ;;  %v1481_v1 = vld [vmem:[%s10019_s7 + $0x2800] sm:$0xff]  ;;  %v1483_v2 = vld [vmem:[%s10019_s7 + $0x2808] sm:$0xff]  ;;  %1480 = vst [vmem:[%s10027_s8 + $0x13f8] sm:$0xff] %v1479_v0 }
 0x153   : > { %1482 = vst [vmem:[%s10027_s8 + $0x1400] sm:$0xff] %v1481_v1  ;;  %1484 = vst [vmem:[%s10027_s8 + $0x1408] sm:$0xff] %v1483_v2  ;;  %v1485_v3 = vld [vmem:[%s10019_s7 + $0x2820] sm:$0xff]  ;;  %v1487_v4 = vld [vmem:[%s10019_s7 + $0x2828] sm:$0xff] }
 0x154   : > { %v1489_v5 = vld [vmem:[%s10019_s7 + $0x2840] sm:$0xff]  ;;  %1486 = vst [vmem:[%s10027_s8 + $0x1410] sm:$0xff] %v1485_v3  ;;  %1488 = vst [vmem:[%s10027_s8 + $0x1418] sm:$0xff] %v1487_v4  ;;  %v1491_v6 = vld [vmem:[%s10019_s7 + $0x2848] sm:$0xff] }
 0x155   : > { %1490 = vst [vmem:[%s10027_s8 + $0x1420] sm:$0xff] %v1489_v5  ;;  %v1493_v7 = vld [vmem:[%s10019_s7 + $0x2860] sm:$0xff]  ;;  %v1495_v8 = vld [vmem:[%s10019_s7 + $0x2868] sm:$0xff]  ;;  %1492 = vst [vmem:[%s10027_s8 + $0x1428] sm:$0xff] %v1491_v6 }
 0x156   : > { %1494 = vst [vmem:[%s10027_s8 + $0x1430] sm:$0xff] %v1493_v7  ;;  %1496 = vst [vmem:[%s10027_s8 + $0x1438] sm:$0xff] %v1495_v8  ;;  %v1497_v9 = vld [vmem:[%s10019_s7 + $0x2880] sm:$0xff]  ;;  %v1499_v10 = vld [vmem:[%s10019_s7 + $0x2888] sm:$0xff] }
 0x157   : > { %v1501_v11 = vld [vmem:[%s10019_s7 + $0x28a0] sm:$0xff]  ;;  %1498 = vst [vmem:[%s10027_s8 + $0x1440] sm:$0xff] %v1497_v9  ;;  %1500 = vst [vmem:[%s10027_s8 + $0x1448] sm:$0xff] %v1499_v10  ;;  %v1503_v12 = vld [vmem:[%s10019_s7 + $0x28a8] sm:$0xff] }
 0x158   : > { %1502 = vst [vmem:[%s10027_s8 + $0x1450] sm:$0xff] %v1501_v11  ;;  %v1505_v13 = vld [vmem:[%s10019_s7 + $0x28c0] sm:$0xff]  ;;  %v1507_v14 = vld [vmem:[%s10019_s7 + $0x28c8] sm:$0xff]  ;;  %1504 = vst [vmem:[%s10027_s8 + $0x1458] sm:$0xff] %v1503_v12 }
 0x159   : > { %1506 = vst [vmem:[%s10027_s8 + $0x1460] sm:$0xff] %v1505_v13  ;;  %1508 = vst [vmem:[%s10027_s8 + $0x1468] sm:$0xff] %v1507_v14  ;;  %v1509_v15 = vld [vmem:[%s10019_s7 + $0x28e0] sm:$0xff]  ;;  %v1511_v16 = vld [vmem:[%s10019_s7 + $0x28e8] sm:$0xff] }
 0x15a   : > { %v1513_v17 = vld [vmem:[%s10019_s7 + $0x2900] sm:$0xff]  ;;  %1510 = vst [vmem:[%s10027_s8 + $0x1470] sm:$0xff] %v1509_v15  ;;  %1512 = vst [vmem:[%s10027_s8 + $0x1478] sm:$0xff] %v1511_v16  ;;  %v1515_v18 = vld [vmem:[%s10019_s7 + $0x2908] sm:$0xff] }
 0x15b   : > { %1514 = vst [vmem:[%s10027_s8 + $0x1480] sm:$0xff] %v1513_v17  ;;  %v1517_v19 = vld [vmem:[%s10019_s7 + $0x2920] sm:$0xff]  ;;  %v1519_v20 = vld [vmem:[%s10019_s7 + $0x2928] sm:$0xff]  ;;  %1516 = vst [vmem:[%s10027_s8 + $0x1488] sm:$0xff] %v1515_v18 }
 0x15c   : > { %1518 = vst [vmem:[%s10027_s8 + $0x1490] sm:$0xff] %v1517_v19  ;;  %1520 = vst [vmem:[%s10027_s8 + $0x1498] sm:$0xff] %v1519_v20  ;;  %v1521_v21 = vld [vmem:[%s10019_s7 + $0x2940] sm:$0xff]  ;;  %v1523_v22 = vld [vmem:[%s10019_s7 + $0x2948] sm:$0xff] }
 0x15d   : > { %v1525_v23 = vld [vmem:[%s10019_s7 + $0x2960] sm:$0xff]  ;;  %1522 = vst [vmem:[%s10027_s8 + $0x14a0] sm:$0xff] %v1521_v21  ;;  %1524 = vst [vmem:[%s10027_s8 + $0x14a8] sm:$0xff] %v1523_v22  ;;  %v1527_v24 = vld [vmem:[%s10019_s7 + $0x2968] sm:$0xff] }
 0x15e   : > { %1526 = vst [vmem:[%s10027_s8 + $0x14b0] sm:$0xff] %v1525_v23  ;;  %v1529_v25 = vld [vmem:[%s10019_s7 + $0x2980] sm:$0xff]  ;;  %v1531_v26 = vld [vmem:[%s10019_s7 + $0x2988] sm:$0xff]  ;;  %1528 = vst [vmem:[%s10027_s8 + $0x14b8] sm:$0xff] %v1527_v24 }
 0x15f   : > { %1530 = vst [vmem:[%s10027_s8 + $0x14c0] sm:$0xff] %v1529_v25  ;;  %1532 = vst [vmem:[%s10027_s8 + $0x14c8] sm:$0xff] %v1531_v26  ;;  %v1533_v27 = vld [vmem:[%s10019_s7 + $0x29a0] sm:$0xff]  ;;  %v1535_v28 = vld [vmem:[%s10019_s7 + $0x29a8] sm:$0xff] }
 0x160   : > { %v1537_v29 = vld [vmem:[%s10019_s7 + $0x29c0] sm:$0xff]  ;;  %1534 = vst [vmem:[%s10027_s8 + $0x14d0] sm:$0xff] %v1533_v27  ;;  %1536 = vst [vmem:[%s10027_s8 + $0x14d8] sm:$0xff] %v1535_v28  ;;  %v1539_v30 = vld [vmem:[%s10019_s7 + $0x29c8] sm:$0xff] }
 0x161   : > { %1538 = vst [vmem:[%s10027_s8 + $0x14e0] sm:$0xff] %v1537_v29  ;;  %v1541_v31 = vld [vmem:[%s10019_s7 + $0x29e0] sm:$0xff]  ;;  %v1543_v32 = vld [vmem:[%s10019_s7 + $0x29e8] sm:$0xff]  ;;  %1540 = vst [vmem:[%s10027_s8 + $0x14e8] sm:$0xff] %v1539_v30 }
 0x162   : > { %1542 = vst [vmem:[%s10027_s8 + $0x14f0] sm:$0xff] %v1541_v31  ;;  %1544 = vst [vmem:[%s10027_s8 + $0x14f8] sm:$0xff] %v1543_v32  ;;  %v1545_v33 = vld [vmem:[%s10019_s7 + $0x2a00] sm:$0xff]  ;;  %v1547_v34 = vld [vmem:[%s10019_s7 + $0x2a08] sm:$0xff] }
 0x163   : > { %v1549_v35 = vld [vmem:[%s10019_s7 + $0x2a20] sm:$0xff]  ;;  %1546 = vst [vmem:[%s10027_s8 + $0x1500] sm:$0xff] %v1545_v33  ;;  %1548 = vst [vmem:[%s10027_s8 + $0x1508] sm:$0xff] %v1547_v34  ;;  %v1551_v36 = vld [vmem:[%s10019_s7 + $0x2a28] sm:$0xff] }
 0x164   : > { %1550 = vst [vmem:[%s10027_s8 + $0x1510] sm:$0xff] %v1549_v35  ;;  %v1553_v37 = vld [vmem:[%s10019_s7 + $0x2a40] sm:$0xff]  ;;  %v1555_v38 = vld [vmem:[%s10019_s7 + $0x2a48] sm:$0xff]  ;;  %1552 = vst [vmem:[%s10027_s8 + $0x1518] sm:$0xff] %v1551_v36 }
 0x165   : > { %1554 = vst [vmem:[%s10027_s8 + $0x1520] sm:$0xff] %v1553_v37  ;;  %1556 = vst [vmem:[%s10027_s8 + $0x1528] sm:$0xff] %v1555_v38  ;;  %v1557_v39 = vld [vmem:[%s10019_s7 + $0x2a60] sm:$0xff]  ;;  %v1559_v40 = vld [vmem:[%s10019_s7 + $0x2a68] sm:$0xff] }
 0x166   : > { %v1561_v41 = vld [vmem:[%s10019_s7 + $0x2a80] sm:$0xff]  ;;  %1558 = vst [vmem:[%s10027_s8 + $0x1530] sm:$0xff] %v1557_v39  ;;  %1560 = vst [vmem:[%s10027_s8 + $0x1538] sm:$0xff] %v1559_v40  ;;  %v1563_v42 = vld [vmem:[%s10019_s7 + $0x2a88] sm:$0xff] }
 0x167   : > { %1562 = vst [vmem:[%s10027_s8 + $0x1540] sm:$0xff] %v1561_v41  ;;  %v1565_v43 = vld [vmem:[%s10019_s7 + $0x2aa0] sm:$0xff]  ;;  %v1567_v44 = vld [vmem:[%s10019_s7 + $0x2aa8] sm:$0xff]  ;;  %1564 = vst [vmem:[%s10027_s8 + $0x1548] sm:$0xff] %v1563_v42 }
 0x168   : > { %1566 = vst [vmem:[%s10027_s8 + $0x1550] sm:$0xff] %v1565_v43  ;;  %1568 = vst [vmem:[%s10027_s8 + $0x1558] sm:$0xff] %v1567_v44  ;;  %v1569_v45 = vld [vmem:[%s10019_s7 + $0x2ac0] sm:$0xff]  ;;  %v1571_v46 = vld [vmem:[%s10019_s7 + $0x2ac8] sm:$0xff] }
 0x169   : > { %v1573_v47 = vld [vmem:[%s10019_s7 + $0x2ae0] sm:$0xff]  ;;  %1570 = vst [vmem:[%s10027_s8 + $0x1560] sm:$0xff] %v1569_v45  ;;  %1572 = vst [vmem:[%s10027_s8 + $0x1568] sm:$0xff] %v1571_v46  ;;  %v1575_v48 = vld [vmem:[%s10019_s7 + $0x2ae8] sm:$0xff] }
 0x16a   : > { %1574 = vst [vmem:[%s10027_s8 + $0x1570] sm:$0xff] %v1573_v47  ;;  %v1577_v49 = vld [vmem:[%s10019_s7 + $0x2b00] sm:$0xff]  ;;  %v1579_v50 = vld [vmem:[%s10019_s7 + $0x2b08] sm:$0xff]  ;;  %1576 = vst [vmem:[%s10027_s8 + $0x1578] sm:$0xff] %v1575_v48 }
 0x16b   : > { %1578 = vst [vmem:[%s10027_s8 + $0x1580] sm:$0xff] %v1577_v49  ;;  %1580 = vst [vmem:[%s10027_s8 + $0x1588] sm:$0xff] %v1579_v50  ;;  %v1581_v51 = vld [vmem:[%s10019_s7 + $0x2b20] sm:$0xff]  ;;  %v1583_v52 = vld [vmem:[%s10019_s7 + $0x2b28] sm:$0xff] }
 0x16c   : > { %v1585_v53 = vld [vmem:[%s10019_s7 + $0x2b40] sm:$0xff]  ;;  %1582 = vst [vmem:[%s10027_s8 + $0x1590] sm:$0xff] %v1581_v51  ;;  %1584 = vst [vmem:[%s10027_s8 + $0x1598] sm:$0xff] %v1583_v52  ;;  %v1587_v54 = vld [vmem:[%s10019_s7 + $0x2b48] sm:$0xff] }
 0x16d   : > { %1586 = vst [vmem:[%s10027_s8 + $0x15a0] sm:$0xff] %v1585_v53  ;;  %v1589_v55 = vld [vmem:[%s10019_s7 + $0x2b60] sm:$0xff]  ;;  %v1591_v56 = vld [vmem:[%s10019_s7 + $0x2b68] sm:$0xff]  ;;  %1588 = vst [vmem:[%s10027_s8 + $0x15a8] sm:$0xff] %v1587_v54 }
 0x16e   : > { %1590 = vst [vmem:[%s10027_s8 + $0x15b0] sm:$0xff] %v1589_v55  ;;  %1592 = vst [vmem:[%s10027_s8 + $0x15b8] sm:$0xff] %v1591_v56  ;;  %v1593_v57 = vld [vmem:[%s10019_s7 + $0x2b80] sm:$0xff]  ;;  %v1595_v58 = vld [vmem:[%s10019_s7 + $0x2b88] sm:$0xff] }
 0x16f   : > { %v1597_v59 = vld [vmem:[%s10019_s7 + $0x2ba0] sm:$0xff]  ;;  %1594 = vst [vmem:[%s10027_s8 + $0x15c0] sm:$0xff] %v1593_v57  ;;  %1596 = vst [vmem:[%s10027_s8 + $0x15c8] sm:$0xff] %v1595_v58  ;;  %v1599_v60 = vld [vmem:[%s10019_s7 + $0x2ba8] sm:$0xff] }
 0x170   : > { %1598 = vst [vmem:[%s10027_s8 + $0x15d0] sm:$0xff] %v1597_v59  ;;  %v1601_v61 = vld [vmem:[%s10019_s7 + $0x2bc0] sm:$0xff]  ;;  %v1603_v62 = vld [vmem:[%s10019_s7 + $0x2bc8] sm:$0xff]  ;;  %1600 = vst [vmem:[%s10027_s8 + $0x15d8] sm:$0xff] %v1599_v60 }
 0x171   : > { %1602 = vst [vmem:[%s10027_s8 + $0x15e0] sm:$0xff] %v1601_v61  ;;  %1604 = vst [vmem:[%s10027_s8 + $0x15e8] sm:$0xff] %v1603_v62  ;;  %v1605_v63 = vld [vmem:[%s10019_s7 + $0x2be0] sm:$0xff]  ;;  %v1607_v0 = vld [vmem:[%s10019_s7 + $0x2be8] sm:$0xff] }
 0x172   : > { %v1609_v1 = vld [vmem:[%s10019_s7 + $0x2c00] sm:$0xff]  ;;  %1606 = vst [vmem:[%s10027_s8 + $0x15f0] sm:$0xff] %v1605_v63  ;;  %1608 = vst [vmem:[%s10027_s8 + $0x15f8] sm:$0xff] %v1607_v0  ;;  %v1611_v2 = vld [vmem:[%s10019_s7 + $0x2c08] sm:$0xff] }
 0x173   : > { %1610 = vst [vmem:[%s10027_s8 + $0x1600] sm:$0xff] %v1609_v1  ;;  %v1613_v3 = vld [vmem:[%s10019_s7 + $0x2c20] sm:$0xff]  ;;  %v1615_v4 = vld [vmem:[%s10019_s7 + $0x2c28] sm:$0xff]  ;;  %1612 = vst [vmem:[%s10027_s8 + $0x1608] sm:$0xff] %v1611_v2 }
 0x174   : > { %1614 = vst [vmem:[%s10027_s8 + $0x1610] sm:$0xff] %v1613_v3  ;;  %1616 = vst [vmem:[%s10027_s8 + $0x1618] sm:$0xff] %v1615_v4  ;;  %v1617_v5 = vld [vmem:[%s10019_s7 + $0x2c40] sm:$0xff]  ;;  %v1619_v6 = vld [vmem:[%s10019_s7 + $0x2c48] sm:$0xff] }
 0x175   : > { %v1621_v7 = vld [vmem:[%s10019_s7 + $0x2c60] sm:$0xff]  ;;  %1618 = vst [vmem:[%s10027_s8 + $0x1620] sm:$0xff] %v1617_v5  ;;  %1620 = vst [vmem:[%s10027_s8 + $0x1628] sm:$0xff] %v1619_v6  ;;  %v1623_v8 = vld [vmem:[%s10019_s7 + $0x2c68] sm:$0xff] }
 0x176   : > { %1622 = vst [vmem:[%s10027_s8 + $0x1630] sm:$0xff] %v1621_v7  ;;  %v1625_v9 = vld [vmem:[%s10019_s7 + $0x2c80] sm:$0xff]  ;;  %v1627_v10 = vld [vmem:[%s10019_s7 + $0x2c88] sm:$0xff]  ;;  %1624 = vst [vmem:[%s10027_s8 + $0x1638] sm:$0xff] %v1623_v8 }
 0x177   : > { %1626 = vst [vmem:[%s10027_s8 + $0x1640] sm:$0xff] %v1625_v9  ;;  %1628 = vst [vmem:[%s10027_s8 + $0x1648] sm:$0xff] %v1627_v10  ;;  %v1629_v11 = vld [vmem:[%s10019_s7 + $0x2ca0] sm:$0xff]  ;;  %v1631_v12 = vld [vmem:[%s10019_s7 + $0x2ca8] sm:$0xff] }
 0x178   : > { %v1633_v13 = vld [vmem:[%s10019_s7 + $0x2cc0] sm:$0xff]  ;;  %1630 = vst [vmem:[%s10027_s8 + $0x1650] sm:$0xff] %v1629_v11  ;;  %1632 = vst [vmem:[%s10027_s8 + $0x1658] sm:$0xff] %v1631_v12  ;;  %v1635_v14 = vld [vmem:[%s10019_s7 + $0x2cc8] sm:$0xff] }
 0x179   : > { %1634 = vst [vmem:[%s10027_s8 + $0x1660] sm:$0xff] %v1633_v13  ;;  %v1637_v15 = vld [vmem:[%s10019_s7 + $0x2ce0] sm:$0xff]  ;;  %v1639_v16 = vld [vmem:[%s10019_s7 + $0x2ce8] sm:$0xff]  ;;  %1636 = vst [vmem:[%s10027_s8 + $0x1668] sm:$0xff] %v1635_v14 }
 0x17a   : > { %1638 = vst [vmem:[%s10027_s8 + $0x1670] sm:$0xff] %v1637_v15  ;;  %1640 = vst [vmem:[%s10027_s8 + $0x1678] sm:$0xff] %v1639_v16  ;;  %v1641_v17 = vld [vmem:[%s10019_s7 + $0x2d00] sm:$0xff]  ;;  %v1643_v18 = vld [vmem:[%s10019_s7 + $0x2d08] sm:$0xff] }
 0x17b   : > { %v1645_v19 = vld [vmem:[%s10019_s7 + $0x2d20] sm:$0xff]  ;;  %1642 = vst [vmem:[%s10027_s8 + $0x1680] sm:$0xff] %v1641_v17  ;;  %1644 = vst [vmem:[%s10027_s8 + $0x1688] sm:$0xff] %v1643_v18  ;;  %v1647_v20 = vld [vmem:[%s10019_s7 + $0x2d28] sm:$0xff] }
 0x17c   : > { %1646 = vst [vmem:[%s10027_s8 + $0x1690] sm:$0xff] %v1645_v19  ;;  %v1649_v21 = vld [vmem:[%s10019_s7 + $0x2d40] sm:$0xff]  ;;  %v1651_v22 = vld [vmem:[%s10019_s7 + $0x2d48] sm:$0xff]  ;;  %1648 = vst [vmem:[%s10027_s8 + $0x1698] sm:$0xff] %v1647_v20 }
 0x17d   : > { %1650 = vst [vmem:[%s10027_s8 + $0x16a0] sm:$0xff] %v1649_v21  ;;  %1652 = vst [vmem:[%s10027_s8 + $0x16a8] sm:$0xff] %v1651_v22  ;;  %v1653_v23 = vld [vmem:[%s10019_s7 + $0x2d60] sm:$0xff]  ;;  %v1655_v24 = vld [vmem:[%s10019_s7 + $0x2d68] sm:$0xff] }
 0x17e   : > { %v1657_v25 = vld [vmem:[%s10019_s7 + $0x2d80] sm:$0xff]  ;;  %1654 = vst [vmem:[%s10027_s8 + $0x16b0] sm:$0xff] %v1653_v23  ;;  %1656 = vst [vmem:[%s10027_s8 + $0x16b8] sm:$0xff] %v1655_v24  ;;  %v1659_v26 = vld [vmem:[%s10019_s7 + $0x2d88] sm:$0xff] }
 0x17f   : > { %1658 = vst [vmem:[%s10027_s8 + $0x16c0] sm:$0xff] %v1657_v25  ;;  %v1661_v27 = vld [vmem:[%s10019_s7 + $0x2da0] sm:$0xff]  ;;  %v1663_v28 = vld [vmem:[%s10019_s7 + $0x2da8] sm:$0xff]  ;;  %1660 = vst [vmem:[%s10027_s8 + $0x16c8] sm:$0xff] %v1659_v26 }
 0x180   : > { %1662 = vst [vmem:[%s10027_s8 + $0x16d0] sm:$0xff] %v1661_v27  ;;  %1664 = vst [vmem:[%s10027_s8 + $0x16d8] sm:$0xff] %v1663_v28  ;;  %v1665_v29 = vld [vmem:[%s10019_s7 + $0x2dc0] sm:$0xff]  ;;  %v1667_v30 = vld [vmem:[%s10019_s7 + $0x2dc8] sm:$0xff] }
 0x181   : > { %v1669_v31 = vld [vmem:[%s10019_s7 + $0x2de0] sm:$0xff]  ;;  %1666 = vst [vmem:[%s10027_s8 + $0x16e0] sm:$0xff] %v1665_v29  ;;  %1668 = vst [vmem:[%s10027_s8 + $0x16e8] sm:$0xff] %v1667_v30  ;;  %v1671_v32 = vld [vmem:[%s10019_s7 + $0x2de8] sm:$0xff] }
 0x182   : > { %1670 = vst [vmem:[%s10027_s8 + $0x16f0] sm:$0xff] %v1669_v31  ;;  %v1673_v33 = vld [vmem:[%s10019_s7 + $0x2e00] sm:$0xff]  ;;  %v1675_v34 = vld [vmem:[%s10019_s7 + $0x2e08] sm:$0xff]  ;;  %1672 = vst [vmem:[%s10027_s8 + $0x16f8] sm:$0xff] %v1671_v32 }
 0x183   : > { %1674 = vst [vmem:[%s10027_s8 + $0x1700] sm:$0xff] %v1673_v33  ;;  %1676 = vst [vmem:[%s10027_s8 + $0x1708] sm:$0xff] %v1675_v34  ;;  %v1677_v35 = vld [vmem:[%s10019_s7 + $0x2e20] sm:$0xff]  ;;  %v1679_v36 = vld [vmem:[%s10019_s7 + $0x2e28] sm:$0xff] }
 0x184   : > { %v1681_v37 = vld [vmem:[%s10019_s7 + $0x2e40] sm:$0xff]  ;;  %1678 = vst [vmem:[%s10027_s8 + $0x1710] sm:$0xff] %v1677_v35  ;;  %1680 = vst [vmem:[%s10027_s8 + $0x1718] sm:$0xff] %v1679_v36  ;;  %v1683_v38 = vld [vmem:[%s10019_s7 + $0x2e48] sm:$0xff] }
 0x185   : > { %1682 = vst [vmem:[%s10027_s8 + $0x1720] sm:$0xff] %v1681_v37  ;;  %v1685_v39 = vld [vmem:[%s10019_s7 + $0x2e60] sm:$0xff]  ;;  %v1687_v40 = vld [vmem:[%s10019_s7 + $0x2e68] sm:$0xff]  ;;  %1684 = vst [vmem:[%s10027_s8 + $0x1728] sm:$0xff] %v1683_v38 }
 0x186   : > { %1686 = vst [vmem:[%s10027_s8 + $0x1730] sm:$0xff] %v1685_v39  ;;  %1688 = vst [vmem:[%s10027_s8 + $0x1738] sm:$0xff] %v1687_v40  ;;  %v1689_v41 = vld [vmem:[%s10019_s7 + $0x2e80] sm:$0xff]  ;;  %v1691_v42 = vld [vmem:[%s10019_s7 + $0x2e88] sm:$0xff] }
 0x187   : > { %v1693_v43 = vld [vmem:[%s10019_s7 + $0x2ea0] sm:$0xff]  ;;  %1690 = vst [vmem:[%s10027_s8 + $0x1740] sm:$0xff] %v1689_v41  ;;  %1692 = vst [vmem:[%s10027_s8 + $0x1748] sm:$0xff] %v1691_v42  ;;  %v1695_v44 = vld [vmem:[%s10019_s7 + $0x2ea8] sm:$0xff] }
 0x188   : > { %1694 = vst [vmem:[%s10027_s8 + $0x1750] sm:$0xff] %v1693_v43  ;;  %v1697_v45 = vld [vmem:[%s10019_s7 + $0x2ec0] sm:$0xff]  ;;  %v1699_v46 = vld [vmem:[%s10019_s7 + $0x2ec8] sm:$0xff]  ;;  %1696 = vst [vmem:[%s10027_s8 + $0x1758] sm:$0xff] %v1695_v44 }
 0x189   : > { %1698 = vst [vmem:[%s10027_s8 + $0x1760] sm:$0xff] %v1697_v45  ;;  %1700 = vst [vmem:[%s10027_s8 + $0x1768] sm:$0xff] %v1699_v46  ;;  %v1701_v47 = vld [vmem:[%s10019_s7 + $0x2ee0] sm:$0xff]  ;;  %v1703_v48 = vld [vmem:[%s10019_s7 + $0x2ee8] sm:$0xff] }
 0x18a   : > { %v1705_v49 = vld [vmem:[%s10019_s7 + $0x2f00] sm:$0xff]  ;;  %1702 = vst [vmem:[%s10027_s8 + $0x1770] sm:$0xff] %v1701_v47  ;;  %1704 = vst [vmem:[%s10027_s8 + $0x1778] sm:$0xff] %v1703_v48  ;;  %v1707_v50 = vld [vmem:[%s10019_s7 + $0x2f08] sm:$0xff] }
 0x18b   : > { %1706 = vst [vmem:[%s10027_s8 + $0x1780] sm:$0xff] %v1705_v49  ;;  %v1709_v51 = vld [vmem:[%s10019_s7 + $0x2f20] sm:$0xff]  ;;  %v1711_v52 = vld [vmem:[%s10019_s7 + $0x2f28] sm:$0xff]  ;;  %1708 = vst [vmem:[%s10027_s8 + $0x1788] sm:$0xff] %v1707_v50 }
 0x18c   : > { %1710 = vst [vmem:[%s10027_s8 + $0x1790] sm:$0xff] %v1709_v51  ;;  %1712 = vst [vmem:[%s10027_s8 + $0x1798] sm:$0xff] %v1711_v52  ;;  %v1713_v53 = vld [vmem:[%s10019_s7 + $0x2f40] sm:$0xff]  ;;  %v1715_v54 = vld [vmem:[%s10019_s7 + $0x2f48] sm:$0xff] }
 0x18d   : > { %v1717_v55 = vld [vmem:[%s10019_s7 + $0x2f60] sm:$0xff]  ;;  %1714 = vst [vmem:[%s10027_s8 + $0x17a0] sm:$0xff] %v1713_v53  ;;  %1716 = vst [vmem:[%s10027_s8 + $0x17a8] sm:$0xff] %v1715_v54  ;;  %v1719_v56 = vld [vmem:[%s10019_s7 + $0x2f68] sm:$0xff] }
 0x18e   : > { %1718 = vst [vmem:[%s10027_s8 + $0x17b0] sm:$0xff] %v1717_v55  ;;  %v1721_v57 = vld [vmem:[%s10019_s7 + $0x2f80] sm:$0xff]  ;;  %v1723_v58 = vld [vmem:[%s10019_s7 + $0x2f88] sm:$0xff]  ;;  %1720 = vst [vmem:[%s10027_s8 + $0x17b8] sm:$0xff] %v1719_v56 }
 0x18f   : > { %1722 = vst [vmem:[%s10027_s8 + $0x17c0] sm:$0xff] %v1721_v57  ;;  %1724 = vst [vmem:[%s10027_s8 + $0x17c8] sm:$0xff] %v1723_v58  ;;  %v1725_v59 = vld [vmem:[%s10019_s7 + $0x2fa0] sm:$0xff]  ;;  %v1727_v60 = vld [vmem:[%s10019_s7 + $0x2fa8] sm:$0xff] }
 0x190   : > { %v1729_v61 = vld [vmem:[%s10019_s7 + $0x2fc0] sm:$0xff]  ;;  %1726 = vst [vmem:[%s10027_s8 + $0x17d0] sm:$0xff] %v1725_v59  ;;  %1728 = vst [vmem:[%s10027_s8 + $0x17d8] sm:$0xff] %v1727_v60  ;;  %v1731_v62 = vld [vmem:[%s10019_s7 + $0x2fc8] sm:$0xff] }
 0x191   : > { %1730 = vst [vmem:[%s10027_s8 + $0x17e0] sm:$0xff] %v1729_v61  ;;  %v1733_v63 = vld [vmem:[%s10019_s7 + $0x2fe0] sm:$0xff]  ;;  %v1735_v0 = vld [vmem:[%s10019_s7 + $0x2fe8] sm:$0xff]  ;;  %1732 = vst [vmem:[%s10027_s8 + $0x17e8] sm:$0xff] %v1731_v62 }
 0x192   : > { %1734 = vst [vmem:[%s10027_s8 + $0x17f0] sm:$0xff] %v1733_v63  ;;  %1736 = vst [vmem:[%s10027_s8 + $0x17f8] sm:$0xff] %v1735_v0  ;;  %v1737_v1 = vld [vmem:[%s10019_s7 + $0x3000] sm:$0xff]  ;;  %v1739_v2 = vld [vmem:[%s10019_s7 + $0x3008] sm:$0xff] }
 0x193   : > { %v1741_v3 = vld [vmem:[%s10019_s7 + $0x3020] sm:$0xff]  ;;  %1738 = vst [vmem:[%s10027_s8 + $0x1800] sm:$0xff] %v1737_v1  ;;  %1740 = vst [vmem:[%s10027_s8 + $0x1808] sm:$0xff] %v1739_v2  ;;  %v1743_v4 = vld [vmem:[%s10019_s7 + $0x3028] sm:$0xff] }
 0x194   : > { %1742 = vst [vmem:[%s10027_s8 + $0x1810] sm:$0xff] %v1741_v3  ;;  %v1745_v5 = vld [vmem:[%s10019_s7 + $0x3040] sm:$0xff]  ;;  %v1747_v6 = vld [vmem:[%s10019_s7 + $0x3048] sm:$0xff]  ;;  %1744 = vst [vmem:[%s10027_s8 + $0x1818] sm:$0xff] %v1743_v4 }
 0x195   : > { %1746 = vst [vmem:[%s10027_s8 + $0x1820] sm:$0xff] %v1745_v5  ;;  %1748 = vst [vmem:[%s10027_s8 + $0x1828] sm:$0xff] %v1747_v6  ;;  %v1749_v7 = vld [vmem:[%s10019_s7 + $0x3060] sm:$0xff]  ;;  %v1751_v8 = vld [vmem:[%s10019_s7 + $0x3068] sm:$0xff] }
 0x196   : > { %v1753_v9 = vld [vmem:[%s10019_s7 + $0x3080] sm:$0xff]  ;;  %1750 = vst [vmem:[%s10027_s8 + $0x1830] sm:$0xff] %v1749_v7  ;;  %1752 = vst [vmem:[%s10027_s8 + $0x1838] sm:$0xff] %v1751_v8  ;;  %v1755_v10 = vld [vmem:[%s10019_s7 + $0x3088] sm:$0xff] }
 0x197   : > { %1754 = vst [vmem:[%s10027_s8 + $0x1840] sm:$0xff] %v1753_v9  ;;  %v1757_v11 = vld [vmem:[%s10019_s7 + $0x30a0] sm:$0xff]  ;;  %v1759_v12 = vld [vmem:[%s10019_s7 + $0x30a8] sm:$0xff]  ;;  %1756 = vst [vmem:[%s10027_s8 + $0x1848] sm:$0xff] %v1755_v10 }
 0x198   : > { %1758 = vst [vmem:[%s10027_s8 + $0x1850] sm:$0xff] %v1757_v11  ;;  %1760 = vst [vmem:[%s10027_s8 + $0x1858] sm:$0xff] %v1759_v12  ;;  %v1761_v13 = vld [vmem:[%s10019_s7 + $0x30c0] sm:$0xff]  ;;  %v1763_v14 = vld [vmem:[%s10019_s7 + $0x30c8] sm:$0xff] }
 0x199   : > { %v1765_v15 = vld [vmem:[%s10019_s7 + $0x30e0] sm:$0xff]  ;;  %1762 = vst [vmem:[%s10027_s8 + $0x1860] sm:$0xff] %v1761_v13  ;;  %1764 = vst [vmem:[%s10027_s8 + $0x1868] sm:$0xff] %v1763_v14  ;;  %v1767_v16 = vld [vmem:[%s10019_s7 + $0x30e8] sm:$0xff] }
 0x19a   : > { %1766 = vst [vmem:[%s10027_s8 + $0x1870] sm:$0xff] %v1765_v15  ;;  %1768 = vst [vmem:[%s10027_s8 + $0x1878] sm:$0xff] %v1767_v16 }
 0x19b PF: > { %p7869_p5 = scmp.ge.s32.totalorder %s9946_s22, 1  ;;  %p1789_p6 = scmp.lt.s32.totalorder %s9946_s22, 3 }
 0x19d   : > { %p1790_p7 = pnand %p7869_p5, %p1789_p6 }
 0x19e   : > { %s1796_s9 = sand.u32 (!%p1790_p7), 1, %s9938_s20   ;;  %s7870_s10 = sshll.u32 (!%p1790_p7), %s9999_s4, 2 }
 0x19f   : > { %1793 = sbr.rel (%p1790_p7) target bundleno = 1611 (0x64b), region = 59  ;;  %p1828_p8 = scmp.lt.s32.totalorder (!%p1790_p7), %s7870_s10, 7 }
 0x1a0   : > { %s8690_s11 = smul.u32 (!%p1790_p7), 6272, %s1796_s9  ;;  %p7872_p9 = scmp.ne.s32.totalorder (!%p1790_p7), %s9999_s4, 0 }
 0x1a2   : > { %s11607_s18 = scalar_lea.vmem (!%p1790_p7), [#allocation4], %s8690_s11 }
 0x1a4   : > { %s12702_s10 = smov (!%p1828_p8, %s7870_s10), 7  ;;  %1841 = sbr.rel (%p7872_p9) target bundleno = 427 (0x1ab), region = 67 }
 0x1a5   : > { %s11601_s14 = scalar_lea.vmem %s12694_s2, %s12702_s10  ;;  %s1835_s17 = scalar_lea.vmem %s12695_s3, %s12702_s10 }
 0x1a9   : > { %vm1842_vm0 = vcmask 7168   ;;  %v9948_v17 = vmov 0.0  }
 0x1aa   : > { %1843 = vst.msk [vmem:[#allocation2] sm:$0xff] %vm1842_vm0, %v9948_v17 }
 0x1ab PF: > { %v8717_v18 = vld [vmem:[%s11607_s18 + $0xe4] ss:$16 sps:$4 sm:$0xff]   ;;  %v8721_v20 = vld [vmem:[%s11607_s18 + $0xe0] ss:$16 sps:$4 sm:$0xff]   ;;  %vm6670_vm1 = vcmask 523264   ;;  %vm7785_vm6 = vcmask 7168  }
 0x1ac   : > { %v8719_v19 = vld [vmem:[%s11607_s18 + $0x2e4] ss:$16 sps:$4 sm:$0xff]   ;;  %6674 = vmatprep.subr.bf16.mxu0 %v8717_v18  ;;  %v8722_v21 = vld [vmem:[%s11607_s18 + $0x2e0] ss:$16 sps:$4 sm:$0xff]   ;;  %p8684_p10 = scmp.ne.s32.totalorder %s9999_s4, 1 }
 0x1ad   : > { %6715 = vmatprep.subr.bf16.mxu1 %v8719_v19  ;;  %v8723_v22 = vld [vmem:[%s11607_s18 + $0xc4] ss:$16 sps:$4 sm:$0xff]   ;;  %6675 = vmatpush1.bf16.msra.mxu0 %v8721_v20  ;;  %v8727_v24 = vld [vmem:[%s11607_s18 + $0xc0] ss:$16 sps:$4 sm:$0xff]  }
 0x1ae   : > { %6716 = vmatpush1.bf16.msra.mxu1 %v8722_v21  ;;  %v8725_v23 = vld [vmem:[%s11607_s18 + $0x2c4] ss:$16 sps:$4 sm:$0xff]   ;;  %6676 = vmatprep.subr.bf16.mxu0 %v8723_v22  ;;  %v8728_v25 = vld [vmem:[%s11607_s18 + $0x2c0] ss:$16 sps:$4 sm:$0xff]  }
 0x1af   : > { %6717 = vmatprep.subr.bf16.mxu1 %v8725_v23  ;;  %v8729_v26 = vld [vmem:[%s11607_s18 + $0xa4] ss:$16 sps:$4 sm:$0xff]   ;;  %v8733_v28 = vld [vmem:[%s11607_s18 + $0xa0] ss:$16 sps:$4 sm:$0xff]  }
 0x1b0   : > { %v8731_v27 = vld [vmem:[%s11607_s18 + $0x2a4] ss:$16 sps:$4 sm:$0xff]   ;;  %v8734_v29 = vld [vmem:[%s11607_s18 + $0x2a0] ss:$16 sps:$4 sm:$0xff]  }
 0x1b1   : > { %6677 = vmatpush1.bf16.msra.mxu0 %v8727_v24  ;;  %v8735_v30 = vld [vmem:[%s11607_s18 + $0x84] ss:$16 sps:$4 sm:$0xff]   ;;  %v8739_v32 = vld [vmem:[%s11607_s18 + $0x80] ss:$16 sps:$4 sm:$0xff]  }
 0x1b2   : > { %6718 = vmatpush1.bf16.msra.mxu1 %v8728_v25  ;;  %6678 = vmatprep.subr.bf16.mxu0 %v8729_v26  ;;  %v8737_v31 = vld [vmem:[%s11607_s18 + $0x284] ss:$16 sps:$4 sm:$0xff]   ;;  %v8740_v33 = vld [vmem:[%s11607_s18 + $0x280] ss:$16 sps:$4 sm:$0xff]  }
 0x1b3   : > { %6719 = vmatprep.subr.bf16.mxu1 %v8731_v27  ;;  %v8741_v34 = vld [vmem:[%s11607_s18 + $0x64] ss:$16 sps:$4 sm:$0xff]   ;;  %v8745_v36 = vld [vmem:[%s11607_s18 + $0x60] ss:$16 sps:$4 sm:$0xff]  }
 0x1b4   : > { %v8743_v35 = vld [vmem:[%s11607_s18 + $0x264] ss:$16 sps:$4 sm:$0xff]   ;;  %v8746_v37 = vld [vmem:[%s11607_s18 + $0x260] ss:$16 sps:$4 sm:$0xff]  }
 0x1b5   : > { %6679 = vmatpush1.bf16.msra.mxu0 %v8733_v28  ;;  %v8747_v38 = vld [vmem:[%s11607_s18 + $0x44] ss:$16 sps:$4 sm:$0xff]   ;;  %v8751_v40 = vld [vmem:[%s11607_s18 + $0x40] ss:$16 sps:$4 sm:$0xff]  }
 0x1b6   : > { %6720 = vmatpush1.bf16.msra.mxu1 %v8734_v29  ;;  %6680 = vmatprep.subr.bf16.mxu0 %v8735_v30  ;;  %v8749_v39 = vld [vmem:[%s11607_s18 + $0x244] ss:$16 sps:$4 sm:$0xff]   ;;  %v8752_v41 = vld [vmem:[%s11607_s18 + $0x240] ss:$16 sps:$4 sm:$0xff]  }
 0x1b7   : > { %6721 = vmatprep.subr.bf16.mxu1 %v8737_v31  ;;  %v8753_v42 = vld [vmem:[%s11607_s18 + $0x24] ss:$16 sps:$4 sm:$0xff]   ;;  %v8757_v44 = vld [vmem:[%s11607_s18 + $0x20] ss:$16 sps:$4 sm:$0xff]  }
 0x1b8   : > { %v8755_v43 = vld [vmem:[%s11607_s18 + $0x224] ss:$16 sps:$4 sm:$0xff]   ;;  %v8758_v45 = vld [vmem:[%s11607_s18 + $0x220] ss:$16 sps:$4 sm:$0xff]  }
 0x1b9   : > { %6681 = vmatpush1.bf16.msra.mxu0 %v8739_v32  ;;  %v8759_v46 = vld [vmem:[%s11607_s18 + $0x4] ss:$16 sps:$4 sm:$0xff]   ;;  %v8763_v48 = vld [vmem:[%s11607_s18] ss:$16 sps:$4 sm:$0xff]  }
 0x1ba   : > { %6722 = vmatpush1.bf16.msra.mxu1 %v8740_v33  ;;  %6682 = vmatprep.subr.bf16.mxu0 %v8741_v34  ;;  %v8761_v47 = vld [vmem:[%s11607_s18 + $0x204] ss:$16 sps:$4 sm:$0xff]   ;;  %v8764_v49 = vld [vmem:[%s11607_s18 + $0x200] ss:$16 sps:$4 sm:$0xff]  }
 0x1bb   : > { %6723 = vmatprep.subr.bf16.mxu1 %v8743_v35  ;;  %v8765_v50 = vld [vmem:[%s11607_s18 + $0x1e4] ss:$16 sps:$4 sm:$0xff]   ;;  %v8769_v52 = vld [vmem:[%s11607_s18 + $0x1e0] ss:$16 sps:$4 sm:$0xff]  }
 0x1bc   : > { %v8767_v51 = vld [vmem:[%s11607_s18 + $0x3e4] ss:$16 sps:$4 sm:$0xff]   ;;  %v8770_v53 = vld [vmem:[%s11607_s18 + $0x3e0] ss:$16 sps:$4 sm:$0xff]  }
 0x1bd   : > { %6683 = vmatpush1.bf16.msra.mxu0 %v8745_v36  ;;  %v8771_v54 = vld [vmem:[%s11607_s18 + $0x1c4] ss:$16 sps:$4 sm:$0xff]   ;;  %v8775_v56 = vld [vmem:[%s11607_s18 + $0x1c0] ss:$16 sps:$4 sm:$0xff]  }
 0x1be   : > { %6724 = vmatpush1.bf16.msra.mxu1 %v8746_v37  ;;  %6684 = vmatprep.subr.bf16.mxu0 %v8747_v38  ;;  %v8773_v55 = vld [vmem:[%s11607_s18 + $0x3c4] ss:$16 sps:$4 sm:$0xff]   ;;  %v8776_v57 = vld [vmem:[%s11607_s18 + $0x3c0] ss:$16 sps:$4 sm:$0xff]  }
 0x1bf   : > { %6725 = vmatprep.subr.bf16.mxu1 %v8749_v39  ;;  %v8777_v58 = vld [vmem:[%s11607_s18 + $0x1a4] ss:$16 sps:$4 sm:$0xff]   ;;  %v8781_v60 = vld [vmem:[%s11607_s18 + $0x1a0] ss:$16 sps:$4 sm:$0xff]  }
 0x1c0   : > { %v8779_v59 = vld [vmem:[%s11607_s18 + $0x3a4] ss:$16 sps:$4 sm:$0xff]   ;;  %v8782_v61 = vld [vmem:[%s11607_s18 + $0x3a0] ss:$16 sps:$4 sm:$0xff]  }
 0x1c1   : > { %6685 = vmatpush1.bf16.msra.mxu0 %v8751_v40  ;;  %v8783_v62 = vld [vmem:[%s11607_s18 + $0x184] ss:$16 sps:$4 sm:$0xff]   ;;  %v8787_v3 = vld [vmem:[%s11607_s18 + $0x180] ss:$16 sps:$4 sm:$0xff]  }
 0x1c2   : > { %6726 = vmatpush1.bf16.msra.mxu1 %v8752_v41  ;;  %6686 = vmatprep.subr.bf16.mxu0 %v8753_v42  ;;  %v8785_v63 = vld [vmem:[%s11607_s18 + $0x384] ss:$16 sps:$4 sm:$0xff]   ;;  %v8788_v4 = vld [vmem:[%s11607_s18 + $0x380] ss:$16 sps:$4 sm:$0xff]  }
 0x1c3   : > { %6727 = vmatprep.subr.bf16.mxu1 %v8755_v43  ;;  %v1844_v0 = vld [vmem:[%s12692_s0] sm:$0xff]  ;;  %v1845_v2 = vld [vmem:[%s12692_s0 + $0x8] sm:$0xff] }
 0x1c4   : > { %v11659_v1 = vcombine.high %v1844_v0, %v1844_v0  ;;  %v11666_v5 = vcombine.high %v1845_v2, %v1845_v2  ;;  %v8789_v6 = vld [vmem:[%s11607_s18 + $0x164] ss:$16 sps:$4 sm:$0xff]   ;;  %v8793_v8 = vld [vmem:[%s11607_s18 + $0x160] ss:$16 sps:$4 sm:$0xff]   ;;  %v11688_v24 = vcombine.low %v1844_v0, %v1844_v0  ;;  %v11690_v25 = vcombine.low %v1845_v2, %v1845_v2 }
 0x1c5   : > { %6687 = vmatpush1.bf16.msra.mxu0 %v8757_v44  ;;  %v8791_v7 = vld [vmem:[%s11607_s18 + $0x364] ss:$16 sps:$4 sm:$0xff]   ;;  %v8794_v9 = vld [vmem:[%s11607_s18 + $0x360] ss:$16 sps:$4 sm:$0xff]  }
 0x1c6   : > { %6728 = vmatpush1.bf16.msra.mxu1 %v8758_v45  ;;  %6688 = vmatprep.subr.bf16.mxu0 %v8759_v46  ;;  %v8795_v10 = vld [vmem:[%s11607_s18 + $0x144] ss:$16 sps:$4 sm:$0xff]   ;;  %v8799_v12 = vld [vmem:[%s11607_s18 + $0x140] ss:$16 sps:$4 sm:$0xff]  }
 0x1c7   : > { %6729 = vmatprep.subr.bf16.mxu1 %v8761_v47  ;;  %6706 = vmatprep.mubr.bf16.mxu0 %v11659_v1  ;;  %v8797_v11 = vld [vmem:[%s11607_s18 + $0x344] ss:$16 sps:$4 sm:$0xff]   ;;  %v8800_v13 = vld [vmem:[%s11607_s18 + $0x340] ss:$16 sps:$4 sm:$0xff]  }
 0x1c8   : > { %6747 = vmatprep.mubr.bf16.mxu1 %v11666_v5  ;;  %v8801_v14 = vld [vmem:[%s11607_s18 + $0x124] ss:$16 sps:$4 sm:$0xff]   ;;  %v8805_v16 = vld [vmem:[%s11607_s18 + $0x120] ss:$16 sps:$4 sm:$0xff]  }
 0x1c9   : > { %6689 = vmatpush1.bf16.msra.mxu0 %v8763_v48  ;;  %v8803_v15 = vld [vmem:[%s11607_s18 + $0x324] ss:$16 sps:$4 sm:$0xff]   ;;  %v8806_v17 = vld [vmem:[%s11607_s18 + $0x320] ss:$16 sps:$4 sm:$0xff]  }
 0x1ca   : > { %6730 = vmatpush1.bf16.msra.mxu1 %v8764_v49  ;;  %6690 = vmatprep.subr.bf16.mxu0 %v8765_v50  ;;  %v8807_v18 = vld [vmem:[%s11607_s18 + $0x104] ss:$16 sps:$4 sm:$0xff]   ;;  %v8811_v20 = vld [vmem:[%s11607_s18 + $0x100] ss:$16 sps:$4 sm:$0xff]  }
 0x1cb   : > { %6731 = vmatprep.subr.bf16.mxu1 %v8767_v51  ;;  %v8809_v19 = vld [vmem:[%s11607_s18 + $0x304] ss:$16 sps:$4 sm:$0xff]   ;;  %v8812_v21 = vld [vmem:[%s11607_s18 + $0x300] ss:$16 sps:$4 sm:$0xff]  }
 0x1cc   : > { %v8819_v22 = vld [vmem:[%s11607_s18 + $0x4e4] ss:$16 sps:$4 sm:$0xff]   ;;  %v8817_v26 = vld [vmem:[%s11607_s18 + $0x4e0] ss:$16 sps:$4 sm:$0xff]  }
 0x1cd   : > { %6691 = vmatpush2.bf16.msra.mxu0 %v8769_v52  ;;  %v8822_v23 = vld [vmem:[%s11607_s18 + $0x6e4] ss:$16 sps:$4 sm:$0xff]   ;;  %v8820_v27 = vld [vmem:[%s11607_s18 + $0x6e0] ss:$16 sps:$4 sm:$0xff]  }
 0x1ce   : > { %6732 = vmatpush2.bf16.msra.mxu1 %v8770_v53  ;;  %6692 = vmatprep.subr.bf16.mxu0 %v8771_v54  ;;  %v8825_v28 = vld [vmem:[%s11607_s18 + $0x4c4] ss:$16 sps:$4 sm:$0xff]   ;;  %v8823_v30 = vld [vmem:[%s11607_s18 + $0x4c0] ss:$16 sps:$4 sm:$0xff]  }
 0x1cf   : > { %6733 = vmatprep.subr.bf16.mxu1 %v8773_v55  ;;  %v8828_v29 = vld [vmem:[%s11607_s18 + $0x6c4] ss:$16 sps:$4 sm:$0xff]   ;;  %v8826_v31 = vld [vmem:[%s11607_s18 + $0x6c0] ss:$16 sps:$4 sm:$0xff]  }
 0x1d0   : > { %v8831_v32 = vld [vmem:[%s11607_s18 + $0x4a4] ss:$16 sps:$4 sm:$0xff]   ;;  %v8829_v34 = vld [vmem:[%s11607_s18 + $0x4a0] ss:$16 sps:$4 sm:$0xff]  }
 0x1d1   : > { %6693 = vmatpush2.bf16.msra.mxu0 %v8775_v56  ;;  %v8834_v33 = vld [vmem:[%s11607_s18 + $0x6a4] ss:$16 sps:$4 sm:$0xff]   ;;  %v8832_v35 = vld [vmem:[%s11607_s18 + $0x6a0] ss:$16 sps:$4 sm:$0xff]  }
 0x1d2   : > { %6734 = vmatpush2.bf16.msra.mxu1 %v8776_v57  ;;  %6694 = vmatprep.subr.bf16.mxu0 %v8777_v58  ;;  %v8837_v36 = vld [vmem:[%s11607_s18 + $0x484] ss:$16 sps:$4 sm:$0xff]   ;;  %v8835_v38 = vld [vmem:[%s11607_s18 + $0x480] ss:$16 sps:$4 sm:$0xff]  }
 0x1d3   : > { %6735 = vmatprep.subr.bf16.mxu1 %v8779_v59  ;;  %v8840_v37 = vld [vmem:[%s11607_s18 + $0x684] ss:$16 sps:$4 sm:$0xff]   ;;  %v8838_v39 = vld [vmem:[%s11607_s18 + $0x680] ss:$16 sps:$4 sm:$0xff]  }
 0x1d4   : > { %v8843_v40 = vld [vmem:[%s11607_s18 + $0x464] ss:$16 sps:$4 sm:$0xff]   ;;  %v8841_v42 = vld [vmem:[%s11607_s18 + $0x460] ss:$16 sps:$4 sm:$0xff]  }
 0x1d5   : > { %6695 = vmatpush2.bf16.msra.mxu0 %v8781_v60  ;;  %v8846_v41 = vld [vmem:[%s11607_s18 + $0x664] ss:$16 sps:$4 sm:$0xff]   ;;  %v8844_v43 = vld [vmem:[%s11607_s18 + $0x660] ss:$16 sps:$4 sm:$0xff]  }
 0x1d6   : > { %6736 = vmatpush2.bf16.msra.mxu1 %v8782_v61  ;;  %6696 = vmatprep.subr.bf16.mxu0 %v8783_v62  ;;  %v8849_v44 = vld [vmem:[%s11607_s18 + $0x444] ss:$16 sps:$4 sm:$0xff]   ;;  %v8847_v46 = vld [vmem:[%s11607_s18 + $0x440] ss:$16 sps:$4 sm:$0xff]  }
 0x1d7   : > { %6737 = vmatprep.subr.bf16.mxu1 %v8785_v63  ;;  %v8852_v45 = vld [vmem:[%s11607_s18 + $0x644] ss:$16 sps:$4 sm:$0xff]   ;;  %v8850_v47 = vld [vmem:[%s11607_s18 + $0x640] ss:$16 sps:$4 sm:$0xff]  }
 0x1d8   : > { %v8855_v48 = vld [vmem:[%s11607_s18 + $0x424] ss:$16 sps:$4 sm:$0xff]   ;;  %v8853_v52 = vld [vmem:[%s11607_s18 + $0x420] ss:$16 sps:$4 sm:$0xff]  }
 0x1d9   : > { %6697 = vmatpush2.bf16.msra.mxu0 %v8787_v3  ;;  %v8858_v49 = vld [vmem:[%s11607_s18 + $0x624] ss:$16 sps:$4 sm:$0xff]   ;;  %v8856_v53 = vld [vmem:[%s11607_s18 + $0x620] ss:$16 sps:$4 sm:$0xff]  }
 0x1da   : > { %6738 = vmatpush2.bf16.msra.mxu1 %v8788_v4  ;;  %6698 = vmatprep.subr.bf16.mxu0 %v8789_v6  ;;  %v11721_v50 = vld [vmem:[%s12692_s0 + $0x10] sm:$0xff]  ;;  %v11726_v51 = vld [vmem:[%s12692_s0 + $0x18] sm:$0xff] }
 0x1db   : > { %6739 = vmatprep.subr.bf16.mxu1 %v8791_v7  ;;  %v11732_v54 = vcombine.high %v11721_v50, %v11721_v50  ;;  %v11736_v55 = vcombine.high %v11726_v51, %v11726_v51  ;;  %v8861_v56 = vld [vmem:[%s11607_s18 + $0x404] ss:$16 sps:$4 sm:$0xff]   ;;  %v8859_v58 = vld [vmem:[%s11607_s18 + $0x400] ss:$16 sps:$4 sm:$0xff]  }
 0x1dc   : > { %v8864_v57 = vld [vmem:[%s11607_s18 + $0x604] ss:$16 sps:$4 sm:$0xff]   ;;  %v8862_v59 = vld [vmem:[%s11607_s18 + $0x600] ss:$16 sps:$4 sm:$0xff]  }
 0x1dd   : > { %6699 = vmatpush2.bf16.msra.mxu0 %v8793_v8  ;;  %v8867_v60 = vld [vmem:[%s11607_s18 + $0x5e4] ss:$16 sps:$4 sm:$0xff]   ;;  %v8865_v62 = vld [vmem:[%s11607_s18 + $0x5e0] ss:$16 sps:$4 sm:$0xff]  }
 0x1de   : > { %6740 = vmatpush2.bf16.msra.mxu1 %v8794_v9  ;;  %6700 = vmatprep.subr.bf16.mxu0 %v8795_v10  ;;  %v8870_v61 = vld [vmem:[%s11607_s18 + $0x7e4] ss:$16 sps:$4 sm:$0xff]   ;;  %v8868_v63 = vld [vmem:[%s11607_s18 + $0x7e0] ss:$16 sps:$4 sm:$0xff]  }
 0x1df   : > { %6741 = vmatprep.subr.bf16.mxu1 %v8797_v11  ;;  %v8873_v0 = vld [vmem:[%s11607_s18 + $0x5c4] ss:$16 sps:$4 sm:$0xff]   ;;  %v8871_v3 = vld [vmem:[%s11607_s18 + $0x5c0] ss:$16 sps:$4 sm:$0xff]  }
 0x1e0   : > { %v8876_v2 = vld [vmem:[%s11607_s18 + $0x7c4] ss:$16 sps:$4 sm:$0xff]   ;;  %v8874_v4 = vld [vmem:[%s11607_s18 + $0x7c0] ss:$16 sps:$4 sm:$0xff]  }
 0x1e1   : > { %6701 = vmatpush2.bf16.msra.mxu0 %v8799_v12  ;;  %v8879_v6 = vld [vmem:[%s11607_s18 + $0x5a4] ss:$16 sps:$4 sm:$0xff]   ;;  %v8877_v8 = vld [vmem:[%s11607_s18 + $0x5a0] ss:$16 sps:$4 sm:$0xff]  }
 0x1e2   : > { %6742 = vmatpush2.bf16.msra.mxu1 %v8800_v13  ;;  %6702 = vmatprep.subr.bf16.mxu0 %v8801_v14  ;;  %v8882_v7 = vld [vmem:[%s11607_s18 + $0x7a4] ss:$16 sps:$4 sm:$0xff]   ;;  %v8880_v9 = vld [vmem:[%s11607_s18 + $0x7a0] ss:$16 sps:$4 sm:$0xff]  }
 0x1e3   : > { %6743 = vmatprep.subr.bf16.mxu1 %v8803_v15  ;;  %v8885_v10 = vld [vmem:[%s11607_s18 + $0x584] ss:$16 sps:$4 sm:$0xff]   ;;  %v8883_v12 = vld [vmem:[%s11607_s18 + $0x580] ss:$16 sps:$4 sm:$0xff]  }
 0x1e4   : > { %v8888_v11 = vld [vmem:[%s11607_s18 + $0x784] ss:$16 sps:$4 sm:$0xff]   ;;  %v8886_v13 = vld [vmem:[%s11607_s18 + $0x780] ss:$16 sps:$4 sm:$0xff]  }
 0x1e5   : > { %6703 = vmatpush2.bf16.msra.mxu0 %v8805_v16  ;;  %v8891_v14 = vld [vmem:[%s11607_s18 + $0x564] ss:$16 sps:$4 sm:$0xff]   ;;  %v8889_v16 = vld [vmem:[%s11607_s18 + $0x560] ss:$16 sps:$4 sm:$0xff]  }
 0x1e6   : > { %6744 = vmatpush2.bf16.msra.mxu1 %v8806_v17  ;;  %6704 = vmatprep.subr.bf16.mxu0 %v8807_v18  ;;  %v8894_v15 = vld [vmem:[%s11607_s18 + $0x764] ss:$16 sps:$4 sm:$0xff]   ;;  %v8892_v17 = vld [vmem:[%s11607_s18 + $0x760] ss:$16 sps:$4 sm:$0xff]  }
 0x1e7   : > { %6745 = vmatprep.subr.bf16.mxu1 %v8809_v19  ;;  %v8897_v18 = vld [vmem:[%s11607_s18 + $0x544] ss:$16 sps:$4 sm:$0xff]  }
 0x1e8   : > { %v8900_v19 = vld [vmem:[%s11607_s18 + $0x744] ss:$16 sps:$4 sm:$0xff]  }
 0x1e9   : > { %6705 = vmatpush2.bf16.msra.mxu0 %v8811_v20  ;;  %v8895_v20 = vld [vmem:[%s11607_s18 + $0x540] ss:$16 sps:$4 sm:$0xff]  }
 0x1ea   : > { %6746 = vmatpush2.bf16.msra.mxu1 %v8812_v21  ;;  %6756 = vmatprep.subr.bf16.mxu0 %v8819_v22  ;;  %v8898_v21 = vld [vmem:[%s11607_s18 + $0x740] ss:$16 sps:$4 sm:$0xff]   ;;  %v8903_v22 = vld [vmem:[%s11607_s18 + $0x524] ss:$16 sps:$4 sm:$0xff]  }
 0x1eb   : > { %6797 = vmatprep.subr.bf16.mxu1 %v8822_v23  ;;  %v8906_v23 = vld [vmem:[%s11607_s18 + $0x724] ss:$16 sps:$4 sm:$0xff]  }
 0x1ec   : > { %6707 = vmatmul.mubr.bf16.vlgmr.msra.gmra.mxu0 %v11688_v24 }
 0x1ed   : > { %6748 = vmatmul.mubr.bf16.vlgmr.msra.gmra.mxu1 %v11690_v25  ;;  %6757 = vmatpush1.bf16.msra.mxu0 %v8817_v26  ;;  %v8901_v26 = vld [vmem:[%s11607_s18 + $0x520] ss:$16 sps:$4 sm:$0xff]  }
 0x1ee   : > { %6798 = vmatpush1.bf16.msra.mxu1 %v8820_v27  ;;  %6758 = vmatprep.subr.bf16.mxu0 %v8825_v28  ;;  %v8904_v27 = vld [vmem:[%s11607_s18 + $0x720] ss:$16 sps:$4 sm:$0xff]   ;;  %v8909_v28 = vld [vmem:[%s11607_s18 + $0x504] ss:$16 sps:$4 sm:$0xff]  }
 0x1ef   : > { %6799 = vmatprep.subr.bf16.mxu1 %v8828_v29  ;;  %6788 = vmatprep.mubr.bf16.mxu0 %v11732_v54  ;;  %v8912_v29 = vld [vmem:[%s11607_s18 + $0x704] ss:$16 sps:$4 sm:$0xff]  }
 0x1f0   : > { %6829 = vmatprep.mubr.bf16.mxu1 %v11736_v55 }
 0x1f1   : > { %6759 = vmatpush1.bf16.msra.mxu0 %v8823_v30  ;;  %v8907_v30 = vld [vmem:[%s11607_s18 + $0x500] ss:$16 sps:$4 sm:$0xff]  }
 0x1f2   : > { %6800 = vmatpush1.bf16.msra.mxu1 %v8826_v31  ;;  %6760 = vmatprep.subr.bf16.mxu0 %v8831_v32  ;;  %v8910_v31 = vld [vmem:[%s11607_s18 + $0x700] ss:$16 sps:$4 sm:$0xff]   ;;  %v8919_v32 = vld [vmem:[%s11607_s18 + $0x8e4] ss:$16 sps:$4 sm:$0xff]  }
 0x1f3   : > { %6801 = vmatprep.subr.bf16.mxu1 %v8834_v33  ;;  %v8922_v33 = vld [vmem:[%s11607_s18 + $0xae4] ss:$16 sps:$4 sm:$0xff]  }
 0x1f5   : > { %6761 = vmatpush1.bf16.msra.mxu0 %v8829_v34  ;;  %v11780_v34 = vcombine.low %v11721_v50, %v11721_v50  ;;  %v8937_v50 = vld [vmem:[%s11607_s18 + $0x884] ss:$16 sps:$4 sm:$0xff]  }
 0x1f6   : > { %6802 = vmatpush1.bf16.msra.mxu1 %v8832_v35  ;;  %6762 = vmatprep.subr.bf16.mxu0 %v8837_v36  ;;  %v11784_v35 = vcombine.low %v11726_v51, %v11726_v51  ;;  %v8917_v36 = vld [vmem:[%s11607_s18 + $0x8e0] ss:$16 sps:$4 sm:$0xff]   ;;  %v8940_v51 = vld [vmem:[%s11607_s18 + $0xa84] ss:$16 sps:$4 sm:$0xff]  }
 0x1f7   : > { %6803 = vmatprep.subr.bf16.mxu1 %v8840_v37  ;;  %v8920_v37 = vld [vmem:[%s11607_s18 + $0xae0] ss:$16 sps:$4 sm:$0xff]  }
 0x1f9   : > { %6763 = vmatpush1.bf16.msra.mxu0 %v8835_v38  ;;  %v8925_v38 = vld [vmem:[%s11607_s18 + $0x8c4] ss:$16 sps:$4 sm:$0xff]  }
 0x1fa   : > { %6804 = vmatpush1.bf16.msra.mxu1 %v8838_v39  ;;  %6764 = vmatprep.subr.bf16.mxu0 %v8843_v40  ;;  %v8928_v39 = vld [vmem:[%s11607_s18 + $0xac4] ss:$16 sps:$4 sm:$0xff]  }
 0x1fb   : > { %6805 = vmatprep.subr.bf16.mxu1 %v8846_v41  ;;  %v11793_v40 = vld [vmem:[%s12692_s0 + $0x20] sm:$0xff]  ;;  %v11798_v41 = vld [vmem:[%s12692_s0 + $0x28] sm:$0xff] }
 0x1fd   : > { %6765 = vmatpush1.bf16.msra.mxu0 %v8841_v42  ;;  %v11802_v42 = vcombine.high %v11793_v40, %v11793_v40 }
 0x1fe   : > { %6806 = vmatpush1.bf16.msra.mxu1 %v8844_v43  ;;  %6766 = vmatprep.subr.bf16.mxu0 %v8849_v44  ;;  %v11806_v43 = vcombine.high %v11798_v41, %v11798_v41  ;;  %v8923_v44 = vld [vmem:[%s11607_s18 + $0x8c0] ss:$16 sps:$4 sm:$0xff]  }
 0x1ff   : > { %6807 = vmatprep.subr.bf16.mxu1 %v8852_v45  ;;  %v8926_v45 = vld [vmem:[%s11607_s18 + $0xac0] ss:$16 sps:$4 sm:$0xff]  }
 0x201   : > { %6767 = vmatpush1.bf16.msra.mxu0 %v8847_v46  ;;  %v8931_v46 = vld [vmem:[%s11607_s18 + $0x8a4] ss:$16 sps:$4 sm:$0xff]  }
 0x202   : > { %6808 = vmatpush1.bf16.msra.mxu1 %v8850_v47  ;;  %6768 = vmatprep.subr.bf16.mxu0 %v8855_v48  ;;  %v8934_v47 = vld [vmem:[%s11607_s18 + $0xaa4] ss:$16 sps:$4 sm:$0xff]   ;;  %v8929_v48 = vld [vmem:[%s11607_s18 + $0x8a0] ss:$16 sps:$4 sm:$0xff]  }
 0x203   : > { %6809 = vmatprep.subr.bf16.mxu1 %v8858_v49  ;;  %v8932_v49 = vld [vmem:[%s11607_s18 + $0xaa0] ss:$16 sps:$4 sm:$0xff]  }
 0x205   : > { %6769 = vmatpush1.bf16.msra.mxu0 %v8853_v52  ;;  %v8935_v52 = vld [vmem:[%s11607_s18 + $0x880] ss:$16 sps:$4 sm:$0xff]  }
 0x206   : > { %6810 = vmatpush1.bf16.msra.mxu1 %v8856_v53  ;;  %6770 = vmatprep.subr.bf16.mxu0 %v8861_v56  ;;  %v8938_v53 = vld [vmem:[%s11607_s18 + $0xa80] ss:$16 sps:$4 sm:$0xff]   ;;  %v8943_v56 = vld [vmem:[%s11607_s18 + $0x864] ss:$16 sps:$4 sm:$0xff]  }
 0x207   : > { %6811 = vmatprep.subr.bf16.mxu1 %v8864_v57  ;;  %v8946_v57 = vld [vmem:[%s11607_s18 + $0xa64] ss:$16 sps:$4 sm:$0xff]  }
 0x209   : > { %6771 = vmatpush1.bf16.msra.mxu0 %v8859_v58  ;;  %v8941_v58 = vld [vmem:[%s11607_s18 + $0x860] ss:$16 sps:$4 sm:$0xff]  }
 0x20a   : > { %6812 = vmatpush1.bf16.msra.mxu1 %v8862_v59  ;;  %6772 = vmatprep.subr.bf16.mxu0 %v8867_v60  ;;  %v8944_v59 = vld [vmem:[%s11607_s18 + $0xa60] ss:$16 sps:$4 sm:$0xff]   ;;  %v8949_v60 = vld [vmem:[%s11607_s18 + $0x844] ss:$16 sps:$4 sm:$0xff]  }
 0x20b   : > { %6813 = vmatprep.subr.bf16.mxu1 %v8870_v61  ;;  %v8952_v61 = vld [vmem:[%s11607_s18 + $0xa44] ss:$16 sps:$4 sm:$0xff]  }
 0x20d   : > { %6773 = vmatpush2.bf16.msra.mxu0 %v8865_v62  ;;  %v8947_v62 = vld [vmem:[%s11607_s18 + $0x840] ss:$16 sps:$4 sm:$0xff]  }
 0x20e   : > { %6814 = vmatpush2.bf16.msra.mxu1 %v8868_v63  ;;  %6774 = vmatprep.subr.bf16.mxu0 %v8873_v0  ;;  %v8950_v63 = vld [vmem:[%s11607_s18 + $0xa40] ss:$16 sps:$4 sm:$0xff]   ;;  %v8955_v0 = vld [vmem:[%s11607_s18 + $0x824] ss:$16 sps:$4 sm:$0xff]  }
 0x20f   : > { %6815 = vmatprep.subr.bf16.mxu1 %v8876_v2  ;;  %v8958_v2 = vld [vmem:[%s11607_s18 + $0xa24] ss:$16 sps:$4 sm:$0xff]  }
 0x211   : > { %6775 = vmatpush2.bf16.msra.mxu0 %v8871_v3  ;;  %v8953_v3 = vld [vmem:[%s11607_s18 + $0x820] ss:$16 sps:$4 sm:$0xff]  }
 0x212   : > { %6816 = vmatpush2.bf16.msra.mxu1 %v8874_v4  ;;  %6776 = vmatprep.subr.bf16.mxu0 %v8879_v6  ;;  %v8956_v4 = vld [vmem:[%s11607_s18 + $0xa20] ss:$16 sps:$4 sm:$0xff]   ;;  %v8961_v6 = vld [vmem:[%s11607_s18 + $0x804] ss:$16 sps:$4 sm:$0xff]  }
 0x213   : > { %6817 = vmatprep.subr.bf16.mxu1 %v8882_v7  ;;  %v8964_v7 = vld [vmem:[%s11607_s18 + $0xa04] ss:$16 sps:$4 sm:$0xff]  }
 0x215   : > { %6777 = vmatpush2.bf16.msra.mxu0 %v8877_v8  ;;  %v8959_v8 = vld [vmem:[%s11607_s18 + $0x800] ss:$16 sps:$4 sm:$0xff]  }
 0x216   : > { %6818 = vmatpush2.bf16.msra.mxu1 %v8880_v9  ;;  %6778 = vmatprep.subr.bf16.mxu0 %v8885_v10  ;;  %v8962_v9 = vld [vmem:[%s11607_s18 + $0xa00] ss:$16 sps:$4 sm:$0xff]   ;;  %v8967_v10 = vld [vmem:[%s11607_s18 + $0x9e4] ss:$16 sps:$4 sm:$0xff]  }
 0x217   : > { %6819 = vmatprep.subr.bf16.mxu1 %v8888_v11  ;;  %v8970_v11 = vld [vmem:[%s11607_s18 + $0xbe4] ss:$16 sps:$4 sm:$0xff]  }
 0x219   : > { %6779 = vmatpush2.bf16.msra.mxu0 %v8883_v12  ;;  %v8965_v12 = vld [vmem:[%s11607_s18 + $0x9e0] ss:$16 sps:$4 sm:$0xff]  }
 0x21a   : > { %6820 = vmatpush2.bf16.msra.mxu1 %v8886_v13  ;;  %6780 = vmatprep.subr.bf16.mxu0 %v8891_v14  ;;  %v8968_v13 = vld [vmem:[%s11607_s18 + $0xbe0] ss:$16 sps:$4 sm:$0xff]   ;;  %v8973_v14 = vld [vmem:[%s11607_s18 + $0x9c4] ss:$16 sps:$4 sm:$0xff]  }
 0x21b   : > { %6821 = vmatprep.subr.bf16.mxu1 %v8894_v15  ;;  %v8976_v15 = vld [vmem:[%s11607_s18 + $0xbc4] ss:$16 sps:$4 sm:$0xff]  }
 0x21d   : > { %6781 = vmatpush2.bf16.msra.mxu0 %v8889_v16  ;;  %v8971_v16 = vld [vmem:[%s11607_s18 + $0x9c0] ss:$16 sps:$4 sm:$0xff]  }
 0x21e   : > { %6822 = vmatpush2.bf16.msra.mxu1 %v8892_v17  ;;  %6782 = vmatprep.subr.bf16.mxu0 %v8897_v18  ;;  %v8974_v17 = vld [vmem:[%s11607_s18 + $0xbc0] ss:$16 sps:$4 sm:$0xff]   ;;  %v8979_v18 = vld [vmem:[%s11607_s18 + $0x9a4] ss:$16 sps:$4 sm:$0xff]  }
 0x21f   : > { %6823 = vmatprep.subr.bf16.mxu1 %v8900_v19  ;;  %v8982_v19 = vld [vmem:[%s11607_s18 + $0xba4] ss:$16 sps:$4 sm:$0xff]  }
 0x221   : > { %6783 = vmatpush2.bf16.msra.mxu0 %v8895_v20  ;;  %v8977_v20 = vld [vmem:[%s11607_s18 + $0x9a0] ss:$16 sps:$4 sm:$0xff]  }
 0x222   : > { %6824 = vmatpush2.bf16.msra.mxu1 %v8898_v21  ;;  %6784 = vmatprep.subr.bf16.mxu0 %v8903_v22  ;;  %v8980_v21 = vld [vmem:[%s11607_s18 + $0xba0] ss:$16 sps:$4 sm:$0xff]   ;;  %v8985_v22 = vld [vmem:[%s11607_s18 + $0x984] ss:$16 sps:$4 sm:$0xff]  }
 0x223   : > { %6825 = vmatprep.subr.bf16.mxu1 %v8906_v23  ;;  %v8988_v23 = vld [vmem:[%s11607_s18 + $0xb84] ss:$16 sps:$4 sm:$0xff]  }
 0x225   : > { %6785 = vmatpush2.bf16.msra.mxu0 %v8901_v26  ;;  %v8983_v26 = vld [vmem:[%s11607_s18 + $0x980] ss:$16 sps:$4 sm:$0xff]  }
 0x226   : > { %6826 = vmatpush2.bf16.msra.mxu1 %v8904_v27  ;;  %6786 = vmatprep.subr.bf16.mxu0 %v8909_v28  ;;  %v8986_v27 = vld [vmem:[%s11607_s18 + $0xb80] ss:$16 sps:$4 sm:$0xff]   ;;  %v8991_v28 = vld [vmem:[%s11607_s18 + $0x964] ss:$16 sps:$4 sm:$0xff]  }
 0x227   : > { %6827 = vmatprep.subr.bf16.mxu1 %v8912_v29  ;;  %v8994_v29 = vld [vmem:[%s11607_s18 + $0xb64] ss:$16 sps:$4 sm:$0xff]  }
 0x229   : > { %6787 = vmatpush2.bf16.msra.mxu0 %v8907_v30  ;;  %v8989_v30 = vld [vmem:[%s11607_s18 + $0x960] ss:$16 sps:$4 sm:$0xff]  }
 0x22a   : > { %6828 = vmatpush2.bf16.msra.mxu1 %v8910_v31  ;;  %6838 = vmatprep.subr.bf16.mxu0 %v8919_v32  ;;  %v8992_v31 = vld [vmem:[%s11607_s18 + $0xb60] ss:$16 sps:$4 sm:$0xff]   ;;  %v8997_v32 = vld [vmem:[%s11607_s18 + $0x944] ss:$16 sps:$4 sm:$0xff]  }
 0x22b   : > { %6879 = vmatprep.subr.bf16.mxu1 %v8922_v33  ;;  %v9000_v33 = vld [vmem:[%s11607_s18 + $0xb44] ss:$16 sps:$4 sm:$0xff]  }
 0x22c   : > { %6789 = vmatmul.mubr.bf16.vlgmr.msra.gmra.mxu0 %v11780_v34 }
 0x22d   : > { %6830 = vmatmul.mubr.bf16.vlgmr.msra.gmra.mxu1 %v11784_v35  ;;  %6839 = vmatpush1.bf16.msra.mxu0 %v8917_v36  ;;  %v8995_v36 = vld [vmem:[%s11607_s18 + $0x940] ss:$16 sps:$4 sm:$0xff]  }
 0x22e   : > { %6880 = vmatpush1.bf16.msra.mxu1 %v8920_v37  ;;  %6840 = vmatprep.subr.bf16.mxu0 %v8925_v38  ;;  %v8998_v37 = vld [vmem:[%s11607_s18 + $0xb40] ss:$16 sps:$4 sm:$0xff]   ;;  %v9003_v38 = vld [vmem:[%s11607_s18 + $0x924] ss:$16 sps:$4 sm:$0xff]  }
 0x22f   : > { %6881 = vmatprep.subr.bf16.mxu1 %v8928_v39  ;;  %6870 = vmatprep.mubr.bf16.mxu0 %v11802_v42  ;;  %v9006_v39 = vld [vmem:[%s11607_s18 + $0xb24] ss:$16 sps:$4 sm:$0xff]  }
 0x230   : > { %6911 = vmatprep.mubr.bf16.mxu1 %v11806_v43 }
 0x231   : > { %6841 = vmatpush1.bf16.msra.mxu0 %v8923_v44  ;;  %v9001_v44 = vld [vmem:[%s11607_s18 + $0x920] ss:$16 sps:$4 sm:$0xff]  }
 0x232   : > { %6882 = vmatpush1.bf16.msra.mxu1 %v8926_v45  ;;  %6842 = vmatprep.subr.bf16.mxu0 %v8931_v46  ;;  %v9004_v45 = vld [vmem:[%s11607_s18 + $0xb20] ss:$16 sps:$4 sm:$0xff]   ;;  %v9009_v46 = vld [vmem:[%s11607_s18 + $0x904] ss:$16 sps:$4 sm:$0xff]  }
 0x233   : > { %6883 = vmatprep.subr.bf16.mxu1 %v8934_v47  ;;  %v9012_v47 = vld [vmem:[%s11607_s18 + $0xb04] ss:$16 sps:$4 sm:$0xff]  }
 0x235   : > { %6843 = vmatpush1.bf16.msra.mxu0 %v8929_v48  ;;  %v9007_v48 = vld [vmem:[%s11607_s18 + $0x900] ss:$16 sps:$4 sm:$0xff]  }
 0x236   : > { %6884 = vmatpush1.bf16.msra.mxu1 %v8932_v49  ;;  %6844 = vmatprep.subr.bf16.mxu0 %v8937_v50  ;;  %v9010_v49 = vld [vmem:[%s11607_s18 + $0xb00] ss:$16 sps:$4 sm:$0xff]   ;;  %v9019_v50 = vld [vmem:[%s11607_s18 + $0xce4] ss:$16 sps:$4 sm:$0xff]  }
 0x237   : > { %6885 = vmatprep.subr.bf16.mxu1 %v8940_v51  ;;  %v9022_v51 = vld [vmem:[%s11607_s18 + $0xee4] ss:$16 sps:$4 sm:$0xff]  }
 0x239   : > { %6845 = vmatpush1.bf16.msra.mxu0 %v8935_v52  ;;  %v11875_v52 = vld [vmem:[%s12692_s0 + $0x30] sm:$0xff] }
 0x23a   : > { %6886 = vmatpush1.bf16.msra.mxu1 %v8938_v53  ;;  %6846 = vmatprep.subr.bf16.mxu0 %v8943_v56  ;;  %v11879_v53 = vcombine.low %v11793_v40, %v11793_v40  ;;  %v11883_v56 = vcombine.low %v11798_v41, %v11798_v41  ;;  %v9025_v40 = vld [vmem:[%s11607_s18 + $0xcc4] ss:$16 sps:$4 sm:$0xff]   ;;  %v11896_v41 = vcombine.high %v11875_v52, %v11875_v52 }
 0x23b   : > { %6887 = vmatprep.subr.bf16.mxu1 %v8946_v57  ;;  %v11888_v57 = vld [vmem:[%s12692_s0 + $0x38] sm:$0xff] }
 0x23d   : > { %6847 = vmatpush1.bf16.msra.mxu0 %v8941_v58  ;;  %v9017_v58 = vld [vmem:[%s11607_s18 + $0xce0] ss:$16 sps:$4 sm:$0xff]  }
 0x23e   : > { %6888 = vmatpush1.bf16.msra.mxu1 %v8944_v59  ;;  %6848 = vmatprep.subr.bf16.mxu0 %v8949_v60  ;;  %v9020_v59 = vld [vmem:[%s11607_s18 + $0xee0] ss:$16 sps:$4 sm:$0xff]   ;;  %v9028_v60 = vld [vmem:[%s11607_s18 + $0xec4] ss:$16 sps:$4 sm:$0xff]  }
 0x23f   : > { %6889 = vmatprep.subr.bf16.mxu1 %v8952_v61  ;;  %v11900_v61 = vcombine.high %v11888_v57, %v11888_v57 }
 0x241   : > { %6849 = vmatpush1.bf16.msra.mxu0 %v8947_v62  ;;  %v9023_v62 = vld [vmem:[%s11607_s18 + $0xcc0] ss:$16 sps:$4 sm:$0xff]  }
 0x242   : > { %6890 = vmatpush1.bf16.msra.mxu1 %v8950_v63  ;;  %6850 = vmatprep.subr.bf16.mxu0 %v8955_v0  ;;  %v9026_v63 = vld [vmem:[%s11607_s18 + $0xec0] ss:$16 sps:$4 sm:$0xff]   ;;  %v9031_v0 = vld [vmem:[%s11607_s18 + $0xca4] ss:$16 sps:$4 sm:$0xff]  }
 0x243   : > { %6891 = vmatprep.subr.bf16.mxu1 %v8958_v2  ;;  %v9034_v2 = vld [vmem:[%s11607_s18 + $0xea4] ss:$16 sps:$4 sm:$0xff]  }
 0x245   : > { %6851 = vmatpush1.bf16.msra.mxu0 %v8953_v3  ;;  %v9029_v3 = vld [vmem:[%s11607_s18 + $0xca0] ss:$16 sps:$4 sm:$0xff]  }
 0x246   : > { %6892 = vmatpush1.bf16.msra.mxu1 %v8956_v4  ;;  %6852 = vmatprep.subr.bf16.mxu0 %v8961_v6  ;;  %v9032_v4 = vld [vmem:[%s11607_s18 + $0xea0] ss:$16 sps:$4 sm:$0xff]   ;;  %v9037_v6 = vld [vmem:[%s11607_s18 + $0xc84] ss:$16 sps:$4 sm:$0xff]  }
 0x247   : > { %6893 = vmatprep.subr.bf16.mxu1 %v8964_v7  ;;  %v9040_v7 = vld [vmem:[%s11607_s18 + $0xe84] ss:$16 sps:$4 sm:$0xff]  }
 0x249   : > { %6853 = vmatpush1.bf16.msra.mxu0 %v8959_v8  ;;  %v9035_v8 = vld [vmem:[%s11607_s18 + $0xc80] ss:$16 sps:$4 sm:$0xff]  }
 0x24a   : > { %6894 = vmatpush1.bf16.msra.mxu1 %v8962_v9  ;;  %6854 = vmatprep.subr.bf16.mxu0 %v8967_v10  ;;  %v9038_v9 = vld [vmem:[%s11607_s18 + $0xe80] ss:$16 sps:$4 sm:$0xff]   ;;  %v9043_v10 = vld [vmem:[%s11607_s18 + $0xc64] ss:$16 sps:$4 sm:$0xff]  }
 0x24b   : > { %6895 = vmatprep.subr.bf16.mxu1 %v8970_v11  ;;  %v9046_v11 = vld [vmem:[%s11607_s18 + $0xe64] ss:$16 sps:$4 sm:$0xff]  }
 0x24d   : > { %6855 = vmatpush2.bf16.msra.mxu0 %v8965_v12  ;;  %v9041_v12 = vld [vmem:[%s11607_s18 + $0xc60] ss:$16 sps:$4 sm:$0xff]  }
 0x24e   : > { %6896 = vmatpush2.bf16.msra.mxu1 %v8968_v13  ;;  %6856 = vmatprep.subr.bf16.mxu0 %v8973_v14  ;;  %v9044_v13 = vld [vmem:[%s11607_s18 + $0xe60] ss:$16 sps:$4 sm:$0xff]   ;;  %v9049_v14 = vld [vmem:[%s11607_s18 + $0xc44] ss:$16 sps:$4 sm:$0xff]  }
 0x24f   : > { %6897 = vmatprep.subr.bf16.mxu1 %v8976_v15  ;;  %v9052_v15 = vld [vmem:[%s11607_s18 + $0xe44] ss:$16 sps:$4 sm:$0xff]  }
 0x251   : > { %6857 = vmatpush2.bf16.msra.mxu0 %v8971_v16  ;;  %v9047_v16 = vld [vmem:[%s11607_s18 + $0xc40] ss:$16 sps:$4 sm:$0xff]  }
 0x252   : > { %6898 = vmatpush2.bf16.msra.mxu1 %v8974_v17  ;;  %6858 = vmatprep.subr.bf16.mxu0 %v8979_v18  ;;  %v9050_v17 = vld [vmem:[%s11607_s18 + $0xe40] ss:$16 sps:$4 sm:$0xff]   ;;  %v9055_v18 = vld [vmem:[%s11607_s18 + $0xc24] ss:$16 sps:$4 sm:$0xff]  }
 0x253   : > { %6899 = vmatprep.subr.bf16.mxu1 %v8982_v19  ;;  %v9058_v19 = vld [vmem:[%s11607_s18 + $0xe24] ss:$16 sps:$4 sm:$0xff]  }
 0x255   : > { %6859 = vmatpush2.bf16.msra.mxu0 %v8977_v20  ;;  %v9053_v20 = vld [vmem:[%s11607_s18 + $0xc20] ss:$16 sps:$4 sm:$0xff]  }
 0x256   : > { %6900 = vmatpush2.bf16.msra.mxu1 %v8980_v21  ;;  %6860 = vmatprep.subr.bf16.mxu0 %v8985_v22  ;;  %v9056_v21 = vld [vmem:[%s11607_s18 + $0xe20] ss:$16 sps:$4 sm:$0xff]   ;;  %v9061_v22 = vld [vmem:[%s11607_s18 + $0xc04] ss:$16 sps:$4 sm:$0xff]  }
 0x257   : > { %6901 = vmatprep.subr.bf16.mxu1 %v8988_v23  ;;  %v9064_v23 = vld [vmem:[%s11607_s18 + $0xe04] ss:$16 sps:$4 sm:$0xff]  }
 0x259   : > { %6861 = vmatpush2.bf16.msra.mxu0 %v8983_v26  ;;  %v9059_v26 = vld [vmem:[%s11607_s18 + $0xc00] ss:$16 sps:$4 sm:$0xff]  }
 0x25a   : > { %6902 = vmatpush2.bf16.msra.mxu1 %v8986_v27  ;;  %6862 = vmatprep.subr.bf16.mxu0 %v8991_v28  ;;  %v9062_v27 = vld [vmem:[%s11607_s18 + $0xe00] ss:$16 sps:$4 sm:$0xff]   ;;  %v9067_v28 = vld [vmem:[%s11607_s18 + $0xde4] ss:$16 sps:$4 sm:$0xff]  }
 0x25b   : > { %6903 = vmatprep.subr.bf16.mxu1 %v8994_v29  ;;  %v9070_v29 = vld [vmem:[%s11607_s18 + $0xfe4] ss:$16 sps:$4 sm:$0xff]  }
 0x25d   : > { %6863 = vmatpush2.bf16.msra.mxu0 %v8989_v30  ;;  %v9065_v30 = vld [vmem:[%s11607_s18 + $0xde0] ss:$16 sps:$4 sm:$0xff]  }
 0x25e   : > { %6904 = vmatpush2.bf16.msra.mxu1 %v8992_v31  ;;  %6864 = vmatprep.subr.bf16.mxu0 %v8997_v32  ;;  %v9068_v31 = vld [vmem:[%s11607_s18 + $0xfe0] ss:$16 sps:$4 sm:$0xff]   ;;  %v9073_v32 = vld [vmem:[%s11607_s18 + $0xdc4] ss:$16 sps:$4 sm:$0xff]  }
 0x25f   : > { %6905 = vmatprep.subr.bf16.mxu1 %v9000_v33  ;;  %v9076_v33 = vld [vmem:[%s11607_s18 + $0xfc4] ss:$16 sps:$4 sm:$0xff]  }
 0x261   : > { %6865 = vmatpush2.bf16.msra.mxu0 %v8995_v36  ;;  %v9071_v36 = vld [vmem:[%s11607_s18 + $0xdc0] ss:$16 sps:$4 sm:$0xff]  }
 0x262   : > { %6906 = vmatpush2.bf16.msra.mxu1 %v8998_v37  ;;  %6866 = vmatprep.subr.bf16.mxu0 %v9003_v38  ;;  %v9074_v37 = vld [vmem:[%s11607_s18 + $0xfc0] ss:$16 sps:$4 sm:$0xff]   ;;  %v9079_v38 = vld [vmem:[%s11607_s18 + $0xda4] ss:$16 sps:$4 sm:$0xff]  }
 0x263   : > { %6907 = vmatprep.subr.bf16.mxu1 %v9006_v39  ;;  %v9082_v39 = vld [vmem:[%s11607_s18 + $0xfa4] ss:$16 sps:$4 sm:$0xff]  }
 0x265   : > { %6867 = vmatpush2.bf16.msra.mxu0 %v9001_v44  ;;  %v9077_v44 = vld [vmem:[%s11607_s18 + $0xda0] ss:$16 sps:$4 sm:$0xff]  }
 0x266   : > { %6908 = vmatpush2.bf16.msra.mxu1 %v9004_v45  ;;  %6868 = vmatprep.subr.bf16.mxu0 %v9009_v46  ;;  %v9080_v45 = vld [vmem:[%s11607_s18 + $0xfa0] ss:$16 sps:$4 sm:$0xff]   ;;  %v9085_v46 = vld [vmem:[%s11607_s18 + $0xd84] ss:$16 sps:$4 sm:$0xff]  }
 0x267   : > { %6909 = vmatprep.subr.bf16.mxu1 %v9012_v47  ;;  %v9088_v47 = vld [vmem:[%s11607_s18 + $0xf84] ss:$16 sps:$4 sm:$0xff]  }
 0x269   : > { %6869 = vmatpush2.bf16.msra.mxu0 %v9007_v48  ;;  %v9083_v48 = vld [vmem:[%s11607_s18 + $0xd80] ss:$16 sps:$4 sm:$0xff]  }
 0x26a   : > { %6910 = vmatpush2.bf16.msra.mxu1 %v9010_v49  ;;  %6920 = vmatprep.subr.bf16.mxu0 %v9019_v50  ;;  %v9086_v49 = vld [vmem:[%s11607_s18 + $0xf80] ss:$16 sps:$4 sm:$0xff]   ;;  %v9091_v50 = vld [vmem:[%s11607_s18 + $0xd64] ss:$16 sps:$4 sm:$0xff]  }
 0x26b   : > { %6961 = vmatprep.subr.bf16.mxu1 %v9022_v51  ;;  %v9094_v51 = vld [vmem:[%s11607_s18 + $0xf64] ss:$16 sps:$4 sm:$0xff]  }
 0x26c   : > { %6871 = vmatmul.mubr.bf16.vlgmr.msra.gmra.mxu0 %v11879_v53 }
 0x26d   : > { %6912 = vmatmul.mubr.bf16.vlgmr.msra.gmra.mxu1 %v11883_v56  ;;  %6921 = vmatpush1.bf16.msra.mxu0 %v9017_v58  ;;  %v9089_v58 = vld [vmem:[%s11607_s18 + $0xd60] ss:$16 sps:$4 sm:$0xff]  }
 0x26e   : > { %6962 = vmatpush1.bf16.msra.mxu1 %v9020_v59  ;;  %6922 = vmatprep.subr.bf16.mxu0 %v9025_v40  ;;  %v9092_v59 = vld [vmem:[%s11607_s18 + $0xf60] ss:$16 sps:$4 sm:$0xff]   ;;  %v9097_v40 = vld [vmem:[%s11607_s18 + $0xd44] ss:$16 sps:$4 sm:$0xff]  }
 0x26f   : > { %6963 = vmatprep.subr.bf16.mxu1 %v9028_v60  ;;  %6952 = vmatprep.mubr.bf16.mxu0 %v11896_v41  ;;  %v9100_v60 = vld [vmem:[%s11607_s18 + $0xf44] ss:$16 sps:$4 sm:$0xff]  }
 0x270   : > { %6993 = vmatprep.mubr.bf16.mxu1 %v11900_v61 }
 0x271   : > { %6923 = vmatpush1.bf16.msra.mxu0 %v9023_v62  ;;  %v9095_v62 = vld [vmem:[%s11607_s18 + $0xd40] ss:$16 sps:$4 sm:$0xff]  }
 0x272   : > { %6964 = vmatpush1.bf16.msra.mxu1 %v9026_v63  ;;  %6924 = vmatprep.subr.bf16.mxu0 %v9031_v0  ;;  %v9098_v63 = vld [vmem:[%s11607_s18 + $0xf40] ss:$16 sps:$4 sm:$0xff]   ;;  %v9103_v0 = vld [vmem:[%s11607_s18 + $0xd24] ss:$16 sps:$4 sm:$0xff]  }
 0x273   : > { %6965 = vmatprep.subr.bf16.mxu1 %v9034_v2  ;;  %v2643_v2 = vlaneseq }
 0x275   : > { %6925 = vmatpush1.bf16.msra.mxu0 %v9029_v3  ;;  %v9106_v3 = vld [vmem:[%s11607_s18 + $0xf24] ss:$16 sps:$4 sm:$0xff]  }
 0x276   : > { %6966 = vmatpush1.bf16.msra.mxu1 %v9032_v4  ;;  %6926 = vmatprep.subr.bf16.mxu0 %v9037_v6  ;;  %v9101_v4 = vld [vmem:[%s11607_s18 + $0xd20] ss:$16 sps:$4 sm:$0xff]  }
 0x277   : > { %6967 = vmatprep.subr.bf16.mxu1 %v9040_v7  ;;  %v9104_v6 = vld [vmem:[%s11607_s18 + $0xf20] ss:$16 sps:$4 sm:$0xff]   ;;  %v9109_v7 = vld [vmem:[%s11607_s18 + $0xd04] ss:$16 sps:$4 sm:$0xff]  }
 0x279   : > { %6927 = vmatpush1.bf16.msra.mxu0 %v9035_v8  ;;  %v11961_v8 = vshrl.u32 %v2643_v2, 7  ;;  %v9141_v2 = vld [vmem:[%s11607_s18 + $0x1060] ss:$16 sps:$4 sm:$0xff]  }
 0x27a   : > { %6968 = vmatpush1.bf16.msra.mxu1 %v9038_v9  ;;  %6928 = vmatprep.subr.bf16.mxu0 %v9043_v10  ;;  %v9112_v9 = vld [vmem:[%s11607_s18 + $0xf04] ss:$16 sps:$4 sm:$0xff]   ;;  %v9107_v10 = vld [vmem:[%s11607_s18 + $0xd00] ss:$16 sps:$4 sm:$0xff]  }
 0x27b   : > { %6969 = vmatprep.subr.bf16.mxu1 %v9046_v11  ;;  %v9110_v11 = vld [vmem:[%s11607_s18 + $0xf00] ss:$16 sps:$4 sm:$0xff]  }
 0x27d   : > { %6929 = vmatpush1.bf16.msra.mxu0 %v9041_v12  ;;  %v2641_v12 = vld [vmem:[%s11601_s14] sm:$0xf] }
 0x27e   : > { %6970 = vmatpush1.bf16.msra.mxu1 %v9044_v13  ;;  %6930 = vmatprep.subr.bf16.mxu0 %v9049_v14  ;;  %v2645_v13 = vsub.s32 0, %v11961_v8  ;;  %v9119_v14 = vld [vmem:[%s11607_s18 + $0x10e4] ss:$16 sps:$4 sm:$0xff]  }
 0x27f   : > { %6971 = vmatprep.subr.bf16.mxu1 %v9052_v15  ;;  %v9122_v15 = vld [vmem:[%s11607_s18 + $0x12e4] ss:$16 sps:$4 sm:$0xff]  }
 0x281   : > { %6931 = vmatpush1.bf16.msra.mxu0 %v9047_v16  ;;  %v9117_v16 = vld [vmem:[%s11607_s18 + $0x10e0] ss:$16 sps:$4 sm:$0xff]  }
 0x282   : > { %6972 = vmatpush1.bf16.msra.mxu1 %v9050_v17  ;;  %6932 = vmatprep.subr.bf16.mxu0 %v9055_v18  ;;  %v9120_v17 = vld [vmem:[%s11607_s18 + $0x12e0] ss:$16 sps:$4 sm:$0xff]   ;;  %v2649_v18 = vsub.s32 1, %v11961_v8 }
 0x283   : > { %6973 = vmatprep.subr.bf16.mxu1 %v9058_v19  ;;  %v11975_v19 = vcombine.low %v11875_v52, %v11875_v52  ;;  %v2646_v52 = vrot.slane %v2641_v12, %v2645_v13 }
 0x285   : > { %6933 = vmatpush1.bf16.msra.mxu0 %v9053_v20  ;;  %v11979_v20 = vcombine.low %v11888_v57, %v11888_v57  ;;  %v9128_v57 = vld [vmem:[%s11607_s18 + $0x12c4] ss:$16 sps:$4 sm:$0xff]  }
 0x286   : > { %6974 = vmatpush1.bf16.msra.mxu1 %v9056_v21  ;;  %6934 = vmatprep.subr.bf16.mxu0 %v9061_v22  ;;  %v11984_v21 = vld [vmem:[%s12692_s0 + $0x40] sm:$0xff]  ;;  %v11989_v22 = vld [vmem:[%s12692_s0 + $0x48] sm:$0xff] }
 0x287   : > { %6975 = vmatprep.subr.bf16.mxu1 %v9064_v23  ;;  %v9125_v23 = vld [vmem:[%s11607_s18 + $0x10c4] ss:$16 sps:$4 sm:$0xff]  }
 0x289   : > { %6935 = vmatpush1.bf16.msra.mxu0 %v9059_v26  ;;  %v2650_v26 = vrot.slane %v2641_v12, %v2649_v18  ;;  %v9153_v12 = vld [vmem:[%s11607_s18 + $0x1020] ss:$16 sps:$4 sm:$0xff]  }
 0x28a   : > { %6976 = vmatpush1.bf16.msra.mxu1 %v9062_v27  ;;  %6936 = vmatprep.subr.bf16.mxu0 %v9067_v28  ;;  %v11999_v27 = vcombine.high %v11984_v21, %v11984_v21  ;;  %v12003_v28 = vcombine.high %v11989_v22, %v11989_v22 }
 0x28b   : > { %6977 = vmatprep.subr.bf16.mxu1 %v9070_v29 }
 0x28d   : > { %6937 = vmatpush2.bf16.msra.mxu0 %v9065_v30 }
 0x28e   : > { %6978 = vmatpush2.bf16.msra.mxu1 %v9068_v31  ;;  %6938 = vmatprep.subr.bf16.mxu0 %v9073_v32  ;;  %v9123_v32 = vld [vmem:[%s11607_s18 + $0x10c0] ss:$16 sps:$4 sm:$0xff]  }
 0x28f   : > { %6979 = vmatprep.subr.bf16.mxu1 %v9076_v33  ;;  %v9126_v33 = vld [vmem:[%s11607_s18 + $0x12c0] ss:$16 sps:$4 sm:$0xff]  }
 0x291   : > { %6939 = vmatpush2.bf16.msra.mxu0 %v9071_v36 }
 0x292   : > { %6980 = vmatpush2.bf16.msra.mxu1 %v9074_v37  ;;  %6940 = vmatprep.subr.bf16.mxu0 %v9079_v38  ;;  %v9131_v38 = vld [vmem:[%s11607_s18 + $0x10a4] ss:$16 sps:$4 sm:$0xff]  }
 0x293   : > { %6981 = vmatprep.subr.bf16.mxu1 %v9082_v39  ;;  %v9134_v39 = vld [vmem:[%s11607_s18 + $0x12a4] ss:$16 sps:$4 sm:$0xff]  }
 0x295   : > { %6941 = vmatpush2.bf16.msra.mxu0 %v9077_v44 }
 0x296   : > { %6982 = vmatpush2.bf16.msra.mxu1 %v9080_v45  ;;  %6942 = vmatprep.subr.bf16.mxu0 %v9085_v46 }
 0x297   : > { %6983 = vmatprep.subr.bf16.mxu1 %v9088_v47 }
 0x299   : > { %6943 = vmatpush2.bf16.msra.mxu0 %v9083_v48 }
 0x29a   : > { %6984 = vmatpush2.bf16.msra.mxu1 %v9086_v49  ;;  %6944 = vmatprep.subr.bf16.mxu0 %v9091_v50  ;;  %v9129_v49 = vld [vmem:[%s11607_s18 + $0x10a0] ss:$16 sps:$4 sm:$0xff]  }
 0x29b   : > { %6985 = vmatprep.subr.bf16.mxu1 %v9094_v51  ;;  %v9132_v50 = vld [vmem:[%s11607_s18 + $0x12a0] ss:$16 sps:$4 sm:$0xff]  }
 0x29d   : > { %6945 = vmatpush2.bf16.msra.mxu0 %v9089_v58 }
 0x29e   : > { %6986 = vmatpush2.bf16.msra.mxu1 %v9092_v59  ;;  %6946 = vmatprep.subr.bf16.mxu0 %v9097_v40  ;;  %v9137_v59 = vld [vmem:[%s11607_s18 + $0x1084] ss:$16 sps:$4 sm:$0xff]  }
 0x29f   : > { %6987 = vmatprep.subr.bf16.mxu1 %v9100_v60  ;;  %v9140_v40 = vld [vmem:[%s11607_s18 + $0x1284] ss:$16 sps:$4 sm:$0xff]   ;;  %v9135_v60 = vld [vmem:[%s11607_s18 + $0x1080] ss:$16 sps:$4 sm:$0xff]  }
 0x2a1   : > { %6947 = vmatpush2.bf16.msra.mxu0 %v9095_v62  ;;  %v9138_v62 = vld [vmem:[%s11607_s18 + $0x1280] ss:$16 sps:$4 sm:$0xff]  }
 0x2a2   : > { %6988 = vmatpush2.bf16.msra.mxu1 %v9098_v63  ;;  %6948 = vmatprep.subr.bf16.mxu0 %v9103_v0  ;;  %v9143_v63 = vld [vmem:[%s11607_s18 + $0x1064] ss:$16 sps:$4 sm:$0xff]  }
 0x2a3   : > { %6989 = vmatprep.subr.bf16.mxu1 %v9106_v3  ;;  %v9146_v0 = vld [vmem:[%s11607_s18 + $0x1264] ss:$16 sps:$4 sm:$0xff]   ;;  %v9144_v3 = vld [vmem:[%s11607_s18 + $0x1260] ss:$16 sps:$4 sm:$0xff]  }
 0x2a5   : > { %6949 = vmatpush2.bf16.msra.mxu0 %v9101_v4  ;;  %v9149_v4 = vld [vmem:[%s11607_s18 + $0x1044] ss:$16 sps:$4 sm:$0xff]  }
 0x2a6   : > { %6990 = vmatpush2.bf16.msra.mxu1 %v9104_v6  ;;  %6950 = vmatprep.subr.bf16.mxu0 %v9109_v7  ;;  %v9152_v6 = vld [vmem:[%s11607_s18 + $0x1244] ss:$16 sps:$4 sm:$0xff]   ;;  %v9147_v7 = vld [vmem:[%s11607_s18 + $0x1040] ss:$16 sps:$4 sm:$0xff]  }
 0x2a7   : > { %6991 = vmatprep.subr.bf16.mxu1 %v9112_v9  ;;  %v9150_v9 = vld [vmem:[%s11607_s18 + $0x1240] ss:$16 sps:$4 sm:$0xff]  }
 0x2a9   : > { %6951 = vmatpush2.bf16.msra.mxu0 %v9107_v10  ;;  %v9155_v10 = vld [vmem:[%s11607_s18 + $0x1024] ss:$16 sps:$4 sm:$0xff]  }
 0x2aa   : > { %6992 = vmatpush2.bf16.msra.mxu1 %v9110_v11  ;;  %7002 = vmatprep.subr.bf16.mxu0 %v9119_v14  ;;  %v9158_v11 = vld [vmem:[%s11607_s18 + $0x1224] ss:$16 sps:$4 sm:$0xff]   ;;  %v9156_v14 = vld [vmem:[%s11607_s18 + $0x1220] ss:$16 sps:$4 sm:$0xff]  }
 0x2ab   : > { %7043 = vmatprep.subr.bf16.mxu1 %v9122_v15  ;;  %v9161_v15 = vld [vmem:[%s11607_s18 + $0x1004] ss:$16 sps:$4 sm:$0xff]  }
 0x2ac   : > { %v6708_v29 = vpop.f32.mrf.mxu0  ;;  %6953 = vmatmul.mubr.bf16.vlgmr.msra.gmra.mxu0 %v11975_v19 }
 0x2ad   : > { %v6749_v30 = vpop.f32.mrf.mxu1  ;;  %6994 = vmatmul.mubr.bf16.vlgmr.msra.gmra.mxu1 %v11979_v20  ;;  %v6709_v31 = vadd.f32 %v6708_v29, %v2646_v52  ;;  %7003 = vmatpush1.bf16.msra.mxu0 %v9117_v16  ;;  %v9164_v16 = vld [vmem:[%s11607_s18 + $0x1204] ss:$16 sps:$4 sm:$0xff]   ;;  %v9162_v52 = vld [vmem:[%s11607_s18 + $0x1200] ss:$16 sps:$4 sm:$0xff]  }
 0x2ae   : > { %7044 = vmatpush1.bf16.msra.mxu1 %v9120_v17  ;;  %v6710_v36 = vpop.f32.mrf.mxu0  ;;  %7004 = vmatprep.subr.bf16.mxu0 %v9125_v23  ;;  %v9159_v17 = vld [vmem:[%s11607_s18 + $0x1000] ss:$16 sps:$4 sm:$0xff]   ;;  %v9167_v23 = vld [vmem:[%s11607_s18 + $0x11e4] ss:$16 sps:$4 sm:$0xff]  }
 0x2af   : > { %v6751_v37 = vpop.f32.mrf.mxu1  ;;  %7045 = vmatprep.subr.bf16.mxu1 %v9128_v57  ;;  %v12011_v44 = vadd.f32 %v6749_v30, %v6709_v31  ;;  %v6711_v45 = vadd.f32 %v6710_v36, %v2650_v26  ;;  %7034 = vmatprep.mubr.bf16.mxu0 %v11999_v27  ;;  %v9170_v57 = vld [vmem:[%s11607_s18 + $0x13e4] ss:$16 sps:$4 sm:$0xff]   ;;  %v9165_v26 = vld [vmem:[%s11607_s18 + $0x11e0] ss:$16 sps:$4 sm:$0xff]  }
 0x2b0   : > { %7075 = vmatprep.mubr.bf16.mxu1 %v12003_v28  ;;  %v6712_v46 = vpop.f32.mrf.mxu0  ;;  %v9168_v29 = vld [vmem:[%s11607_s18 + $0x13e0] ss:$16 sps:$4 sm:$0xff]   ;;  %v9173_v30 = vld [vmem:[%s11607_s18 + $0x11c4] ss:$16 sps:$4 sm:$0xff]  }
 0x2b1   : > { %v6753_v47 = vpop.f32.mrf.mxu1  ;;  %v12015_v48 = vadd.f32 %v6751_v37, %v6711_v45  ;;  %7005 = vmatpush1.bf16.msra.mxu0 %v9123_v32  ;;  %v9176_v31 = vld [vmem:[%s11607_s18 + $0x13c4] ss:$16 sps:$4 sm:$0xff]   ;;  %v9171_v32 = vld [vmem:[%s11607_s18 + $0x11c0] ss:$16 sps:$4 sm:$0xff]  }
 0x2b2   : > { %7046 = vmatpush1.bf16.msra.mxu1 %v9126_v33  ;;  %v6713_v51 = vpop.f32.mrf.mxu0  ;;  %7006 = vmatprep.subr.bf16.mxu0 %v9131_v38  ;;  %v9174_v33 = vld [vmem:[%s11607_s18 + $0x13c0] ss:$16 sps:$4 sm:$0xff]   ;;  %v9179_v36 = vld [vmem:[%s11607_s18 + $0x11a4] ss:$16 sps:$4 sm:$0xff]  }
 0x2b3   : > { %v6754_v58 = vpop.f32.mrf.mxu1  ;;  %7047 = vmatprep.subr.bf16.mxu1 %v9134_v39  ;;  %v9182_v37 = vld [vmem:[%s11607_s18 + $0x13a4] ss:$16 sps:$4 sm:$0xff]   ;;  %v9177_v38 = vld [vmem:[%s11607_s18 + $0x11a0] ss:$16 sps:$4 sm:$0xff]  }
 0x2b4   : > { %v9180_v39 = vld [vmem:[%s11607_s18 + $0x13a0] ss:$16 sps:$4 sm:$0xff]   ;;  %v9185_v45 = vld [vmem:[%s11607_s18 + $0x1184] ss:$16 sps:$4 sm:$0xff]  }
 0x2b5   : > { %7007 = vmatpush1.bf16.msra.mxu0 %v9129_v49  ;;  %v9188_v46 = vld [vmem:[%s11607_s18 + $0x1384] ss:$16 sps:$4 sm:$0xff]   ;;  %v9183_v47 = vld [vmem:[%s11607_s18 + $0x1180] ss:$16 sps:$4 sm:$0xff]  }
 0x2b6   : > { %7048 = vmatpush1.bf16.msra.mxu1 %v9132_v50  ;;  %7008 = vmatprep.subr.bf16.mxu0 %v9137_v59  ;;  %v9186_v49 = vld [vmem:[%s11607_s18 + $0x1380] ss:$16 sps:$4 sm:$0xff]   ;;  %v9191_v50 = vld [vmem:[%s11607_s18 + $0x1164] ss:$16 sps:$4 sm:$0xff]  }
 0x2b7   : > { %7049 = vmatprep.subr.bf16.mxu1 %v9140_v40  ;;  %v9194_v51 = vld [vmem:[%s11607_s18 + $0x1364] ss:$16 sps:$4 sm:$0xff]   ;;  %v9189_v58 = vld [vmem:[%s11607_s18 + $0x1160] ss:$16 sps:$4 sm:$0xff]  }
 0x2b8   : > { %v9192_v59 = vld [vmem:[%s11607_s18 + $0x1360] ss:$16 sps:$4 sm:$0xff]   ;;  %v9197_v40 = vld [vmem:[%s11607_s18 + $0x1144] ss:$16 sps:$4 sm:$0xff]  }
 0x2b9   : > { %7009 = vmatpush1.bf16.msra.mxu0 %v9135_v60  ;;  %v9200_v60 = vld [vmem:[%s11607_s18 + $0x1344] ss:$16 sps:$4 sm:$0xff]  }
 0x2ba   : > { %7050 = vmatpush1.bf16.msra.mxu1 %v9138_v62  ;;  %7010 = vmatprep.subr.bf16.mxu0 %v9143_v63  ;;  %v9195_v62 = vld [vmem:[%s11607_s18 + $0x1140] ss:$16 sps:$4 sm:$0xff]  }
 0x2bb   : > { %7051 = vmatprep.subr.bf16.mxu1 %v9146_v0  ;;  %v9198_v63 = vld [vmem:[%s11607_s18 + $0x1340] ss:$16 sps:$4 sm:$0xff]   ;;  %v9203_v0 = vld [vmem:[%s11607_s18 + $0x1124] ss:$16 sps:$4 sm:$0xff]  }
 0x2bd   : > { %7011 = vmatpush1.bf16.msra.mxu0 %v9141_v2  ;;  %v9206_v2 = vld [vmem:[%s11607_s18 + $0x1324] ss:$16 sps:$4 sm:$0xff]  }
 0x2be   : > { %7052 = vmatpush1.bf16.msra.mxu1 %v9144_v3  ;;  %7012 = vmatprep.subr.bf16.mxu0 %v9149_v4  ;;  %v9201_v3 = vld [vmem:[%s11607_s18 + $0x1120] ss:$16 sps:$4 sm:$0xff]  }
 0x2bf   : > { %7053 = vmatprep.subr.bf16.mxu1 %v9152_v6  ;;  %v9204_v4 = vld [vmem:[%s11607_s18 + $0x1320] ss:$16 sps:$4 sm:$0xff]   ;;  %v9209_v6 = vld [vmem:[%s11607_s18 + $0x1104] ss:$16 sps:$4 sm:$0xff]  }
 0x2c1   : > { %7013 = vmatpush1.bf16.msra.mxu0 %v9147_v7  ;;  %v9212_v7 = vld [vmem:[%s11607_s18 + $0x1304] ss:$16 sps:$4 sm:$0xff]  }
 0x2c2   : > { %7054 = vmatpush1.bf16.msra.mxu1 %v9150_v9  ;;  %7014 = vmatprep.subr.bf16.mxu0 %v9155_v10  ;;  %v9207_v9 = vld [vmem:[%s11607_s18 + $0x1100] ss:$16 sps:$4 sm:$0xff]  }
 0x2c3   : > { %7055 = vmatprep.subr.bf16.mxu1 %v9158_v11  ;;  %v9210_v10 = vld [vmem:[%s11607_s18 + $0x1300] ss:$16 sps:$4 sm:$0xff]   ;;  %v9219_v11 = vld [vmem:[%s11607_s18 + $0x14e4] ss:$16 sps:$4 sm:$0xff]  }
 0x2c5   : > { %7015 = vmatpush1.bf16.msra.mxu0 %v9153_v12  ;;  %v9222_v12 = vld [vmem:[%s11607_s18 + $0x16e4] ss:$16 sps:$4 sm:$0xff]  }
 0x2c6   : > { %7056 = vmatpush1.bf16.msra.mxu1 %v9156_v14  ;;  %7016 = vmatprep.subr.bf16.mxu0 %v9161_v15  ;;  %v12076_v14 = vld [vmem:[%s12692_s0 + $0x50] sm:$0xff]  ;;  %v12081_v15 = vld [vmem:[%s12692_s0 + $0x58] sm:$0xff] }
 0x2c7   : > { %7057 = vmatprep.subr.bf16.mxu1 %v9164_v16  ;;  %v9217_v16 = vld [vmem:[%s11607_s18 + $0x14e0] ss:$16 sps:$4 sm:$0xff]  }
 0x2c9   : > { %7017 = vmatpush1.bf16.msra.mxu0 %v9159_v17  ;;  %v9220_v17 = vld [vmem:[%s11607_s18 + $0x16e0] ss:$16 sps:$4 sm:$0xff]  }
 0x2ca   : > { %7058 = vmatpush1.bf16.msra.mxu1 %v9162_v52  ;;  %7018 = vmatprep.subr.bf16.mxu0 %v9167_v23  ;;  %v12087_v52 = vcombine.low %v11984_v21, %v11984_v21  ;;  %v12091_v23 = vcombine.low %v11989_v22, %v11989_v22  ;;  %v12103_v21 = vcombine.high %v12081_v15, %v12081_v15 }
 0x2cb   : > { %7059 = vmatprep.subr.bf16.mxu1 %v9170_v57  ;;  %v9225_v57 = vld [vmem:[%s11607_s18 + $0x14c4] ss:$16 sps:$4 sm:$0xff]  }
 0x2cd   : > { %7019 = vmatpush2.bf16.msra.mxu0 %v9165_v26  ;;  %v9228_v26 = vld [vmem:[%s11607_s18 + $0x16c4] ss:$16 sps:$4 sm:$0xff]  }
 0x2ce   : > { %7060 = vmatpush2.bf16.msra.mxu1 %v9168_v29  ;;  %7020 = vmatprep.subr.bf16.mxu0 %v9173_v30  ;;  %v9223_v29 = vld [vmem:[%s11607_s18 + $0x14c0] ss:$16 sps:$4 sm:$0xff]  }
 0x2cf   : > { %7061 = vmatprep.subr.bf16.mxu1 %v9176_v31  ;;  %v9226_v30 = vld [vmem:[%s11607_s18 + $0x16c0] ss:$16 sps:$4 sm:$0xff]   ;;  %v12099_v31 = vcombine.high %v12076_v14, %v12076_v14 }
 0x2d1   : > { %7021 = vmatpush2.bf16.msra.mxu0 %v9171_v32 }
 0x2d2   : > { %7062 = vmatpush2.bf16.msra.mxu1 %v9174_v33  ;;  %7022 = vmatprep.subr.bf16.mxu0 %v9179_v36 }
 0x2d3   : > { %7063 = vmatprep.subr.bf16.mxu1 %v9182_v37 }
 0x2d5   : > { %7023 = vmatpush2.bf16.msra.mxu0 %v9177_v38  ;;  %v9231_v38 = vld [vmem:[%s11607_s18 + $0x14a4] ss:$16 sps:$4 sm:$0xff]  }
 0x2d6   : > { %7064 = vmatpush2.bf16.msra.mxu1 %v9180_v39  ;;  %7024 = vmatprep.subr.bf16.mxu0 %v9185_v45  ;;  %v9234_v39 = vld [vmem:[%s11607_s18 + $0x16a4] ss:$16 sps:$4 sm:$0xff]  }
 0x2d7   : > { %7065 = vmatprep.subr.bf16.mxu1 %v9188_v46 }
 0x2d9   : > { %7025 = vmatpush2.bf16.msra.mxu0 %v9183_v47  ;;  %v9229_v47 = vld [vmem:[%s11607_s18 + $0x14a0] ss:$16 sps:$4 sm:$0xff]  }
 0x2da   : > { %7066 = vmatpush2.bf16.msra.mxu1 %v9186_v49  ;;  %7026 = vmatprep.subr.bf16.mxu0 %v9191_v50  ;;  %v9232_v49 = vld [vmem:[%s11607_s18 + $0x16a0] ss:$16 sps:$4 sm:$0xff]  }
 0x2db   : > { %7067 = vmatprep.subr.bf16.mxu1 %v9194_v51 }
 0x2dd   : > { %7027 = vmatpush2.bf16.msra.mxu0 %v9189_v58 }
 0x2de   : > { %7068 = vmatpush2.bf16.msra.mxu1 %v9192_v59  ;;  %7028 = vmatprep.subr.bf16.mxu0 %v9197_v40  ;;  %v9237_v59 = vld [vmem:[%s11607_s18 + $0x1484] ss:$16 sps:$4 sm:$0xff]  }
 0x2df   : > { %7069 = vmatprep.subr.bf16.mxu1 %v9200_v60  ;;  %v9240_v40 = vld [vmem:[%s11607_s18 + $0x1684] ss:$16 sps:$4 sm:$0xff]   ;;  %v9235_v60 = vld [vmem:[%s11607_s18 + $0x1480] ss:$16 sps:$4 sm:$0xff]  }
 0x2e1   : > { %7029 = vmatpush2.bf16.msra.mxu0 %v9195_v62  ;;  %v9238_v62 = vld [vmem:[%s11607_s18 + $0x1680] ss:$16 sps:$4 sm:$0xff]  }
 0x2e2   : > { %7070 = vmatpush2.bf16.msra.mxu1 %v9198_v63  ;;  %7030 = vmatprep.subr.bf16.mxu0 %v9203_v0  ;;  %v9243_v63 = vld [vmem:[%s11607_s18 + $0x1464] ss:$16 sps:$4 sm:$0xff]  }
 0x2e3   : > { %7071 = vmatprep.subr.bf16.mxu1 %v9206_v2  ;;  %v9246_v0 = vld [vmem:[%s11607_s18 + $0x1664] ss:$16 sps:$4 sm:$0xff]   ;;  %v9241_v2 = vld [vmem:[%s11607_s18 + $0x1460] ss:$16 sps:$4 sm:$0xff]  }
 0x2e5   : > { %7031 = vmatpush2.bf16.msra.mxu0 %v9201_v3  ;;  %v9244_v3 = vld [vmem:[%s11607_s18 + $0x1660] ss:$16 sps:$4 sm:$0xff]  }
 0x2e6   : > { %7072 = vmatpush2.bf16.msra.mxu1 %v9204_v4  ;;  %7032 = vmatprep.subr.bf16.mxu0 %v9209_v6  ;;  %v9249_v4 = vld [vmem:[%s11607_s18 + $0x1444] ss:$16 sps:$4 sm:$0xff]  }
 0x2e7   : > { %7073 = vmatprep.subr.bf16.mxu1 %v9212_v7  ;;  %v9252_v6 = vld [vmem:[%s11607_s18 + $0x1644] ss:$16 sps:$4 sm:$0xff]   ;;  %v9247_v7 = vld [vmem:[%s11607_s18 + $0x1440] ss:$16 sps:$4 sm:$0xff]  }
 0x2e9   : > { %7033 = vmatpush2.bf16.msra.mxu0 %v9207_v9  ;;  %v9250_v9 = vld [vmem:[%s11607_s18 + $0x1640] ss:$16 sps:$4 sm:$0xff]  }
 0x2ea   : > { %7074 = vmatpush2.bf16.msra.mxu1 %v9210_v10  ;;  %7084 = vmatprep.subr.bf16.mxu0 %v9219_v11  ;;  %v9255_v10 = vld [vmem:[%s11607_s18 + $0x1424] ss:$16 sps:$4 sm:$0xff]  }
 0x2eb   : > { %7125 = vmatprep.subr.bf16.mxu1 %v9222_v12  ;;  %v9258_v11 = vld [vmem:[%s11607_s18 + $0x1624] ss:$16 sps:$4 sm:$0xff]   ;;  %v9253_v12 = vld [vmem:[%s11607_s18 + $0x1420] ss:$16 sps:$4 sm:$0xff]  }
 0x2ec   : > { %v6790_v22 = vpop.f32.mrf.mxu0  ;;  %7035 = vmatmul.mubr.bf16.vlgmr.msra.gmra.mxu0 %v12087_v52 }
 0x2ed   : > { %v6831_v32 = vpop.f32.mrf.mxu1  ;;  %7076 = vmatmul.mubr.bf16.vlgmr.msra.gmra.mxu1 %v12091_v23  ;;  %v6791_v33 = vadd.f32 %v6790_v22, %v12011_v44  ;;  %7085 = vmatpush1.bf16.msra.mxu0 %v9217_v16  ;;  %v9256_v16 = vld [vmem:[%s11607_s18 + $0x1620] ss:$16 sps:$4 sm:$0xff]   ;;  %v9270_v22 = vld [vmem:[%s11607_s18 + $0x17e4] ss:$16 sps:$4 sm:$0xff]  }
 0x2ee   : > { %7126 = vmatpush1.bf16.msra.mxu1 %v9220_v17  ;;  %v6792_v36 = vpop.f32.mrf.mxu0  ;;  %7086 = vmatprep.subr.bf16.mxu0 %v9225_v57  ;;  %v9261_v17 = vld [vmem:[%s11607_s18 + $0x1404] ss:$16 sps:$4 sm:$0xff]  }
 0x2ef   : > { %v6833_v37 = vpop.f32.mrf.mxu1  ;;  %7127 = vmatprep.subr.bf16.mxu1 %v9228_v26  ;;  %v12110_v45 = vadd.f32 %v6831_v32, %v6791_v33  ;;  %v6793_v46 = vadd.f32 %v6792_v36, %v12015_v48  ;;  %7116 = vmatprep.mubr.bf16.mxu0 %v12099_v31  ;;  %v9264_v57 = vld [vmem:[%s11607_s18 + $0x1604] ss:$16 sps:$4 sm:$0xff]   ;;  %v9259_v26 = vld [vmem:[%s11607_s18 + $0x1400] ss:$16 sps:$4 sm:$0xff]  }
 0x2f0   : > { %7157 = vmatprep.mubr.bf16.mxu1 %v12103_v21  ;;  %v6794_v44 = vpop.f32.mrf.mxu0  ;;  %v9265_v32 = vld [vmem:[%s11607_s18 + $0x15e0] ss:$16 sps:$4 sm:$0xff]   ;;  %v9273_v36 = vld [vmem:[%s11607_s18 + $0x15c4] ss:$16 sps:$4 sm:$0xff]  }
 0x2f1   : > { %v6835_v50 = vpop.f32.mrf.mxu1  ;;  %v12117_v51 = vadd.f32 %v6833_v37, %v6793_v46  ;;  %7087 = vmatpush1.bf16.msra.mxu0 %v9223_v29  ;;  %v9262_v29 = vld [vmem:[%s11607_s18 + $0x1600] ss:$16 sps:$4 sm:$0xff]   ;;  %v9276_v37 = vld [vmem:[%s11607_s18 + $0x17c4] ss:$16 sps:$4 sm:$0xff]  }
 0x2f2   : > { %7128 = vmatpush1.bf16.msra.mxu1 %v9226_v30  ;;  %v6795_v58 = vpop.f32.mrf.mxu0  ;;  %7088 = vmatprep.subr.bf16.mxu0 %v9231_v38  ;;  %v9267_v30 = vld [vmem:[%s11607_s18 + $0x15e4] ss:$16 sps:$4 sm:$0xff]   ;;  %v9268_v33 = vld [vmem:[%s11607_s18 + $0x17e0] ss:$16 sps:$4 sm:$0xff]  }
 0x2f3   : > { %v6836_v48 = vpop.f32.mrf.mxu1  ;;  %7129 = vmatprep.subr.bf16.mxu1 %v9234_v39  ;;  %v9271_v38 = vld [vmem:[%s11607_s18 + $0x15c0] ss:$16 sps:$4 sm:$0xff]   ;;  %v9279_v46 = vld [vmem:[%s11607_s18 + $0x15a4] ss:$16 sps:$4 sm:$0xff]  }
 0x2f4   : > { %v9274_v39 = vld [vmem:[%s11607_s18 + $0x17c0] ss:$16 sps:$4 sm:$0xff]   ;;  %v9285_v50 = vld [vmem:[%s11607_s18 + $0x1584] ss:$16 sps:$4 sm:$0xff]  }
 0x2f5   : > { %7089 = vmatpush1.bf16.msra.mxu0 %v9229_v47  ;;  %v9282_v47 = vld [vmem:[%s11607_s18 + $0x17a4] ss:$16 sps:$4 sm:$0xff]   ;;  %v9280_v44 = vld [vmem:[%s11607_s18 + $0x17a0] ss:$16 sps:$4 sm:$0xff]  }
 0x2f6   : > { %7130 = vmatpush1.bf16.msra.mxu1 %v9232_v49  ;;  %7090 = vmatprep.subr.bf16.mxu0 %v9237_v59  ;;  %v9277_v49 = vld [vmem:[%s11607_s18 + $0x15a0] ss:$16 sps:$4 sm:$0xff]   ;;  %v9288_v58 = vld [vmem:[%s11607_s18 + $0x1784] ss:$16 sps:$4 sm:$0xff]  }
 0x2f7   : > { %7131 = vmatprep.subr.bf16.mxu1 %v9240_v40  ;;  %v9283_v48 = vld [vmem:[%s11607_s18 + $0x1580] ss:$16 sps:$4 sm:$0xff]   ;;  %v9291_v40 = vld [vmem:[%s11607_s18 + $0x1564] ss:$16 sps:$4 sm:$0xff]  }
 0x2f8   : > { %v9286_v59 = vld [vmem:[%s11607_s18 + $0x1780] ss:$16 sps:$4 sm:$0xff]  }
 0x2f9   : > { %7091 = vmatpush1.bf16.msra.mxu0 %v9235_v60  ;;  %v9294_v60 = vld [vmem:[%s11607_s18 + $0x1764] ss:$16 sps:$4 sm:$0xff]  }
 0x2fa   : > { %7132 = vmatpush1.bf16.msra.mxu1 %v9238_v62  ;;  %7092 = vmatprep.subr.bf16.mxu0 %v9243_v63  ;;  %v9289_v62 = vld [vmem:[%s11607_s18 + $0x1560] ss:$16 sps:$4 sm:$0xff]  }
 0x2fb   : > { %7133 = vmatprep.subr.bf16.mxu1 %v9246_v0  ;;  %v9292_v63 = vld [vmem:[%s11607_s18 + $0x1760] ss:$16 sps:$4 sm:$0xff]   ;;  %v9297_v0 = vld [vmem:[%s11607_s18 + $0x1544] ss:$16 sps:$4 sm:$0xff]  }
 0x2fd   : > { %7093 = vmatpush1.bf16.msra.mxu0 %v9241_v2  ;;  %v9300_v2 = vld [vmem:[%s11607_s18 + $0x1744] ss:$16 sps:$4 sm:$0xff]  }
 0x2fe   : > { %7134 = vmatpush1.bf16.msra.mxu1 %v9244_v3  ;;  %7094 = vmatprep.subr.bf16.mxu0 %v9249_v4  ;;  %v9295_v3 = vld [vmem:[%s11607_s18 + $0x1540] ss:$16 sps:$4 sm:$0xff]  }
 0x2ff   : > { %7135 = vmatprep.subr.bf16.mxu1 %v9252_v6  ;;  %v9298_v4 = vld [vmem:[%s11607_s18 + $0x1740] ss:$16 sps:$4 sm:$0xff]   ;;  %v9303_v6 = vld [vmem:[%s11607_s18 + $0x1524] ss:$16 sps:$4 sm:$0xff]  }
 0x301   : > { %7095 = vmatpush1.bf16.msra.mxu0 %v9247_v7  ;;  %v9306_v7 = vld [vmem:[%s11607_s18 + $0x1724] ss:$16 sps:$4 sm:$0xff]  }
 0x302   : > { %7136 = vmatpush1.bf16.msra.mxu1 %v9250_v9  ;;  %7096 = vmatprep.subr.bf16.mxu0 %v9255_v10  ;;  %v9301_v9 = vld [vmem:[%s11607_s18 + $0x1520] ss:$16 sps:$4 sm:$0xff]  }
 0x303   : > { %7137 = vmatprep.subr.bf16.mxu1 %v9258_v11  ;;  %v9304_v10 = vld [vmem:[%s11607_s18 + $0x1720] ss:$16 sps:$4 sm:$0xff]   ;;  %v9309_v11 = vld [vmem:[%s11607_s18 + $0x1504] ss:$16 sps:$4 sm:$0xff]  }
 0x305   : > { %7097 = vmatpush1.bf16.msra.mxu0 %v9253_v12  ;;  %v9312_v12 = vld [vmem:[%s11607_s18 + $0x1704] ss:$16 sps:$4 sm:$0xff]  }
 0x306   : > { %7138 = vmatpush1.bf16.msra.mxu1 %v9256_v16  ;;  %7098 = vmatprep.subr.bf16.mxu0 %v9261_v17  ;;  %v9307_v16 = vld [vmem:[%s11607_s18 + $0x1500] ss:$16 sps:$4 sm:$0xff]  }
 0x307   : > { %7139 = vmatprep.subr.bf16.mxu1 %v9264_v57  ;;  %v9310_v17 = vld [vmem:[%s11607_s18 + $0x1700] ss:$16 sps:$4 sm:$0xff]   ;;  %v9319_v57 = vld [vmem:[%s11607_s18 + $0x1864] ss:$16 sps:$4 sm:$0xff]  }
 0x309   : > { %7099 = vmatpush1.bf16.msra.mxu0 %v9259_v26  ;;  %v9322_v26 = vld [vmem:[%s11607_s18 + $0xec] ss:$16 sps:$4 sm:$0xff]  }
 0x30a   : > { %7140 = vmatpush1.bf16.msra.mxu1 %v9262_v29  ;;  %7100 = vmatprep.subr.bf16.mxu0 %v9267_v30  ;;  %v9317_v29 = vld [vmem:[%s11607_s18 + $0x1860] ss:$16 sps:$4 sm:$0xff]   ;;  %v9320_v30 = vld [vmem:[%s11607_s18 + $0xe8] ss:$16 sps:$4 sm:$0xff]  }
 0x30b   : > { %7141 = vmatprep.subr.bf16.mxu1 %v9270_v22  ;;  %v12177_v22 = vcombine.low %v12076_v14, %v12076_v14 }
 0x30d   : > { %7101 = vmatpush2.bf16.msra.mxu0 %v9265_v32  ;;  %v12181_v32 = vcombine.low %v12081_v15, %v12081_v15 }
 0x30e   : > { %7142 = vmatpush2.bf16.msra.mxu1 %v9268_v33  ;;  %7102 = vmatprep.subr.bf16.mxu0 %v9273_v36  ;;  %v9325_v33 = vld [vmem:[%s11607_s18 + $0x1844] ss:$16 sps:$4 sm:$0xff]   ;;  %v9328_v36 = vld [vmem:[%s11607_s18 + $0xcc] ss:$16 sps:$4 sm:$0xff]  }
 0x30f   : > { %7143 = vmatprep.subr.bf16.mxu1 %v9276_v37  ;;  %v9323_v37 = vld [vmem:[%s11607_s18 + $0x1840] ss:$16 sps:$4 sm:$0xff]  }
 0x311   : > { %7103 = vmatpush2.bf16.msra.mxu0 %v9271_v38  ;;  %v9326_v38 = vld [vmem:[%s11607_s18 + $0xc8] ss:$16 sps:$4 sm:$0xff]  }
 0x312   : > { %7144 = vmatpush2.bf16.msra.mxu1 %v9274_v39  ;;  %7104 = vmatprep.subr.bf16.mxu0 %v9279_v46 }
 0x313   : > { %7145 = vmatprep.subr.bf16.mxu1 %v9282_v47 }
 0x315   : > { %7105 = vmatpush2.bf16.msra.mxu0 %v9277_v49  ;;  %v9331_v49 = vld [vmem:[%s11607_s18 + $0x1824] ss:$16 sps:$4 sm:$0xff]  }
 0x316   : > { %7146 = vmatpush2.bf16.msra.mxu1 %v9280_v44  ;;  %7106 = vmatprep.subr.bf16.mxu0 %v9285_v50  ;;  %v9334_v44 = vld [vmem:[%s11607_s18 + $0xac] ss:$16 sps:$4 sm:$0xff]  }
 0x317   : > { %7147 = vmatprep.subr.bf16.mxu1 %v9288_v58 }
 0x319   : > { %7107 = vmatpush2.bf16.msra.mxu0 %v9283_v48  ;;  %v9329_v48 = vld [vmem:[%s11607_s18 + $0x1820] ss:$16 sps:$4 sm:$0xff]  }
 0x31a   : > { %7148 = vmatpush2.bf16.msra.mxu1 %v9286_v59  ;;  %7108 = vmatprep.subr.bf16.mxu0 %v9291_v40  ;;  %v9332_v59 = vld [vmem:[%s11607_s18 + $0xa8] ss:$16 sps:$4 sm:$0xff]   ;;  %v9949_v40 = vmov 0  }
 0x31b   : > { %7149 = vmatprep.subr.bf16.mxu1 %v9294_v60 }
 0x31d   : > { %7109 = vmatpush2.bf16.msra.mxu0 %v9289_v62 }
 0x31e   : > { %7150 = vmatpush2.bf16.msra.mxu1 %v9292_v63  ;;  %7110 = vmatprep.subr.bf16.mxu0 %v9297_v0  ;;  %v9337_v0 = vld [vmem:[%s11607_s18 + $0x1804] ss:$16 sps:$4 sm:$0xff]  }
 0x31f   : > { %7151 = vmatprep.subr.bf16.mxu1 %v9300_v2  ;;  %v9340_v2 = vld [vmem:[%s11607_s18 + $0x8c] ss:$16 sps:$4 sm:$0xff]  }
 0x321   : > { %7111 = vmatpush2.bf16.msra.mxu0 %v9295_v3  ;;  %v9338_v3 = vld [vmem:[%s11607_s18 + $0x88] ss:$16 sps:$4 sm:$0xff]  }
 0x322   : > { %7152 = vmatpush2.bf16.msra.mxu1 %v9298_v4  ;;  %7112 = vmatprep.subr.bf16.mxu0 %v9303_v6  ;;  %v9341_v4 = vld [vmem:[%s12692_s0 + $0x60] ss:$0 sps:$4 sm:$0xff]   ;;  %v9344_v6 = vld [vmem:[%s11607_s18 + $0x6c] ss:$16 sps:$4 sm:$0xff]  }
 0x323   : > { %7153 = vmatprep.subr.bf16.mxu1 %v9306_v7  ;;  %v9347_v7 = vld [vmem:[%s11607_s18 + $0x2ec] ss:$16 sps:$4 sm:$0xff]  }
 0x325   : > { %7113 = vmatpush2.bf16.msra.mxu0 %v9301_v9  ;;  %v9342_v9 = vld [vmem:[%s11607_s18 + $0x68] ss:$16 sps:$4 sm:$0xff]  }
 0x326   : > { %7154 = vmatpush2.bf16.msra.mxu1 %v9304_v10  ;;  %7114 = vmatprep.subr.bf16.mxu0 %v9309_v11  ;;  %v9345_v10 = vld [vmem:[%s11607_s18 + $0x2e8] ss:$16 sps:$4 sm:$0xff]   ;;  %v9350_v11 = vld [vmem:[%s11607_s18 + $0x4c] ss:$16 sps:$4 sm:$0xff]  }
 0x327   : > { %7155 = vmatprep.subr.bf16.mxu1 %v9312_v12  ;;  %v9353_v12 = vld [vmem:[%s11607_s18 + $0x2cc] ss:$16 sps:$4 sm:$0xff]  }
 0x329   : > { %7115 = vmatpush2.bf16.msra.mxu0 %v9307_v16  ;;  %v9348_v16 = vld [vmem:[%s11607_s18 + $0x48] ss:$16 sps:$4 sm:$0xff]  }
 0x32a   : > { %7156 = vmatpush2.bf16.msra.mxu1 %v9310_v17  ;;  %7174 = vmatprep.subr.bf16.mxu0 %v9319_v57  ;;  %v9351_v17 = vld [vmem:[%s11607_s18 + $0x2c8] ss:$16 sps:$4 sm:$0xff]   ;;  %v9356_v57 = vld [vmem:[%s11607_s18 + $0x2c] ss:$16 sps:$4 sm:$0xff]  }
 0x32b   : > { %7207 = vmatprep.subr.bf16.mxu1 %v9322_v26  ;;  %v9359_v26 = vld [vmem:[%s11607_s18 + $0x2ac] ss:$16 sps:$4 sm:$0xff]  }
 0x32c   : > { %v6872_v39 = vpop.f32.mrf.mxu0  ;;  %7117 = vmatmul.mubr.bf16.vlgmr.msra.gmra.mxu0 %v12177_v22 }
 0x32d   : > { %v6913_v46 = vpop.f32.mrf.mxu1  ;;  %7158 = vmatmul.mubr.bf16.vlgmr.msra.gmra.mxu1 %v12181_v32  ;;  %v6873_v14 = vadd.f32 %v6872_v39, %v12110_v45  ;;  %7175 = vmatpush1.bf16.msra.mxu0 %v9317_v29  ;;  %v9354_v29 = vld [vmem:[%s11607_s18 + $0x28] ss:$16 sps:$4 sm:$0xff]   ;;  %v9371_v39 = vld [vmem:[%s11607_s18 + $0x26c] ss:$16 sps:$4 sm:$0xff]  }
 0x32e   : > { %7208 = vmatpush1.bf16.msra.mxu1 %v9320_v30  ;;  %v6874_v15 = vpop.f32.mrf.mxu0  ;;  %7176 = vmatprep.subr.bf16.mxu0 %v9325_v33  ;;  %v9357_v30 = vld [vmem:[%s11607_s18 + $0x2a8] ss:$16 sps:$4 sm:$0xff]   ;;  %v9362_v33 = vld [vmem:[%s11607_s18 + $0xc] ss:$16 sps:$4 sm:$0xff]  }
 0x32f   : > { %v6915_v47 = vpop.f32.mrf.mxu1  ;;  %7209 = vmatprep.subr.bf16.mxu1 %v9328_v36  ;;  %v12192_v50 = vadd.f32 %v6913_v46, %v6873_v14  ;;  %v6875_v58 = vadd.f32 %v6874_v15, %v12117_v51  ;;  %7198 = vmatprep.mubr.bf16.mxu0 %v9949_v40  ;;  %v9365_v36 = vld [vmem:[%s11607_s18 + $0x28c] ss:$16 sps:$4 sm:$0xff]   ;;  %v9366_v46 = vld [vmem:[%s11607_s18 + $0x1e8] ss:$16 sps:$4 sm:$0xff]  }
 0x330   : > { %7239 = vmatprep.mubr.bf16.mxu1 %v11659_v1  ;;  %v6876_v45 = vpop.f32.mrf.mxu0  ;;  %v9335_v1 = vld [vmem:[%s11607_s18 + $0x1800] ss:$16 sps:$4 sm:$0xff]   ;;  %v9369_v14 = vld [vmem:[%s11607_s18 + $0x268] ss:$16 sps:$4 sm:$0xff]   ;;  %v9374_v15 = vld [vmem:[%s11607_s18 + $0x1cc] ss:$16 sps:$4 sm:$0xff]  }
 0x331   : > { %v6917_v60 = vpop.f32.mrf.mxu1  ;;  %v12199_v62 = vadd.f32 %v6915_v47, %v6875_v58  ;;  %7177 = vmatpush1.bf16.msra.mxu0 %v9323_v37  ;;  %v9360_v37 = vld [vmem:[%s11607_s18 + $0x8] ss:$16 sps:$4 sm:$0xff]   ;;  %v9377_v47 = vld [vmem:[%s11607_s18 + $0x24c] ss:$16 sps:$4 sm:$0xff]  }
 0x332   : > { %7210 = vmatpush1.bf16.msra.mxu1 %v9326_v38  ;;  %v6877_v51 = vpop.f32.mrf.mxu0  ;;  %7178 = vmatprep.subr.bf16.mxu0 %v9331_v49  ;;  %v9363_v38 = vld [vmem:[%s11607_s18 + $0x288] ss:$16 sps:$4 sm:$0xff]   ;;  %v9380_v58 = vld [vmem:[%s11607_s18 + $0x1ac] ss:$16 sps:$4 sm:$0xff]  }
 0x333   : > { %v6918_v63 = vpop.f32.mrf.mxu1  ;;  %7211 = vmatprep.subr.bf16.mxu1 %v9334_v44  ;;  %v9372_v49 = vld [vmem:[%s11607_s18 + $0x1c8] ss:$16 sps:$4 sm:$0xff]   ;;  %v9386_v60 = vld [vmem:[%s11607_s18 + $0x18c] ss:$16 sps:$4 sm:$0xff]  }
 0x334   : > { %v9375_v44 = vld [vmem:[%s11607_s18 + $0x248] ss:$16 sps:$4 sm:$0xff]   ;;  %v9389_v51 = vld [vmem:[%s11607_s18 + $0x20c] ss:$16 sps:$4 sm:$0xff]  }
 0x335   : > { %7179 = vmatpush1.bf16.msra.mxu0 %v9329_v48  ;;  %v9383_v48 = vld [vmem:[%s11607_s18 + $0x22c] ss:$16 sps:$4 sm:$0xff]   ;;  %v9381_v45 = vld [vmem:[%s11607_s18 + $0x228] ss:$16 sps:$4 sm:$0xff]  }
 0x336   : > { %7212 = vmatpush1.bf16.msra.mxu1 %v9332_v59  ;;  %7180 = vmatprep.subr.bf16.mxu0 %v9337_v0  ;;  %v9378_v59 = vld [vmem:[%s11607_s18 + $0x1a8] ss:$16 sps:$4 sm:$0xff]  }
 0x337   : > { %7213 = vmatprep.subr.bf16.mxu1 %v9340_v2  ;;  %v9384_v63 = vld [vmem:[%s11607_s18 + $0x188] ss:$16 sps:$4 sm:$0xff]   ;;  %v9392_v2 = vld [vmem:[%s11607_s18 + $0x16c] ss:$16 sps:$4 sm:$0xff]  }
 0x338   : > { %v9387_v0 = vld [vmem:[%s11607_s18 + $0x208] ss:$16 sps:$4 sm:$0xff]  }
 0x339   : > { %7181 = vmatpush1.bf16.msra.mxu0 %v9335_v1  ;;  %v9395_v1 = vld [vmem:[%s11607_s18 + $0x3ec] ss:$16 sps:$4 sm:$0xff]  }
 0x33a   : > { %7214 = vmatpush1.bf16.msra.mxu1 %v9338_v3  ;;  %7248 = vmatprep.subr.bf16.mxu0 %v9347_v7  ;;  %v9390_v3 = vld [vmem:[%s11607_s18 + $0x168] ss:$16 sps:$4 sm:$0xff]   ;;  %v9401_v7 = vld [vmem:[%s11607_s18 + $0x3cc] ss:$16 sps:$4 sm:$0xff]  }
 0x33b   : > { %7215 = vmatprep.subr.bf16.mxu1 %v9344_v6  ;;  %v9398_v6 = vld [vmem:[%s11607_s18 + $0x14c] ss:$16 sps:$4 sm:$0xff]  }
 0x33c   : > { %8682 = vmatmul.mubr.msk.bf16.vlgmr.msra.gmra.mxu0 %vm6670_vm1, %v9341_v4  ;;  %v9393_v4 = vld [vmem:[%s11607_s18 + $0x3e8] ss:$16 sps:$4 sm:$0xff]  }
 0x33d   : > { %7249 = vmatpush1.bf16.msra.mxu0 %v9345_v10  ;;  %7280 = vmatprep.mubr.bf16.mxu0 %v11666_v5  ;;  %v9368_v5 = vld [vmem:[%s11607_s18 + $0x1ec] ss:$16 sps:$4 sm:$0xff]   ;;  %v9399_v10 = vld [vmem:[%s11607_s18 + $0x3c8] ss:$16 sps:$4 sm:$0xff]  }
 0x33e   : > { %7216 = vmatpush1.bf16.msra.mxu1 %v9342_v9  ;;  %7250 = vmatprep.subr.bf16.mxu0 %v9353_v12  ;;  %v9396_v9 = vld [vmem:[%s11607_s18 + $0x148] ss:$16 sps:$4 sm:$0xff]   ;;  %v9407_v12 = vld [vmem:[%s11607_s18 + $0x3ac] ss:$16 sps:$4 sm:$0xff]  }
 0x33f   : > { %7217 = vmatprep.subr.bf16.mxu1 %v9350_v11  ;;  %v9404_v11 = vld [vmem:[%s11607_s18 + $0x12c] ss:$16 sps:$4 sm:$0xff]  }
 0x341   : > { %7251 = vmatpush1.bf16.msra.mxu0 %v9351_v17  ;;  %v9405_v17 = vld [vmem:[%s11607_s18 + $0x3a8] ss:$16 sps:$4 sm:$0xff]  }
 0x342   : > { %7218 = vmatpush1.bf16.msra.mxu1 %v9348_v16  ;;  %7252 = vmatprep.subr.bf16.mxu0 %v9359_v26  ;;  %v9402_v16 = vld [vmem:[%s11607_s18 + $0x128] ss:$16 sps:$4 sm:$0xff]   ;;  %v9413_v26 = vld [vmem:[%s11607_s18 + $0x38c] ss:$16 sps:$4 sm:$0xff]  }
 0x343   : > { %7219 = vmatprep.subr.bf16.mxu1 %v9356_v57  ;;  %v9410_v57 = vld [vmem:[%s11607_s18 + $0x10c] ss:$16 sps:$4 sm:$0xff]  }
 0x345   : > { %7253 = vmatpush1.bf16.msra.mxu0 %v9357_v30  ;;  %v9411_v30 = vld [vmem:[%s11607_s18 + $0x388] ss:$16 sps:$4 sm:$0xff]  }
 0x346   : > { %7220 = vmatpush1.bf16.msra.mxu1 %v9354_v29  ;;  %7254 = vmatprep.subr.bf16.mxu0 %v9365_v36  ;;  %v9408_v29 = vld [vmem:[%s11607_s18 + $0x108] ss:$16 sps:$4 sm:$0xff]   ;;  %v9419_v36 = vld [vmem:[%s11607_s18 + $0x4ec] ss:$16 sps:$4 sm:$0xff]  }
 0x347   : > { %7221 = vmatprep.subr.bf16.mxu1 %v9362_v33  ;;  %v9416_v33 = vld [vmem:[%s11607_s18 + $0x36c] ss:$16 sps:$4 sm:$0xff]  }
 0x349   : > { %7255 = vmatpush1.bf16.msra.mxu0 %v9363_v38  ;;  %v9417_v38 = vld [vmem:[%s11607_s18 + $0x4e8] ss:$16 sps:$4 sm:$0xff]  }
 0x34a   : > { %7222 = vmatpush1.bf16.msra.mxu1 %v9360_v37  ;;  %7256 = vmatprep.subr.bf16.mxu0 %v9371_v39  ;;  %v9414_v37 = vld [vmem:[%s11607_s18 + $0x368] ss:$16 sps:$4 sm:$0xff]   ;;  %v9425_v39 = vld [vmem:[%s11607_s18 + $0x4cc] ss:$16 sps:$4 sm:$0xff]  }
 0x34b   : > { %7223 = vmatprep.subr.bf16.mxu1 %v9368_v5  ;;  %v9422_v5 = vld [vmem:[%s11607_s18 + $0x34c] ss:$16 sps:$4 sm:$0xff]  }
 0x34d   : > { %7257 = vmatpush1.bf16.msra.mxu0 %v9369_v14  ;;  %v9423_v14 = vld [vmem:[%s11607_s18 + $0x4c8] ss:$16 sps:$4 sm:$0xff]  }
 0x34e   : > { %7224 = vmatpush2.bf16.msra.mxu1 %v9366_v46  ;;  %7258 = vmatprep.subr.bf16.mxu0 %v9377_v47  ;;  %v9420_v46 = vld [vmem:[%s11607_s18 + $0x348] ss:$16 sps:$4 sm:$0xff]  }
 0x34f   : > { %7225 = vmatprep.subr.bf16.mxu1 %v9374_v15 }
 0x351   : > { %7259 = vmatpush1.bf16.msra.mxu0 %v9375_v44 }
 0x352   : > { %7226 = vmatpush2.bf16.msra.mxu1 %v9372_v49  ;;  %7260 = vmatprep.subr.bf16.mxu0 %v9383_v48  ;;  %v9428_v48 = vld [vmem:[%s11607_s18 + $0x32c] ss:$16 sps:$4 sm:$0xff]  }
 0x353   : > { %7227 = vmatprep.subr.bf16.mxu1 %v9380_v58 }
 0x355   : > { %7261 = vmatpush1.bf16.msra.mxu0 %v9381_v45 }
 0x356   : > { %7228 = vmatpush2.bf16.msra.mxu1 %v9378_v59  ;;  %7262 = vmatprep.subr.bf16.mxu0 %v9389_v51  ;;  %v9431_v59 = vld [vmem:[%s11607_s18 + $0x4ac] ss:$16 sps:$4 sm:$0xff]   ;;  %v9426_v51 = vld [vmem:[%s11607_s18 + $0x328] ss:$16 sps:$4 sm:$0xff]  }
 0x357   : > { %7229 = vmatprep.subr.bf16.mxu1 %v9386_v60 }
 0x359   : > { %7263 = vmatpush1.bf16.msra.mxu0 %v9387_v0 }
 0x35a   : > { %7230 = vmatpush2.bf16.msra.mxu1 %v9384_v63  ;;  %7264 = vmatprep.subr.bf16.mxu0 %v9395_v1  ;;  %v9429_v63 = vld [vmem:[%s11607_s18 + $0x4a8] ss:$16 sps:$4 sm:$0xff]  }
 0x35b   : > { %7231 = vmatprep.subr.bf16.mxu1 %v9392_v2 }
 0x35d   : > { %7265 = vmatpush2.bf16.msra.mxu0 %v9393_v4  ;;  %v9435_v4 = vld [vmem:[%s11607_s18 + $0x488] ss:$16 sps:$4 sm:$0xff]  }
 0x35e   : > { %7232 = vmatpush2.bf16.msra.mxu1 %v9390_v3  ;;  %7266 = vmatprep.subr.bf16.mxu0 %v9401_v7  ;;  %v9437_v3 = vld [vmem:[%s11607_s18 + $0x48c] ss:$16 sps:$4 sm:$0xff]  }
 0x35f   : > { %7233 = vmatprep.subr.bf16.mxu1 %v9398_v6  ;;  %v9440_v6 = vld [vmem:[%s11607_s18 + $0x46c] ss:$16 sps:$4 sm:$0xff]  }
 0x360   : > { %v9443_v7 = vld [vmem:[%s11607_s18 + $0x6ec] ss:$16 sps:$4 sm:$0xff]  }
 0x361   : > { %7267 = vmatpush2.bf16.msra.mxu0 %v9399_v10  ;;  %v9441_v10 = vld [vmem:[%s11607_s18 + $0x6e8] ss:$16 sps:$4 sm:$0xff]  }
 0x362   : > { %7234 = vmatpush2.bf16.msra.mxu1 %v9396_v9  ;;  %7268 = vmatprep.subr.bf16.mxu0 %v9407_v12  ;;  %v9438_v9 = vld [vmem:[%s11607_s18 + $0x468] ss:$16 sps:$4 sm:$0xff]   ;;  %v9449_v12 = vld [vmem:[%s11607_s18 + $0x6cc] ss:$16 sps:$4 sm:$0xff]  }
 0x363   : > { %7235 = vmatprep.subr.bf16.mxu1 %v9404_v11  ;;  %v9446_v11 = vld [vmem:[%s11607_s18 + $0x44c] ss:$16 sps:$4 sm:$0xff]  }
 0x365   : > { %7269 = vmatpush2.bf16.msra.mxu0 %v9405_v17  ;;  %v9447_v17 = vld [vmem:[%s11607_s18 + $0x6c8] ss:$16 sps:$4 sm:$0xff]  }
 0x366   : > { %7236 = vmatpush2.bf16.msra.mxu1 %v9402_v16  ;;  %7270 = vmatprep.subr.bf16.mxu0 %v9413_v26  ;;  %v9444_v16 = vld [vmem:[%s11607_s18 + $0x448] ss:$16 sps:$4 sm:$0xff]   ;;  %v9455_v26 = vld [vmem:[%s11607_s18 + $0x6ac] ss:$16 sps:$4 sm:$0xff]  }
 0x367   : > { %7237 = vmatprep.subr.bf16.mxu1 %v9410_v57  ;;  %v9452_v57 = vld [vmem:[%s11607_s18 + $0x42c] ss:$16 sps:$4 sm:$0xff]  }
 0x369   : > { %7271 = vmatpush2.bf16.msra.mxu0 %v9411_v30  ;;  %v9458_v30 = vld [vmem:[%s11607_s18 + $0x40c] ss:$16 sps:$4 sm:$0xff]  }
 0x36a   : > { %7238 = vmatpush2.bf16.msra.mxu1 %v9408_v29  ;;  %7272 = vmatprep.subr.bf16.mxu0 %v9416_v33  ;;  %v9450_v29 = vld [vmem:[%s11607_s18 + $0x428] ss:$16 sps:$4 sm:$0xff]   ;;  %v9461_v33 = vld [vmem:[%s11607_s18 + $0x68c] ss:$16 sps:$4 sm:$0xff]  }
 0x36b   : > { %7289 = vmatprep.subr.bf16.mxu1 %v9419_v36  ;;  %v9456_v36 = vld [vmem:[%s11607_s18 + $0x408] ss:$16 sps:$4 sm:$0xff]  }
 0x36c   : > { %v6954_v15 = vpop.f32.mrf.mxu0 }
 0x36d   : > { %v6995_v47 = vpop.f32.mrf.mxu1  ;;  %7240 = vmatmul.mubr.bf16.vlgmr.msra.gmra.mxu1 %v11688_v24  ;;  %v6955_v49 = vadd.f32 %v6954_v15, %v12192_v50  ;;  %7273 = vmatpush2.bf16.msra.mxu0 %v9414_v37  ;;  %v9459_v37 = vld [vmem:[%s11607_s18 + $0x688] ss:$16 sps:$4 sm:$0xff]  }
 0x36e   : > { %7290 = vmatpush1.bf16.msra.mxu1 %v9417_v38  ;;  %v6956_v44 = vpop.f32.mrf.mxu0  ;;  %7274 = vmatprep.subr.bf16.mxu0 %v9422_v5  ;;  %v9467_v38 = vld [vmem:[%s11607_s18 + $0x66c] ss:$16 sps:$4 sm:$0xff]   ;;  %v9462_v5 = vld [vmem:[%s11607_s18 + $0x5e8] ss:$16 sps:$4 sm:$0xff]  }
 0x36f   : > { %v6997_v58 = vpop.f32.mrf.mxu1  ;;  %7291 = vmatprep.subr.bf16.mxu1 %v9425_v39  ;;  %v12270_v45 = vadd.f32 %v6995_v47, %v6955_v49  ;;  %v6957_v60 = vadd.f32 %v6956_v44, %v12199_v62  ;;  %7321 = vmatprep.mubr.bf16.mxu1 %v11732_v54  ;;  %v9434_v62 = vld [vmem:[%s11607_s18 + $0x30c] ss:$16 sps:$4 sm:$0xff]   ;;  %v9432_v54 = vld [vmem:[%s11607_s18 + $0x308] ss:$16 sps:$4 sm:$0xff]  }
 0x370   : > { %v6958_v24 = vpop.f32.mrf.mxu0  ;;  %v9465_v39 = vld [vmem:[%s11607_s18 + $0x668] ss:$16 sps:$4 sm:$0xff]   ;;  %v9476_v49 = vld [vmem:[%s11607_s18 + $0x5ac] ss:$16 sps:$4 sm:$0xff]  }
 0x371   : > { %v6999_v50 = vpop.f32.mrf.mxu1  ;;  %v12276_v0 = vadd.f32 %v6997_v58, %v6957_v60  ;;  %7275 = vmatpush2.bf16.msra.mxu0 %v9420_v46  ;;  %v9470_v46 = vld [vmem:[%s11607_s18 + $0x5cc] ss:$16 sps:$4 sm:$0xff]   ;;  %v9468_v15 = vld [vmem:[%s11607_s18 + $0x5c8] ss:$16 sps:$4 sm:$0xff]  }
 0x372   : > { %7292 = vmatpush1.bf16.msra.mxu1 %v9423_v14  ;;  %v6959_v2 = vpop.f32.mrf.mxu0  ;;  %7276 = vmatprep.subr.bf16.mxu0 %v9428_v48  ;;  %v9473_v14 = vld [vmem:[%s11607_s18 + $0x64c] ss:$16 sps:$4 sm:$0xff]   ;;  %v9471_v47 = vld [vmem:[%s11607_s18 + $0x648] ss:$16 sps:$4 sm:$0xff]  }
 0x373   : > { %v7000_v1 = vpop.f32.mrf.mxu1  ;;  %7293 = vmatprep.subr.bf16.mxu1 %v9431_v59  ;;  %v9479_v44 = vld [vmem:[%s11607_s18 + $0x62c] ss:$16 sps:$4 sm:$0xff]   ;;  %v9474_v58 = vld [vmem:[%s11607_s18 + $0x5a8] ss:$16 sps:$4 sm:$0xff]  }
 0x374   : > { %v9477_v48 = vld [vmem:[%s11607_s18 + $0x628] ss:$16 sps:$4 sm:$0xff]   ;;  %v9482_v59 = vld [vmem:[%s11607_s18 + $0x58c] ss:$16 sps:$4 sm:$0xff]  }
 0x375   : > { %7277 = vmatpush2.bf16.msra.mxu0 %v9426_v51  ;;  %v9485_v60 = vld [vmem:[%s11607_s18 + $0x60c] ss:$16 sps:$4 sm:$0xff]   ;;  %v9480_v51 = vld [vmem:[%s11607_s18 + $0x588] ss:$16 sps:$4 sm:$0xff]  }
 0x376   : > { %7294 = vmatpush1.bf16.msra.mxu1 %v9429_v63  ;;  %7278 = vmatprep.subr.bf16.mxu0 %v9434_v62  ;;  %v9483_v63 = vld [vmem:[%s11607_s18 + $0x608] ss:$16 sps:$4 sm:$0xff]   ;;  %v9488_v24 = vld [vmem:[%s11607_s18 + $0x56c] ss:$16 sps:$4 sm:$0xff]  }
 0x377   : > { %7295 = vmatprep.subr.bf16.mxu1 %v9437_v3  ;;  %v9491_v50 = vld [vmem:[%s11607_s18 + $0x7ec] ss:$16 sps:$4 sm:$0xff]   ;;  %v9486_v2 = vld [vmem:[%s11607_s18 + $0x568] ss:$16 sps:$4 sm:$0xff]  }
 0x378   : > { %v9489_v1 = vld [vmem:[%s11607_s18 + $0x7e8] ss:$16 sps:$4 sm:$0xff]   ;;  %v9494_v62 = vld [vmem:[%s11607_s18 + $0x54c] ss:$16 sps:$4 sm:$0xff]  }
 0x379   : > { %7279 = vmatpush2.bf16.msra.mxu0 %v9432_v54  ;;  %v9497_v3 = vld [vmem:[%s11607_s18 + $0x7cc] ss:$16 sps:$4 sm:$0xff]   ;;  %v9492_v54 = vld [vmem:[%s11607_s18 + $0x548] ss:$16 sps:$4 sm:$0xff]  }
 0x37a   : > { %7296 = vmatpush1.bf16.msra.mxu1 %v9435_v4  ;;  %7330 = vmatprep.subr.bf16.mxu0 %v9443_v7  ;;  %v9495_v4 = vld [vmem:[%s11607_s18 + $0x7c8] ss:$16 sps:$4 sm:$0xff]   ;;  %v9503_v7 = vld [vmem:[%s11607_s18 + $0x7ac] ss:$16 sps:$4 sm:$0xff]  }
 0x37b   : > { %7297 = vmatprep.subr.bf16.mxu1 %v9440_v6  ;;  %v9500_v6 = vld [vmem:[%s11607_s18 + $0x52c] ss:$16 sps:$4 sm:$0xff]  }
 0x37c   : > { %7281 = vmatmul.mubr.bf16.vlgmr.msra.gmra.mxu0 %v11690_v25  ;;  %v9453_v25 = vld [vmem:[%s11607_s18 + $0x6a8] ss:$16 sps:$4 sm:$0xff]  }
 0x37d   : > { %7331 = vmatpush1.bf16.msra.mxu0 %v9441_v10  ;;  %7362 = vmatprep.mubr.bf16.mxu0 %v11736_v55  ;;  %v9464_v55 = vld [vmem:[%s11607_s18 + $0x5ec] ss:$16 sps:$4 sm:$0xff]   ;;  %v9501_v10 = vld [vmem:[%s11607_s18 + $0x7a8] ss:$16 sps:$4 sm:$0xff]  }
 0x37e   : > { %7298 = vmatpush1.bf16.msra.mxu1 %v9438_v9  ;;  %7332 = vmatprep.subr.bf16.mxu0 %v9449_v12  ;;  %v9498_v9 = vld [vmem:[%s11607_s18 + $0x528] ss:$16 sps:$4 sm:$0xff]   ;;  %v9509_v12 = vld [vmem:[%s11607_s18 + $0x78c] ss:$16 sps:$4 sm:$0xff]  }
 0x37f   : > { %7299 = vmatprep.subr.bf16.mxu1 %v9446_v11  ;;  %v9506_v11 = vld [vmem:[%s11607_s18 + $0x50c] ss:$16 sps:$4 sm:$0xff]  }
 0x381   : > { %7333 = vmatpush1.bf16.msra.mxu0 %v9447_v17  ;;  %v9507_v17 = vld [vmem:[%s11607_s18 + $0x788] ss:$16 sps:$4 sm:$0xff]  }
 0x382   : > { %7300 = vmatpush1.bf16.msra.mxu1 %v9444_v16  ;;  %7334 = vmatprep.subr.bf16.mxu0 %v9455_v26  ;;  %v9504_v16 = vld [vmem:[%s11607_s18 + $0x508] ss:$16 sps:$4 sm:$0xff]   ;;  %v9515_v26 = vld [vmem:[%s11607_s18 + $0x8ec] ss:$16 sps:$4 sm:$0xff]  }
 0x383   : > { %7301 = vmatprep.subr.bf16.mxu1 %v9452_v57  ;;  %v9512_v57 = vld [vmem:[%s11607_s18 + $0x76c] ss:$16 sps:$4 sm:$0xff]  }
 0x385   : > { %7335 = vmatpush1.bf16.msra.mxu0 %v9453_v25  ;;  %v9513_v25 = vld [vmem:[%s11607_s18 + $0x8e8] ss:$16 sps:$4 sm:$0xff]  }
 0x386   : > { %7302 = vmatpush1.bf16.msra.mxu1 %v9450_v29  ;;  %7336 = vmatprep.subr.bf16.mxu0 %v9461_v33  ;;  %v9510_v29 = vld [vmem:[%s11607_s18 + $0x768] ss:$16 sps:$4 sm:$0xff]   ;;  %v9521_v33 = vld [vmem:[%s11607_s18 + $0x8cc] ss:$16 sps:$4 sm:$0xff]  }
 0x387   : > { %7303 = vmatprep.subr.bf16.mxu1 %v9458_v30  ;;  %v9518_v30 = vld [vmem:[%s11607_s18 + $0x74c] ss:$16 sps:$4 sm:$0xff]  }
 0x389   : > { %7337 = vmatpush1.bf16.msra.mxu0 %v9459_v37 }
 0x38a   : > { %7304 = vmatpush1.bf16.msra.mxu1 %v9456_v36  ;;  %7338 = vmatprep.subr.bf16.mxu0 %v9467_v38  ;;  %v9516_v38 = vld [vmem:[%s11607_s18 + $0x748] ss:$16 sps:$4 sm:$0xff]  }
 0x38b   : > { %7305 = vmatprep.subr.bf16.mxu1 %v9464_v55 }
 0x38d   : > { %7339 = vmatpush1.bf16.msra.mxu0 %v9465_v39 }
 0x38e   : > { %7306 = vmatpush2.bf16.msra.mxu1 %v9462_v5  ;;  %7340 = vmatprep.subr.bf16.mxu0 %v9473_v14  ;;  %v9519_v5 = vld [vmem:[%s11607_s18 + $0x8c8] ss:$16 sps:$4 sm:$0xff]   ;;  %v9524_v14 = vld [vmem:[%s11607_s18 + $0x72c] ss:$16 sps:$4 sm:$0xff]  }
 0x38f   : > { %7307 = vmatprep.subr.bf16.mxu1 %v9470_v46 }
 0x391   : > { %7341 = vmatpush1.bf16.msra.mxu0 %v9471_v47 }
 0x392   : > { %7308 = vmatpush2.bf16.msra.mxu1 %v9468_v15  ;;  %7342 = vmatprep.subr.bf16.mxu0 %v9479_v44  ;;  %v9527_v15 = vld [vmem:[%s11607_s18 + $0x8ac] ss:$16 sps:$4 sm:$0xff]  }
 0x393   : > { %7309 = vmatprep.subr.bf16.mxu1 %v9476_v49 }
 0x395   : > { %7343 = vmatpush1.bf16.msra.mxu0 %v9477_v48  ;;  %v9525_v48 = vld [vmem:[%s11607_s18 + $0x8a8] ss:$16 sps:$4 sm:$0xff]  }
 0x396   : > { %7310 = vmatpush2.bf16.msra.mxu1 %v9474_v58  ;;  %7344 = vmatprep.subr.bf16.mxu0 %v9485_v60  ;;  %v9522_v58 = vld [vmem:[%s11607_s18 + $0x728] ss:$16 sps:$4 sm:$0xff]  }
 0x397   : > { %7311 = vmatprep.subr.bf16.mxu1 %v9482_v59 }
 0x399   : > { %7345 = vmatpush1.bf16.msra.mxu0 %v9483_v63  ;;  %v9531_v63 = vld [vmem:[%s11607_s18 + $0x888] ss:$16 sps:$4 sm:$0xff]  }
 0x39a   : > { %7312 = vmatpush2.bf16.msra.mxu1 %v9480_v51  ;;  %7346 = vmatprep.subr.bf16.mxu0 %v9491_v50  ;;  %v9528_v51 = vld [vmem:[%s11607_s18 + $0x708] ss:$16 sps:$4 sm:$0xff]   ;;  %v9539_v50 = vld [vmem:[%s11607_s18 + $0xaec] ss:$16 sps:$4 sm:$0xff]  }
 0x39b   : > { %7313 = vmatprep.subr.bf16.mxu1 %v9488_v24  ;;  %v9536_v24 = vld [vmem:[%s11607_s18 + $0x86c] ss:$16 sps:$4 sm:$0xff]  }
 0x39d   : > { %7347 = vmatpush2.bf16.msra.mxu0 %v9489_v1  ;;  %v9537_v1 = vld [vmem:[%s11607_s18 + $0xae8] ss:$16 sps:$4 sm:$0xff]  }
 0x39e   : > { %7314 = vmatpush2.bf16.msra.mxu1 %v9486_v2  ;;  %7348 = vmatprep.subr.bf16.mxu0 %v9497_v3  ;;  %v9534_v2 = vld [vmem:[%s11607_s18 + $0x868] ss:$16 sps:$4 sm:$0xff]   ;;  %v9545_v3 = vld [vmem:[%s11607_s18 + $0xacc] ss:$16 sps:$4 sm:$0xff]  }
 0x39f   : > { %7315 = vmatprep.subr.bf16.mxu1 %v9494_v62  ;;  %v9542_v62 = vld [vmem:[%s11607_s18 + $0x84c] ss:$16 sps:$4 sm:$0xff]  }
 0x3a1   : > { %7349 = vmatpush2.bf16.msra.mxu0 %v9495_v4  ;;  %v9543_v4 = vld [vmem:[%s11607_s18 + $0xac8] ss:$16 sps:$4 sm:$0xff]  }
 0x3a2   : > { %7316 = vmatpush2.bf16.msra.mxu1 %v9492_v54  ;;  %7350 = vmatprep.subr.bf16.mxu0 %v9503_v7  ;;  %v9540_v54 = vld [vmem:[%s11607_s18 + $0x848] ss:$16 sps:$4 sm:$0xff]   ;;  %v9551_v7 = vld [vmem:[%s11607_s18 + $0xaac] ss:$16 sps:$4 sm:$0xff]  }
 0x3a3   : > { %7317 = vmatprep.subr.bf16.mxu1 %v9500_v6  ;;  %v9548_v6 = vld [vmem:[%s11607_s18 + $0x82c] ss:$16 sps:$4 sm:$0xff]  }
 0x3a5   : > { %7351 = vmatpush2.bf16.msra.mxu0 %v9501_v10  ;;  %v9554_v10 = vld [vmem:[%s11607_s18 + $0x80c] ss:$16 sps:$4 sm:$0xff]  }
 0x3a6   : > { %7318 = vmatpush2.bf16.msra.mxu1 %v9498_v9  ;;  %7352 = vmatprep.subr.bf16.mxu0 %v9509_v12  ;;  %v9546_v9 = vld [vmem:[%s11607_s18 + $0x828] ss:$16 sps:$4 sm:$0xff]  }
 0x3a7   : > { %7319 = vmatprep.subr.bf16.mxu1 %v9506_v11  ;;  %v9557_v11 = vld [vmem:[%s11607_s18 + $0xa8c] ss:$16 sps:$4 sm:$0xff]   ;;  %v9552_v12 = vld [vmem:[%s11607_s18 + $0x808] ss:$16 sps:$4 sm:$0xff]  }
 0x3a9   : > { %7353 = vmatpush2.bf16.msra.mxu0 %v9507_v17  ;;  %v9563_v17 = vld [vmem:[%s11607_s18 + $0xa6c] ss:$16 sps:$4 sm:$0xff]  }
 0x3aa   : > { %7320 = vmatpush2.bf16.msra.mxu1 %v9504_v16  ;;  %7354 = vmatprep.subr.bf16.mxu0 %v9512_v57  ;;  %v9555_v16 = vld [vmem:[%s11607_s18 + $0xa88] ss:$16 sps:$4 sm:$0xff]  }
 0x3ab   : > { %7371 = vmatprep.subr.bf16.mxu1 %v9515_v26  ;;  %v9558_v57 = vld [vmem:[%s11607_s18 + $0x9e8] ss:$16 sps:$4 sm:$0xff]  }
 0x3ac   : > { %v7036_v36 = vpop.f32.mrf.mxu0  ;;  %v9561_v26 = vld [vmem:[%s11607_s18 + $0xa68] ss:$16 sps:$4 sm:$0xff]  }
 0x3ad   : > { %v7077_v37 = vpop.f32.mrf.mxu1  ;;  %7322 = vmatmul.mubr.bf16.vlgmr.msra.gmra.mxu1 %v11780_v34  ;;  %v7037_v55 = vadd.f32 %v7036_v36, %v12270_v45  ;;  %7355 = vmatpush2.bf16.msra.mxu0 %v9510_v29  ;;  %v9566_v29 = vld [vmem:[%s11607_s18 + $0x9cc] ss:$16 sps:$4 sm:$0xff]  }
 0x3ae   : > { %7372 = vmatpush1.bf16.msra.mxu1 %v9513_v25  ;;  %v7038_v39 = vpop.f32.mrf.mxu0  ;;  %7356 = vmatprep.subr.bf16.mxu0 %v9518_v30  ;;  %v9569_v25 = vld [vmem:[%s11607_s18 + $0xa4c] ss:$16 sps:$4 sm:$0xff]   ;;  %v9564_v30 = vld [vmem:[%s11607_s18 + $0x9c8] ss:$16 sps:$4 sm:$0xff]  }
 0x3af   : > { %v7079_v46 = vpop.f32.mrf.mxu1  ;;  %7373 = vmatprep.subr.bf16.mxu1 %v9521_v33  ;;  %v12344_v47 = vadd.f32 %v7077_v37, %v7037_v55  ;;  %v7039_v34 = vadd.f32 %v7038_v39, %v12276_v0  ;;  %7403 = vmatprep.mubr.bf16.mxu1 %v11802_v42  ;;  %v9530_v0 = vld [vmem:[%s11607_s18 + $0x70c] ss:$16 sps:$4 sm:$0xff]   ;;  %v9567_v33 = vld [vmem:[%s11607_s18 + $0xa48] ss:$16 sps:$4 sm:$0xff]  }
 0x3b0   : > { %v7040_v45 = vpop.f32.mrf.mxu0  ;;  %v9533_v42 = vld [vmem:[%s11607_s18 + $0x88c] ss:$16 sps:$4 sm:$0xff]   ;;  %v9570_v55 = vld [vmem:[%s11607_s18 + $0x9a8] ss:$16 sps:$4 sm:$0xff]  }
 0x3b1   : > { %v7081_v49 = vpop.f32.mrf.mxu1  ;;  %v12348_v44 = vadd.f32 %v7079_v46, %v7039_v34  ;;  %7357 = vmatpush2.bf16.msra.mxu0 %v9516_v38  ;;  %v9572_v36 = vld [vmem:[%s11607_s18 + $0x9ac] ss:$16 sps:$4 sm:$0xff]   ;;  %v9573_v38 = vld [vmem:[%s11607_s18 + $0xa28] ss:$16 sps:$4 sm:$0xff]  }
 0x3b2   : > { %7374 = vmatpush1.bf16.msra.mxu1 %v9519_v5  ;;  %v7041_v59 = vpop.f32.mrf.mxu0  ;;  %7358 = vmatprep.subr.bf16.mxu0 %v9524_v14  ;;  %v9575_v37 = vld [vmem:[%s11607_s18 + $0xa2c] ss:$16 sps:$4 sm:$0xff]   ;;  %v9576_v46 = vld [vmem:[%s11607_s18 + $0x988] ss:$16 sps:$4 sm:$0xff]  }
 0x3b3   : > { %v7082_v60 = vpop.f32.mrf.mxu1  ;;  %7375 = vmatprep.subr.bf16.mxu1 %v9527_v15  ;;  %v9578_v5 = vld [vmem:[%s11607_s18 + $0x98c] ss:$16 sps:$4 sm:$0xff]   ;;  %v9579_v14 = vld [vmem:[%s11607_s18 + $0xa08] ss:$16 sps:$4 sm:$0xff]  }
 0x3b4   : > { %v9581_v39 = vld [vmem:[%s11607_s18 + $0xa0c] ss:$16 sps:$4 sm:$0xff]   ;;  %v9582_v45 = vld [vmem:[%s11607_s18 + $0x968] ss:$16 sps:$4 sm:$0xff]  }
 0x3b5   : > { %7359 = vmatpush2.bf16.msra.mxu0 %v9522_v58  ;;  %v9584_v15 = vld [vmem:[%s11607_s18 + $0x96c] ss:$16 sps:$4 sm:$0xff]   ;;  %v9585_v49 = vld [vmem:[%s11607_s18 + $0xbe8] ss:$16 sps:$4 sm:$0xff]  }
 0x3b6   : > { %7376 = vmatpush1.bf16.msra.mxu1 %v9525_v48  ;;  %7360 = vmatprep.subr.bf16.mxu0 %v9530_v0  ;;  %v9587_v34 = vld [vmem:[%s11607_s18 + $0xbec] ss:$16 sps:$4 sm:$0xff]   ;;  %v9588_v59 = vld [vmem:[%s11607_s18 + $0x948] ss:$16 sps:$4 sm:$0xff]  }
 0x3b7   : > { %7377 = vmatprep.subr.bf16.mxu1 %v9533_v42  ;;  %v9590_v58 = vld [vmem:[%s11607_s18 + $0x94c] ss:$16 sps:$4 sm:$0xff]   ;;  %v9591_v60 = vld [vmem:[%s11607_s18 + $0xbc8] ss:$16 sps:$4 sm:$0xff]  }
 0x3b8   : > { %v9593_v48 = vld [vmem:[%s11607_s18 + $0xbcc] ss:$16 sps:$4 sm:$0xff]  }
 0x3b9   : > { %7361 = vmatpush2.bf16.msra.mxu0 %v9528_v51  ;;  %v9596_v0 = vld [vmem:[%s11607_s18 + $0x92c] ss:$16 sps:$4 sm:$0xff]   ;;  %v9594_v51 = vld [vmem:[%s11607_s18 + $0x928] ss:$16 sps:$4 sm:$0xff]  }
 0x3ba   : > { %7378 = vmatpush1.bf16.msra.mxu1 %v9531_v63  ;;  %7412 = vmatprep.subr.bf16.mxu0 %v9539_v50  ;;  %v9599_v42 = vld [vmem:[%s11607_s18 + $0xbac] ss:$16 sps:$4 sm:$0xff]   ;;  %v9597_v63 = vld [vmem:[%s11607_s18 + $0xba8] ss:$16 sps:$4 sm:$0xff]  }
 0x3bb   : > { %7379 = vmatprep.subr.bf16.mxu1 %v9536_v24  ;;  %v9602_v24 = vld [vmem:[%s11607_s18 + $0x90c] ss:$16 sps:$4 sm:$0xff]  }
 0x3bc   : > { %7363 = vmatmul.mubr.bf16.vlgmr.msra.gmra.mxu0 %v11784_v35  ;;  %v9549_v35 = vld [vmem:[%s11607_s18 + $0xaa8] ss:$16 sps:$4 sm:$0xff]   ;;  %v9605_v50 = vld [vmem:[%s11607_s18 + $0xb8c] ss:$16 sps:$4 sm:$0xff]  }
 0x3bd   : > { %7413 = vmatpush1.bf16.msra.mxu0 %v9537_v1  ;;  %7444 = vmatprep.mubr.bf16.mxu0 %v11806_v43  ;;  %v9560_v43 = vld [vmem:[%s11607_s18 + $0x9ec] ss:$16 sps:$4 sm:$0xff]   ;;  %v9603_v1 = vld [vmem:[%s11607_s18 + $0xb88] ss:$16 sps:$4 sm:$0xff]  }
 0x3be   : > { %7380 = vmatpush1.bf16.msra.mxu1 %v9534_v2  ;;  %7414 = vmatprep.subr.bf16.mxu0 %v9545_v3  ;;  %v9600_v2 = vld [vmem:[%s11607_s18 + $0x908] ss:$16 sps:$4 sm:$0xff]   ;;  %v9611_v3 = vld [vmem:[%s11607_s18 + $0xcec] ss:$16 sps:$4 sm:$0xff]  }
 0x3bf   : > { %7381 = vmatprep.subr.bf16.mxu1 %v9542_v62  ;;  %v9608_v62 = vld [vmem:[%s11607_s18 + $0xb6c] ss:$16 sps:$4 sm:$0xff]  }
 0x3c1   : > { %7415 = vmatpush1.bf16.msra.mxu0 %v9543_v4  ;;  %v9609_v4 = vld [vmem:[%s11607_s18 + $0xce8] ss:$16 sps:$4 sm:$0xff]  }
 0x3c2   : > { %7382 = vmatpush1.bf16.msra.mxu1 %v9540_v54  ;;  %7416 = vmatprep.subr.bf16.mxu0 %v9551_v7  ;;  %v9606_v54 = vld [vmem:[%s11607_s18 + $0xb68] ss:$16 sps:$4 sm:$0xff]   ;;  %v9617_v7 = vld [vmem:[%s11607_s18 + $0xccc] ss:$16 sps:$4 sm:$0xff]  }
 0x3c3   : > { %7383 = vmatprep.subr.bf16.mxu1 %v9548_v6  ;;  %v9614_v6 = vld [vmem:[%s11607_s18 + $0xb4c] ss:$16 sps:$4 sm:$0xff]  }
 0x3c5   : > { %7417 = vmatpush1.bf16.msra.mxu0 %v9549_v35 }
 0x3c6   : > { %7384 = vmatpush1.bf16.msra.mxu1 %v9546_v9  ;;  %7418 = vmatprep.subr.bf16.mxu0 %v9557_v11  ;;  %v9612_v11 = vld [vmem:[%s11607_s18 + $0xb48] ss:$16 sps:$4 sm:$0xff]  }
 0x3c7   : > { %7385 = vmatprep.subr.bf16.mxu1 %v9554_v10 }
 0x3c9   : > { %7419 = vmatpush1.bf16.msra.mxu0 %v9555_v16 }
 0x3ca   : > { %7386 = vmatpush1.bf16.msra.mxu1 %v9552_v12  ;;  %7420 = vmatprep.subr.bf16.mxu0 %v9563_v17  ;;  %v9615_v12 = vld [vmem:[%s11607_s18 + $0xcc8] ss:$16 sps:$4 sm:$0xff]   ;;  %v9620_v17 = vld [vmem:[%s11607_s18 + $0xb2c] ss:$16 sps:$4 sm:$0xff]  }
 0x3cb   : > { %7387 = vmatprep.subr.bf16.mxu1 %v9560_v43 }
 0x3cd   : > { %7421 = vmatpush1.bf16.msra.mxu0 %v9561_v26 }
 0x3ce   : > { %7388 = vmatpush2.bf16.msra.mxu1 %v9558_v57  ;;  %7422 = vmatprep.subr.bf16.mxu0 %v9569_v25  ;;  %v9623_v57 = vld [vmem:[%s11607_s18 + $0xcac] ss:$16 sps:$4 sm:$0xff]  }
 0x3cf   : > { %7389 = vmatprep.subr.bf16.mxu1 %v9566_v29 }
 0x3d1   : > { %7423 = vmatpush1.bf16.msra.mxu0 %v9567_v33  ;;  %v9621_v33 = vld [vmem:[%s11607_s18 + $0xca8] ss:$16 sps:$4 sm:$0xff]  }
 0x3d2   : > { %7390 = vmatpush2.bf16.msra.mxu1 %v9564_v30  ;;  %7424 = vmatprep.subr.bf16.mxu0 %v9575_v37  ;;  %v9618_v30 = vld [vmem:[%s11607_s18 + $0xb28] ss:$16 sps:$4 sm:$0xff]  }
 0x3d3   : > { %7391 = vmatprep.subr.bf16.mxu1 %v9572_v36 }
 0x3d5   : > { %7425 = vmatpush1.bf16.msra.mxu0 %v9573_v38  ;;  %v9627_v38 = vld [vmem:[%s11607_s18 + $0xc88] ss:$16 sps:$4 sm:$0xff]  }
 0x3d6   : > { %7392 = vmatpush2.bf16.msra.mxu1 %v9570_v55  ;;  %7426 = vmatprep.subr.bf16.mxu0 %v9581_v39  ;;  %v9624_v55 = vld [vmem:[%s11607_s18 + $0xb08] ss:$16 sps:$4 sm:$0xff]   ;;  %v9635_v39 = vld [vmem:[%s11607_s18 + $0xeec] ss:$16 sps:$4 sm:$0xff]  }
 0x3d7   : > { %7393 = vmatprep.subr.bf16.mxu1 %v9578_v5  ;;  %v9632_v5 = vld [vmem:[%s11607_s18 + $0xc6c] ss:$16 sps:$4 sm:$0xff]  }
 0x3d9   : > { %7427 = vmatpush1.bf16.msra.mxu0 %v9579_v14  ;;  %v9633_v14 = vld [vmem:[%s11607_s18 + $0xee8] ss:$16 sps:$4 sm:$0xff]  }
 0x3da   : > { %7394 = vmatpush2.bf16.msra.mxu1 %v9576_v46  ;;  %7428 = vmatprep.subr.bf16.mxu0 %v9587_v34  ;;  %v9630_v46 = vld [vmem:[%s11607_s18 + $0xc68] ss:$16 sps:$4 sm:$0xff]   ;;  %v9641_v34 = vld [vmem:[%s11607_s18 + $0xecc] ss:$16 sps:$4 sm:$0xff]  }
 0x3db   : > { %7395 = vmatprep.subr.bf16.mxu1 %v9584_v15  ;;  %v9638_v15 = vld [vmem:[%s11607_s18 + $0xc4c] ss:$16 sps:$4 sm:$0xff]  }
 0x3dd   : > { %7429 = vmatpush2.bf16.msra.mxu0 %v9585_v49  ;;  %v12438_v49 = vld [vmem:[%s1835_s17] sm:$0xf] }
 0x3de   : > { %7396 = vmatpush2.bf16.msra.mxu1 %v9582_v45  ;;  %7430 = vmatprep.subr.bf16.mxu0 %v9593_v48  ;;  %v9636_v48 = vld [vmem:[%s11607_s18 + $0xc48] ss:$16 sps:$4 sm:$0xff]  }
 0x3df   : > { %7397 = vmatprep.subr.bf16.mxu1 %v9590_v58 }
 0x3e1   : > { %7431 = vmatpush2.bf16.msra.mxu0 %v9591_v60 }
 0x3e2   : > { %7398 = vmatpush2.bf16.msra.mxu1 %v9588_v59  ;;  %7432 = vmatprep.subr.bf16.mxu0 %v9599_v42  ;;  %v9639_v59 = vld [vmem:[%s11607_s18 + $0xec8] ss:$16 sps:$4 sm:$0xff]   ;;  %v9647_v42 = vld [vmem:[%s11607_s18 + $0xeac] ss:$16 sps:$4 sm:$0xff]  }
 0x3e3   : > { %7399 = vmatprep.subr.bf16.mxu1 %v9596_v0  ;;  %v9644_v0 = vld [vmem:[%s11607_s18 + $0xc2c] ss:$16 sps:$4 sm:$0xff]  }
 0x3e5   : > { %7433 = vmatpush2.bf16.msra.mxu0 %v9597_v63  ;;  %v7758_v63 = vrot.slane %v12438_v49, %v2645_v13  ;;  %v9650_v13 = vld [vmem:[%s11607_s18 + $0xc0c] ss:$16 sps:$4 sm:$0xff]  }
 0x3e6   : > { %7400 = vmatpush2.bf16.msra.mxu1 %v9594_v51  ;;  %7434 = vmatprep.subr.bf16.mxu0 %v9605_v50 }
 0x3e7   : > { %7401 = vmatprep.subr.bf16.mxu1 %v9602_v24  ;;  %v7762_v24 = vrot.slane %v12438_v49, %v2649_v18 }
 0x3e9   : > { %7435 = vmatpush2.bf16.msra.mxu0 %v9603_v1 }
 0x3ea   : > { %7402 = vmatpush2.bf16.msra.mxu1 %v9600_v2  ;;  %7436 = vmatprep.subr.bf16.mxu0 %v9608_v62  ;;  %v9642_v2 = vld [vmem:[%s11607_s18 + $0xc28] ss:$16 sps:$4 sm:$0xff]  }
 0x3eb   : > { %7453 = vmatprep.subr.bf16.mxu1 %v9611_v3  ;;  %v9645_v3 = vld [vmem:[%s11607_s18 + $0xea8] ss:$16 sps:$4 sm:$0xff]  }
 0x3ec   : > { %v7118_v9 = vpop.f32.mrf.mxu0 }
 0x3ed   : > { %v7159_v35 = vpop.f32.mrf.mxu1  ;;  %7404 = vmatmul.mubr.bf16.vlgmr.msra.gmra.mxu1 %v11879_v53  ;;  %v7119_v10 = vadd.f32 %v7118_v9, %v12344_v47  ;;  %7437 = vmatpush2.bf16.msra.mxu0 %v9606_v54  ;;  %v9653_v54 = vld [vmem:[%s11607_s18 + $0xe8c] ss:$16 sps:$4 sm:$0xff]   ;;  %v9651_v9 = vld [vmem:[%s11607_s18 + $0xe88] ss:$16 sps:$4 sm:$0xff]  }
 0x3ee   : > { %7454 = vmatpush1.bf16.msra.mxu1 %v9609_v4  ;;  %v7120_v16 = vpop.f32.mrf.mxu0  ;;  %7438 = vmatprep.subr.bf16.mxu0 %v9614_v6 }
 0x3ef   : > { %v7161_v43 = vpop.f32.mrf.mxu1  ;;  %7455 = vmatprep.subr.bf16.mxu1 %v9617_v7  ;;  %v7160_v26 = vadd.f32 %v7159_v35, %v7119_v10  ;;  %v7121_v29 = vadd.f32 %v7120_v16, %v12348_v44  ;;  %7485 = vmatprep.mubr.bf16.mxu1 %v11896_v41  ;;  %v9626_v44 = vld [vmem:[%s11607_s18 + $0xb0c] ss:$16 sps:$4 sm:$0xff]   ;;  %v9648_v7 = vld [vmem:[%s11607_s18 + $0xc08] ss:$16 sps:$4 sm:$0xff]  }
 0x3f0   : > { %v7122_v53 = vpop.f32.mrf.mxu0  ;;  %v9629_v41 = vld [vmem:[%s11607_s18 + $0xc8c] ss:$16 sps:$4 sm:$0xff]   ;;  %v9657_v16 = vld [vmem:[%s11607_s18 + $0xe68] ss:$16 sps:$4 sm:$0xff]  }
 0x3f1   : > { %v7163_v47 = vpop.f32.mrf.mxu1  ;;  %v7162_v25 = vadd.f32 %v7161_v43, %v7121_v29  ;;  %7439 = vmatpush2.bf16.msra.mxu0 %v9612_v11  ;;  %v9656_v35 = vld [vmem:[%s11607_s18 + $0xdec] ss:$16 sps:$4 sm:$0xff]  }
 0x3f2   : > { %7456 = vmatpush1.bf16.msra.mxu1 %v9615_v12  ;;  %v7123_v36 = vpop.f32.mrf.mxu0  ;;  %7440 = vmatprep.subr.bf16.mxu0 %v9620_v17  ;;  %v9659_v10 = vld [vmem:[%s11607_s18 + $0xe6c] ss:$16 sps:$4 sm:$0xff]   ;;  %v9654_v12 = vld [vmem:[%s11607_s18 + $0xde8] ss:$16 sps:$4 sm:$0xff]  }
 0x3f3   : > { %v7164_v37 = vpop.f32.mrf.mxu1  ;;  %7457 = vmatprep.subr.bf16.mxu1 %v9623_v57  ;;  %v9662_v43 = vld [vmem:[%s11607_s18 + $0xdcc] ss:$16 sps:$4 sm:$0xff]   ;;  %v9660_v57 = vld [vmem:[%s11607_s18 + $0xdc8] ss:$16 sps:$4 sm:$0xff]  }
 0x3f4   : > { %v9665_v17 = vld [vmem:[%s11607_s18 + $0xe4c] ss:$16 sps:$4 sm:$0xff]   ;;  %v9666_v47 = vld [vmem:[%s11607_s18 + $0xda8] ss:$16 sps:$4 sm:$0xff]  }
 0x3f5   : > { %7441 = vmatpush2.bf16.msra.mxu0 %v9618_v30  ;;  %v9668_v29 = vld [vmem:[%s11607_s18 + $0xdac] ss:$16 sps:$4 sm:$0xff]   ;;  %v9672_v36 = vld [vmem:[%s11607_s18 + $0xd88] ss:$16 sps:$4 sm:$0xff]  }
 0x3f6   : > { %7458 = vmatpush1.bf16.msra.mxu1 %v9621_v33  ;;  %7442 = vmatprep.subr.bf16.mxu0 %v9626_v44  ;;  %v9671_v53 = vld [vmem:[%s11607_s18 + $0xe2c] ss:$16 sps:$4 sm:$0xff]   ;;  %v9675_v37 = vld [vmem:[%s11607_s18 + $0xe08] ss:$16 sps:$4 sm:$0xff]  }
 0x3f7   : > { %7459 = vmatprep.subr.bf16.mxu1 %v9629_v41  ;;  %v9674_v30 = vld [vmem:[%s11607_s18 + $0xd8c] ss:$16 sps:$4 sm:$0xff]  }
 0x3f8   : > { %v9677_v33 = vld [vmem:[%s11607_s18 + $0xe0c] ss:$16 sps:$4 sm:$0xff]  }
 0x3f9   : > { %7443 = vmatpush2.bf16.msra.mxu0 %v9624_v55  ;;  %v9680_v44 = vld [vmem:[%s11607_s18 + $0xd6c] ss:$16 sps:$4 sm:$0xff]   ;;  %v9678_v55 = vld [vmem:[%s11607_s18 + $0xd68] ss:$16 sps:$4 sm:$0xff]  }
 0x3fa   : > { %7460 = vmatpush1.bf16.msra.mxu1 %v9627_v38  ;;  %7494 = vmatprep.subr.bf16.mxu0 %v9635_v39  ;;  %v9683_v41 = vld [vmem:[%s11607_s18 + $0xfec] ss:$16 sps:$4 sm:$0xff]   ;;  %v9681_v38 = vld [vmem:[%s11607_s18 + $0xfe8] ss:$16 sps:$4 sm:$0xff]  }
 0x3fb   : > { %7461 = vmatprep.subr.bf16.mxu1 %v9632_v5  ;;  %v9686_v5 = vld [vmem:[%s11607_s18 + $0xd4c] ss:$16 sps:$4 sm:$0xff]  }
 0x3fc   : > { %v7200_v45 = vpop.f32.mrf.mxu0  ;;  %7445 = vmatmul.mubr.bf16.vlgmr.msra.gmra.mxu0 %v11883_v56  ;;  %v9689_v39 = vld [vmem:[%s11607_s18 + $0xfcc] ss:$16 sps:$4 sm:$0xff]  }
 0x3fd   : > { %v7201_v58 = vadd.f32 %v7200_v45, %v7160_v26  ;;  %7495 = vmatpush1.bf16.msra.mxu0 %v9633_v14  ;;  %7526 = vmatprep.mubr.bf16.mxu0 %v11900_v61  ;;  %v9663_v26 = vld [vmem:[%s11607_s18 + $0xe48] ss:$16 sps:$4 sm:$0xff]  }
 0x3fe   : > { %7462 = vmatpush1.bf16.msra.mxu1 %v9630_v46  ;;  %v7202_v60 = vpop.f32.mrf.mxu0  ;;  %7496 = vmatprep.subr.bf16.mxu0 %v9641_v34  ;;  %v9684_v46 = vld [vmem:[%s11607_s18 + $0xd48] ss:$16 sps:$4 sm:$0xff]   ;;  %v9695_v34 = vld [vmem:[%s11607_s18 + $0xfac] ss:$16 sps:$4 sm:$0xff]  }
 0x3ff   : > { %7463 = vmatprep.subr.bf16.mxu1 %v9638_v15  ;;  %vm7740_vm2 = vcmp.ge.f32.partialorder %v7201_v58, 0.0  ;;  %v7744_v56 = vmul.f32 0.2, %v7201_v58  ;;  %v7203_v51 = vadd.f32 %v7202_v60, %v7162_v25  ;;  %v9669_v25 = vld [vmem:[%s11607_s18 + $0xe28] ss:$16 sps:$4 sm:$0xff]  }
 0x400   : > { %v7204_v50 = vpop.f32.mrf.mxu0  ;;  %v9687_v14 = vld [vmem:[%s11607_s18 + $0xfc8] ss:$16 sps:$4 sm:$0xff]   ;;  %v9692_v15 = vld [vmem:[%s11607_s18 + $0xd2c] ss:$16 sps:$4 sm:$0xff]  }
 0x401   : > { %v7748_v1 = vsel %vm7740_vm2, %v7201_v58, %v7744_v56  ;;  %vm7741_vm3 = vcmp.ge.f32.partialorder %v7203_v51, 0.0  ;;  %v7745_v62 = vmul.f32 0.2, %v7203_v51  ;;  %7497 = vmatpush1.bf16.msra.mxu0 %v9639_v59  ;;  %v9690_v45 = vld [vmem:[%s11607_s18 + $0xd28] ss:$16 sps:$4 sm:$0xff]  }
 0x402   : > { %7464 = vmatpush1.bf16.msra.mxu1 %v9636_v48  ;;  %v7205_v61 = vpop.f32.mrf.mxu0  ;;  %7498 = vmatprep.subr.bf16.mxu0 %v9647_v42  ;;  %v7775_v4 = vmul.f32 %v7758_v63, %v7748_v1  ;;  %v9693_v58 = vld [vmem:[%s11607_s18 + $0xfa8] ss:$16 sps:$4 sm:$0xff]   ;;  %v9698_v48 = vld [vmem:[%s11607_s18 + $0xd0c] ss:$16 sps:$4 sm:$0xff]  }
 0x403   : > { %7465 = vmatprep.subr.bf16.mxu1 %v9644_v0  ;;  %v7749_v18 = vsel %vm7741_vm3, %v7203_v51, %v7745_v62  ;;  %v9701_v59 = vld [vmem:[%s11607_s18 + $0xf8c] ss:$16 sps:$4 sm:$0xff]   ;;  %v9696_v60 = vld [vmem:[%s11607_s18 + $0xd08] ss:$16 sps:$4 sm:$0xff]  }
 0x404   : > { %v7776_v6 = vmul.f32 %v7762_v24, %v7749_v18  ;;  %v9699_v0 = vld [vmem:[%s11607_s18 + $0xf88] ss:$16 sps:$4 sm:$0xff]   ;;  %v9704_v42 = vld [vmem:[%s11607_s18 + $0xf6c] ss:$16 sps:$4 sm:$0xff]  }
 0x405   : > { %7499 = vmatpush1.bf16.msra.mxu0 %v9645_v3  ;;  %v9707_v56 = vld [vmem:[%s11607_s18 + $0x10ec] ss:$16 sps:$4 sm:$0xff]   ;;  %v9702_v51 = vld [vmem:[%s11607_s18 + $0xf68] ss:$16 sps:$4 sm:$0xff]  }
 0x406   : > { %7466 = vmatpush1.bf16.msra.mxu1 %v9642_v2  ;;  %7500 = vmatprep.subr.bf16.mxu0 %v9653_v54  ;;  %v12459_v11 = vadd.f32 %v7776_v6, %v7775_v4  ;;  %v9705_v63 = vld [vmem:[%s11607_s18 + $0x10e8] ss:$16 sps:$4 sm:$0xff]   ;;  %v9710_v24 = vld [vmem:[%s11607_s18 + $0xf4c] ss:$16 sps:$4 sm:$0xff]  }
 0x407   : > { %7467 = vmatprep.subr.bf16.mxu1 %v9650_v13  ;;  %v9713_v50 = vld [vmem:[%s11607_s18 + $0x10cc] ss:$16 sps:$4 sm:$0xff]   ;;  %v9708_v1 = vld [vmem:[%s11607_s18 + $0xf48] ss:$16 sps:$4 sm:$0xff]  }
 0x408   : > { %v9711_v62 = vld [vmem:[%s11607_s18 + $0x10c8] ss:$16 sps:$4 sm:$0xff]   ;;  %v9716_v61 = vld [vmem:[%s11607_s18 + $0xf2c] ss:$16 sps:$4 sm:$0xff]  }
 0x409   : > { %7501 = vmatpush1.bf16.msra.mxu0 %v9651_v9  ;;  %v9719_v13 = vld [vmem:[%s11607_s18 + $0x10ac] ss:$16 sps:$4 sm:$0xff]   ;;  %v9717_v18 = vld [vmem:[%s11607_s18 + $0x10a8] ss:$16 sps:$4 sm:$0xff]   ;;  %v2653_v9 = vsub.s32 2, %v11961_v8 }
 0x40a   : > { %7468 = vmatpush1.bf16.msra.mxu1 %v9648_v7  ;;  %7502 = vmatprep.subr.bf16.mxu0 %v9659_v10  ;;  %v9722_v6 = vld [vmem:[%s11607_s18 + $0xf0c] ss:$16 sps:$4 sm:$0xff]   ;;  %v9723_v10 = vld [vmem:[%s11607_s18 + $0x1088] ss:$16 sps:$4 sm:$0xff]  }
 0x40b   : > { %7469 = vmatprep.subr.bf16.mxu1 %v9656_v35  ;;  %v9725_v7 = vld [vmem:[%s11607_s18 + $0x108c] ss:$16 sps:$4 sm:$0xff]   ;;  %v9720_v35 = vld [vmem:[%s11607_s18 + $0xf08] ss:$16 sps:$4 sm:$0xff]  }
 0x40d   : > { %7503 = vmatpush1.bf16.msra.mxu0 %v9657_v16  ;;  %v9731_v16 = vld [vmem:[%s11607_s18 + $0x12ec] ss:$16 sps:$4 sm:$0xff]  }
 0x40e   : > { %7470 = vmatpush2.bf16.msra.mxu1 %v9654_v12  ;;  %7504 = vmatprep.subr.bf16.mxu0 %v9665_v17  ;;  %v9728_v12 = vld [vmem:[%s11607_s18 + $0x106c] ss:$16 sps:$4 sm:$0xff]  }
 0x40f   : > { %7471 = vmatprep.subr.bf16.mxu1 %v9662_v43  ;;  %v9918_v43 = vld [vmem:[%s11601_s14] sm:$0xf] }
 0x410   : > { %v2654_v17 = vrot.slane %v9918_v43, %v2653_v9 }
 0x411   : > { %7505 = vmatpush1.bf16.msra.mxu0 %v9663_v26  ;;  %v9726_v26 = vld [vmem:[%s11607_s18 + $0x1068] ss:$16 sps:$4 sm:$0xff]  }
 0x412   : > { %7472 = vmatpush2.bf16.msra.mxu1 %v9660_v57  ;;  %7506 = vmatprep.subr.bf16.mxu0 %v9671_v53  ;;  %v9734_v53 = vld [vmem:[%s11607_s18 + $0x104c] ss:$16 sps:$4 sm:$0xff]  }
 0x413   : > { %7473 = vmatprep.subr.bf16.mxu1 %v9668_v29  ;;  %v9729_v29 = vld [vmem:[%s11607_s18 + $0x12e8] ss:$16 sps:$4 sm:$0xff]  }
 0x415   : > { %7507 = vmatpush1.bf16.msra.mxu0 %v9669_v25 }
 0x416   : > { %7474 = vmatpush2.bf16.msra.mxu1 %v9666_v47  ;;  %7508 = vmatprep.subr.bf16.mxu0 %v9677_v33  ;;  %v9737_v47 = vld [vmem:[%s11607_s18 + $0x12cc] ss:$16 sps:$4 sm:$0xff]  }
 0x417   : > { %7475 = vmatprep.subr.bf16.mxu1 %v9674_v30 }
 0x419   : > { %7509 = vmatpush1.bf16.msra.mxu0 %v9675_v37  ;;  %v9732_v37 = vld [vmem:[%s11607_s18 + $0x1048] ss:$16 sps:$4 sm:$0xff]  }
 0x41a   : > { %7476 = vmatpush2.bf16.msra.mxu1 %v9672_v36  ;;  %7510 = vmatprep.subr.bf16.mxu0 %v9683_v41 }
 0x41b   : > { %7477 = vmatprep.subr.bf16.mxu1 %v9680_v44  ;;  %v9735_v44 = vld [vmem:[%s11607_s18 + $0x12c8] ss:$16 sps:$4 sm:$0xff]  }
 0x41d   : > { %7511 = vmatpush2.bf16.msra.mxu0 %v9681_v38  ;;  %v9743_v38 = vld [vmem:[%s11607_s18 + $0x12ac] ss:$16 sps:$4 sm:$0xff]  }
 0x41e   : > { %7478 = vmatpush2.bf16.msra.mxu1 %v9678_v55  ;;  %7512 = vmatprep.subr.bf16.mxu0 %v9689_v39  ;;  %v9740_v55 = vld [vmem:[%s11607_s18 + $0x102c] ss:$16 sps:$4 sm:$0xff]   ;;  %v9738_v39 = vld [vmem:[%s11607_s18 + $0x1028] ss:$16 sps:$4 sm:$0xff]  }
 0x41f   : > { %7479 = vmatprep.subr.bf16.mxu1 %v9686_v5 }
 0x421   : > { %7513 = vmatpush2.bf16.msra.mxu0 %v9687_v14 }
 0x422   : > { %7480 = vmatpush2.bf16.msra.mxu1 %v9684_v46  ;;  %7514 = vmatprep.subr.bf16.mxu0 %v9695_v34  ;;  %v9741_v46 = vld [vmem:[%s11607_s18 + $0x12a8] ss:$16 sps:$4 sm:$0xff]   ;;  %v9749_v34 = vld [vmem:[%s11607_s18 + $0x128c] ss:$16 sps:$4 sm:$0xff]  }
 0x423   : > { %7481 = vmatprep.subr.bf16.mxu1 %v9692_v15  ;;  %v9746_v15 = vld [vmem:[%s11607_s18 + $0x100c] ss:$16 sps:$4 sm:$0xff]  }
 0x425   : > { %7515 = vmatpush2.bf16.msra.mxu0 %v9693_v58  ;;  %v9752_v58 = vld [vmem:[%s11607_s18 + $0x11ec] ss:$16 sps:$4 sm:$0xff]  }
 0x426   : > { %7482 = vmatpush2.bf16.msra.mxu1 %v9690_v45  ;;  %7516 = vmatprep.subr.bf16.mxu0 %v9701_v59  ;;  %v9744_v45 = vld [vmem:[%s11607_s18 + $0x1008] ss:$16 sps:$4 sm:$0xff]  }
 0x427   : > { %7483 = vmatprep.subr.bf16.mxu1 %v9698_v48  ;;  %v9755_v48 = vld [vmem:[%s11607_s18 + $0x126c] ss:$16 sps:$4 sm:$0xff]   ;;  %v9750_v59 = vld [vmem:[%s11607_s18 + $0x11e8] ss:$16 sps:$4 sm:$0xff]  }
 0x429   : > { %7517 = vmatpush2.bf16.msra.mxu0 %v9699_v0  ;;  %v9758_v0 = vld [vmem:[%s11607_s18 + $0x11cc] ss:$16 sps:$4 sm:$0xff]  }
 0x42a   : > { %7484 = vmatpush2.bf16.msra.mxu1 %v9696_v60  ;;  %7518 = vmatprep.subr.bf16.mxu0 %v9704_v42  ;;  %v9753_v60 = vld [vmem:[%s11607_s18 + $0x1268] ss:$16 sps:$4 sm:$0xff]   ;;  %v9761_v42 = vld [vmem:[%s11607_s18 + $0x124c] ss:$16 sps:$4 sm:$0xff]  }
 0x42b   : > { %7535 = vmatprep.subr.bf16.mxu1 %v9707_v56  ;;  %v9756_v56 = vld [vmem:[%s11607_s18 + $0x11c8] ss:$16 sps:$4 sm:$0xff]  }
 0x42d   : > { %v7241_v2 = vpop.f32.mrf.mxu1  ;;  %7486 = vmatmul.mubr.bf16.vlgmr.msra.gmra.mxu1 %v11975_v19  ;;  %7519 = vmatpush2.bf16.msra.mxu0 %v9702_v51  ;;  %v9714_v19 = vld [vmem:[%s11607_s18 + $0xf28] ss:$16 sps:$4 sm:$0xff]  }
 0x42e   : > { %7536 = vmatpush1.bf16.msra.mxu1 %v9705_v63  ;;  %7520 = vmatprep.subr.bf16.mxu0 %v9710_v24  ;;  %v7242_v25 = vadd.f32 %v7241_v2, %v2654_v17  ;;  %v9759_v51 = vld [vmem:[%s11607_s18 + $0x1248] ss:$16 sps:$4 sm:$0xff]   ;;  %v9764_v63 = vld [vmem:[%s11607_s18 + $0x11ac] ss:$16 sps:$4 sm:$0xff]  }
 0x42f   : > { %v7243_v3 = vpop.f32.mrf.mxu1  ;;  %7537 = vmatprep.subr.bf16.mxu1 %v9713_v50  ;;  %7567 = vmatprep.mubr.bf16.mxu1 %v11999_v27  ;;  %v2657_v27 = vsub.s32 3, %v11961_v8  ;;  %v9767_v24 = vld [vmem:[%s11607_s18 + $0x122c] ss:$16 sps:$4 sm:$0xff]   ;;  %v9762_v50 = vld [vmem:[%s11607_s18 + $0x11a8] ss:$16 sps:$4 sm:$0xff]  }
 0x430   : > { %v9765_v2 = vld [vmem:[%s11607_s18 + $0x1228] ss:$16 sps:$4 sm:$0xff]   ;;  %v9794_v17 = vld [vmem:[%s11607_s18 + $0x110c] ss:$16 sps:$4 sm:$0xff]  }
 0x431   : > { %v7245_v54 = vpop.f32.mrf.mxu1  ;;  %7521 = vmatpush2.bf16.msra.mxu0 %v9708_v1  ;;  %v2658_v57 = vrot.slane %v9918_v43, %v2657_v27  ;;  %v9770_v1 = vld [vmem:[%s11607_s18 + $0x118c] ss:$16 sps:$4 sm:$0xff]   ;;  %v9789_v43 = vld [vmem:[%s11607_s18 + $0x13a8] ss:$16 sps:$4 sm:$0xff]  }
 0x432   : > { %7538 = vmatpush1.bf16.msra.mxu1 %v9711_v62  ;;  %7522 = vmatprep.subr.bf16.mxu0 %v9716_v61  ;;  %v9773_v62 = vld [vmem:[%s11607_s18 + $0x120c] ss:$16 sps:$4 sm:$0xff]   ;;  %v9771_v61 = vld [vmem:[%s11607_s18 + $0x1208] ss:$16 sps:$4 sm:$0xff]  }
 0x433   : > { %v7246_v4 = vpop.f32.mrf.mxu1  ;;  %7539 = vmatprep.subr.bf16.mxu1 %v9719_v13  ;;  %v7244_v33 = vadd.f32 %v7243_v3, %v2658_v57  ;;  %v9768_v3 = vld [vmem:[%s11607_s18 + $0x1188] ss:$16 sps:$4 sm:$0xff]   ;;  %v9776_v13 = vld [vmem:[%s11607_s18 + $0x116c] ss:$16 sps:$4 sm:$0xff]  }
 0x434   : > { %v9779_v54 = vld [vmem:[%s11607_s18 + $0x13ec] ss:$16 sps:$4 sm:$0xff]  }
 0x435   : > { %7523 = vmatpush2.bf16.msra.mxu0 %v9714_v19  ;;  %v9774_v19 = vld [vmem:[%s11607_s18 + $0x1168] ss:$16 sps:$4 sm:$0xff]   ;;  %v9782_v4 = vld [vmem:[%s11607_s18 + $0x114c] ss:$16 sps:$4 sm:$0xff]  }
 0x436   : > { %7540 = vmatpush1.bf16.msra.mxu1 %v9717_v18  ;;  %7524 = vmatprep.subr.bf16.mxu0 %v9722_v6  ;;  %v9777_v18 = vld [vmem:[%s11607_s18 + $0x13e8] ss:$16 sps:$4 sm:$0xff]   ;;  %v9785_v6 = vld [vmem:[%s11607_s18 + $0x13cc] ss:$16 sps:$4 sm:$0xff]  }
 0x437   : > { %7541 = vmatprep.subr.bf16.mxu1 %v9725_v7  ;;  %v9780_v7 = vld [vmem:[%s11607_s18 + $0x1148] ss:$16 sps:$4 sm:$0xff]   ;;  %v9797_v57 = vld [vmem:[%s11607_s18 + $0x138c] ss:$16 sps:$4 sm:$0xff]  }
 0x439   : > { %7525 = vmatpush2.bf16.msra.mxu0 %v9720_v35  ;;  %v9783_v35 = vld [vmem:[%s11607_s18 + $0x13c8] ss:$16 sps:$4 sm:$0xff]  }
 0x43a   : > { %7542 = vmatpush1.bf16.msra.mxu1 %v9723_v10  ;;  %7576 = vmatprep.subr.bf16.mxu0 %v9731_v16  ;;  %v9788_v10 = vld [vmem:[%s11607_s18 + $0x112c] ss:$16 sps:$4 sm:$0xff]   ;;  %v9786_v16 = vld [vmem:[%s11607_s18 + $0x1128] ss:$16 sps:$4 sm:$0xff]  }
 0x43b   : > { %7543 = vmatprep.subr.bf16.mxu1 %v9728_v12  ;;  %v9791_v12 = vld [vmem:[%s11607_s18 + $0x13ac] ss:$16 sps:$4 sm:$0xff]  }
 0x43c   : > { %v7282_v30 = vpop.f32.mrf.mxu0  ;;  %7527 = vmatmul.mubr.bf16.vlgmr.msra.gmra.mxu0 %v11979_v20 }
 0x43d   : > { %v12523_v36 = vadd.f32 %v7282_v30, %v7242_v25  ;;  %7577 = vmatpush1.bf16.msra.mxu0 %v9729_v29  ;;  %7608 = vmatprep.mubr.bf16.mxu0 %v12003_v28  ;;  %v9747_v28 = vld [vmem:[%s11607_s18 + $0x1288] ss:$16 sps:$4 sm:$0xff]  }
 0x43e   : > { %7544 = vmatpush1.bf16.msra.mxu1 %v9726_v26  ;;  %v7284_v41 = vpop.f32.mrf.mxu0  ;;  %7578 = vmatprep.subr.bf16.mxu0 %v9737_v47  ;;  %v9792_v26 = vld [vmem:[%s11607_s18 + $0x1108] ss:$16 sps:$4 sm:$0xff]   ;;  %v9803_v47 = vld [vmem:[%s11607_s18 + $0x14ec] ss:$16 sps:$4 sm:$0xff]  }
 0x43f   : > { %7545 = vmatprep.subr.bf16.mxu1 %v9734_v53  ;;  %v12529_v5 = vadd.f32 %v7284_v41, %v7244_v33  ;;  %v9795_v29 = vld [vmem:[%s11607_s18 + $0x1388] ss:$16 sps:$4 sm:$0xff]   ;;  %v9800_v53 = vld [vmem:[%s11607_s18 + $0x136c] ss:$16 sps:$4 sm:$0xff]  }
 0x440   : > { %v7286_v20 = vpop.f32.mrf.mxu0  ;;  %v9798_v25 = vld [vmem:[%s11607_s18 + $0x1368] ss:$16 sps:$4 sm:$0xff]   ;;  %v9806_v33 = vld [vmem:[%s11607_s18 + $0x134c] ss:$16 sps:$4 sm:$0xff]  }
 0x441   : > { %7579 = vmatpush1.bf16.msra.mxu0 %v9735_v44  ;;  %v9801_v30 = vld [vmem:[%s11607_s18 + $0x14e8] ss:$16 sps:$4 sm:$0xff]  }
 0x442   : > { %7546 = vmatpush1.bf16.msra.mxu1 %v9732_v37  ;;  %v7287_v14 = vpop.f32.mrf.mxu0  ;;  %7580 = vmatprep.subr.bf16.mxu0 %v9743_v38  ;;  %v9809_v37 = vld [vmem:[%s11607_s18 + $0x14cc] ss:$16 sps:$4 sm:$0xff]   ;;  %v9807_v38 = vld [vmem:[%s11607_s18 + $0x14c8] ss:$16 sps:$4 sm:$0xff]  }
 0x443   : > { %7547 = vmatprep.subr.bf16.mxu1 %v9740_v55  ;;  %v9804_v55 = vld [vmem:[%s11607_s18 + $0x1348] ss:$16 sps:$4 sm:$0xff]  }
 0x445   : > { %7581 = vmatpush1.bf16.msra.mxu0 %v9741_v46  ;;  %v9815_v46 = vld [vmem:[%s11607_s18 + $0x14ac] ss:$16 sps:$4 sm:$0xff]  }
 0x446   : > { %7548 = vmatpush1.bf16.msra.mxu1 %v9738_v39  ;;  %7582 = vmatprep.subr.bf16.mxu0 %v9749_v34  ;;  %v9812_v39 = vld [vmem:[%s11607_s18 + $0x132c] ss:$16 sps:$4 sm:$0xff]  }
 0x447   : > { %7549 = vmatprep.subr.bf16.mxu1 %v9746_v15  ;;  %v9813_v15 = vld [vmem:[%s11607_s18 + $0x14a8] ss:$16 sps:$4 sm:$0xff]  }
 0x449   : > { %7583 = vmatpush1.bf16.msra.mxu0 %v9747_v28  ;;  %v9821_v28 = vld [vmem:[%s11607_s18 + $0x148c] ss:$16 sps:$4 sm:$0xff]  }
 0x44a   : > { %7550 = vmatpush1.bf16.msra.mxu1 %v9744_v45  ;;  %7584 = vmatprep.subr.bf16.mxu0 %v9755_v48  ;;  %v9818_v45 = vld [vmem:[%s11607_s18 + $0x130c] ss:$16 sps:$4 sm:$0xff]  }
 0x44b   : > { %7551 = vmatprep.subr.bf16.mxu1 %v9752_v58  ;;  %v9824_v58 = vld [vmem:[%s11607_s18 + $0x146c] ss:$16 sps:$4 sm:$0xff]  }
 0x44c   : > { %v9827_v48 = vld [vmem:[%s11607_s18 + $0x16ec] ss:$16 sps:$4 sm:$0xff]  }
 0x44d   : > { %7585 = vmatpush1.bf16.msra.mxu0 %v9753_v60  ;;  %v9825_v60 = vld [vmem:[%s11607_s18 + $0x16e8] ss:$16 sps:$4 sm:$0xff]  }
 0x44e   : > { %7552 = vmatpush2.bf16.msra.mxu1 %v9750_v59  ;;  %7586 = vmatprep.subr.bf16.mxu0 %v9761_v42  ;;  %v9822_v59 = vld [vmem:[%s11607_s18 + $0x1468] ss:$16 sps:$4 sm:$0xff]   ;;  %v9833_v42 = vld [vmem:[%s11607_s18 + $0x16cc] ss:$16 sps:$4 sm:$0xff]  }
 0x44f   : > { %7553 = vmatprep.subr.bf16.mxu1 %v9758_v0  ;;  %v9830_v0 = vld [vmem:[%s11607_s18 + $0x144c] ss:$16 sps:$4 sm:$0xff]  }
 0x451   : > { %7587 = vmatpush1.bf16.msra.mxu0 %v9759_v51 }
 0x452   : > { %7554 = vmatpush2.bf16.msra.mxu1 %v9756_v56  ;;  %7588 = vmatprep.subr.bf16.mxu0 %v9767_v24  ;;  %v9831_v24 = vld [vmem:[%s11607_s18 + $0x16c8] ss:$16 sps:$4 sm:$0xff]  }
 0x453   : > { %7555 = vmatprep.subr.bf16.mxu1 %v9764_v63  ;;  %v9828_v63 = vld [vmem:[%s11607_s18 + $0x1448] ss:$16 sps:$4 sm:$0xff]  }
 0x455   : > { %7589 = vmatpush1.bf16.msra.mxu0 %v9765_v2  ;;  %v9836_v2 = vld [vmem:[%s11607_s18 + $0x142c] ss:$16 sps:$4 sm:$0xff]  }
 0x456   : > { %7556 = vmatpush2.bf16.msra.mxu1 %v9762_v50  ;;  %7590 = vmatprep.subr.bf16.mxu0 %v9773_v62 }
 0x457   : > { %7557 = vmatprep.subr.bf16.mxu1 %v9770_v1  ;;  %v9839_v1 = vld [vmem:[%s11607_s18 + $0x16ac] ss:$16 sps:$4 sm:$0xff]  }
 0x459   : > { %7591 = vmatpush1.bf16.msra.mxu0 %v9771_v61  ;;  %v9837_v61 = vld [vmem:[%s11607_s18 + $0x16a8] ss:$16 sps:$4 sm:$0xff]  }
 0x45a   : > { %7558 = vmatpush2.bf16.msra.mxu1 %v9768_v3  ;;  %7592 = vmatprep.subr.bf16.mxu0 %v9779_v54  ;;  %v9834_v3 = vld [vmem:[%s11607_s18 + $0x1428] ss:$16 sps:$4 sm:$0xff]   ;;  %v9842_v54 = vld [vmem:[%s11607_s18 + $0x140c] ss:$16 sps:$4 sm:$0xff]  }
 0x45b   : > { %7559 = vmatprep.subr.bf16.mxu1 %v9776_v13 }
 0x45d   : > { %7593 = vmatpush2.bf16.msra.mxu0 %v9777_v18  ;;  %v9840_v18 = vld [vmem:[%s11607_s18 + $0x1408] ss:$16 sps:$4 sm:$0xff]  }
 0x45e   : > { %7560 = vmatpush2.bf16.msra.mxu1 %v9774_v19  ;;  %7594 = vmatprep.subr.bf16.mxu0 %v9785_v6  ;;  %v9845_v19 = vld [vmem:[%s11607_s18 + $0x168c] ss:$16 sps:$4 sm:$0xff]  }
 0x45f   : > { %7561 = vmatprep.subr.bf16.mxu1 %v9782_v4  ;;  %v9848_v4 = vld [vmem:[%s11607_s18 + $0x15ec] ss:$16 sps:$4 sm:$0xff]  }
 0x460   : > { %v9851_v6 = vld [vmem:[%s11607_s18 + $0x166c] ss:$16 sps:$4 sm:$0xff]  }
 0x461   : > { %7595 = vmatpush2.bf16.msra.mxu0 %v9783_v35  ;;  %v9849_v35 = vld [vmem:[%s11607_s18 + $0x1668] ss:$16 sps:$4 sm:$0xff]  }
 0x462   : > { %7562 = vmatpush2.bf16.msra.mxu1 %v9780_v7  ;;  %7596 = vmatprep.subr.bf16.mxu0 %v9791_v12  ;;  %v9846_v7 = vld [vmem:[%s11607_s18 + $0x15e8] ss:$16 sps:$4 sm:$0xff]   ;;  %v9857_v12 = vld [vmem:[%s11607_s18 + $0x164c] ss:$16 sps:$4 sm:$0xff]  }
 0x463   : > { %7563 = vmatprep.subr.bf16.mxu1 %v9788_v10  ;;  %v9854_v10 = vld [vmem:[%s11607_s18 + $0x15cc] ss:$16 sps:$4 sm:$0xff]  }
 0x465   : > { %7597 = vmatpush2.bf16.msra.mxu0 %v9789_v43  ;;  %v9855_v43 = vld [vmem:[%s11607_s18 + $0x1648] ss:$16 sps:$4 sm:$0xff]  }
 0x466   : > { %7564 = vmatpush2.bf16.msra.mxu1 %v9786_v16  ;;  %7598 = vmatprep.subr.bf16.mxu0 %v9797_v57  ;;  %v9852_v16 = vld [vmem:[%s11607_s18 + $0x15c8] ss:$16 sps:$4 sm:$0xff]   ;;  %v9863_v57 = vld [vmem:[%s11607_s18 + $0x162c] ss:$16 sps:$4 sm:$0xff]  }
 0x467   : > { %7565 = vmatprep.subr.bf16.mxu1 %v9794_v17  ;;  %v9860_v17 = vld [vmem:[%s11607_s18 + $0x15ac] ss:$16 sps:$4 sm:$0xff]  }
 0x469   : > { %7599 = vmatpush2.bf16.msra.mxu0 %v9795_v29  ;;  %v9861_v29 = vld [vmem:[%s11607_s18 + $0x1628] ss:$16 sps:$4 sm:$0xff]  }
 0x46a   : > { %7566 = vmatpush2.bf16.msra.mxu1 %v9792_v26  ;;  %7600 = vmatprep.subr.bf16.mxu0 %v9800_v53  ;;  %v9858_v26 = vld [vmem:[%s11607_s18 + $0x15a8] ss:$16 sps:$4 sm:$0xff]   ;;  %v9866_v53 = vld [vmem:[%s11607_s18 + $0x158c] ss:$16 sps:$4 sm:$0xff]  }
 0x46b   : > { %7617 = vmatprep.subr.bf16.mxu1 %v9803_v47  ;;  %v9869_v47 = vld [vmem:[%s11607_s18 + $0x160c] ss:$16 sps:$4 sm:$0xff]  }
 0x46d   : > { %v7323_v44 = vpop.f32.mrf.mxu1  ;;  %7568 = vmatmul.mubr.bf16.vlgmr.msra.gmra.mxu1 %v12087_v52  ;;  %7601 = vmatpush2.bf16.msra.mxu0 %v9798_v25  ;;  %v9864_v25 = vld [vmem:[%s11607_s18 + $0x1588] ss:$16 sps:$4 sm:$0xff]  }
 0x46e   : > { %v7324_v41 = vadd.f32 %v7323_v44, %v12523_v36  ;;  %7618 = vmatpush1.bf16.msra.mxu1 %v9801_v30  ;;  %7602 = vmatprep.subr.bf16.mxu0 %v9806_v33  ;;  %v9810_v36 = vld [vmem:[%s11607_s18 + $0x1328] ss:$16 sps:$4 sm:$0xff]   ;;  %v9872_v33 = vld [vmem:[%s11607_s18 + $0x156c] ss:$16 sps:$4 sm:$0xff]  }
 0x46f   : > { %v7325_v20 = vpop.f32.mrf.mxu1  ;;  %7619 = vmatprep.subr.bf16.mxu1 %v9809_v37  ;;  %7649 = vmatprep.mubr.bf16.mxu1 %v12099_v31  ;;  %v9819_v31 = vld [vmem:[%s11607_s18 + $0x1488] ss:$16 sps:$4 sm:$0xff]   ;;  %v9875_v37 = vld [vmem:[%s11607_s18 + $0x17ec] ss:$16 sps:$4 sm:$0xff]  }
 0x470   : > { %v7326_v14 = vadd.f32 %v7325_v20, %v12529_v5  ;;  %v9816_v5 = vld [vmem:[%s11607_s18 + $0x1308] ss:$16 sps:$4 sm:$0xff]  }
 0x471   : > { %v7327_v52 = vpop.f32.mrf.mxu1  ;;  %7603 = vmatpush2.bf16.msra.mxu0 %v9804_v55  ;;  %v9867_v30 = vld [vmem:[%s11607_s18 + $0x1608] ss:$16 sps:$4 sm:$0xff]   ;;  %v9878_v55 = vld [vmem:[%s11607_s18 + $0x154c] ss:$16 sps:$4 sm:$0xff]  }
 0x472   : > { %7620 = vmatpush1.bf16.msra.mxu1 %v9807_v38  ;;  %7604 = vmatprep.subr.bf16.mxu0 %v9812_v39  ;;  %v9870_v44 = vld [vmem:[%s11607_s18 + $0x1568] ss:$16 sps:$4 sm:$0xff]   ;;  %v9881_v38 = vld [vmem:[%s11607_s18 + $0x17cc] ss:$16 sps:$4 sm:$0xff]  }
 0x473   : > { %v7328_v34 = vpop.f32.mrf.mxu1  ;;  %7621 = vmatprep.subr.bf16.mxu1 %v9815_v46  ;;  %v9876_v20 = vld [vmem:[%s11607_s18 + $0x1548] ss:$16 sps:$4 sm:$0xff]   ;;  %v9884_v46 = vld [vmem:[%s11607_s18 + $0x152c] ss:$16 sps:$4 sm:$0xff]  }
 0x474   : > { %v9879_v39 = vld [vmem:[%s11607_s18 + $0x17c8] ss:$16 sps:$4 sm:$0xff]   ;;  %v9893_v34 = vld [vmem:[%s11607_s18 + $0x178c] ss:$16 sps:$4 sm:$0xff]  }
 0x475   : > { %7605 = vmatpush2.bf16.msra.mxu0 %v9810_v36  ;;  %v9882_v52 = vld [vmem:[%s11607_s18 + $0x1528] ss:$16 sps:$4 sm:$0xff]  }
 0x476   : > { %7622 = vmatpush1.bf16.msra.mxu1 %v9813_v15  ;;  %7606 = vmatprep.subr.bf16.mxu0 %v9818_v45  ;;  %v9885_v36 = vld [vmem:[%s11607_s18 + $0x17a8] ss:$16 sps:$4 sm:$0xff]   ;;  %v9890_v15 = vld [vmem:[%s11607_s18 + $0x150c] ss:$16 sps:$4 sm:$0xff]  }
 0x477   : > { %7623 = vmatprep.subr.bf16.mxu1 %v9821_v28  ;;  %v9888_v45 = vld [vmem:[%s11607_s18 + $0x1508] ss:$16 sps:$4 sm:$0xff]  }
 0x478   : > { %v9891_v28 = vld [vmem:[%s11607_s18 + $0x1788] ss:$16 sps:$4 sm:$0xff]  }
 0x479   : > { %7607 = vmatpush2.bf16.msra.mxu0 %v9816_v5  ;;  %v9896_v5 = vld [vmem:[%s11607_s18 + $0x176c] ss:$16 sps:$4 sm:$0xff]  }
 0x47a   : > { %7624 = vmatpush1.bf16.msra.mxu1 %v9819_v31  ;;  %7658 = vmatprep.subr.bf16.mxu0 %v9827_v48  ;;  %v9899_v31 = vld [vmem:[%s11607_s18 + $0x186c] ss:$16 sps:$4 sm:$0xff]   ;;  %v9897_v48 = vld [vmem:[%s11607_s18 + $0x1868] ss:$16 sps:$4 sm:$0xff]  }
 0x47b   : > { %7625 = vmatprep.subr.bf16.mxu1 %v9824_v58  ;;  %v9894_v58 = vld [vmem:[%s11607_s18 + $0x1768] ss:$16 sps:$4 sm:$0xff]  }
 0x47c   : > { %v7364_v56 = vpop.f32.mrf.mxu0  ;;  %7609 = vmatmul.mubr.bf16.vlgmr.msra.gmra.mxu0 %v12091_v23 }
 0x47d   : > { %v12597_v51 = vadd.f32 %v7364_v56, %v7324_v41  ;;  %7659 = vmatpush1.bf16.msra.mxu0 %v9825_v60  ;;  %7690 = vmatprep.mubr.bf16.mxu0 %v12103_v21  ;;  %v9843_v21 = vld [vmem:[%s11607_s18 + $0x1688] ss:$16 sps:$4 sm:$0xff]   ;;  %v9905_v60 = vld [vmem:[%s11607_s18 + $0x184c] ss:$16 sps:$4 sm:$0xff]  }
 0x47e   : > { %7626 = vmatpush1.bf16.msra.mxu1 %v9822_v59  ;;  %v7366_v50 = vpop.f32.mrf.mxu0  ;;  %7660 = vmatprep.subr.bf16.mxu0 %v9833_v42  ;;  %v9873_v41 = vld [vmem:[%s11607_s18 + $0x17e8] ss:$16 sps:$4 sm:$0xff]   ;;  %v9902_v59 = vld [vmem:[%s11607_s18 + $0x174c] ss:$16 sps:$4 sm:$0xff]  }
 0x47f   : > { %7627 = vmatprep.subr.bf16.mxu1 %v9830_v0  ;;  %v12603_v62 = vadd.f32 %v7366_v50, %v7326_v14  ;;  %v9887_v14 = vld [vmem:[%s11607_s18 + $0x17ac] ss:$16 sps:$4 sm:$0xff]   ;;  %v9900_v56 = vld [vmem:[%s11607_s18 + $0x1748] ss:$16 sps:$4 sm:$0xff]  }
 0x480   : > { %v7368_v23 = vpop.f32.mrf.mxu0  ;;  %v9908_v50 = vld [vmem:[%s11607_s18 + $0x172c] ss:$16 sps:$4 sm:$0xff]  }
 0x481   : > { %7661 = vmatpush1.bf16.msra.mxu0 %v9831_v24  ;;  %v9909_v23 = vld [vmem:[%s11607_s18 + $0x1828] ss:$16 sps:$4 sm:$0xff]  }
 0x482   : > { %7628 = vmatpush1.bf16.msra.mxu1 %v9828_v63  ;;  %v7369_v13 = vpop.f32.mrf.mxu0  ;;  %7662 = vmatprep.subr.bf16.mxu0 %v9839_v1  ;;  %v9903_v63 = vld [vmem:[%s11607_s18 + $0x1848] ss:$16 sps:$4 sm:$0xff]  }
 0x483   : > { %7629 = vmatprep.subr.bf16.mxu1 %v9836_v2  ;;  %v9911_v2 = vld [vmem:[%s11607_s18 + $0x182c] ss:$16 sps:$4 sm:$0xff]  }
 0x484   : > { %v9917_v13 = vld [vmem:[%s11607_s18 + $0x180c] ss:$16 sps:$4 sm:$0xff]  }
 0x485   : > { %7663 = vmatpush1.bf16.msra.mxu0 %v9837_v61  ;;  %v9914_v61 = vld [vmem:[%s11607_s18 + $0x170c] ss:$16 sps:$4 sm:$0xff]  }
 0x486   : > { %7630 = vmatpush1.bf16.msra.mxu1 %v9834_v3  ;;  %7664 = vmatprep.subr.bf16.mxu0 %v9845_v19  ;;  %v9915_v19 = vld [vmem:[%s11607_s18 + $0x1808] ss:$16 sps:$4 sm:$0xff]  }
 0x487   : > { %7631 = vmatprep.subr.bf16.mxu1 %v9842_v54  ;;  %v9912_v54 = vld [vmem:[%s11607_s18 + $0x1708] ss:$16 sps:$4 sm:$0xff]  }
 0x489   : > { %7665 = vmatpush1.bf16.msra.mxu0 %v9843_v21 }
 0x48a   : > { %7632 = vmatpush1.bf16.msra.mxu1 %v9840_v18  ;;  %7666 = vmatprep.subr.bf16.mxu0 %v9851_v6 }
 0x48b   : > { %7633 = vmatprep.subr.bf16.mxu1 %v9848_v4 }
 0x48d   : > { %7667 = vmatpush1.bf16.msra.mxu0 %v9849_v35 }
 0x48e   : > { %7634 = vmatpush2.bf16.msra.mxu1 %v9846_v7  ;;  %7668 = vmatprep.subr.bf16.mxu0 %v9857_v12 }
 0x48f   : > { %7635 = vmatprep.subr.bf16.mxu1 %v9854_v10 }
 0x491   : > { %7669 = vmatpush1.bf16.msra.mxu0 %v9855_v43 }
 0x492   : > { %7636 = vmatpush2.bf16.msra.mxu1 %v9852_v16  ;;  %7670 = vmatprep.subr.bf16.mxu0 %v9863_v57 }
 0x493   : > { %7637 = vmatprep.subr.bf16.mxu1 %v9860_v17 }
 0x495   : > { %7671 = vmatpush1.bf16.msra.mxu0 %v9861_v29 }
 0x496   : > { %7638 = vmatpush2.bf16.msra.mxu1 %v9858_v26  ;;  %7672 = vmatprep.subr.bf16.mxu0 %v9869_v47 }
 0x497   : > { %7639 = vmatprep.subr.bf16.mxu1 %v9866_v53 }
 0x499   : > { %7673 = vmatpush1.bf16.msra.mxu0 %v9867_v30 }
 0x49a   : > { %7640 = vmatpush2.bf16.msra.mxu1 %v9864_v25  ;;  %7674 = vmatprep.subr.bf16.mxu0 %v9875_v37 }
 0x49b   : > { %7641 = vmatprep.subr.bf16.mxu1 %v9872_v33 }
 0x49d   : > { %7675 = vmatpush2.bf16.msra.mxu0 %v9873_v41 }
 0x49e   : > { %7642 = vmatpush2.bf16.msra.mxu1 %v9870_v44  ;;  %7676 = vmatprep.subr.bf16.mxu0 %v9881_v38 }
 0x49f   : > { %7643 = vmatprep.subr.bf16.mxu1 %v9878_v55 }
 0x4a1   : > { %7677 = vmatpush2.bf16.msra.mxu0 %v9879_v39 }
 0x4a2   : > { %7644 = vmatpush2.bf16.msra.mxu1 %v9876_v20  ;;  %7678 = vmatprep.subr.bf16.mxu0 %v9887_v14 }
 0x4a3   : > { %7645 = vmatprep.subr.bf16.mxu1 %v9884_v46 }
 0x4a5   : > { %7679 = vmatpush2.bf16.msra.mxu0 %v9885_v36 }
 0x4a6   : > { %7646 = vmatpush2.bf16.msra.mxu1 %v9882_v52  ;;  %7680 = vmatprep.subr.bf16.mxu0 %v9893_v34 }
 0x4a7   : > { %7647 = vmatprep.subr.bf16.mxu1 %v9890_v15 }
 0x4a9   : > { %7681 = vmatpush2.bf16.msra.mxu0 %v9891_v28 }
 0x4aa   : > { %7648 = vmatpush2.bf16.msra.mxu1 %v9888_v45  ;;  %7682 = vmatprep.subr.bf16.mxu0 %v9896_v5 }
 0x4ab   : > { %7707 = vmatprep.subr.bf16.mxu1 %v9899_v31 }
 0x4ad   : > { %v7405_v0 = vpop.f32.mrf.mxu1  ;;  %7650 = vmatmul.mubr.bf16.vlgmr.msra.gmra.mxu1 %v12177_v22  ;;  %7683 = vmatpush2.bf16.msra.mxu0 %v9894_v58 }
 0x4ae   : > { %v7406_v42 = vadd.f32 %v7405_v0, %v12597_v51  ;;  %7708 = vmatpush1.bf16.msra.mxu1 %v9897_v48  ;;  %7684 = vmatprep.subr.bf16.mxu0 %v9902_v59  ;;  %v9906_v51 = vld [vmem:[%s11607_s18 + $0x1728] ss:$16 sps:$4 sm:$0xff]  }
 0x4af   : > { %v7407_v24 = vpop.f32.mrf.mxu1  ;;  %7709 = vmatprep.subr.bf16.mxu1 %v9905_v60  ;;  %7731 = vmatprep.mubr.bf16.mxu1 %v9949_v40  ;;  %v9919_v40 = vld [vmem:[%s12692_s0 + $0x60] ss:$0 sps:$4 sm:$0xff]  }
 0x4b0   : > { %v7408_v1 = vadd.f32 %v7407_v24, %v12603_v62 }
 0x4b1   : > { %v7409_v22 = vpop.f32.mrf.mxu1  ;;  %7685 = vmatpush2.bf16.msra.mxu0 %v9900_v56 }
 0x4b2   : > { %7710 = vmatpush1.bf16.msra.mxu1 %v9903_v63  ;;  %7686 = vmatprep.subr.bf16.mxu0 %v9908_v50  ;;  %v7766_v63 = vrot.slane %v12438_v49, %v2653_v9  ;;  %v7770_v22 = vrot.slane %v12438_v49, %v2657_v27  ;;  %v7752_v9 = vld [vmem:[#allocation2] sm:$0xff] }
 0x4b3   : > { %v7410_v3 = vpop.f32.mrf.mxu1  ;;  %7711 = vmatprep.subr.bf16.mxu1 %v9911_v2 }
 0x4b5   : > { %7687 = vmatpush2.bf16.msra.mxu0 %v9906_v51 }
 0x4b6   : > { %7712 = vmatpush1.bf16.msra.mxu1 %v9909_v23  ;;  %7688 = vmatprep.subr.bf16.mxu0 %v9914_v61 }
 0x4b7   : > { %7713 = vmatprep.subr.bf16.mxu1 %v9917_v13 }
 0x4b9   : > { %7689 = vmatpush2.bf16.msra.mxu0 %v9912_v54 }
 0x4ba   : > { %7714 = vmatpush1.bf16.msra.mxu1 %v9915_v19 }
 0x4bc   : > { %v7446_v62 = vpop.f32.mrf.mxu0  ;;  %7691 = vmatmul.mubr.bf16.vlgmr.msra.gmra.mxu0 %v12181_v32 }
 0x4bd   : > { %8683 = vmatmul.mubr.msk.bf16.vlgmr.msra.gmra.mxu1 %vm6670_vm1, %v9919_v40  ;;  %v7447_v18 = vadd.f32 %v7446_v62, %v7406_v42 }
 0x4be   : > { %v7448_v21 = vpop.f32.mrf.mxu0 }
 0x4bf   : > { %v7449_v4 = vadd.f32 %v7448_v21, %v7408_v1 }
 0x4c0   : > { %v7450_v6 = vpop.f32.mrf.mxu0 }
 0x4c2   : > { %v7451_v7 = vpop.f32.mrf.mxu0 }
 0x4ed   : > { %v7487_v35 = vpop.f32.mrf.mxu1 }
 0x4ee   : > { %v7488_v10 = vadd.f32 %v7487_v35, %v7447_v18 }
 0x4ef   : > { %v7489_v12 = vpop.f32.mrf.mxu1 }
 0x4f0   : > { %v7490_v16 = vadd.f32 %v7489_v12, %v7449_v4 }
 0x4f1   : > { %v7491_v43 = vpop.f32.mrf.mxu1 }
 0x4f3   : > { %v7492_v17 = vpop.f32.mrf.mxu1 }
 0x4fc   : > { %v7528_v57 = vpop.f32.mrf.mxu0 }
 0x4fd   : > { %v7529_v26 = vadd.f32 %v7528_v57, %v7488_v10 }
 0x4fe   : > { %v7530_v32 = vpop.f32.mrf.mxu0 }
 0x4ff   : > { %v7531_v29 = vadd.f32 %v7530_v32, %v7490_v16 }
 0x500   : > { %v7532_v53 = vpop.f32.mrf.mxu0 }
 0x502   : > { %v7533_v47 = vpop.f32.mrf.mxu0 }
 0x52d   : > { %v7569_v25 = vpop.f32.mrf.mxu1 }
 0x52e   : > { %v7570_v30 = vadd.f32 %v7569_v25, %v7529_v26 }
 0x52f   : > { %v7571_v33 = vpop.f32.mrf.mxu1 }
 0x530   : > { %v7572_v37 = vadd.f32 %v7571_v33, %v7531_v29 }
 0x531   : > { %v7573_v44 = vpop.f32.mrf.mxu1 }
 0x533   : > { %v7574_v41 = vpop.f32.mrf.mxu1 }
 0x53c   : > { %v7610_v55 = vpop.f32.mrf.mxu0 }
 0x53d   : > { %v7611_v15 = vadd.f32 %v7610_v55, %v7570_v30 }
 0x53e   : > { %v7612_v38 = vpop.f32.mrf.mxu0 }
 0x53f   : > { %v7613_v34 = vadd.f32 %v7612_v38, %v7572_v37 }
 0x540   : > { %v7614_v20 = vpop.f32.mrf.mxu0 }
 0x542   : > { %v7615_v39 = vpop.f32.mrf.mxu0 }
 0x56d   : > { %v7651_v46 = vpop.f32.mrf.mxu1 }
 0x56e   : > { %v7652_v45 = vadd.f32 %v7651_v46, %v7611_v15 }
 0x56f   : > { %v7653_v14 = vpop.f32.mrf.mxu1 }
 0x570   : > { %v7654_v31 = vadd.f32 %v7653_v14, %v7613_v34 }
 0x571   : > { %v7655_v52 = vpop.f32.mrf.mxu1 }
 0x573   : > { %v7656_v36 = vpop.f32.mrf.mxu1 }
 0x57c   : > { %v7692_v28 = vpop.f32.mrf.mxu0 }
 0x57d   : > { %v7733_v5 = vpop.f32.mrf.mxu1  ;;  %v7693_v58 = vadd.f32 %v7692_v28, %v7652_v45 }
 0x57e   : > { %v7694_v48 = vpop.f32.mrf.mxu0 }
 0x57f   : > { %v7735_v59 = vpop.f32.mrf.mxu1  ;;  %v7734_v60 = vadd.f32 %v7733_v5, %v7693_v58  ;;  %v7695_v0 = vadd.f32 %v7694_v48, %v7654_v31 }
 0x580   : > { %v7696_v42 = vpop.f32.mrf.mxu0 }
 0x581   : > { %v7737_v56 = vpop.f32.mrf.mxu1  ;;  %vm7742_vm4 = vcmp.ge.f32.partialorder %v7734_v60, 0.0  ;;  %v7746_v24 = vmul.f32 0.2, %v7734_v60  ;;  %v7736_v50 = vadd.f32 %v7735_v59, %v7695_v0 }
 0x582   : > { %v7697_v2 = vpop.f32.mrf.mxu0 }
 0x583   : > { %v7738_v1 = vpop.f32.mrf.mxu1  ;;  %vm7743_vm5 = vcmp.ge.f32.partialorder %v7736_v50, 0.0  ;;  %v7747_v51 = vmul.f32 0.2, %v7736_v50  ;;  %v7750_v23 = vsel %vm7742_vm4, %v7734_v60, %v7746_v24 }
 0x584   : > { %v7777_v3 = vmul.f32 %v7766_v63, %v7750_v23 }
 0x585   : > { %v7751_v61 = vsel %vm7743_vm5, %v7736_v50, %v7747_v51 }
 0x586   : > { %v7778_v13 = vmul.f32 %v7770_v22, %v7751_v61  ;;  %v7780_v54 = vadd.f32 %v12459_v11, %v7777_v3 }
 0x588   : > { %v7781_v19 = vadd.f32 %v7780_v54, %v7778_v13 }
 0x58a   : > { %7782 = vadd.xlane.f32.xlu0 %v7781_v19 }
 0x612   : > { %7790 = sbr.rel (%p8684_p10) target bundleno = 1611 (0x64b), region = 71 }
 0x613   : > { %v7783_v62 = vpop.xlane.xlu0 %7782 }
 0x614   : > { %v7784_v40 = vadd.f32 %v7783_v62, %v7752_v9 }
 0x616   : > { %7786 = vst.msk [vmem:[#allocation2] sm:$0xff] %vm7785_vm6, %v7784_v40 }
 0x617   : > { %v8685_v49 = vld [vmem:[#allocation3] ss:$0 sm:$0xff] }
 0x61d   : > { %v7791_v8 = vld [vmem:[#allocation2] sm:$0xff] }
 0x61e   : > { %v7799_v27 = vadd.f32 %v8685_v49, %v7791_v8 }
 0x620   : > { %v7800_v18 = vand.u32 2147483647, %v7799_v27  ;;  %vm7804_vm7 = vcmp.ge.f32.partialorder %v7799_v27, 0.0 }
 0x622   : > { %v7801_v21 = vsub.f32 0.0, %v7800_v18 }
 0x624   : > { %v7802_v4 = vmul.f32 1.442695, %v7801_v21 }
 0x626   : > { %9920 = vpow2.f32 %v7802_v4 }
 0x633   : > { %v9921_v6 = vpop.eup %9920 }
 0x634   : > { %v7806_v11 = vadd.f32 1.0, %v9921_v6  ;;  %v7805_v7 = vsel %vm7804_vm7, 1.0, %v9921_v6 }
 0x636   : > { %9922 = vrcp.f32 %v7806_v11 }
 0x643   : > { %v9923_v35 = vpop.eup %9922 }
 0x644   : > { %v7808_v10 = vmul.f32 %v9923_v35, %v7805_v7 }
 0x646   : > { %v7809_v12 = vmax.f32 %v7808_v10, 0.0 }
 0x648   : > { %v7810_v16 = vmin.f32 %v7809_v12, 1.0 }
 0x64a   : > { %7811 = vst.msk [vmem:[%s12697_s5] sm:$0xff] %vm7785_vm6, %v7810_v16 }
 0x64b PF: > { %p14_p11 = scmp.ge.s32.totalorder %s10002_s23, 4   ;;  %s12698_s20 = smov %s9942_s21 }
 0x64c   : > { %s12699_s21 = smov %s10011_s26  ;;  %s12700_s22 = smov %s10002_s23 }
 0x64d   :  { %16 = sbr.rel (!%p14_p11) target bundleno = 5 (0x5), region = 108 }

</bundles_post_ra>
